<compile_context>
chip_gen: v5e
topology: v5e:2x2
jax: 0.10.0
libtpu: 0.0.40
codegen_flags: <defaults>
</compile_context>

<pallas_src>
import functools

import jax
import jax.numpy as jnp
from jax.experimental import pallas as pl
from jax.experimental.pallas import tpu as pltpu

BN_EPS = 1e-5
LEAKY_SLOPE = 0.05

INPUT_SIZE = 48359          # module default (isoforms_count=[])
H1 = 512                    # fc1 output features
N_SPLIT = 2                 # stage-1 output-feature split (one half per TC on v7x)
TK = 9728                   # K tile (multiple of 128; divides K_PAD; 5 steps)
K_PAD = 48640               # round_up(48359, 512) = 5 * 9728


def _bn_leaky(h, gamma, beta):
    # BatchNorm1d (training mode: batch mean, biased var) + LeakyReLU(0.05)
    mean = jnp.mean(h, axis=0, keepdims=True)
    var = jnp.mean((h - mean) ** 2, axis=0, keepdims=True)
    hn = (h - mean) * jax.lax.rsqrt(var + BN_EPS) * gamma + beta
    return jnp.where(hn >= 0, hn, LEAKY_SLOPE * hn)


# ---------------------------------------------------------------------------
# Kernel 1: fc1 (bf16 inputs, K-tiled, N-split) + bias + BN1 + LeakyReLU.
# Output block (B, H1/N_SPLIT) is VMEM-resident across the k axis and doubles
# as the f32 accumulator; BN stats are per-feature so each N half is
# independent and the whole batch lives in the block.
# ---------------------------------------------------------------------------
def fc1_bn_leaky_kernel(x_ref, w_ref, b_ref, g_ref, be_ref, o_ref):
    k = pl.program_id(1)

    @pl.when(k == 0)
    def _():
        o_ref[...] = jnp.zeros_like(o_ref)

    o_ref[...] += jnp.dot(x_ref[...], w_ref[...],
                          preferred_element_type=jnp.float32)

    @pl.when(k == pl.num_programs(1) - 1)
    def _():
        h = o_ref[...] + b_ref[...]
        o_ref[...] = _bn_leaky(h, g_ref[...], be_ref[...])


# ---------------------------------------------------------------------------
# Kernel 2: fc2+bn2+leaky -> fc3+bn3+leaky -> fc4 (output padded to 128 lanes).
# Everything (<1 MiB of weights) is VMEM-resident; no grid.
# ---------------------------------------------------------------------------
def head_kernel(h_ref, w2_ref, b2_ref, g2_ref, be2_ref,
                w3_ref, b3_ref, g3_ref, be3_ref,
                w4_ref, b4_ref, o_ref):
    h = h_ref[...]
    h = _bn_leaky(jnp.dot(h, w2_ref[...], preferred_element_type=jnp.float32)
                  + b2_ref[...], g2_ref[...], be2_ref[...])
    h = _bn_leaky(jnp.dot(h, w3_ref[...], preferred_element_type=jnp.float32)
                  + b3_ref[...], g3_ref[...], be3_ref[...])
    o_ref[...] = (jnp.dot(h, w4_ref[...], preferred_element_type=jnp.float32)
                  + b4_ref[...]).astype(o_ref.dtype)


# ---------------------------------------------------------------------------
# Wrapper
# ---------------------------------------------------------------------------
def prepare_input(x, k_pad=K_PAD):
    """Zero-pad features to k_pad and cast to bf16.  Run once at data-load
    time, OUTSIDE the forward jit (pads contribute exactly 0 to fc1)."""
    b, k = x.shape
    xp = jnp.zeros((b, k_pad), jnp.bfloat16)
    return xp.at[:, :k].set(x.astype(jnp.bfloat16))


@functools.partial(jax.jit, static_argnames=("output_size",))
def fcn_forward(x_prep, params, output_size):
    B, k_pad = x_prep.shape
    assert x_prep.dtype == jnp.bfloat16
    assert k_pad % TK == 0
    nh = H1 // N_SPLIT

    # --- stage 1: fc1 + bn1 + leaky (bf16 stream, f32 accumulate) ---
    h1 = pl.pallas_call(
        fc1_bn_leaky_kernel,
        out_shape=jax.ShapeDtypeStruct((B, H1), jnp.float32),
        grid_spec=pltpu.PrefetchScalarGridSpec(
            num_scalar_prefetch=0,
            grid=(N_SPLIT, k_pad // TK),
            in_specs=[
                pl.BlockSpec((B, TK), lambda n, k: (0, k)),            # x  (bf16)
                pl.BlockSpec((None, TK, nh), lambda n, k: (n, k, 0)),  # w1 (bf16, pre-split)
                pl.BlockSpec((1, nh), lambda n, k: (0, n)),            # b1
                pl.BlockSpec((1, nh), lambda n, k: (0, n)),            # gamma1
                pl.BlockSpec((1, nh), lambda n, k: (0, n)),            # beta1
            ],
            out_specs=pl.BlockSpec((B, nh), lambda n, k: (0, n)),
        ),
        compiler_params=pltpu.CompilerParams(
            dimension_semantics=("parallel", "arbitrary")),
    )(x_prep, params["w1"], params["b1"], params["g1"], params["be1"])

    # --- stage 2: fc2/bn2/leaky -> fc3/bn3/leaky -> fc4 (fully fused) ---
    vmem = pl.BlockSpec(memory_space=pltpu.MemorySpace.VMEM)
    out_pad = pl.pallas_call(
        head_kernel,
        out_shape=jax.ShapeDtypeStruct((B, 128), jnp.float32),
        in_specs=[vmem] * 11,
        out_specs=vmem,
    )(h1,
      params["w2"], params["b2"], params["g2"], params["be2"],
      params["w3"], params["b3"], params["g3"], params["be3"],
      params["w4"], params["b4"])

    return out_pad[:, :output_size]


# ---------------------------------------------------------------------------
# Deterministic parameter init (PyTorch-style U(-1/sqrt(fan_in), 1/sqrt(fan_in)))
# ---------------------------------------------------------------------------
def init_params(key, input_size=INPUT_SIZE, output_size=6, k_pad=K_PAD):
    keys = jax.random.split(key, 8)

    def linear(kw, kb, fin, fout):
        bound = 1.0 / jnp.sqrt(fin)
        w = jax.random.uniform(kw, (fin, fout), jnp.float32, -bound, bound)
        b = jax.random.uniform(kb, (1, fout), jnp.float32, -bound, bound)
        return w, b

    nh = H1 // N_SPLIT
    w1, b1 = linear(keys[0], keys[1], input_size, H1)
    w1 = jnp.zeros((k_pad, H1), jnp.float32).at[:input_size].set(w1)
    # Store fc1 weights as bf16, pre-split along output features so every
    # stage-1 grid tile is one contiguous DMA: (N_SPLIT, k_pad, H1 // N_SPLIT).
    w1 = jnp.stack([w1[:, i * nh:(i + 1) * nh] for i in range(N_SPLIT)], axis=0)
    w1 = w1.astype(jnp.bfloat16)

    w2, b2 = linear(keys[2], keys[3], 512, 256)
    w3, b3 = linear(keys[4], keys[5], 256, 128)
    w4, b4 = linear(keys[6], keys[7], 128, output_size)
    # pad fc4 output to 128 lanes (sliced back after the kernel)
    w4 = jnp.zeros((128, 128), jnp.float32).at[:, :output_size].set(w4)
    b4 = jnp.zeros((1, 128), jnp.float32).at[:, :output_size].set(b4)

    # nn.BatchNorm1d default affine: gamma=1, beta=0
    return dict(
        w1=w1, b1=b1,
        g1=jnp.ones((1, H1), jnp.float32), be1=jnp.zeros((1, H1), jnp.float32),
        w2=w2, b2=b2,
        g2=jnp.ones((1, 256), jnp.float32), be2=jnp.zeros((1, 256), jnp.float32),
        w3=w3, b3=b3,
        g3=jnp.ones((1, 128), jnp.float32), be3=jnp.zeros((1, 128), jnp.float32),
        w4=w4, b4=b4,
    )


# ---------------------------------------------------------------------------
# Pure-JAX reference (same math, same stored bf16 fc1 weights, f32 compute)
# ---------------------------------------------------------------------------
def fcn_reference(x_prep, params, output_size):
    w1 = jnp.concatenate([params["w1"][i] for i in range(N_SPLIT)],
                         axis=1).astype(jnp.float32)
    h = x_prep.astype(jnp.float32) @ w1 + params["b1"]
    h = _bn_leaky(h, params["g1"], params["be1"])
    h = _bn_leaky(h @ params["w2"] + params["b2"], params["g2"], params["be2"])
    h = _bn_leaky(h @ params["w3"] + params["b3"], params["g3"], params["be3"])
    return (h @ params["w4"] + params["b4"])[:, :output_size]


if __name__ == "__main__":
    B = 8
    OUTPUT_SIZE = 6

    key = jax.random.PRNGKey(0)
    kx, kp = jax.random.split(key)
    x = jax.random.normal(kx, (B, INPUT_SIZE), jnp.float32) * 0.1
    params = init_params(kp, INPUT_SIZE, OUTPUT_SIZE)

    # pad + cast once at data-load time (outside the forward jit)
    x_prep = prepare_input(x)

    y = fcn_forward(x_prep, params, OUTPUT_SIZE)
    y = jax.block_until_ready(y)

    y_ref = fcn_reference(x_prep, params, OUTPUT_SIZE)
    assert y.shape == (B, OUTPUT_SIZE), y.shape
    assert jnp.allclose(y, y_ref, atol=2e-3, rtol=2e-3), (
        float(jnp.max(jnp.abs(y - y_ref))))

    print("KERNEL_OK")
</pallas_src>

<mosaic_0001>
module attributes {stable_mosaic.version = 11 : i64} {
  func.func @head_kernel(%arg0: memref<8x512xf32, #tpu.memory_space<vmem>>, %arg1: memref<512x256xf32, #tpu.memory_space<vmem>>, %arg2: memref<1x256xf32, #tpu.memory_space<vmem>>, %arg3: memref<1x256xf32, #tpu.memory_space<vmem>>, %arg4: memref<1x256xf32, #tpu.memory_space<vmem>>, %arg5: memref<256x128xf32, #tpu.memory_space<vmem>>, %arg6: memref<1x128xf32, #tpu.memory_space<vmem>>, %arg7: memref<1x128xf32, #tpu.memory_space<vmem>>, %arg8: memref<1x128xf32, #tpu.memory_space<vmem>>, %arg9: memref<128x128xf32, #tpu.memory_space<vmem>>, %arg10: memref<1x128xf32, #tpu.memory_space<vmem>>, %arg11: memref<8x128xf32, #tpu.memory_space<vmem>>) attributes {dimension_semantics = [], scalar_prefetch = 0 : i64, scratch_operands = 0 : i64, tpu.core_type = #tpu.core_type<tc>} {
    %c0 = arith.constant 0 : index
    %c0_0 = arith.constant 0 : index
    %0 = vector.load %arg0[%c0, %c0_0] : memref<8x512xf32, #tpu.memory_space<vmem>>, vector<8x512xf32>
    %c0_1 = arith.constant 0 : index
    %c0_2 = arith.constant 0 : index
    %1 = vector.load %arg1[%c0_1, %c0_2] : memref<512x256xf32, #tpu.memory_space<vmem>>, vector<512x256xf32>
    %cst = arith.constant dense<0.000000e+00> : vector<8x256xf32>
    %2 = tpu.matmul %0, %1, %cst {dimension_numbers = #tpu.dot_dimension_numbers<[1], [0], [0], [1], [0, 0, 1, 1], [], []>} : vector<8x512xf32>, vector<512x256xf32>, vector<8x256xf32> -> vector<8x256xf32>
    %c0_3 = arith.constant 0 : index
    %c0_4 = arith.constant 0 : index
    %3 = vector.load %arg2[%c0_3, %c0_4] : memref<1x256xf32, #tpu.memory_space<vmem>>, vector<1x256xf32>
    %4 = vector.broadcast %3 : vector<1x256xf32> to vector<8x256xf32>
    %5 = arith.addf %2, %4 : vector<8x256xf32>
    %c0_5 = arith.constant 0 : index
    %c0_6 = arith.constant 0 : index
    %6 = vector.load %arg3[%c0_5, %c0_6] : memref<1x256xf32, #tpu.memory_space<vmem>>, vector<1x256xf32>
    %c0_7 = arith.constant 0 : index
    %c0_8 = arith.constant 0 : index
    %7 = vector.load %arg4[%c0_7, %c0_8] : memref<1x256xf32, #tpu.memory_space<vmem>>, vector<1x256xf32>
    %cst_9 = arith.constant dense<0.000000e+00> : vector<256xf32>
    %8 = vector.multi_reduction <add>, %5, %cst_9 [0] : vector<8x256xf32> to vector<256xf32>
    %9 = vector.shape_cast %8 : vector<256xf32> to vector<1x256xf32>
    %cst_10 = arith.constant 8.000000e+00 : f32
    %10 = vector.broadcast %cst_10 : f32 to vector<1x256xf32>
    %11 = arith.divf %9, %10 : vector<1x256xf32>
    %12 = vector.broadcast %11 : vector<1x256xf32> to vector<8x256xf32>
    %13 = arith.subf %5, %12 : vector<8x256xf32>
    %14 = arith.mulf %13, %13 : vector<8x256xf32>
    %cst_11 = arith.constant dense<0.000000e+00> : vector<256xf32>
    %15 = vector.multi_reduction <add>, %14, %cst_11 [0] : vector<8x256xf32> to vector<256xf32>
    %16 = vector.shape_cast %15 : vector<256xf32> to vector<1x256xf32>
    %cst_12 = arith.constant 8.000000e+00 : f32
    %17 = vector.broadcast %cst_12 : f32 to vector<1x256xf32>
    %18 = arith.divf %16, %17 : vector<1x256xf32>
    %19 = vector.broadcast %11 : vector<1x256xf32> to vector<8x256xf32>
    %20 = arith.subf %5, %19 : vector<8x256xf32>
    %cst_13 = arith.constant 9.99999974E-6 : f32
    %21 = vector.broadcast %cst_13 : f32 to vector<1x256xf32>
    %22 = arith.addf %18, %21 : vector<1x256xf32>
    %23 = math.rsqrt %22 : vector<1x256xf32>
    %24 = vector.broadcast %23 : vector<1x256xf32> to vector<8x256xf32>
    %25 = arith.mulf %20, %24 : vector<8x256xf32>
    %26 = vector.broadcast %6 : vector<1x256xf32> to vector<8x256xf32>
    %27 = arith.mulf %25, %26 : vector<8x256xf32>
    %28 = vector.broadcast %7 : vector<1x256xf32> to vector<8x256xf32>
    %29 = arith.addf %27, %28 : vector<8x256xf32>
    %cst_14 = arith.constant 0.000000e+00 : f32
    %30 = vector.broadcast %cst_14 : f32 to vector<8x256xf32>
    %31 = arith.cmpf oge, %29, %30 : vector<8x256xf32>
    %cst_15 = arith.constant 5.000000e-02 : f32
    %32 = vector.broadcast %cst_15 : f32 to vector<8x256xf32>
    %33 = arith.mulf %32, %29 : vector<8x256xf32>
    %34 = arith.select %31, %29, %33 : vector<8x256xi1>, vector<8x256xf32>
    %c0_16 = arith.constant 0 : index
    %c0_17 = arith.constant 0 : index
    %35 = vector.load %arg5[%c0_16, %c0_17] : memref<256x128xf32, #tpu.memory_space<vmem>>, vector<256x128xf32>
    %cst_18 = arith.constant dense<0.000000e+00> : vector<8x128xf32>
    %36 = tpu.matmul %34, %35, %cst_18 {dimension_numbers = #tpu.dot_dimension_numbers<[1], [0], [0], [1], [0, 0, 1, 1], [], []>} : vector<8x256xf32>, vector<256x128xf32>, vector<8x128xf32> -> vector<8x128xf32>
    %c0_19 = arith.constant 0 : index
    %c0_20 = arith.constant 0 : index
    %37 = vector.load %arg6[%c0_19, %c0_20] : memref<1x128xf32, #tpu.memory_space<vmem>>, vector<1x128xf32>
    %38 = vector.broadcast %37 : vector<1x128xf32> to vector<8x128xf32>
    %39 = arith.addf %36, %38 : vector<8x128xf32>
    %c0_21 = arith.constant 0 : index
    %c0_22 = arith.constant 0 : index
    %40 = vector.load %arg7[%c0_21, %c0_22] : memref<1x128xf32, #tpu.memory_space<vmem>>, vector<1x128xf32>
    %c0_23 = arith.constant 0 : index
    %c0_24 = arith.constant 0 : index
    %41 = vector.load %arg8[%c0_23, %c0_24] : memref<1x128xf32, #tpu.memory_space<vmem>>, vector<1x128xf32>
    %cst_25 = arith.constant dense<0.000000e+00> : vector<128xf32>
    %42 = vector.multi_reduction <add>, %39, %cst_25 [0] : vector<8x128xf32> to vector<128xf32>
    %43 = vector.shape_cast %42 : vector<128xf32> to vector<1x128xf32>
    %cst_26 = arith.constant 8.000000e+00 : f32
    %44 = vector.broadcast %cst_26 : f32 to vector<1x128xf32>
    %45 = arith.divf %43, %44 : vector<1x128xf32>
    %46 = vector.broadcast %45 : vector<1x128xf32> to vector<8x128xf32>
    %47 = arith.subf %39, %46 : vector<8x128xf32>
    %48 = arith.mulf %47, %47 : vector<8x128xf32>
    %cst_27 = arith.constant dense<0.000000e+00> : vector<128xf32>
    %49 = vector.multi_reduction <add>, %48, %cst_27 [0] : vector<8x128xf32> to vector<128xf32>
    %50 = vector.shape_cast %49 : vector<128xf32> to vector<1x128xf32>
    %cst_28 = arith.constant 8.000000e+00 : f32
    %51 = vector.broadcast %cst_28 : f32 to vector<1x128xf32>
    %52 = arith.divf %50, %51 : vector<1x128xf32>
    %53 = vector.broadcast %45 : vector<1x128xf32> to vector<8x128xf32>
    %54 = arith.subf %39, %53 : vector<8x128xf32>
    %cst_29 = arith.constant 9.99999974E-6 : f32
    %55 = vector.broadcast %cst_29 : f32 to vector<1x128xf32>
    %56 = arith.addf %52, %55 : vector<1x128xf32>
    %57 = math.rsqrt %56 : vector<1x128xf32>
    %58 = vector.broadcast %57 : vector<1x128xf32> to vector<8x128xf32>
    %59 = arith.mulf %54, %58 : vector<8x128xf32>
    %60 = vector.broadcast %40 : vector<1x128xf32> to vector<8x128xf32>
    %61 = arith.mulf %59, %60 : vector<8x128xf32>
    %62 = vector.broadcast %41 : vector<1x128xf32> to vector<8x128xf32>
    %63 = arith.addf %61, %62 : vector<8x128xf32>
    %cst_30 = arith.constant 0.000000e+00 : f32
    %64 = vector.broadcast %cst_30 : f32 to vector<8x128xf32>
    %65 = arith.cmpf oge, %63, %64 : vector<8x128xf32>
    %cst_31 = arith.constant 5.000000e-02 : f32
    %66 = vector.broadcast %cst_31 : f32 to vector<8x128xf32>
    %67 = arith.mulf %66, %63 : vector<8x128xf32>
    %68 = arith.select %65, %63, %67 : vector<8x128xi1>, vector<8x128xf32>
    %c0_32 = arith.constant 0 : index
    %c0_33 = arith.constant 0 : index
    %69 = vector.load %arg9[%c0_32, %c0_33] : memref<128x128xf32, #tpu.memory_space<vmem>>, vector<128x128xf32>
    %cst_34 = arith.constant dense<0.000000e+00> : vector<8x128xf32>
    %70 = tpu.matmul %68, %69, %cst_34 {dimension_numbers = #tpu.dot_dimension_numbers<[1], [0], [0], [1], [0, 0, 1, 1], [], []>} : vector<8x128xf32>, vector<128x128xf32>, vector<8x128xf32> -> vector<8x128xf32>
    %c0_35 = arith.constant 0 : index
    %c0_36 = arith.constant 0 : index
    %71 = vector.load %arg10[%c0_35, %c0_36] : memref<1x128xf32, #tpu.memory_space<vmem>>, vector<1x128xf32>
    %72 = vector.broadcast %71 : vector<1x128xf32> to vector<8x128xf32>
    %73 = arith.addf %70, %72 : vector<8x128xf32>
    %c0_37 = arith.constant 0 : index
    %c0_38 = arith.constant 0 : index
    %74 = vector.load %arg11[%c0_37, %c0_38] : memref<8x128xf32, #tpu.memory_space<vmem>>, vector<8x128xf32>
    tpu.vector_store %arg11[%c0_37, %c0_38], %73 {strides = array<i32>} : memref<8x128xf32, #tpu.memory_space<vmem>>, vector<8x128xf32>,
    return
  }
}

module attributes {stable_mosaic.version = 11 : i64} {
  func.func @fc1_bn_leaky_kernel(%arg0: i32, %arg1: i32, %arg2: memref<8x9728xbf16, #tpu.memory_space<vmem>>, %arg3: memref<1x9728x256xbf16, #tpu.memory_space<vmem>>, %arg4: memref<1x256xf32, #tpu.memory_space<vmem>>, %arg5: memref<1x256xf32, #tpu.memory_space<vmem>>, %arg6: memref<1x256xf32, #tpu.memory_space<vmem>>, %arg7: memref<8x256xf32, #tpu.memory_space<vmem>>) attributes {dimension_semantics = [#tpu.dimension_semantics<parallel>, #tpu.dimension_semantics<arbitrary>], iteration_bounds = array<i64: 2, 5>, scalar_prefetch = 0 : i64, scratch_operands = 0 : i64, tpu.core_type = #tpu.core_type<tc>, window_params = [{transform_indices = @transform_0, window_bounds = array<i64: 8, 9728>}, {transform_indices = @transform_1, window_bounds = array<i64: 1, 9728, 256>}, {transform_indices = @transform_2, window_bounds = array<i64: 1, 256>}, {transform_indices = @transform_3, window_bounds = array<i64: 1, 256>}, {transform_indices = @transform_4, window_bounds = array<i64: 1, 256>}, {transform_indices = @transform_5, window_bounds = array<i64: 8, 256>}]} {
    %c0_i32 = arith.constant 0 : i32
    %0 = arith.cmpi eq, %arg1, %c0_i32 : i32
    %1 = arith.extui %0 : i1 to i32
    %c0_i32_0 = arith.constant 0 : i32
    %2 = arith.cmpi ne, %1, %c0_i32_0 : i32
    scf.if %2 {
      %cst_10 = arith.constant 0.000000e+00 : f32
      %13 = vector.broadcast %cst_10 : f32 to vector<8x256xf32>
      %c0_11 = arith.constant 0 : index
      %c0_12 = arith.constant 0 : index
      %14 = vector.load %arg7[%c0_11, %c0_12] : memref<8x256xf32, #tpu.memory_space<vmem>>, vector<8x256xf32>
      tpu.vector_store %arg7[%c0_11, %c0_12], %13 {strides = array<i32>} : memref<8x256xf32, #tpu.memory_space<vmem>>, vector<8x256xf32>,
    } else {
    }
    %c0 = arith.constant 0 : index
    %c0_1 = arith.constant 0 : index
    %3 = vector.load %arg7[%c0, %c0_1] : memref<8x256xf32, #tpu.memory_space<vmem>>, vector<8x256xf32>
    %c0_2 = arith.constant 0 : index
    %c0_3 = arith.constant 0 : index
    %4 = vector.load %arg2[%c0_2, %c0_3] : memref<8x9728xbf16, #tpu.memory_space<vmem>>, vector<8x9728xbf16>
    %c0_4 = arith.constant 0 : index
    %c0_5 = arith.constant 0 : index
    %c0_6 = arith.constant 0 : index
    %5 = vector.load %arg3[%c0_4, %c0_5, %c0_6] : memref<1x9728x256xbf16, #tpu.memory_space<vmem>>, vector<1x9728x256xbf16>
    %6 = vector.shape_cast %5 : vector<1x9728x256xbf16> to vector<9728x256xbf16>
    %cst = arith.constant dense<0.000000e+00> : vector<8x256xf32>
    %7 = tpu.matmul %4, %6, %cst {dimension_numbers = #tpu.dot_dimension_numbers<[1], [0], [0], [1], [0, 0, 1, 1], [], []>} : vector<8x9728xbf16>, vector<9728x256xbf16>, vector<8x256xf32> -> vector<8x256xf32>
    %8 = arith.addf %3, %7 : vector<8x256xf32>
    %c0_7 = arith.constant 0 : index
    %c0_8 = arith.constant 0 : index
    %9 = vector.load %arg7[%c0_7, %c0_8] : memref<8x256xf32, #tpu.memory_space<vmem>>, vector<8x256xf32>
    tpu.vector_store %arg7[%c0_7, %c0_8], %8 {strides = array<i32>} : memref<8x256xf32, #tpu.memory_space<vmem>>, vector<8x256xf32>,
    %c4_i32 = arith.constant 4 : i32
    %10 = arith.cmpi eq, %arg1, %c4_i32 : i32
    %11 = arith.extui %10 : i1 to i32
    %c0_i32_9 = arith.constant 0 : i32
    %12 = arith.cmpi ne, %11, %c0_i32_9 : i32
    scf.if %12 {
      %c0_10 = arith.constant 0 : index
      %c0_11 = arith.constant 0 : index
      %13 = vector.load %arg7[%c0_10, %c0_11] : memref<8x256xf32, #tpu.memory_space<vmem>>, vector<8x256xf32>
      %c0_12 = arith.constant 0 : index
      %c0_13 = arith.constant 0 : index
      %14 = vector.load %arg4[%c0_12, %c0_13] : memref<1x256xf32, #tpu.memory_space<vmem>>, vector<1x256xf32>
      %15 = vector.broadcast %14 : vector<1x256xf32> to vector<8x256xf32>
      %16 = arith.addf %13, %15 : vector<8x256xf32>
      %c0_14 = arith.constant 0 : index
      %c0_15 = arith.constant 0 : index
      %17 = vector.load %arg5[%c0_14, %c0_15] : memref<1x256xf32, #tpu.memory_space<vmem>>, vector<1x256xf32>
      %c0_16 = arith.constant 0 : index
      %c0_17 = arith.constant 0 : index
      %18 = vector.load %arg6[%c0_16, %c0_17] : memref<1x256xf32, #tpu.memory_space<vmem>>, vector<1x256xf32>
      %cst_18 = arith.constant dense<0.000000e+00> : vector<256xf32>
      %19 = vector.multi_reduction <add>, %16, %cst_18 [0] : vector<8x256xf32> to vector<256xf32>
      %20 = vector.shape_cast %19 : vector<256xf32> to vector<1x256xf32>
      %cst_19 = arith.constant 8.000000e+00 : f32
      %21 = vector.broadcast %cst_19 : f32 to vector<1x256xf32>
      %22 = arith.divf %20, %21 : vector<1x256xf32>
      %23 = vector.broadcast %22 : vector<1x256xf32> to vector<8x256xf32>
      %24 = arith.subf %16, %23 : vector<8x256xf32>
      %25 = arith.mulf %24, %24 : vector<8x256xf32>
      %cst_20 = arith.constant dense<0.000000e+00> : vector<256xf32>
      %26 = vector.multi_reduction <add>, %25, %cst_20 [0] : vector<8x256xf32> to vector<256xf32>
      %27 = vector.shape_cast %26 : vector<256xf32> to vector<1x256xf32>
      %cst_21 = arith.constant 8.000000e+00 : f32
      %28 = vector.broadcast %cst_21 : f32 to vector<1x256xf32>
      %29 = arith.divf %27, %28 : vector<1x256xf32>
      %30 = vector.broadcast %22 : vector<1x256xf32> to vector<8x256xf32>
      %31 = arith.subf %16, %30 : vector<8x256xf32>
      %cst_22 = arith.constant 9.99999974E-6 : f32
      %32 = vector.broadcast %cst_22 : f32 to vector<1x256xf32>
      %33 = arith.addf %29, %32 : vector<1x256xf32>
      %34 = math.rsqrt %33 : vector<1x256xf32>
      %35 = vector.broadcast %34 : vector<1x256xf32> to vector<8x256xf32>
      %36 = arith.mulf %31, %35 : vector<8x256xf32>
      %37 = vector.broadcast %17 : vector<1x256xf32> to vector<8x256xf32>
      %38 = arith.mulf %36, %37 : vector<8x256xf32>
      %39 = vector.broadcast %18 : vector<1x256xf32> to vector<8x256xf32>
      %40 = arith.addf %38, %39 : vector<8x256xf32>
      %cst_23 = arith.constant 0.000000e+00 : f32
      %41 = vector.broadcast %cst_23 : f32 to vector<8x256xf32>
      %42 = arith.cmpf oge, %40, %41 : vector<8x256xf32>
      %cst_24 = arith.constant 5.000000e-02 : f32
      %43 = vector.broadcast %cst_24 : f32 to vector<8x256xf32>
      %44 = arith.mulf %43, %40 : vector<8x256xf32>
      %45 = arith.select %42, %40, %44 : vector<8x256xi1>, vector<8x256xf32>
      %c0_25 = arith.constant 0 : index
      %c0_26 = arith.constant 0 : index
      %46 = vector.load %arg7[%c0_25, %c0_26] : memref<8x256xf32, #tpu.memory_space<vmem>>, vector<8x256xf32>
      tpu.vector_store %arg7[%c0_25, %c0_26], %45 {strides = array<i32>} : memref<8x256xf32, #tpu.memory_space<vmem>>, vector<8x256xf32>,
    } else {
    }
    return
  }
  func.func @transform_0(%arg0: i32, %arg1: i32) -> (i32, i32) {
    %c0_i32 = arith.constant 0 : i32
    %c0_i32_0 = arith.constant 0 : i32
    return %c0_i32, %arg1 : i32, i32
  }
  func.func @transform_1(%arg0: i32, %arg1: i32) -> (i32, i32, i32) {
    %c0_i32 = arith.constant 0 : i32
    %c0_i32_0 = arith.constant 0 : i32
    return %arg0, %arg1, %c0_i32 : i32, i32, i32
  }
  func.func @transform_2(%arg0: i32, %arg1: i32) -> (i32, i32) {
    %c0_i32 = arith.constant 0 : i32
    %c0_i32_0 = arith.constant 0 : i32
    return %c0_i32, %arg0 : i32, i32
  }
  func.func @transform_3(%arg0: i32, %arg1: i32) -> (i32, i32) {
    %c0_i32 = arith.constant 0 : i32
    %c0_i32_0 = arith.constant 0 : i32
    return %c0_i32, %arg0 : i32, i32
  }
  func.func @transform_4(%arg0: i32, %arg1: i32) -> (i32, i32) {
    %c0_i32 = arith.constant 0 : i32
    %c0_i32_0 = arith.constant 0 : i32
    return %c0_i32, %arg0 : i32, i32
  }
  func.func @transform_5(%arg0: i32, %arg1: i32) -> (i32, i32) {
    %c0_i32 = arith.constant 0 : i32
    %c0_i32_0 = arith.constant 0 : i32
    return %c0_i32, %arg0 : i32, i32
  }
}

</mosaic_0001>

<bundles_post_ra>
// kernel: fcn_forward.3
= control target key start
LH: loop header
LB: loop body
LE: loop exit
PB: predicated region body
PF: predicated region fallthrough
CT: control target
= control target key end

     0   :  { %16 = vsyncpa [#allocation3], 0  ;;  %s1200_s0 = inlined_call_operand.vmem [shape: f32[8,512], index: 0, kind: input, shape index: {}]   ;;  %s1201_s1 = inlined_call_operand.hbm [shape: f32[512,256], index: 1, kind: input, shape index: {}]   ;;  %s1202_s2 = inlined_call_operand.hbm [shape: f32[1,256], index: 2, kind: input, shape index: {}]   ;;  %s1203_s3 = inlined_call_operand.hbm [shape: f32[1,256], index: 3, kind: input, shape index: {}]   ;;  %s1204_s4 = inlined_call_operand.hbm [shape: f32[1,256], index: 4, kind: input, shape index: {}]   ;;  %s1205_s5 = inlined_call_operand.hbm [shape: f32[256,128], index: 5, kind: input, shape index: {}]   ;;  %s1206_s6 = inlined_call_operand.hbm [shape: f32[1,128], index: 6, kind: input, shape index: {}]   ;;  %s1207_s7 = inlined_call_operand.hbm [shape: f32[1,128], index: 7, kind: input, shape index: {}]   ;;  %s1208_s8 = inlined_call_operand.hbm [shape: f32[1,128], index: 8, kind: input, shape index: {}]   ;;  %s1209_s9 = inlined_call_operand.hbm [shape: f32[128,128], index: 9, kind: input, shape index: {}]   ;;  %s1210_s10 = inlined_call_operand.hbm [shape: f32[1,128], index: 10, kind: input, shape index: {}]   ;;  %s1211_s11 = inlined_call_operand.hbm [shape: f32[8,128], index: 11, kind: output, shape index: {}]  }
   0x1   :  { %17 = vsyncpa [#allocation6], 0 }
   0x2   :  { %18 = vsyncpa [#allocation9], 0 }
   0x3   :  { %19 = vsyncpa [#allocation12], 0 }
   0x4   :  { %20 = vsyncpa [#allocation15], 0 }
   0x5   :  { %21 = vsyncpa [#allocation18], 0  ;;  %s43_s19 = sshll.u32 %s1202_s2, 4  ;;  %s44_s19 = int_to_ptr.hbm [resolvable:$true] %s43_s19 }
   0x6   :  { %22 = vsyncpa [#allocation4], 0  ;;  %s1050_s20 = smov [#allocation5]   ;;  %s65_s24 = sshll.u32 %s1204_s4, 4  ;;  %s66_s24 = int_to_ptr.hbm [resolvable:$true] %s65_s24 }
   0x7   :  { %s45_s21 = sshll.u32 %s1050_s20, 4  ;;  %s1051_s25 = smov [#allocation8]   ;;  %s46_s21 = int_to_ptr.vmem [resolvable:$true] %s45_s21 }
   0x8   :  { %48 = dma.hbm_to_vmem [thread:$0]  %s44_s19, 32, %s46_s21, [#allocation6]  }
   0x9   :  { %s67_s26 = sshll.u32 %s1051_s25, 4  ;;  %s89_s29 = sshll.u32 %s1206_s6, 4  ;;  %s68_s26 = int_to_ptr.vmem [resolvable:$true] %s67_s26  ;;  %s90_s29 = int_to_ptr.hbm [resolvable:$true] %s89_s29 }
   0xa   :  { %70 = dma.hbm_to_vmem [thread:$0]  %s66_s24, 32, %s68_s26, [#allocation9]  }
   0xb   :  { %s111_s12 = sshll.u32 %s1208_s8, 4  ;;  %s1052_s13 = smov [#allocation11]   ;;  %s112_s12 = int_to_ptr.hbm [resolvable:$true] %s111_s12 }
   0xc   :  { %s91_s14 = sshll.u32 %s1052_s13, 4  ;;  %s1053_s4 = smov [#allocation14]   ;;  %s92_s14 = int_to_ptr.vmem [resolvable:$true] %s91_s14 }
   0xd   :  { %94 = dma.hbm_to_vmem [thread:$0]  %s90_s29, 16, %s92_s14, [#allocation12]  }
   0xe   :  { %s113_s15 = sshll.u32 %s1053_s4, 4  ;;  %s29_s18 = sshll.u32 %s1201_s1, 4  ;;  %s114_s15 = int_to_ptr.vmem [resolvable:$true] %s113_s15  ;;  %s30_s18 = int_to_ptr.hbm [resolvable:$true] %s29_s18 }
   0xf   :  { %116 = dma.hbm_to_vmem [thread:$0]  %s112_s12, 16, %s114_s15, [#allocation15]  }
  0x10   :  { %s1054_s6 = smov [#allocation2]   ;;  %s54_s8 = sshll.u32 %s1203_s3, 4  ;;  %s55_s8 = int_to_ptr.hbm [resolvable:$true] %s54_s8 }
  0x11   :  { %s31_s19 = sshll.u32 %s1054_s6, 4  ;;  %s1055_s22 = smov 256   ;;  %s32_s19 = int_to_ptr.vmem [resolvable:$true] %s31_s19 }
  0x12   :  { %s1056_s23 = smov 16   ;;  %s1057_s24 = smov [#allocation7]  }
  0x13   :  { %37 = dma.hbm_to_vmem [thread:$0]  %s30_s18, 16384, %s32_s19, [#allocation3], %s1055_s22, %s1055_s22, %s1056_s23  }
  0x14   :  { %s56_s25 = sshll.u32 %s1057_s24, 4  ;;  %s75_s1 = sshll.u32 %s1205_s5, 4  ;;  %s57_s25 = int_to_ptr.vmem [resolvable:$true] %s56_s25  ;;  %s76_s1 = int_to_ptr.hbm [resolvable:$true] %s75_s1 }
  0x15   :  { %59 = dma.hbm_to_vmem [thread:$0]  %s55_s8, 32, %s57_s25, [#allocation6]  }
  0x16   :  { %s1058_s28 = smov [#allocation10]   ;;  %s100_s3 = sshll.u32 %s1207_s7, 4  ;;  %s101_s3 = int_to_ptr.hbm [resolvable:$true] %s100_s3 }
  0x17   :  { %s77_s29 = sshll.u32 %s1058_s28, 4  ;;  %s1059_s12 = smov 128   ;;  %s78_s29 = int_to_ptr.vmem [resolvable:$true] %s77_s29 }
  0x18   :  { %s1060_s13 = smov 8   ;;  %s1061_s14 = smov [#allocation13]  }
  0x19   :  { %83 = dma.hbm_to_vmem [thread:$0]  %s76_s1, 4096, %s78_s29, [#allocation9], %s1059_s12, %s1059_s12, %s1060_s13  }
  0x1a   :  { %s102_s4 = sshll.u32 %s1061_s14, 4  ;;  %s121_s5 = sshll.u32 %s1209_s9, 4  ;;  %s103_s4 = int_to_ptr.vmem [resolvable:$true] %s102_s4  ;;  %s122_s5 = int_to_ptr.hbm [resolvable:$true] %s121_s5 }
  0x1b   :  { %105 = dma.hbm_to_vmem [thread:$0]  %s101_s3, 16, %s103_s4, [#allocation12]  }
  0x1c   :  { %s135_s6 = sshll.u32 %s1210_s10, 4  ;;  %s1062_s19 = smov [#allocation16]   ;;  %s136_s6 = int_to_ptr.hbm [resolvable:$true] %s135_s6 }
  0x1d   :  { %s123_s20 = sshll.u32 %s1062_s19, 4  ;;  %s1063_s7 = smov [#allocation17]   ;;  %s124_s20 = int_to_ptr.vmem [resolvable:$true] %s123_s20 }
  0x1e   :  { %129 = dma.hbm_to_vmem [thread:$0]  %s122_s5, 2048, %s124_s20, [#allocation15], %s1059_s12, %s1059_s12, %s1060_s13  }
  0x1f   :  { %s137_s21 = sshll.u32 %s1063_s7, 4  ;;  %s138_s21 = int_to_ptr.vmem [resolvable:$true] %s137_s21 }
  0x20   :  { %140 = dma.hbm_to_vmem [thread:$0]  %s136_s6, 16, %s138_s21, [#allocation18]  }
  0x21   :  { %1036 = dma.done.wait [#allocation3], 16384  }
  0x22   :  { %1037 = vsyncadd [#allocation3], 4294950912 }
  0x23   :  { %1038 = dma.done.wait [#allocation6], 64  }
  0x24   :  { %1039 = vsyncadd [#allocation6], 4294967232 }
  0x25   :  { %1040 = dma.done.wait [#allocation9], 4128  }
  0x26   :  { %1041 = vsyncadd [#allocation9], 4294963168 }
  0x27   :  { %1042 = dma.done.wait [#allocation12], 32  }
  0x28   :  { %1043 = vsyncadd [#allocation12], 4294967264 }
  0x29   :  { %1044 = dma.done.wait [#allocation15], 2064  }
  0x2a   :  { %1045 = vsyncadd [#allocation15], 4294965232 }
  0x2b   :  { %1046 = dma.done.wait [#allocation18], 16  }
  0x2c   :  { %1047 = vsyncadd [#allocation18], 4294967280  ;;  %v279_v0 = vld [vmem:[#allocation2 + $0x2f0] sm:$0xff]  ;;  %v277_v2 = vld [vmem:[#allocation2 + $0x2e0] sm:$0xff]  ;;  %s729_s29 = sshll.u32 %s1211_s11, 4  ;;  %s730_s29 = int_to_ptr.hbm [resolvable:$true] %s729_s29 }
  0x2d   :  { %v215_v1 = vld [vmem:[#allocation2 + $0xf0] sm:$0xff]  ;;  %359 = vmatpush.msra.mxu2 %v279_v0  ;;  %v213_v4 = vld [vmem:[#allocation2 + $0xe0] sm:$0xff]  ;;  %v280_v0 = vld [vmem:[#allocation2 + $0x2f8] sm:$0xff] }
  0x2e   :  { %319 = vmatpush.msra.mxu0 %v215_v1  ;;  %v311_v3 = vld [vmem:[#allocation2 + $0x3f0] sm:$0xff]  ;;  %v309_v7 = vld [vmem:[#allocation2 + $0x3e0] sm:$0xff] }
  0x2f   :  { %v247_v5 = vld [vmem:[#allocation2 + $0x1f0] sm:$0xff]  ;;  %379 = vmatpush.msra.mxu3 %v311_v3  ;;  %360 = vmatpush.msra.mxu2 %v277_v2  ;;  %v245_v9 = vld [vmem:[#allocation2 + $0x1e0] sm:$0xff]  ;;  %v1169_v2 = vld [vmem:[%s1200_s0 + $0x18] sm:$0xff] }
  0x30   :  { %339 = vmatpush.msra.mxu1 %v247_v5  ;;  %v275_v6 = vld [vmem:[#allocation2 + $0x2d0] sm:$0xff]  ;;  %320 = vmatpush.msra.mxu0 %v213_v4  ;;  %v273_v11 = vld [vmem:[#allocation2 + $0x2c0] sm:$0xff]  ;;  %v216_v3 = vld [vmem:[#allocation2 + $0xf8] sm:$0xff] }
  0x31   :  { %v211_v8 = vld [vmem:[#allocation2 + $0xd0] sm:$0xff]  ;;  %380 = vmatpush.msra.mxu3 %v309_v7  ;;  %v209_v12 = vld [vmem:[#allocation2 + $0xc0] sm:$0xff]  ;;  %361 = vmatpush.msra.mxu2 %v275_v6  ;;  %v278_v4 = vld [vmem:[#allocation2 + $0x2e8] sm:$0xff] }
  0x32   :  { %v307_v10 = vld [vmem:[#allocation2 + $0x3d0] sm:$0xff]  ;;  %340 = vmatpush.msra.mxu1 %v245_v9  ;;  %321 = vmatpush.msra.mxu0 %v211_v8  ;;  %v305_v14 = vld [vmem:[#allocation2 + $0x3c0] sm:$0xff]  ;;  %v312_v5 = vld [vmem:[#allocation2 + $0x3f8] sm:$0xff] }
  0x33   :  { %v243_v13 = vld [vmem:[#allocation2 + $0x1d0] sm:$0xff]  ;;  %v241_v15 = vld [vmem:[#allocation2 + $0x1c0] sm:$0xff]  ;;  %381 = vmatpush.msra.mxu3 %v307_v10  ;;  %362 = vmatpush.msra.mxu2 %v273_v11  ;;  %v214_v7 = vld [vmem:[#allocation2 + $0xe8] sm:$0xff] }
  0x34   :  { %341 = vmatpush.msra.mxu1 %v243_v13  ;;  %v271_v16 = vld [vmem:[#allocation2 + $0x2b0] sm:$0xff]  ;;  %322 = vmatpush.msra.mxu0 %v209_v12  ;;  %v269_v20 = vld [vmem:[#allocation2 + $0x2a0] sm:$0xff]  ;;  %v1177_v8 = vld [vmem:[%s1200_s0 + $0x8] sm:$0xff] }
  0x35   :  { %v207_v17 = vld [vmem:[#allocation2 + $0xb0] sm:$0xff]  ;;  %382 = vmatpush.msra.mxu3 %v305_v14  ;;  %v205_v21 = vld [vmem:[#allocation2 + $0xa0] sm:$0xff]  ;;  %363 = vmatpush.msra.mxu2 %v271_v16  ;;  %v276_v9 = vld [vmem:[#allocation2 + $0x2d8] sm:$0xff] }
  0x36   :  { %v303_v18 = vld [vmem:[#allocation2 + $0x3b0] sm:$0xff]  ;;  %342 = vmatpush.msra.mxu1 %v241_v15  ;;  %323 = vmatpush.msra.mxu0 %v207_v17  ;;  %v301_v22 = vld [vmem:[#allocation2 + $0x3a0] sm:$0xff]  ;;  %v248_v10 = vld [vmem:[#allocation2 + $0x1f8] sm:$0xff] }
  0x37   :  { %v239_v19 = vld [vmem:[#allocation2 + $0x1b0] sm:$0xff]  ;;  %v237_v23 = vld [vmem:[#allocation2 + $0x1a0] sm:$0xff]  ;;  %383 = vmatpush.msra.mxu3 %v303_v18  ;;  %364 = vmatpush.msra.mxu2 %v269_v20  ;;  %v310_v11 = vld [vmem:[#allocation2 + $0x3e8] sm:$0xff] }
  0x38   :  { %343 = vmatpush.msra.mxu1 %v239_v19  ;;  %v267_v24 = vld [vmem:[#allocation2 + $0x290] sm:$0xff]  ;;  %324 = vmatpush.msra.mxu0 %v205_v21  ;;  %v265_v28 = vld [vmem:[#allocation2 + $0x280] sm:$0xff]  ;;  %v212_v12 = vld [vmem:[#allocation2 + $0xd8] sm:$0xff] }
  0x39   :  { %v203_v25 = vld [vmem:[#allocation2 + $0x90] sm:$0xff]  ;;  %384 = vmatpush.msra.mxu3 %v301_v22  ;;  %v201_v29 = vld [vmem:[#allocation2 + $0x80] sm:$0xff]  ;;  %365 = vmatpush.msra.mxu2 %v267_v24  ;;  %v274_v13 = vld [vmem:[#allocation2 + $0x2c8] sm:$0xff] }
  0x3a   :  { %v299_v26 = vld [vmem:[#allocation2 + $0x390] sm:$0xff]  ;;  %344 = vmatpush.msra.mxu1 %v237_v23  ;;  %325 = vmatpush.msra.mxu0 %v203_v25  ;;  %v297_v30 = vld [vmem:[#allocation2 + $0x380] sm:$0xff]  ;;  %v246_v14 = vld [vmem:[#allocation2 + $0x1e8] sm:$0xff] }
  0x3b   :  { %v235_v27 = vld [vmem:[#allocation2 + $0x190] sm:$0xff]  ;;  %v233_v31 = vld [vmem:[#allocation2 + $0x180] sm:$0xff]  ;;  %385 = vmatpush.msra.mxu3 %v299_v26  ;;  %366 = vmatpush.msra.mxu2 %v265_v28  ;;  %v308_v15 = vld [vmem:[#allocation2 + $0x3d8] sm:$0xff] }
  0x3c   :  { %345 = vmatpush.msra.mxu1 %v235_v27  ;;  %v263_v32 = vld [vmem:[#allocation2 + $0x270] sm:$0xff]  ;;  %326 = vmatpush.msra.mxu0 %v201_v29  ;;  %v261_v36 = vld [vmem:[#allocation2 + $0x260] sm:$0xff]  ;;  %v210_v16 = vld [vmem:[#allocation2 + $0xc8] sm:$0xff] }
  0x3d   :  { %v199_v33 = vld [vmem:[#allocation2 + $0x70] sm:$0xff]  ;;  %386 = vmatpush.msra.mxu3 %v297_v30  ;;  %v197_v37 = vld [vmem:[#allocation2 + $0x60] sm:$0xff]  ;;  %367 = vmatpush.msra.mxu2 %v263_v32  ;;  %v272_v17 = vld [vmem:[#allocation2 + $0x2b8] sm:$0xff] }
  0x3e   :  { %v295_v34 = vld [vmem:[#allocation2 + $0x370] sm:$0xff]  ;;  %346 = vmatpush.msra.mxu1 %v233_v31  ;;  %327 = vmatpush.msra.mxu0 %v199_v33  ;;  %v293_v38 = vld [vmem:[#allocation2 + $0x360] sm:$0xff]  ;;  %v244_v18 = vld [vmem:[#allocation2 + $0x1d8] sm:$0xff] }
  0x3f   :  { %v231_v35 = vld [vmem:[#allocation2 + $0x170] sm:$0xff]  ;;  %v229_v39 = vld [vmem:[#allocation2 + $0x160] sm:$0xff]  ;;  %387 = vmatpush.msra.mxu3 %v295_v34  ;;  %368 = vmatpush.msra.mxu2 %v261_v36  ;;  %v306_v19 = vld [vmem:[#allocation2 + $0x3c8] sm:$0xff] }
  0x40   :  { %347 = vmatpush.msra.mxu1 %v231_v35  ;;  %v259_v40 = vld [vmem:[#allocation2 + $0x250] sm:$0xff]  ;;  %328 = vmatpush.msra.mxu0 %v197_v37  ;;  %v257_v44 = vld [vmem:[#allocation2 + $0x240] sm:$0xff]  ;;  %v208_v20 = vld [vmem:[#allocation2 + $0xb8] sm:$0xff] }
  0x41   :  { %v195_v41 = vld [vmem:[#allocation2 + $0x50] sm:$0xff]  ;;  %388 = vmatpush.msra.mxu3 %v293_v38  ;;  %v193_v45 = vld [vmem:[#allocation2 + $0x40] sm:$0xff]  ;;  %369 = vmatpush.msra.mxu2 %v259_v40  ;;  %v270_v21 = vld [vmem:[#allocation2 + $0x2a8] sm:$0xff] }
  0x42   :  { %v291_v42 = vld [vmem:[#allocation2 + $0x350] sm:$0xff]  ;;  %348 = vmatpush.msra.mxu1 %v229_v39  ;;  %329 = vmatpush.msra.mxu0 %v195_v41  ;;  %v289_v46 = vld [vmem:[#allocation2 + $0x340] sm:$0xff]  ;;  %v242_v22 = vld [vmem:[#allocation2 + $0x1c8] sm:$0xff] }
  0x43   :  { %v227_v43 = vld [vmem:[#allocation2 + $0x150] sm:$0xff]  ;;  %v225_v47 = vld [vmem:[#allocation2 + $0x140] sm:$0xff]  ;;  %389 = vmatpush.msra.mxu3 %v291_v42  ;;  %370 = vmatpush.msra.mxu2 %v257_v44  ;;  %v304_v23 = vld [vmem:[#allocation2 + $0x3b8] sm:$0xff] }
  0x44   :  { %349 = vmatpush.msra.mxu1 %v227_v43  ;;  %v255_v48 = vld [vmem:[#allocation2 + $0x230] sm:$0xff]  ;;  %330 = vmatpush.msra.mxu0 %v193_v45  ;;  %v253_v52 = vld [vmem:[#allocation2 + $0x220] sm:$0xff]  ;;  %v206_v24 = vld [vmem:[#allocation2 + $0xa8] sm:$0xff] }
  0x45   :  { %v191_v49 = vld [vmem:[#allocation2 + $0x30] sm:$0xff]  ;;  %390 = vmatpush.msra.mxu3 %v289_v46  ;;  %v189_v53 = vld [vmem:[#allocation2 + $0x20] sm:$0xff]  ;;  %371 = vmatpush.msra.mxu2 %v255_v48  ;;  %v240_v25 = vld [vmem:[#allocation2 + $0x1b8] sm:$0xff] }
  0x46   :  { %v287_v50 = vld [vmem:[#allocation2 + $0x330] sm:$0xff]  ;;  %350 = vmatpush.msra.mxu1 %v225_v47  ;;  %331 = vmatpush.msra.mxu0 %v191_v49  ;;  %v285_v54 = vld [vmem:[#allocation2 + $0x320] sm:$0xff]  ;;  %v268_v26 = vld [vmem:[#allocation2 + $0x298] sm:$0xff] }
  0x47   :  { %v223_v51 = vld [vmem:[#allocation2 + $0x130] sm:$0xff]  ;;  %v221_v55 = vld [vmem:[#allocation2 + $0x120] sm:$0xff]  ;;  %391 = vmatpush.msra.mxu3 %v287_v50  ;;  %372 = vmatpush.msra.mxu2 %v253_v52  ;;  %v302_v27 = vld [vmem:[#allocation2 + $0x3a8] sm:$0xff] }
  0x48   :  { %351 = vmatpush.msra.mxu1 %v223_v51  ;;  %v251_v56 = vld [vmem:[#allocation2 + $0x210] sm:$0xff]  ;;  %332 = vmatpush.msra.mxu0 %v189_v53  ;;  %v249_v60 = vld [vmem:[#allocation2 + $0x200] sm:$0xff]  ;;  %v204_v28 = vld [vmem:[#allocation2 + $0x98] sm:$0xff] }
  0x49   :  { %v187_v57 = vld [vmem:[#allocation2 + $0x10] sm:$0xff]  ;;  %392 = vmatpush.msra.mxu3 %v285_v54  ;;  %v185_v61 = vld [vmem:[#allocation2] sm:$0xff]  ;;  %373 = vmatpush.msra.mxu2 %v251_v56  ;;  %v238_v29 = vld [vmem:[#allocation2 + $0x1a8] sm:$0xff] }
  0x4a   :  { %v283_v58 = vld [vmem:[#allocation2 + $0x310] sm:$0xff]  ;;  %352 = vmatpush.msra.mxu1 %v221_v55  ;;  %333 = vmatpush.msra.mxu0 %v187_v57  ;;  %v281_v63 = vld [vmem:[#allocation2 + $0x300] sm:$0xff]  ;;  %v266_v30 = vld [vmem:[#allocation2 + $0x288] sm:$0xff] }
  0x4b   :  { %v219_v59 = vld [vmem:[#allocation2 + $0x110] sm:$0xff]  ;;  %393 = vmatpush.msra.mxu3 %v283_v58  ;;  %v1164_v1 = vld [vmem:[%s1200_s0] sm:$0xff]  ;;  %374 = vmatpush.msra.mxu2 %v249_v60  ;;  %v300_v31 = vld [vmem:[#allocation2 + $0x398] sm:$0xff] }
  0x4c   :  { %v1159_v62 = vld [vmem:[%s1200_s0 + $0x10] sm:$0xff]  ;;  %353 = vmatpush.msra.mxu1 %v219_v59  ;;  %334 = vmatpush.msra.mxu0 %v185_v61  ;;  %v217_v6 = vld [vmem:[#allocation2 + $0x100] sm:$0xff]  ;;  %v202_v32 = vld [vmem:[#allocation2 + $0x88] sm:$0xff]  ;;  %s1065_s0 = smov [#allocation19]  }
  0x4d   :  { %375 = vmatmul.f32.vlgmr.msra.gmra.mxu2 %v1159_v62  ;;  %394 = vmatpush.msra.mxu3 %v281_v63  ;;  %v264_v33 = vld [vmem:[#allocation2 + $0x278] sm:$0xff]  ;;  %v298_v35 = vld [vmem:[#allocation2 + $0x388] sm:$0xff]  ;;  %s727_s27 = sshll.u32 %s1065_s0, 4  ;;  %s728_s27 = int_to_ptr.vmem [resolvable:$true] %s727_s27 }
  0x4e   :  { %439 = vmatpush.msrb.mxu2 %v280_v0  ;;  %335 = vmatmul.f32.vlgmr.msra.gmra.mxu0 %v1164_v1  ;;  %v236_v34 = vld [vmem:[#allocation2 + $0x198] sm:$0xff]  ;;  %v262_v37 = vld [vmem:[#allocation2 + $0x268] sm:$0xff] }
  0x4f   :  { %395 = vmatmul.f32.vlgmr.msra.gmra.mxu3 %v1169_v2  ;;  %399 = vmatpush.msrb.mxu0 %v216_v3  ;;  %v200_v36 = vld [vmem:[#allocation2 + $0x78] sm:$0xff]  ;;  %v234_v38 = vld [vmem:[#allocation2 + $0x188] sm:$0xff] }
  0x50   :  { %440 = vmatpush.msrb.mxu2 %v278_v4  ;;  %459 = vmatpush.msrb.mxu3 %v312_v5  ;;  %v296_v39 = vld [vmem:[#allocation2 + $0x378] sm:$0xff]  ;;  %v198_v40 = vld [vmem:[#allocation2 + $0x68] sm:$0xff] }
  0x51   :  { %354 = vmatpush.msra.mxu1 %v217_v6  ;;  %400 = vmatpush.msrb.mxu0 %v214_v7  ;;  %v260_v41 = vld [vmem:[#allocation2 + $0x258] sm:$0xff]  ;;  %v294_v43 = vld [vmem:[#allocation2 + $0x368] sm:$0xff]  ;;  %v313_v7 = vld [vmem:[#allocation5] sm:$0x3] }
  0x52   :  { %355 = vmatmul.f32.vlgmr.msra.gmra.mxu1 %v1177_v8  ;;  %441 = vmatpush.msrb.mxu2 %v276_v9  ;;  %v232_v42 = vld [vmem:[#allocation2 + $0x178] sm:$0xff]  ;;  %v258_v45 = vld [vmem:[#allocation2 + $0x248] sm:$0xff]  ;;  %v1064_v9 = vmov 8.0  }
  0x53   :  { %419 = vmatpush.msrb.mxu1 %v248_v10  ;;  %460 = vmatpush.msrb.mxu3 %v310_v11  ;;  %v196_v44 = vld [vmem:[#allocation2 + $0x58] sm:$0xff]  ;;  %v230_v46 = vld [vmem:[#allocation2 + $0x168] sm:$0xff]  ;;  %764 = vrcp.f32 %v1064_v9  ;;  %v315_v10 = vperm.slane %v313_v7, 0 }
  0x54   :  { %401 = vmatpush.msrb.mxu0 %v212_v12  ;;  %442 = vmatpush.msrb.mxu2 %v274_v13  ;;  %v292_v47 = vld [vmem:[#allocation2 + $0x358] sm:$0xff]  ;;  %v194_v48 = vld [vmem:[#allocation2 + $0x48] sm:$0xff] }
  0x55   :  { %420 = vmatpush.msrb.mxu1 %v246_v14  ;;  %461 = vmatpush.msrb.mxu3 %v308_v15  ;;  %v256_v49 = vld [vmem:[#allocation2 + $0x238] sm:$0xff]  ;;  %v290_v51 = vld [vmem:[#allocation2 + $0x348] sm:$0xff] }
  0x56   :  { %402 = vmatpush.msrb.mxu0 %v210_v16  ;;  %443 = vmatpush.msrb.mxu2 %v272_v17  ;;  %v228_v50 = vld [vmem:[#allocation2 + $0x158] sm:$0xff]  ;;  %v254_v53 = vld [vmem:[#allocation2 + $0x228] sm:$0xff] }
  0x57   :  { %421 = vmatpush.msrb.mxu1 %v244_v18  ;;  %462 = vmatpush.msrb.mxu3 %v306_v19  ;;  %v192_v52 = vld [vmem:[#allocation2 + $0x38] sm:$0xff]  ;;  %v226_v54 = vld [vmem:[#allocation2 + $0x148] sm:$0xff] }
  0x58   :  { %403 = vmatpush.msrb.mxu0 %v208_v20  ;;  %444 = vmatpush.msrb.mxu2 %v270_v21  ;;  %v288_v55 = vld [vmem:[#allocation2 + $0x338] sm:$0xff]  ;;  %v190_v56 = vld [vmem:[#allocation2 + $0x28] sm:$0xff] }
  0x59   :  { %422 = vmatpush.msrb.mxu1 %v242_v22  ;;  %463 = vmatpush.msrb.mxu3 %v304_v23  ;;  %v252_v57 = vld [vmem:[#allocation2 + $0x218] sm:$0xff]  ;;  %v286_v59 = vld [vmem:[#allocation2 + $0x328] sm:$0xff]  ;;  %v765_v12 = vpop.eup %764 }
  0x5a   :  { %404 = vmatpush.msrb.mxu0 %v206_v24  ;;  %445 = vmatpush.msrb.mxu2 %v268_v26  ;;  %v224_v58 = vld [vmem:[#allocation2 + $0x138] sm:$0xff]  ;;  %v250_v61 = vld [vmem:[#allocation2 + $0x208] sm:$0xff]  ;;  %vm498_vm0 = vweird.f32 %v765_v12 }
  0x5b   :  { %423 = vmatpush.msrb.mxu1 %v240_v25  ;;  %464 = vmatpush.msrb.mxu3 %v302_v27  ;;  %v188_v60 = vld [vmem:[#allocation2 + $0x18] sm:$0xff]  ;;  %v222_v63 = vld [vmem:[#allocation2 + $0x128] sm:$0xff] }
  0x5c   :  { %405 = vmatpush.msrb.mxu0 %v204_v28  ;;  %446 = vmatpush.msrb.mxu2 %v266_v30  ;;  %v284_v0 = vld [vmem:[#allocation2 + $0x318] sm:$0xff]  ;;  %v186_v3 = vld [vmem:[#allocation2 + $0x8] sm:$0xff] }
  0x5d   :  { %424 = vmatpush.msrb.mxu1 %v238_v29  ;;  %465 = vmatpush.msrb.mxu3 %v300_v31  ;;  %v220_v4 = vld [vmem:[#allocation2 + $0x118] sm:$0xff]  ;;  %v282_v5 = vld [vmem:[#allocation2 + $0x308] sm:$0xff] }
  0x5e   :  { %406 = vmatpush.msrb.mxu0 %v202_v32  ;;  %447 = vmatpush.msrb.mxu2 %v264_v33  ;;  %v218_v6 = vld [vmem:[#allocation2 + $0x108] sm:$0xff]  ;;  %v579_v20 = vld [vmem:[#allocation10 + $0x78] sm:$0xff]  ;;  %v578_v21 = vld [vmem:[#allocation10 + $0x70] sm:$0xff] }
  0x5f   :  { %425 = vmatpush.msrb.mxu1 %v236_v34  ;;  %466 = vmatpush.msrb.mxu3 %v298_v35  ;;  %v577_v23 = vld [vmem:[#allocation10 + $0x68] sm:$0xff]  ;;  %v576_v25 = vld [vmem:[#allocation10 + $0x60] sm:$0xff]  ;;  %v575_v28 = vld [vmem:[#allocation10 + $0x58] sm:$0xff] }
  0x60   :  { %407 = vmatpush.msrb.mxu0 %v200_v36  ;;  %448 = vmatpush.msrb.mxu2 %v262_v37  ;;  %v574_v30 = vld [vmem:[#allocation10 + $0x50] sm:$0xff]  ;;  %v573_v33 = vld [vmem:[#allocation10 + $0x48] sm:$0xff]  ;;  %v572_v35 = vld [vmem:[#allocation10 + $0x40] sm:$0xff] }
  0x61   :  { %426 = vmatpush.msrb.mxu1 %v234_v38  ;;  %467 = vmatpush.msrb.mxu3 %v296_v39  ;;  %v571_v37 = vld [vmem:[#allocation10 + $0x38] sm:$0xff]  ;;  %v570_v39 = vld [vmem:[#allocation10 + $0x30] sm:$0xff] }
  0x62   :  { %408 = vmatpush.msrb.mxu0 %v198_v40  ;;  %449 = vmatpush.msrb.mxu2 %v260_v41  ;;  %v569_v41 = vld [vmem:[#allocation10 + $0x28] sm:$0xff] }
  0x63   :  { %427 = vmatpush.msrb.mxu1 %v232_v42  ;;  %468 = vmatpush.msrb.mxu3 %v294_v43  ;;  %v316_v43 = vperm.slane %v313_v7, 1  ;;  %v592_v7 = vld [vmem:[#allocation10 + $0xe0] sm:$0xff] }
  0x64   :  { %409 = vmatpush.msrb.mxu0 %v196_v44  ;;  %450 = vmatpush.msrb.mxu2 %v258_v45  ;;  %v568_v44 = vld [vmem:[#allocation10 + $0x20] sm:$0xff] }
  0x65   :  { %428 = vmatpush.msrb.mxu1 %v230_v46  ;;  %469 = vmatpush.msrb.mxu3 %v292_v47  ;;  %v567_v46 = vld [vmem:[#allocation10 + $0x18] sm:$0xff] }
  0x66   :  { %410 = vmatpush.msrb.mxu0 %v194_v48  ;;  %451 = vmatpush.msrb.mxu2 %v256_v49 }
  0x67   :  { %429 = vmatpush.msrb.mxu1 %v228_v50  ;;  %470 = vmatpush.msrb.mxu3 %v290_v51  ;;  %v566_v50 = vld [vmem:[#allocation10 + $0x10] sm:$0xff] }
  0x68   :  { %411 = vmatpush.msrb.mxu0 %v192_v52  ;;  %452 = vmatpush.msrb.mxu2 %v254_v53 }
  0x69   :  { %430 = vmatpush.msrb.mxu1 %v226_v54  ;;  %471 = vmatpush.msrb.mxu3 %v288_v55  ;;  %v565_v54 = vld [vmem:[#allocation10 + $0x8] sm:$0xff] }
  0x6a   :  { %412 = vmatpush.msrb.mxu0 %v190_v56  ;;  %453 = vmatpush.msrb.mxu2 %v252_v57 }
  0x6b   :  { %431 = vmatpush.msrb.mxu1 %v224_v58  ;;  %472 = vmatpush.msrb.mxu3 %v286_v59  ;;  %v564_v58 = vld [vmem:[#allocation10] sm:$0xff] }
  0x6c   :  { %413 = vmatpush.msrb.mxu0 %v188_v60  ;;  %454 = vmatpush.msrb.mxu2 %v250_v61  ;;  %v595_v60 = vld [vmem:[#allocation10 + $0xf8] sm:$0xff] }
  0x6d   :  { %432 = vmatpush.msrb.mxu1 %v222_v63  ;;  %473 = vmatpush.msrb.mxu3 %v284_v0  ;;  %v594_v0 = vld [vmem:[#allocation10 + $0xf0] sm:$0xff] }
  0x6e   :  { %455 = vmatmul.f32.vlgmr.msrb.gmra.mxu2 %v1159_v62  ;;  %414 = vmatpush.msrb.mxu0 %v186_v3  ;;  %v494_v62 = vmul.f32 8.0, %v765_v12 }
  0x6f   :  { %433 = vmatpush.msrb.mxu1 %v220_v4  ;;  %474 = vmatpush.msrb.mxu3 %v282_v5  ;;  %v593_v5 = vld [vmem:[#allocation10 + $0xe8] sm:$0xff] }
  0x70   :  { %415 = vmatmul.f32.vlgmr.msrb.gmra.mxu0 %v1164_v1  ;;  %475 = vmatmul.f32.vlgmr.msrb.gmra.mxu3 %v1169_v2  ;;  %v495_v19 = vsub.f32 1.0, %v494_v62 }
  0x71   :  { %434 = vmatpush.msrb.mxu1 %v218_v6  ;;  %600 = vmatpush.msra.mxu0 %v579_v20  ;;  %v587_v20 = vld [vmem:[#allocation10 + $0xb8] sm:$0xff] }
  0x72   :  { %435 = vmatmul.f32.vlgmr.msrb.gmra.mxu1 %v1177_v8  ;;  %v496_v8 = vmul.f32 %v765_v12, %v495_v19 }
  0x73   :  { %601 = vmatpush.msra.mxu0 %v578_v21  ;;  %620 = vmatpush.msra.mxu1 %v595_v60  ;;  %v479_v21 = vld [vmem:[#allocation7] sm:$0x3] }
  0x74   :  { %v497_v26 = vadd.f32 %v765_v12, %v496_v8 }
  0x75   :  { %602 = vmatpush.msra.mxu0 %v577_v23  ;;  %621 = vmatpush.msra.mxu1 %v594_v0  ;;  %v760_v0 = vld [vmem:[#allocation11] ss:$0 sm:$0xff] }
  0x76   :  { %v1184_v31 = vsel %vm498_vm0, %v765_v12, %v497_v26  ;;  %v590_v12 = vld [vmem:[#allocation10 + $0xd0] sm:$0xff]  ;;  %v585_v26 = vld [vmem:[#allocation10 + $0xa8] sm:$0xff] }
  0x77   :  { %603 = vmatpush.msra.mxu0 %v576_v25  ;;  %622 = vmatpush.msra.mxu1 %v593_v5  ;;  %v480_v25 = vld [vmem:[#allocation8] sm:$0x3] }
  0x79   :  { %604 = vmatpush.msra.mxu0 %v575_v28  ;;  %623 = vmatpush.msra.mxu1 %v592_v7 }
  0x7b   :  { %605 = vmatpush.msra.mxu0 %v574_v30  ;;  %v584_v30 = vld [vmem:[#allocation10 + $0xa0] sm:$0xff] }
  0x7d   :  { %606 = vmatpush.msra.mxu0 %v573_v33 }
  0x7f   :  { %607 = vmatpush.msra.mxu0 %v572_v35  ;;  %v583_v35 = vld [vmem:[#allocation10 + $0x98] sm:$0xff] }
  0x81   :  { %608 = vmatpush.msra.mxu0 %v571_v37 }
  0x83   :  { %609 = vmatpush.msra.mxu0 %v570_v39  ;;  %v582_v39 = vld [vmem:[#allocation10 + $0x90] sm:$0xff] }
  0x85   :  { %610 = vmatpush.msra.mxu0 %v569_v41 }
  0x87   :  { %611 = vmatpush.msra.mxu0 %v568_v44 }
  0x89   :  { %612 = vmatpush.msra.mxu0 %v567_v46 }
  0x8b   :  { %613 = vmatpush.msra.mxu0 %v566_v50 }
  0x8d   :  { %614 = vmatpush.msra.mxu0 %v565_v54 }
  0x8f   :  { %615 = vmatpush.msra.mxu0 %v564_v58  ;;  %v553_v58 = vperm.slane %v480_v25, 1 }
  0xcb   :  { %v336_v11 = vpop.f32.mrf.mxu0 }
  0xcc   :  { %v337_v13 = vadd.f32 %v336_v11, %v315_v10  ;;  %v591_v10 = vld [vmem:[#allocation10 + $0xd8] sm:$0xff] }
  0xcd   :  { %624 = vmatpush.msra.mxu1 %v591_v10 }
  0xcf   :  { %v356_v14 = vpop.f32.mrf.mxu1  ;;  %625 = vmatpush.msra.mxu1 %v590_v12 }
  0xd0   :  { %v357_v15 = vadd.f32 %v356_v14, %v337_v13  ;;  %v376_v16 = vpop.f32.mrf.mxu2 }
  0xd2   :  { %v377_v17 = vadd.f32 %v376_v16, %v357_v15  ;;  %v396_v18 = vpop.f32.mrf.mxu3  ;;  %v589_v15 = vld [vmem:[#allocation10 + $0xc8] sm:$0xff] }
  0xd3   :  { %626 = vmatpush.msra.mxu1 %v589_v15 }
  0xd4   :  { %v397_v1 = vadd.f32 %v396_v18, %v377_v17  ;;  %v588_v18 = vld [vmem:[#allocation10 + $0xc0] sm:$0xff] }
  0xd5   :  { %627 = vmatpush.msra.mxu1 %v588_v18  ;;  %v690_v18 = vld [vmem:[#allocation16 + $0x48] sm:$0xff] }
  0xd6   :  { %v481_v2 = vrot.slane %v397_v1, 4 }
  0xd7   :  { %628 = vmatpush.msra.mxu1 %v587_v20 }
  0xd8   :  { %v482_v22 = vadd.f32 %v481_v2, %v397_v1 }
  0xda   :  { %v483_v24 = vrot.slane %v482_v22, 2 }
  0xdc   :  { %v484_v27 = vadd.f32 %v483_v24, %v482_v22  ;;  %v586_v22 = vld [vmem:[#allocation10 + $0xb0] sm:$0xff] }
  0xdd   :  { %629 = vmatpush.msra.mxu1 %v586_v22 }
  0xde   :  { %v485_v29 = vrot.slane %v484_v27, 1 }
  0xdf   :  { %630 = vmatpush.msra.mxu1 %v585_v26 }
  0xe0   :  { %v486_v32 = vadd.f32 %v485_v29, %v484_v27  ;;  %v545_v27 = vperm.slane %v479_v21, 0 }
  0xe1   :  { %631 = vmatpush.msra.mxu1 %v584_v30  ;;  %v682_v30 = vld [vmem:[#allocation16 + $0x8] sm:$0xff] }
  0xe2   :  { %v500_v34 = vmul.f32 %v1184_v31, %v486_v32 }
  0xe3   :  { %632 = vmatpush.msra.mxu1 %v583_v35 }
  0xe4   :  { %v1187_v36 = vsub.f32 %v397_v1, %v500_v34  ;;  %v552_v34 = vperm.slane %v480_v25, 0  ;;  %v685_v25 = vld [vmem:[#allocation16 + $0x20] sm:$0xff] }
  0xe5   :  { %633 = vmatpush.msra.mxu1 %v582_v39 }
  0xe6   :  { %v504_v38 = vmul.f32 %v1187_v36, %v1187_v36 }
  0xe8   :  { %v506_v40 = vrot.slane %v504_v38, 4 }
  0xea   :  { %v507_v42 = vadd.f32 %v506_v40, %v504_v38  ;;  %v581_v40 = vld [vmem:[#allocation10 + $0x88] sm:$0xff] }
  0xeb   :  { %634 = vmatpush.msra.mxu1 %v581_v40 }
  0xec   :  { %v508_v45 = vrot.slane %v507_v42, 2 }
  0xed   :  { %v416_v47 = vpop.f32.mrf.mxu0 }
  0xee   :  { %v509_v48 = vadd.f32 %v508_v45, %v507_v42  ;;  %v417_v49 = vadd.f32 %v416_v47, %v316_v43  ;;  %v580_v43 = vld [vmem:[#allocation10 + $0x80] sm:$0xff] }
  0xef   :  { %v436_v51 = vpop.f32.mrf.mxu1  ;;  %635 = vmatpush.msra.mxu1 %v580_v43 }
  0xf0   :  { %v510_v52 = vrot.slane %v509_v48, 1  ;;  %v437_v53 = vadd.f32 %v436_v51, %v417_v49 }
  0xf1   :  { %v456_v55 = vpop.f32.mrf.mxu2 }
  0xf2   :  { %v511_v56 = vadd.f32 %v510_v52, %v509_v48  ;;  %v457_v57 = vadd.f32 %v456_v55, %v437_v53  ;;  %v546_v55 = vperm.slane %v479_v21, 1 }
  0xf3   :  { %v476_v59 = vpop.f32.mrf.mxu3 }
  0xf4   :  { %v518_v61 = vmul.f32 %v511_v56, %v1184_v31  ;;  %v477_v63 = vadd.f32 %v476_v59, %v457_v57 }
  0xf6   :  { %v520_v3 = vadd.f32 1e-05, %v518_v61  ;;  %v487_v4 = vrot.slane %v477_v63, 4 }
  0xf8   :  { %766 = vrsqrt.f32 %v520_v3  ;;  %v488_v6 = vadd.f32 %v487_v4, %v477_v63  ;;  %vm528_vm2 = vweird.f32 %v520_v3 }
  0xfa   :  { %v489_v9 = vrot.slane %v488_v6, 2 }
  0xfc   :  { %v490_v11 = vadd.f32 %v489_v9, %v488_v6  ;;  %v696_v6 = vld [vmem:[#allocation16 + $0x78] sm:$0xff]  ;;  %v695_v9 = vld [vmem:[#allocation16 + $0x70] sm:$0xff] }
  0xfd   :  { %701 = vmatpush.msra.mxu2 %v696_v6 }
  0xfe   :  { %v767_v13 = vpop.eup %766  ;;  %v491_v14 = vrot.slane %v490_v11, 1 }
  0xff   :  { %v523_v62 = vmul.f32 %v767_v13, %v520_v3  ;;  %vm529_vm1 = vweird.f32 %v767_v13  ;;  %702 = vmatpush.msra.mxu2 %v695_v9 }
 0x100   :  { %v492_v16 = vadd.f32 %v491_v14, %v490_v11  ;;  %vm530_vm3 = vmor %vm528_vm2, %vm529_vm1  ;;  %v694_v11 = vld [vmem:[#allocation16 + $0x68] sm:$0xff] }
 0x101   :  { %v524_v17 = vmul.f32 %v767_v13, %v523_v62  ;;  %703 = vmatpush.msra.mxu2 %v694_v11  ;;  %v692_v62 = vld [vmem:[#allocation16 + $0x58] sm:$0xff] }
 0x102   :  { %v501_v19 = vmul.f32 %v1184_v31, %v492_v16  ;;  %v691_v16 = vld [vmem:[#allocation16 + $0x50] sm:$0xff] }
 0x103   :  { %v525_v1 = vmul.f32 0.5, %v524_v17 }
 0x104   :  { %v503_v2 = vsub.f32 %v477_v63, %v501_v19 }
 0x105   :  { %v526_v8 = vsub.f32 1.5, %v525_v1  ;;  %v689_v1 = vld [vmem:[#allocation16 + $0x40] sm:$0xff] }
 0x106   :  { %v505_v23 = vmul.f32 %v503_v2, %v503_v2 }
 0x107   :  { %v527_v24 = vmul.f32 %v767_v13, %v526_v8  ;;  %v687_v8 = vld [vmem:[#allocation16 + $0x30] sm:$0xff] }
 0x108   :  { %v512_v28 = vrot.slane %v505_v23, 4 }
 0x109   :  { %v531_v29 = vsel %vm530_vm3, %v767_v13, %v527_v24  ;;  %v693_v13 = vld [vmem:[#allocation16 + $0x60] sm:$0xff] }
 0x10a   :  { %v542_v32 = vmul.f32 %v531_v29, %v1187_v36  ;;  %v513_v33 = vadd.f32 %v512_v28, %v505_v23  ;;  %704 = vmatpush.msra.mxu2 %v693_v13  ;;  %v686_v23 = vld [vmem:[#allocation16 + $0x28] sm:$0xff]  ;;  %v683_v29 = vld [vmem:[#allocation16 + $0x10] sm:$0xff] }
 0x10c   :  { %v549_v37 = vmul.f32 %v545_v27, %v542_v32  ;;  %v514_v38 = vrot.slane %v513_v33, 2  ;;  %705 = vmatpush.msra.mxu2 %v692_v62  ;;  %v684_v27 = vld [vmem:[#allocation16 + $0x18] sm:$0xff] }
 0x10e   :  { %v515_v41 = vadd.f32 %v514_v38, %v513_v33  ;;  %v556_v42 = vadd.f32 %v552_v34, %v549_v37  ;;  %706 = vmatpush.msra.mxu2 %v691_v16  ;;  %v681_v33 = vld [vmem:[#allocation16] sm:$0xff] }
 0x110   :  { %v516_v44 = vrot.slane %v515_v41, 1  ;;  %vm558_vm4 = vcmp.ge.f32.partialorder %v556_v42, 0.0  ;;  %v560_v45 = vmul.f32 0.05, %v556_v42  ;;  %707 = vmatpush.msra.mxu2 %v690_v18 }
 0x112   :  { %v517_v46 = vadd.f32 %v516_v44, %v515_v41  ;;  %v562_v47 = vsel %vm558_vm4, %v556_v42, %v560_v45  ;;  %708 = vmatpush.msra.mxu2 %v689_v1  ;;  %v761_v45 = vld [vmem:[#allocation13] ss:$0 sm:$0xff] }
 0x113   :  { %616 = vmatmul.f32.vlgmr.msra.gmra.mxu0 %v562_v47 }
 0x114   :  { %v519_v36 = vmul.f32 %v517_v46, %v1184_v31 }
 0x116   :  { %v521_v48 = vadd.f32 1e-05, %v519_v36  ;;  %v762_v36 = vld [vmem:[#allocation14] ss:$0 sm:$0xff] }
 0x118   :  { %768 = vrsqrt.f32 %v521_v48  ;;  %vm538_vm6 = vweird.f32 %v521_v48 }
 0x11e   :  { %v769_v49 = vpop.eup %768 }
 0x11f   :  { %v533_v50 = vmul.f32 %v769_v49, %v521_v48  ;;  %vm539_vm5 = vweird.f32 %v769_v49 }
 0x120   :  { %vm540_vm7 = vmor %vm538_vm6, %vm539_vm5 }
 0x121   :  { %v534_v51 = vmul.f32 %v769_v49, %v533_v50 }
 0x123   :  { %v535_v52 = vmul.f32 0.5, %v534_v51  ;;  %v763_v51 = vld [vmem:[#allocation17] ss:$0 sm:$0xff] }
 0x125   :  { %v536_v53 = vsub.f32 1.5, %v535_v52 }
 0x127   :  { %v537_v54 = vmul.f32 %v769_v49, %v536_v53 }
 0x129   :  { %v541_v56 = vsel %vm540_vm7, %v769_v49, %v537_v54 }
 0x12a   :  { %v543_v57 = vmul.f32 %v541_v56, %v503_v2  ;;  %v688_v2 = vld [vmem:[#allocation16 + $0x38] sm:$0xff] }
 0x12b   :  { %709 = vmatpush.msra.mxu2 %v688_v2 }
 0x12c   :  { %v550_v59 = vmul.f32 %v546_v55, %v543_v57 }
 0x12d   :  { %710 = vmatpush.msra.mxu2 %v687_v8 }
 0x12e   :  { %v557_v60 = vadd.f32 %v553_v58, %v550_v59 }
 0x12f   :  { %711 = vmatpush.msra.mxu2 %v686_v23 }
 0x130   :  { %vm559_vm8 = vcmp.ge.f32.partialorder %v557_v60, 0.0  ;;  %v561_v61 = vmul.f32 0.05, %v557_v60 }
 0x131   :  { %712 = vmatpush.msra.mxu2 %v685_v25 }
 0x132   :  { %v563_v63 = vsel %vm559_vm8, %v557_v60, %v561_v61 }
 0x133   :  { %636 = vmatmul.f32.vlgmr.msra.gmra.mxu1 %v563_v63  ;;  %713 = vmatpush.msra.mxu2 %v684_v27 }
 0x135   :  { %714 = vmatpush.msra.mxu2 %v683_v29 }
 0x137   :  { %715 = vmatpush.msra.mxu2 %v682_v30 }
 0x139   :  { %716 = vmatpush.msra.mxu2 %v681_v33 }
 0x190   :  { %v617_v3 = vpop.f32.mrf.mxu0 }
 0x191   :  { %v618_v4 = vadd.f32 %v760_v0, %v617_v3 }
 0x1b0   :  { %v637_v5 = vpop.f32.mrf.mxu1 }
 0x1b1   :  { %v638_v7 = vadd.f32 %v637_v5, %v618_v4 }
 0x1b3   :  { %v642_v10 = vrot.slane %v638_v7, 4 }
 0x1b5   :  { %v643_v12 = vadd.f32 %v642_v10, %v638_v7 }
 0x1b7   :  { %v644_v14 = vrot.slane %v643_v12, 2 }
 0x1b9   :  { %v645_v15 = vadd.f32 %v644_v14, %v643_v12 }
 0x1bb   :  { %v646_v17 = vrot.slane %v645_v15, 1 }
 0x1bd   :  { %v647_v19 = vadd.f32 %v646_v17, %v645_v15 }
 0x1bf   :  { %v648_v20 = vmul.f32 %v647_v19, %v1184_v31 }
 0x1c1   :  { %v649_v21 = vsub.f32 %v638_v7, %v648_v20 }
 0x1c3   :  { %v650_v22 = vmul.f32 %v649_v21, %v649_v21 }
 0x1c5   :  { %v651_v24 = vrot.slane %v650_v22, 4 }
 0x1c7   :  { %v652_v26 = vadd.f32 %v651_v24, %v650_v22 }
 0x1c9   :  { %v653_v28 = vrot.slane %v652_v26, 2 }
 0x1cb   :  { %v654_v32 = vadd.f32 %v653_v28, %v652_v26 }
 0x1cd   :  { %v655_v34 = vrot.slane %v654_v32, 1 }
 0x1cf   :  { %v656_v35 = vadd.f32 %v655_v34, %v654_v32 }
 0x1d1   :  { %v657_v37 = vmul.f32 %v656_v35, %v1184_v31 }
 0x1d3   :  { %v658_v38 = vadd.f32 1e-05, %v657_v37 }
 0x1d5   :  { %770 = vrsqrt.f32 %v658_v38  ;;  %vm665_vm10 = vweird.f32 %v658_v38 }
 0x1db   :  { %v771_v39 = vpop.eup %770 }
 0x1dc   :  { %v660_v40 = vmul.f32 %v771_v39, %v658_v38  ;;  %vm666_vm9 = vweird.f32 %v771_v39 }
 0x1dd   :  { %vm667_vm11 = vmor %vm665_vm10, %vm666_vm9 }
 0x1de   :  { %v661_v41 = vmul.f32 %v771_v39, %v660_v40 }
 0x1e0   :  { %v662_v42 = vmul.f32 0.5, %v661_v41 }
 0x1e2   :  { %v663_v43 = vsub.f32 1.5, %v662_v42 }
 0x1e4   :  { %v664_v44 = vmul.f32 %v771_v39, %v663_v43 }
 0x1e6   :  { %v668_v46 = vsel %vm667_vm11, %v771_v39, %v664_v44 }
 0x1e7   :  { %v669_v47 = vmul.f32 %v668_v46, %v649_v21 }
 0x1e9   :  { %v673_v48 = vmul.f32 %v761_v45, %v669_v47 }
 0x1eb   :  { %v677_v49 = vadd.f32 %v762_v36, %v673_v48 }
 0x1ed   :  { %vm678_vm12 = vcmp.ge.f32.partialorder %v677_v49, 0.0  ;;  %v679_v50 = vmul.f32 0.05, %v677_v49 }
 0x1ef   :  { %v680_v31 = vsel %vm678_vm12, %v677_v49, %v679_v50 }
 0x1f0   :  { %717 = vmatmul.f32.vlgmr.msra.gmra.mxu2 %v680_v31 }
 0x273   :  { %v718_v52 = vpop.f32.mrf.mxu2 }
 0x274   :  { %v719_v53 = vadd.f32 %v763_v51, %v718_v52 }
 0x276   :  { %721 = vst [vmem:[#allocation19] sm:$0xff] %v719_v53 }
 0x277   :  { %732 = dma.vmem_to_hbm [thread:$0]  %s728_s27, 128, %s730_s29, [#allocation4]  }
 0x278   :  { %1048 = dma.done.wait [#allocation4], 128  }
 0x279   :  { %1049 = vsyncadd [#allocation4], 4294967168 }
 0x27a   :  { %737 = vsyncpa [#allocation3], 1 }
 0x27b   :  { %738 = vsyncpa [#allocation6], 1 }
 0x27c   :  { %739 = vsyncpa [#allocation9], 1 }
 0x27d   :  { %740 = vsyncpa [#allocation12], 1 }
 0x27e   :  { %741 = vsyncpa [#allocation15], 1 }
 0x27f   :  { %742 = vsyncpa [#allocation18], 1 }
 0x280   :  { %743 = vsyncpa [#allocation4], 1 }

// kernel: fcn_forward.2
= control target key start
LH: loop header
LB: loop body
LE: loop exit
PB: predicated region body
PF: predicated region fallthrough
CT: control target
= control target key end

     0   :  { %s20059_s0 = inlined_call_operand.hbm [shape: bf16[8,48640], index: 0, kind: input, shape index: {}]   ;;  %s20060_s1 = inlined_call_operand.hbm [shape: bf16[2,48640,256], index: 1, kind: input, shape index: {}]   ;;  %s20061_s2 = inlined_call_operand.hbm [shape: f32[1,512], index: 2, kind: input, shape index: {}]   ;;  %s20062_s3 = inlined_call_operand.hbm [shape: f32[1,512], index: 3, kind: input, shape index: {}]   ;;  %s20063_s4 = inlined_call_operand.hbm [shape: f32[1,512], index: 4, kind: input, shape index: {}]   ;;  %s20064_s5 = inlined_call_operand.vmem [shape: f32[8,512], index: 5, kind: output, shape index: {}]  }
   0x1   :  { %20114 = sst [smem:[#allocation67_spill]] %s20059_s0 }
   0x2   :  { %20115 = sst [smem:[#allocation68_spill]] %s20060_s1 }
   0x3   :  { %20116 = sst [smem:[#allocation69_spill]] %s20061_s2 }
   0x4   :  { %20117 = sst [smem:[#allocation70_spill]] %s20062_s3 }
   0x5   :  { %20118 = sst [smem:[#allocation71_spill]] %s20063_s4 }
   0x6   :  { %20119 = sst [smem:[#allocation72_spill]] %s20064_s5 }
   0x7   :  { %10 = vsyncpa [#allocation3], 0 }
   0x8   :  { %12 = vsyncpa [#allocation3 + $0x1], 0 }
   0x9   :  { %13 = vsyncpa [#allocation5], 0 }
   0xa   :  { %15 = vsyncpa [#allocation5 + $0x1], 0 }
   0xb   :  { %16 = vsyncpa [#allocation8], 0 }
   0xc   :  { %18 = vsyncpa [#allocation8 + $0x1], 0  ;;  %s16849_s18 = smov 0   ;;  %s16851_s19 = smov 0  }
   0xd   :  { %s16853_s20 = smov 0   ;;  %s16855_s21 = smov 0  }
   0xe   :  { %s16857_s22 = smov 0   ;;  %s16859_s23 = smov 0  }
   0xf   :  { %s16861_s24 = smov 0   ;;  %s16863_s25 = smov 0  }
  0x10   :  { %s16865_s26 = smov 0   ;;  %s16867_s27 = smov 0  }
  0x11   :  { %s16869_s28 = smov 0   ;;  %s16871_s29 = smov 0  }
  0x12   :  { %s16873_s30 = smov 0   ;;  %s16875_s6 = smov 0  }
  0x13 LB: > { %20120 = sst [smem:[#allocation14_spill]] %s16769_s20  ;;  %s33_s7 = sadd.s32 1, %s16805_s29  ;;  %s16813_s6 = sphi %s16875_s6, %s24_s6   ;;  %s16809_s30 = sphi %s16873_s30, %s20252_s30   ;;  %s16805_s29 = sphi %s16871_s29, %s20251_s29   ;;  %s16801_s28 = sphi %s16869_s28, %s20241_s28   ;;  %s16797_s27 = sphi %s16867_s27, %s20240_s27   ;;  %s16793_s26 = sphi %s16865_s26, %s20250_s26   ;;  %s16789_s25 = sphi %s16863_s25, %s20249_s25   ;;  %s16785_s24 = sphi %s16861_s24, %s20248_s24   ;;  %s16781_s23 = sphi %s16859_s23, %s20237_s23   ;;  %s16777_s22 = sphi %s16857_s22, %s20247_s22   ;;  %s16773_s21 = sphi %s16855_s21, %s20246_s21   ;;  %s16769_s20 = sphi %s16853_s20, %s20235_s20   ;;  %s16765_s19 = sphi %s16851_s19, %s20245_s19   ;;  %s16761_s18 = sphi %s16849_s18, %s20244_s18  }
  0x14   : > { %20121 = sst [smem:[#allocation15_spill]] %s16781_s23  ;;  %s36_s8 = sadd.s32 1, %s16809_s30 }
  0x15   : > { %20122 = sst [smem:[#allocation16_spill]] %s16793_s26  ;;  %p34_p0 = scmp.ge.s32.totalorder %s33_s7, 5 }
  0x16   : > { %20123 = sst [smem:[#allocation17_spill]] %s16797_s27  ;;  %p51_p1 = scmp.eq.s32.totalorder %s16813_s6, 0 }
  0x17   : > { %20124 = sst [smem:[#allocation18_spill]] %s16801_s28  ;;  %s71_s9 = sadd.s32 1, %s16781_s23 }
  0x18   : > { %20125 = sst [smem:[#allocation19_spill]] %s16805_s29  ;;  %p78_p2 = scmp.ne.s32.totalorder %s16781_s23, %s16777_s22 }
  0x19   : > { %20126 = sst [smem:[#allocation20_spill]] %s16809_s30  ;;  %s20254_s7 = smov (%p34_p0, %s33_s7), 0 }
  0x1a   : > { %20127 = sst [smem:[#allocation21_spill]] %s20254_s7  ;;  %s20256_s8 = smov (!%p34_p0, %s36_s8), %s16809_s30 }
  0x1b   : > { %s16930_s10 = ssub.s32 %s16805_s29, %s20254_s7  ;;  %p16934_p3 = por %p78_p2, %p51_p1 }
  0x1c   : > { %p38_p4 = scmp.ge.s32.totalorder %s20256_s8, 2  ;;  %p84_p5 = scmp.ne.s32.totalorder %s16777_s22, %s16773_s21 }
  0x1d   : > { %p16414_p6 = scmp.lt.s32.totalorder %s16813_s6, 10  ;;  %s234_s13 = sand.u32 1, %s16781_s23  }
  0x1e   : > { %s20258_s8 = smov (%p38_p4, %s20256_s8), 0  ;;  %s16384_s16 = smul.u32 9728, %s234_s13 }
  0x1f   : > { %20129 = sst [smem:[#allocation22_spill]] %s20258_s8  ;;  %s66_s14 = ssub.s32 %s16809_s30, %s20258_s8 }
  0x20   : > { %s68_s15 = sor.u32 %s66_s14, %s16930_s10  ;;  %s15166_s17 = smul.u32 2432, %s16805_s29 }
  0x21   : > { %p69_p7 = scmp.eq.s32.totalorder %s68_s15, 0  ;;  %s16385_s7 = smul.u32 12160, %s16809_s30 }
  0x22   : > { %s236_s28 = scalar_lea.vmem [#allocation4], %s16384_s16  ;;  %s20131_s1 = sld [smem:[#allocation68_spill]] }
  0x23   : > { %s16951_s27 = scalar_select %p69_p7, %s16781_s23, %s71_s9  }
  0x24   : > { %s242_s5 = sadd.s32 %s16385_s7, %s15166_s17  ;;  %s247_s4 = sshll.u32 %s236_s28, 4  ;;  %s248_s4 = int_to_ptr.vmem [resolvable:$true] %s247_s4 }
  0x25   : > { %20130 = sst [smem:[#allocation23_spill]] %s16951_s27  ;;  %s10284_s2 = sshll.u32 %s242_s5, 2 }
  0x26   : > { %p16402_p8 = pnand %p16414_p6, %p16934_p3  ;;  %p10291_p9 = scmp.ge.s32.totalorder %s16813_s6, 1 }
  0x27   : > { %s20132_s5 = sand.u32 1, %s16813_s6   ;;  %s16815_s8 = smov 128  }
  0x28   : > { %s244_s0 = scalar_lea.hbm %s20131_s1, %s10284_s2  ;;  %s16963_s28 = scalar_lea.sflag [#allocation5], %s20132_s5 }
  0x29   : > { %s245_s7 = sshll.u32 %s244_s0, 4  ;;  %s16816_s2 = smov 8   ;;  %s246_s7 = int_to_ptr.hbm [resolvable:$true] %s245_s7 }
  0x2a   : > { %16404 = dma.hbm_to_vmem [thread:$0]  (!%p16402_p8), %s246_s7, 155648, %s248_s4, %s16963_s28, %s16815_s8, %s16815_s8, %s16816_s2  }
  0x2b   : > { %p312_p10 = scmp.lt.s32.totalorder %s16813_s6, 11  ;;  %s20067_s0 = sadd.s32 4294967295, %s16813_s6  }
  0x2c   : > { %p95_p12 = scmp.eq.s32.totalorder %s66_s14, 0  ;;  %p16974_p13 = scmp.eq.s32.totalorder %s20067_s0, 0 }
  0x2d   : > { %p16967_p11 = pnand %p10291_p9, %p312_p10  ;;  %s97_s12 = sadd.s32 1, %s16769_s20 }
  0x2e   : > { %s16980_s13 = scalar_select %p95_p12, %s16769_s20, %s97_s12  }
  0x2f   : > { %p16987_p0 = por %p84_p5, %p16974_p13  ;;  %p104_p2 = scmp.ne.s32.totalorder %s16769_s20, %s16765_s19 }
  0x30   : > { %20135 = sst [smem:[#allocation24_spill]] %s16980_s13  ;;  %p110_p3 = scmp.ne.s32.totalorder %s16765_s19, %s16761_s18 }
  0x31   : > { %s259_s14 = sand.u32 1, %s16769_s20   ;;  %p106_p4 = por %p104_p2, %p51_p1 }
  0x32   : > { %s16998_s15 = sshll.u32 %s259_s14, 1  ;;  %p17002_p7 = por %p110_p3, %p16974_p13 }
  0x33   : > { %s17007_s16 = sshll.u32 %s16809_s30, 1  ;;  %p17011_p5 = pnand %p16414_p6, %p106_p4 }
  0x34   : > { %s20139_s3 = sld [smem:[#allocation70_spill]]  ;;  %s280_s2 = scalar_lea.vmem [#allocation7], %s16998_s15 }
  0x35   : > { %s288_s12 = sshll.u32 %s280_s2, 4  ;;  %s20140_s14 = sand.u32 1, %s16813_s6   ;;  %s289_s12 = int_to_ptr.vmem [resolvable:$true] %s288_s12 }
  0x36   : > { %s17022_s0 = scalar_lea.sflag [#allocation8], %s20140_s14  ;;  %p41_p8 = scmp.eq.s32.totalorder %s16930_s10, 0 }
  0x37   : > { %s43_s1 = sadd.s32 1, %s16793_s26  ;;  %p50_p9 = scmp.ne.s32.totalorder %s16793_s26, %s16789_s25 }
  0x38   : > { %s17032_s17 = scalar_select %p41_p8, %s16793_s26, %s43_s1  }
  0x39   : > { %p52_p10 = por %p51_p1, %p50_p9  ;;  %p56_p12 = scmp.ne.s32.totalorder %s16789_s25, %s16785_s24 }
  0x3a   : > { %s284_s5 = scalar_lea.hbm %s20139_s3, %s17007_s16  ;;  %20141 = sst [smem:[#allocation25_spill]] %s17032_s17 }
  0x3b   : > { %s286_s8 = sshll.u32 %s284_s5, 4  ;;  %s212_s7 = sand.u32 1, %s16793_s26   ;;  %s287_s8 = int_to_ptr.hbm [resolvable:$true] %s286_s8 }
  0x3c   : > { %16410 = dma.hbm_to_vmem [thread:$0]  (!%p17011_p5), %s287_s8, 32, %s289_s12, %s17022_s0  }
  0x3d   : > { %s15165_s5 = smul.u32 304, %s16805_s29  ;;  %p17042_p2 = por %p16974_p13, %p56_p12 }
  0x3e   : > { %s16383_s14 = smul.u32 304, %s212_s7  ;;  %s20143_s10 = sld [smem:[#allocation67_spill]] }
  0x3f   : > { %p16399_p1 = pnand %p16414_p6, %p52_p10  ;;  %s213_s11 = scalar_lea.sflag [#allocation3], %s212_s7 }
  0x40   : > { %s216_s24 = scalar_lea.vmem [#allocation2], %s16383_s14  ;;  %s20144_s26 = sld [smem:[#allocation69_spill]] }
  0x41   : > { %s225_s30 = sshll.u32 %s216_s24, 4  ;;  %s261_s8 = scalar_lea.vmem [#allocation6], %s16998_s15  ;;  %s226_s30 = int_to_ptr.vmem [resolvable:$true] %s225_s30 }
  0x42   : > { %s269_s27 = sshll.u32 %s261_s8, 4  ;;  %s20145_s14 = sld [smem:[#allocation71_spill]]  ;;  %s270_s27 = int_to_ptr.vmem [resolvable:$true] %s269_s27 }
  0x43   : > { %s299_s23 = scalar_lea.vmem [#allocation9], %s16998_s15 }
  0x44   : > { %s221_s1 = scalar_lea.hbm %s20143_s10, %s15165_s5  ;;  %s307_s13 = sshll.u32 %s299_s23, 4  ;;  %s308_s13 = int_to_ptr.vmem [resolvable:$true] %s307_s13 }
  0x45   : > { %s223_s12 = sshll.u32 %s221_s1, 4  ;;  %s224_s12 = int_to_ptr.hbm [resolvable:$true] %s223_s12 }
  0x46   : > { %16401 = dma.hbm_to_vmem [thread:$0]  (!%p16399_p1), %s224_s12, 4864, %s226_s30, %s213_s11  }
  0x47   : > { %s265_s3 = scalar_lea.hbm %s20144_s26, %s17007_s16  ;;  %316 = sbr.rel (%p16967_p11) target bundleno = 1540 (0x604), region = 40 }
  0x48   : > { %s267_s5 = sshll.u32 %s265_s3, 4  ;;  %s303_s24 = scalar_lea.hbm %s20145_s14, %s17007_s16  ;;  %s268_s5 = int_to_ptr.hbm [resolvable:$true] %s267_s5 }
  0x49   : > { %16407 = dma.hbm_to_vmem [thread:$0]  (!%p17011_p5), %s268_s5, 32, %s270_s27, %s16963_s28  }
  0x4a   : > { %s305_s20 = sshll.u32 %s303_s24, 4  ;;  %s306_s20 = int_to_ptr.hbm [resolvable:$true] %s305_s20 }
  0x4b   : > { %16413 = dma.hbm_to_vmem [thread:$0]  (!%p17011_p5), %s306_s20, 32, %s308_s13, %s17022_s0  }
  0x4c   : > { %s318_s26 = sand.u32 1, %s16789_s25  }
  0x4d   : > { %s16386_s29 = smul.u32 304, %s318_s26  ;;  %s319_s30 = scalar_lea.sflag [#allocation3], %s318_s26 }
  0x4f   : > { %s17070_s27 = scalar_lea.vmem [#allocation2], %s16386_s29 }
  0x50   : > { %16744 = dma.done.wait (%p17042_p2), %s319_s30, 4864  }
  0x51   : > { %16746 = vsyncadd (%p17042_p2), %s319_s30, 4294962432  ;;  %s20146_s23 = sadd.s32 4294967295, %s16813_s6   ;;  %s330_s28 = sand.u32 1, %s16777_s22  }
  0x52   : > { %s328_s20 = sand.u32 1, %s20146_s23   ;;  %s16387_s9 = smul.u32 9728, %s330_s28 }
  0x53   : > { %s329_s0 = scalar_lea.sflag [#allocation5], %s328_s20 }
  0x54   : > { %s17079_s13 = scalar_lea.vmem [#allocation4], %s16387_s9 }
  0x55   : > { %16748 = dma.done.wait (%p16987_p0), %s329_s0, 155648  }
  0x56   : > { %16750 = vsyncadd (%p16987_p0), %s329_s0, 4294811648  ;;  %s340_s15 = sand.u32 1, %s16765_s19  }
  0x57   : > { %s17086_s16 = sshll.u32 %s340_s15, 1 }
  0x58   : > { %s342_s18 = scalar_lea.vmem [#allocation6], %s17086_s16 }
  0x59   : > { %16752 = dma.done.wait (%p17002_p7), %s329_s0, 32  }
  0x5a   : > { %16754 = vsyncadd (%p17002_p7), %s329_s0, 4294967264  ;;  %s349_s17 = scalar_lea.sflag [#allocation8], %s328_s20  ;;  %s352_s7 = scalar_lea.vmem [#allocation7], %s17086_s16 }
  0x5b   : > { %16756 = dma.done.wait (%p17002_p7), %s349_s17, 64  }
  0x5c   : > { %16758 = vsyncadd (%p17002_p7), %s349_s17, 4294967232  ;;  %s20147_s4 = sld [smem:[#allocation18_spill]]  ;;  %s362_s10 = scalar_lea.vmem [#allocation9], %s17086_s16 }
  0x5d   : > { %s20148_s8 = sld [smem:[#allocation72_spill]] }
  0x5e   : > { %s20149_s1 = sld [smem:[#allocation17_spill]] }
  0x62   : > { %s10295_s2 = sshll.u32 %s20147_s4, 1 }
  0x63   : > { %p416_p6 = scmp.lt.s32.totalorder %s10295_s2, 3 }
  0x64   : > { %p10297_p11 = scmp.ne.s32.totalorder %s20149_s1, 0 }
  0x65   : > { %s20260_s2 = smov (!%p416_p6, %s10295_s2), 3 }
  0x66   : > { %s10296_s12 = sshll.u32 %s20260_s2, 3  ;;  %424 = sbr.rel (%p10297_p11) target bundleno = 110 (0x6e), region = 64 }
  0x67   : > { %s17102_s5 = scalar_lea.vmem %s20148_s8, %s10296_s12 }
  0x6b   : > { %v16817_v0 = vmov 0.0  }
  0x6c   : > { %425 = vst [vmem:[%s17102_s5] sm:$0xff] %v16817_v0 }
  0x6d   : > { %426 = vst [vmem:[%s17102_s5 + $0x8] sm:$0xff] %v16817_v0 }
  0x6e PF: > { %v10356_v1 = vld [vmem:[%s17079_s13 + $0x70] sm:$0xf]  ;;  %v15182_v2 = vld [vmem:[%s17079_s13 + $0x74] sm:$0xf0]  ;;  %v10348_v12 = vld [vmem:[%s17079_s13 + $0x60] sm:$0xf] }
  0x6f   : > { %v10420_v3 = vld [vmem:[%s17079_s13 + $0xf0] sm:$0xf]  ;;  %v10357_v4 = vor.u32 %v15182_v2, %v10356_v1  ;;  %v15198_v5 = vld [vmem:[%s17079_s13 + $0xf4] sm:$0xf0]  ;;  %v15180_v14 = vld [vmem:[%s17079_s13 + $0x64] sm:$0xf0] }
  0x70   : > { %v10484_v6 = vld [vmem:[%s17079_s13 + $0x170] sm:$0xf]  ;;  %v15214_v7 = vld [vmem:[%s17079_s13 + $0x174] sm:$0xf0]  ;;  %v10421_v8 = vor.u32 %v15198_v5, %v10420_v3  ;;  %v10412_v15 = vld [vmem:[%s17079_s13 + $0xe0] sm:$0xf]  ;;  %v10349_v17 = vor.u32 %v15180_v14, %v10348_v12 }
  0x71   : > { %v10485_v9 = vor.u32 %v15214_v7, %v10484_v6  ;;  %v10548_v10 = vld [vmem:[%s17079_s13 + $0x1f0] sm:$0xf]  ;;  %v15230_v11 = vld [vmem:[%s17079_s13 + $0x1f4] sm:$0xf0]  ;;  %8029 = vmatpush.bf16.msra.mxu0 %v10357_v4  ;;  %v15196_v16 = vld [vmem:[%s17079_s13 + $0xe4] sm:$0xf0] }
  0x72   : > { %v10549_v13 = vor.u32 %v15230_v11, %v10548_v10  ;;  %8042 = vmatpush.bf16.msra.mxu1 %v10421_v8  ;;  %v10413_v18 = vor.u32 %v15196_v16, %v10412_v15  ;;  %v10476_v19 = vld [vmem:[%s17079_s13 + $0x160] sm:$0xf]  ;;  %v15212_v20 = vld [vmem:[%s17079_s13 + $0x164] sm:$0xf0]  ;;  %v10340_v24 = vld [vmem:[%s17079_s13 + $0x50] sm:$0xf] }
  0x73   : > { %8055 = vmatpush.bf16.msra.mxu2 %v10485_v9  ;;  %v10540_v21 = vld [vmem:[%s17079_s13 + $0x1e0] sm:$0xf]  ;;  %v10477_v22 = vor.u32 %v15212_v20, %v10476_v19  ;;  %v15228_v23 = vld [vmem:[%s17079_s13 + $0x1e4] sm:$0xf0]  ;;  %v15178_v25 = vld [vmem:[%s17079_s13 + $0x54] sm:$0xf0] }
  0x74   : > { %8068 = vmatpush.bf16.msra.mxu3 %v10549_v13  ;;  %v10541_v26 = vor.u32 %v15228_v23, %v10540_v21  ;;  %v10404_v27 = vld [vmem:[%s17079_s13 + $0xd0] sm:$0xf]  ;;  %v15194_v28 = vld [vmem:[%s17079_s13 + $0xd4] sm:$0xf0]  ;;  %v10341_v30 = vor.u32 %v15178_v25, %v10340_v24  ;;  %v10332_v36 = vld [vmem:[%s17079_s13 + $0x40] sm:$0xf] }
  0x75   : > { %v10468_v29 = vld [vmem:[%s17079_s13 + $0x150] sm:$0xf]  ;;  %8030 = vmatpush.bf16.msra.mxu0 %v10349_v17  ;;  %v15210_v31 = vld [vmem:[%s17079_s13 + $0x154] sm:$0xf0]  ;;  %v10405_v34 = vor.u32 %v15194_v28, %v10404_v27  ;;  %v15176_v37 = vld [vmem:[%s17079_s13 + $0x44] sm:$0xf0] }
  0x76   : > { %v10532_v32 = vld [vmem:[%s17079_s13 + $0x1d0] sm:$0xf]  ;;  %v15226_v33 = vld [vmem:[%s17079_s13 + $0x1d4] sm:$0xf0]  ;;  %8043 = vmatpush.bf16.msra.mxu1 %v10413_v18  ;;  %v10469_v35 = vor.u32 %v15210_v31, %v10468_v29  ;;  %v10396_v38 = vld [vmem:[%s17079_s13 + $0xc0] sm:$0xf]  ;;  %v10333_v45 = vor.u32 %v15176_v37, %v10332_v36 }
  0x77   : > { %8056 = vmatpush.bf16.msra.mxu2 %v10477_v22  ;;  %v10533_v39 = vor.u32 %v15226_v33, %v10532_v32  ;;  %v15192_v40 = vld [vmem:[%s17079_s13 + $0xc4] sm:$0xf0]  ;;  %v10460_v41 = vld [vmem:[%s17079_s13 + $0x140] sm:$0xf]  ;;  %v10324_v48 = vld [vmem:[%s17079_s13 + $0x30] sm:$0xf] }
  0x78   : > { %8069 = vmatpush.bf16.msra.mxu3 %v10541_v26  ;;  %v15208_v42 = vld [vmem:[%s17079_s13 + $0x144] sm:$0xf0]  ;;  %v10524_v43 = vld [vmem:[%s17079_s13 + $0x1c0] sm:$0xf]  ;;  %v10397_v46 = vor.u32 %v15192_v40, %v10396_v38  ;;  %v15174_v49 = vld [vmem:[%s17079_s13 + $0x34] sm:$0xf0] }
  0x79   : > { %v15224_v44 = vld [vmem:[%s17079_s13 + $0x1c4] sm:$0xf0]  ;;  %8031 = vmatpush.bf16.msra.mxu0 %v10341_v30  ;;  %v10461_v47 = vor.u32 %v15208_v42, %v10460_v41  ;;  %v10388_v50 = vld [vmem:[%s17079_s13 + $0xb0] sm:$0xf]  ;;  %v15190_v52 = vld [vmem:[%s17079_s13 + $0xb4] sm:$0xf0]  ;;  %v10325_v57 = vor.u32 %v15174_v49, %v10324_v48 }
  0x7a   : > { %8044 = vmatpush.bf16.msra.mxu1 %v10405_v34  ;;  %v10525_v51 = vor.u32 %v15224_v44, %v10524_v43  ;;  %v10452_v53 = vld [vmem:[%s17079_s13 + $0x130] sm:$0xf]  ;;  %v15206_v54 = vld [vmem:[%s17079_s13 + $0x134] sm:$0xf0]  ;;  %v10389_v58 = vor.u32 %v15190_v52, %v10388_v50  ;;  %v10316_v60 = vld [vmem:[%s17079_s13 + $0x20] sm:$0xf] }
  0x7b   : > { %8057 = vmatpush.bf16.msra.mxu2 %v10469_v35  ;;  %v10516_v55 = vld [vmem:[%s17079_s13 + $0x1b0] sm:$0xf]  ;;  %v15222_v56 = vld [vmem:[%s17079_s13 + $0x1b4] sm:$0xf0]  ;;  %v10453_v59 = vor.u32 %v15206_v54, %v10452_v53  ;;  %v15172_v61 = vld [vmem:[%s17079_s13 + $0x24] sm:$0xf0] }
  0x7c   : > { %8070 = vmatpush.bf16.msra.mxu3 %v10533_v39  ;;  %v10380_v62 = vld [vmem:[%s17079_s13 + $0xa0] sm:$0xf]  ;;  %v10517_v63 = vor.u32 %v15222_v56, %v10516_v55  ;;  %v15188_v0 = vld [vmem:[%s17079_s13 + $0xa4] sm:$0xf0]  ;;  %v10317_v5 = vor.u32 %v15172_v61, %v10316_v60  ;;  %v10308_v8 = vld [vmem:[%s17079_s13 + $0x10] sm:$0xf] }
  0x7d   : > { %8032 = vmatpush.bf16.msra.mxu0 %v10333_v45  ;;  %v10444_v1 = vld [vmem:[%s17079_s13 + $0x120] sm:$0xf]  ;;  %v15204_v2 = vld [vmem:[%s17079_s13 + $0x124] sm:$0xf0]  ;;  %v10381_v6 = vor.u32 %v15188_v0, %v10380_v62  ;;  %v15170_v9 = vld [vmem:[%s17079_s13 + $0x14] sm:$0xf0] }
  0x7e   : > { %8045 = vmatpush.bf16.msra.mxu1 %v10397_v46  ;;  %v10508_v3 = vld [vmem:[%s17079_s13 + $0x1a0] sm:$0xf]  ;;  %v15220_v4 = vld [vmem:[%s17079_s13 + $0x1a4] sm:$0xf0]  ;;  %v10445_v7 = vor.u32 %v15204_v2, %v10444_v1  ;;  %v10372_v10 = vld [vmem:[%s17079_s13 + $0x90] sm:$0xf]  ;;  %v10309_v17 = vor.u32 %v15170_v9, %v10308_v8 }
  0x7f   : > { %8058 = vmatpush.bf16.msra.mxu2 %v10461_v47  ;;  %v10509_v11 = vor.u32 %v15220_v4, %v10508_v3  ;;  %v15186_v12 = vld [vmem:[%s17079_s13 + $0x94] sm:$0xf0]  ;;  %v10436_v13 = vld [vmem:[%s17079_s13 + $0x110] sm:$0xf]  ;;  %v10300_v18 = vld [vmem:[%s17079_s13] sm:$0xf] }
  0x80   : > { %8071 = vmatpush.bf16.msra.mxu3 %v10525_v51  ;;  %v15202_v14 = vld [vmem:[%s17079_s13 + $0x114] sm:$0xf0]  ;;  %v10500_v15 = vld [vmem:[%s17079_s13 + $0x190] sm:$0xf]  ;;  %v15168_v19 = vld [vmem:[%s17079_s13 + $0x4] sm:$0xf0]  ;;  %v10373_v20 = vor.u32 %v15186_v12, %v10372_v10 }
  0x81   : > { %8033 = vmatpush.bf16.msra.mxu0 %v10325_v57  ;;  %v15218_v16 = vld [vmem:[%s17079_s13 + $0x194] sm:$0xf0]  ;;  %v10437_v21 = vor.u32 %v15202_v14, %v10436_v13  ;;  %v10364_v22 = vld [vmem:[%s17079_s13 + $0x80] sm:$0xf]  ;;  %v15184_v23 = vld [vmem:[%s17079_s13 + $0x84] sm:$0xf0]  ;;  %v10301_v32 = vor.u32 %v15168_v19, %v10300_v18 }
  0x82   : > { %8046 = vmatpush.bf16.msra.mxu1 %v10389_v58  ;;  %v10428_v24 = vld [vmem:[%s17079_s13 + $0x100] sm:$0xf]  ;;  %v10501_v25 = vor.u32 %v15218_v16, %v10500_v15  ;;  %v15200_v26 = vld [vmem:[%s17079_s13 + $0x104] sm:$0xf0]  ;;  %v10612_v29 = vld [vmem:[%s17079_s13 + $0x270] sm:$0xf]  ;;  %v10365_v36 = vor.u32 %v15184_v23, %v10364_v22 }
  0x83   : > { %8059 = vmatpush.bf16.msra.mxu2 %v10453_v59  ;;  %v10492_v27 = vld [vmem:[%s17079_s13 + $0x180] sm:$0xf]  ;;  %v15216_v28 = vld [vmem:[%s17079_s13 + $0x184] sm:$0xf0]  ;;  %v15246_v30 = vld [vmem:[%s17079_s13 + $0x274] sm:$0xf0]  ;;  %v10429_v37 = vor.u32 %v15200_v26, %v10428_v24 }
  0x84   : > { %8072 = vmatpush.bf16.msra.mxu3 %v10517_v63  ;;  %v10676_v31 = vld [vmem:[%s17079_s13 + $0x2f0] sm:$0xf]  ;;  %v15262_v33 = vld [vmem:[%s17079_s13 + $0x2f4] sm:$0xf0]  ;;  %v10493_v40 = vor.u32 %v15216_v28, %v10492_v27  ;;  %v10613_v41 = vor.u32 %v15246_v30, %v10612_v29  ;;  %v10604_v44 = vld [vmem:[%s17079_s13 + $0x260] sm:$0xf] }
  0x85   : > { %8034 = vmatpush.bf16.msra.mxu0 %v10317_v5  ;;  %v10740_v34 = vld [vmem:[%s17079_s13 + $0x370] sm:$0xf]  ;;  %v15278_v35 = vld [vmem:[%s17079_s13 + $0x374] sm:$0xf0]  ;;  %v10677_v42 = vor.u32 %v15262_v33, %v10676_v31  ;;  %v15244_v45 = vld [vmem:[%s17079_s13 + $0x264] sm:$0xf0] }
  0x86   : > { %8047 = vmatpush.bf16.msra.mxu1 %v10381_v6  ;;  %v10804_v38 = vld [vmem:[%s17079_s13 + $0x3f0] sm:$0xf]  ;;  %v15294_v39 = vld [vmem:[%s17079_s13 + $0x3f4] sm:$0xf0]  ;;  %v10741_v43 = vor.u32 %v15278_v35, %v10740_v34  ;;  %v10668_v46 = vld [vmem:[%s17079_s13 + $0x2e0] sm:$0xf]  ;;  %v10605_v53 = vor.u32 %v15244_v45, %v10604_v44 }
  0x87   : > { %8060 = vmatpush.bf16.msra.mxu2 %v10445_v7  ;;  %v10805_v47 = vor.u32 %v15294_v39, %v10804_v38  ;;  %v15260_v48 = vld [vmem:[%s17079_s13 + $0x2e4] sm:$0xf0]  ;;  %v10732_v49 = vld [vmem:[%s17079_s13 + $0x360] sm:$0xf]  ;;  %v10596_v54 = vld [vmem:[%s17079_s13 + $0x250] sm:$0xf] }
  0x88   : > { %8073 = vmatpush.bf16.msra.mxu3 %v10509_v11  ;;  %v15276_v50 = vld [vmem:[%s17079_s13 + $0x364] sm:$0xf0]  ;;  %v10796_v51 = vld [vmem:[%s17079_s13 + $0x3e0] sm:$0xf]  ;;  %v10669_v55 = vor.u32 %v15260_v48, %v10668_v46  ;;  %v15242_v57 = vld [vmem:[%s17079_s13 + $0x254] sm:$0xf0] }
  0x89   : > { %8035 = vmatpush.bf16.msra.mxu0 %v10309_v17  ;;  %v15292_v52 = vld [vmem:[%s17079_s13 + $0x3e4] sm:$0xf0]  ;;  %v10733_v56 = vor.u32 %v15276_v50, %v10732_v49  ;;  %v10660_v58 = vld [vmem:[%s17079_s13 + $0x2d0] sm:$0xf]  ;;  %v15258_v61 = vld [vmem:[%s17079_s13 + $0x2d4] sm:$0xf0]  ;;  %v10597_v4 = vor.u32 %v15242_v57, %v10596_v54 }
  0x8a   : > { %8048 = vmatpush.bf16.msra.mxu1 %v10373_v20  ;;  %v430_v59 = vld [vmem:[%s17070_s27 + $0x8] sm:$0xff]  ;;  %v10797_v60 = vor.u32 %v15292_v52, %v10796_v51  ;;  %v10724_v62 = vld [vmem:[%s17079_s13 + $0x350] sm:$0xf]  ;;  %v10661_v8 = vor.u32 %v15258_v61, %v10660_v58  ;;  %v10588_v10 = vld [vmem:[%s17079_s13 + $0x240] sm:$0xf]  ;;  %s20232_s21 = sld [smem:[#allocation17_spill]] }
  0x8b   : > { %8061 = vmatpush.bf16.msra.mxu2 %v10437_v21  ;;  %v15274_v63 = vld [vmem:[%s17079_s13 + $0x354] sm:$0xf0]  ;;  %v1723_v0 = vunpack.c.l.b16 %v430_v59  ;;  %v1724_v1 = vunpack.c.h.b16 %v430_v59  ;;  %v10788_v2 = vld [vmem:[%s17079_s13 + $0x3d0] sm:$0xf]  ;;  %v15240_v11 = vld [vmem:[%s17079_s13 + $0x244] sm:$0xf0] }
  0x8c   : > { %8074 = vmatpush.bf16.msra.mxu3 %v10501_v25  ;;  %v15290_v3 = vld [vmem:[%s17079_s13 + $0x3d4] sm:$0xf0]  ;;  %v429_v6 = vld [vmem:[%s17070_s27] sm:$0xff]  ;;  %v10725_v9 = vor.u32 %v15274_v63, %v10724_v62  ;;  %v15256_v16 = vld [vmem:[%s17079_s13 + $0x2c4] sm:$0xf0]  ;;  %v10589_v23 = vor.u32 %v15240_v11, %v10588_v10 }
  0x8d   : > { %8036 = vmatpush.bf16.msra.mxu0 %v10301_v32  ;;  %v17197_v5 = vpack.c.b16 %v1723_v0, %v1723_v0  ;;  %v17200_v7 = vpack.c.b16 %v1724_v1, %v1724_v1  ;;  %v10652_v12 = vld [vmem:[%s17079_s13 + $0x2c0] sm:$0xf]  ;;  %v1721_v13 = vunpack.c.l.b16 %v429_v6  ;;  %v1722_v14 = vunpack.c.h.b16 %v429_v6  ;;  %v15272_v18 = vld [vmem:[%s17079_s13 + $0x344] sm:$0xf0]  ;;  %v10580_v26 = vld [vmem:[%s17079_s13 + $0x230] sm:$0xf] }
  0x8e   : > { %8049 = vmatpush.bf16.msra.mxu1 %v10365_v36  ;;  %v10789_v15 = vor.u32 %v15290_v3, %v10788_v2  ;;  %v10716_v17 = vld [vmem:[%s17079_s13 + $0x340] sm:$0xf]  ;;  %v15288_v20 = vld [vmem:[%s17079_s13 + $0x3c4] sm:$0xf0]  ;;  %v10653_v24 = vor.u32 %v15256_v16, %v10652_v12  ;;  %v15238_v27 = vld [vmem:[%s17079_s13 + $0x234] sm:$0xf0] }
  0x8f   : > { %8062 = vmatpush.bf16.msra.mxu2 %v10429_v37  ;;  %v10780_v19 = vld [vmem:[%s17079_s13 + $0x3c0] sm:$0xf]  ;;  %v17211_v21 = vpack.c.b16 %v1721_v13, %v1721_v13  ;;  %v17214_v22 = vpack.c.b16 %v1722_v14, %v1722_v14  ;;  %v10717_v25 = vor.u32 %v15272_v18, %v10716_v17  ;;  %v10644_v28 = vld [vmem:[%s17079_s13 + $0x2b0] sm:$0xf]  ;;  %v15254_v30 = vld [vmem:[%s17079_s13 + $0x2b4] sm:$0xf0]  ;;  %v10581_v35 = vor.u32 %v15238_v27, %v10580_v26 }
  0x90   : > { %8075 = vmatpush.bf16.msra.mxu3 %v10493_v40  ;;  %v10781_v29 = vor.u32 %v15288_v20, %v10780_v19  ;;  %v10708_v31 = vld [vmem:[%s17079_s13 + $0x330] sm:$0xf]  ;;  %v15270_v32 = vld [vmem:[%s17079_s13 + $0x334] sm:$0xf0]  ;;  %v10645_v36 = vor.u32 %v15254_v30, %v10644_v28  ;;  %v10572_v38 = vld [vmem:[%s17079_s13 + $0x220] sm:$0xf] }
  0x91   : > { %8081 = vmatpush.bf16.msrb.mxu0 %v10613_v41  ;;  %v10772_v33 = vld [vmem:[%s17079_s13 + $0x3b0] sm:$0xf]  ;;  %v15286_v34 = vld [vmem:[%s17079_s13 + $0x3b4] sm:$0xf0]  ;;  %8050 = vmatmul.bf16.vlgmr.msra.gmra.mxu1 %v17214_v22  ;;  %v10709_v37 = vor.u32 %v15270_v32, %v10708_v31  ;;  %v15236_v39 = vld [vmem:[%s17079_s13 + $0x224] sm:$0xf0] }
  0x92   : > { %8094 = vmatpush.bf16.msrb.mxu1 %v10677_v42  ;;  %8063 = vmatmul.bf16.vlgmr.msra.gmra.mxu2 %v17197_v5  ;;  %v10636_v40 = vld [vmem:[%s17079_s13 + $0x2a0] sm:$0xf]  ;;  %v10773_v41 = vor.u32 %v15286_v34, %v10772_v33  ;;  %v15252_v42 = vld [vmem:[%s17079_s13 + $0x2a4] sm:$0xf0]  ;;  %v10564_v50 = vld [vmem:[%s17079_s13 + $0x210] sm:$0xf] }
  0x93   : > { %8107 = vmatpush.bf16.msrb.mxu2 %v10741_v43  ;;  %8076 = vmatmul.bf16.vlgmr.msra.gmra.mxu3 %v17200_v7  ;;  %v10700_v43 = vld [vmem:[%s17079_s13 + $0x320] sm:$0xf]  ;;  %v15268_v44 = vld [vmem:[%s17079_s13 + $0x324] sm:$0xf0]  ;;  %v10637_v48 = vor.u32 %v15252_v42, %v10636_v40  ;;  %v15234_v51 = vld [vmem:[%s17079_s13 + $0x214] sm:$0xf0] }
  0x94   : > { %8120 = vmatpush.bf16.msrb.mxu3 %v10805_v47  ;;  %8037 = vmatmul.bf16.vlgmr.msra.gmra.mxu0 %v17211_v21  ;;  %v10764_v45 = vld [vmem:[%s17079_s13 + $0x3a0] sm:$0xf]  ;;  %v15284_v46 = vld [vmem:[%s17079_s13 + $0x3a4] sm:$0xf0]  ;;  %v10573_v47 = vor.u32 %v15236_v39, %v10572_v38  ;;  %v10701_v49 = vor.u32 %v15268_v44, %v10700_v43  ;;  %v10628_v52 = vld [vmem:[%s17079_s13 + $0x290] sm:$0xf] }
  0x95   : > { %8082 = vmatpush.bf16.msrb.mxu0 %v10605_v53  ;;  %v10765_v53 = vor.u32 %v15284_v46, %v10764_v45  ;;  %v15250_v54 = vld [vmem:[%s17079_s13 + $0x294] sm:$0xf0]  ;;  %v10756_v57 = vld [vmem:[%s17079_s13 + $0x390] sm:$0xf]  ;;  %v10556_v59 = vld [vmem:[%s17079_s13 + $0x200] sm:$0xf] }
  0x96   : > { %8095 = vmatpush.bf16.msrb.mxu1 %v10669_v55  ;;  %v10692_v55 = vld [vmem:[%s17079_s13 + $0x310] sm:$0xf]  ;;  %v15282_v58 = vld [vmem:[%s17079_s13 + $0x394] sm:$0xf0]  ;;  %v15232_v61 = vld [vmem:[%s17079_s13 + $0x204] sm:$0xf0]  ;;  %v10629_v0 = vor.u32 %v15250_v54, %v10628_v52 }
  0x97   : > { %8108 = vmatpush.bf16.msrb.mxu2 %v10733_v56  ;;  %v15266_v56 = vld [vmem:[%s17079_s13 + $0x314] sm:$0xf0]  ;;  %v10620_v62 = vld [vmem:[%s17079_s13 + $0x280] sm:$0xf]  ;;  %v15248_v63 = vld [vmem:[%s17079_s13 + $0x284] sm:$0xf0]  ;;  %v10757_v6 = vor.u32 %v15282_v58, %v10756_v57  ;;  %v10557_v14 = vor.u32 %v15232_v61, %v10556_v59 }
  0x98   : > { %8121 = vmatpush.bf16.msrb.mxu3 %v10797_v60  ;;  %v10565_v60 = vor.u32 %v15234_v51, %v10564_v50  ;;  %v10693_v1 = vor.u32 %v15266_v56, %v10692_v55  ;;  %v10684_v2 = vld [vmem:[%s17079_s13 + $0x300] sm:$0xf]  ;;  %v15264_v3 = vld [vmem:[%s17079_s13 + $0x304] sm:$0xf0]  ;;  %v10868_v11 = vld [vmem:[%s17079_s13 + $0x470] sm:$0xf]  ;;  %v10621_v19 = vor.u32 %v15248_v63, %v10620_v62 }
  0x99   : > { %8083 = vmatpush.bf16.msrb.mxu0 %v10597_v4  ;;  %v432_v4 = vld [vmem:[%s17070_s27 + $0x18] sm:$0xff]  ;;  %v431_v10 = vld [vmem:[%s17070_s27 + $0x10] sm:$0xff]  ;;  %v10685_v20 = vor.u32 %v15264_v3, %v10684_v2  ;;  %p15162_p13 = scmp.ne.s32.totalorder %s20232_s21, 4 }
  0x9a   : > { %8096 = vmatpush.bf16.msrb.mxu1 %v10661_v8  ;;  %v10748_v8 = vld [vmem:[%s17079_s13 + $0x380] sm:$0xf]  ;;  %v15310_v12 = vld [vmem:[%s17079_s13 + $0x474] sm:$0xf0]  ;;  %v10932_v13 = vld [vmem:[%s17079_s13 + $0x4f0] sm:$0xf]  ;;  %v1727_v18 = vunpack.c.l.b16 %v432_v4  ;;  %v1728_v26 = vunpack.c.h.b16 %v432_v4 }
  0x9b   : > { %8109 = vmatpush.bf16.msrb.mxu2 %v10725_v9  ;;  %v15280_v9 = vld [vmem:[%s17079_s13 + $0x384] sm:$0xf0]  ;;  %v10996_v16 = vld [vmem:[%s17079_s13 + $0x570] sm:$0xf]  ;;  %v15342_v17 = vld [vmem:[%s17079_s13 + $0x574] sm:$0xf0]  ;;  %v10869_v28 = vor.u32 %v15310_v12, %v10868_v11 }
  0x9c   : > { %8122 = vmatpush.bf16.msrb.mxu3 %v10789_v15  ;;  %v15326_v15 = vld [vmem:[%s17079_s13 + $0x4f4] sm:$0xf0]  ;;  %v10749_v27 = vor.u32 %v15280_v9, %v10748_v8  ;;  %v10997_v31 = vor.u32 %v15342_v17, %v10996_v16  ;;  %v10860_v32 = vld [vmem:[%s17079_s13 + $0x460] sm:$0xf]  ;;  %v15308_v33 = vld [vmem:[%s17079_s13 + $0x464] sm:$0xf0]  ;;  %v17266_v39 = vpack.c.b16 %v1727_v18, %v1727_v18  ;;  %v17272_v43 = vpack.c.b16 %v1728_v26, %v1728_v26 }
  0x9d   : > { %8084 = vmatpush.bf16.msrb.mxu0 %v10589_v23  ;;  %v11060_v23 = vld [vmem:[%s17079_s13 + $0x5f0] sm:$0xf]  ;;  %v10933_v30 = vor.u32 %v15326_v15, %v10932_v13  ;;  %v10924_v34 = vld [vmem:[%s17079_s13 + $0x4e0] sm:$0xf]  ;;  %v15340_v38 = vld [vmem:[%s17079_s13 + $0x564] sm:$0xf0]  ;;  %v10861_v44 = vor.u32 %v15308_v33, %v10860_v32 }
  0x9e   : > { %8097 = vmatpush.bf16.msrb.mxu1 %v10653_v24  ;;  %v15358_v24 = vld [vmem:[%s17079_s13 + $0x5f4] sm:$0xf0]  ;;  %v11052_v40 = vld [vmem:[%s17079_s13 + $0x5e0] sm:$0xf]  ;;  %v10916_v50 = vld [vmem:[%s17079_s13 + $0x4d0] sm:$0xf] }
  0x9f   : > { %8110 = vmatpush.bf16.msrb.mxu2 %v10717_v25  ;;  %v1725_v25 = vunpack.c.l.b16 %v431_v10  ;;  %v15322_v52 = vld [vmem:[%s17079_s13 + $0x4d4] sm:$0xf0]  ;;  %v11044_v55 = vld [vmem:[%s17079_s13 + $0x5d0] sm:$0xf]  ;;  %v15304_v61 = vld [vmem:[%s17079_s13 + $0x444] sm:$0xf0] }
  0xa0   : > { %8123 = vmatpush.bf16.msrb.mxu3 %v10781_v29  ;;  %v1726_v29 = vunpack.c.h.b16 %v431_v10  ;;  %v15338_v54 = vld [vmem:[%s17079_s13 + $0x554] sm:$0xf0]  ;;  %v10917_v58 = vor.u32 %v15322_v52, %v10916_v50  ;;  %v10908_v62 = vld [vmem:[%s17079_s13 + $0x4c0] sm:$0xf]  ;;  %v15336_v2 = vld [vmem:[%s17079_s13 + $0x544] sm:$0xf0] }
  0xa1   : > { %8085 = vmatpush.bf16.msrb.mxu0 %v10581_v35  ;;  %v11061_v35 = vor.u32 %v15358_v24, %v11060_v23  ;;  %v17270_v42 = vpack.c.b16 %v1725_v25, %v1725_v25  ;;  %v15354_v56 = vld [vmem:[%s17079_s13 + $0x5d4] sm:$0xf0]  ;;  %v11036_v3 = vld [vmem:[%s17079_s13 + $0x5c0] sm:$0xf]  ;;  %v15352_v4 = vld [vmem:[%s17079_s13 + $0x5c4] sm:$0xf0] }
  0xa2   : > { %8098 = vmatpush.bf16.msrb.mxu1 %v10645_v36  ;;  %v15324_v36 = vld [vmem:[%s17079_s13 + $0x4e4] sm:$0xf0]  ;;  %v17274_v45 = vpack.c.b16 %v1726_v29, %v1726_v29  ;;  %v11045_v63 = vor.u32 %v15354_v56, %v11044_v55  ;;  %v10836_v10 = vld [vmem:[%s17079_s13 + $0x430] sm:$0xf]  ;;  %v15302_v11 = vld [vmem:[%s17079_s13 + $0x434] sm:$0xf0]  ;;  %v11037_v13 = vor.u32 %v15352_v4, %v11036_v3 }
  0xa3   : > { %8111 = vmatpush.bf16.msrb.mxu2 %v10709_v37  ;;  %v10988_v37 = vld [vmem:[%s17079_s13 + $0x560] sm:$0xf]  ;;  %v10925_v46 = vor.u32 %v15324_v36, %v10924_v34  ;;  %v10900_v12 = vld [vmem:[%s17079_s13 + $0x4b0] sm:$0xf]  ;;  %v15334_v16 = vld [vmem:[%s17079_s13 + $0x534] sm:$0xf0] }
  0xa4   : > { %8124 = vmatpush.bf16.msrb.mxu3 %v10773_v41  ;;  %v15356_v41 = vld [vmem:[%s17079_s13 + $0x5e4] sm:$0xf0]  ;;  %v10964_v15 = vld [vmem:[%s17079_s13 + $0x530] sm:$0xf]  ;;  %v15350_v18 = vld [vmem:[%s17079_s13 + $0x5b4] sm:$0xf0] }
  0xa5   : > { %8086 = vmatpush.bf16.msrb.mxu0 %v10573_v47  ;;  %v10989_v47 = vor.u32 %v15340_v38, %v10988_v37  ;;  %v11053_v51 = vor.u32 %v15356_v41, %v11052_v40  ;;  %v11028_v17 = vld [vmem:[%s17079_s13 + $0x5b0] sm:$0xf]  ;;  %v10965_v23 = vor.u32 %v15334_v16, %v10964_v15  ;;  %v10828_v24 = vld [vmem:[%s17079_s13 + $0x420] sm:$0xf]  ;;  %v15300_v25 = vld [vmem:[%s17079_s13 + $0x424] sm:$0xf0] }
  0xa6   : > { %8099 = vmatpush.bf16.msrb.mxu1 %v10637_v48  ;;  %v10852_v48 = vld [vmem:[%s17079_s13 + $0x450] sm:$0xf]  ;;  %v10892_v26 = vld [vmem:[%s17079_s13 + $0x4a0] sm:$0xf]  ;;  %v15348_v32 = vld [vmem:[%s17079_s13 + $0x5a4] sm:$0xf0]  ;;  %v10829_v33 = vor.u32 %v15300_v25, %v10828_v24 }
  0xa7   : > { %8112 = vmatpush.bf16.msrb.mxu2 %v10701_v49  ;;  %v15306_v49 = vld [vmem:[%s17079_s13 + $0x454] sm:$0xf0]  ;;  %v10956_v29 = vld [vmem:[%s17079_s13 + $0x520] sm:$0xf]  ;;  %v10820_v36 = vld [vmem:[%s17079_s13 + $0x410] sm:$0xf] }
  0xa8   : > { %8125 = vmatpush.bf16.msrb.mxu3 %v10765_v53  ;;  %v10980_v53 = vld [vmem:[%s17079_s13 + $0x550] sm:$0xf]  ;;  %v10853_v57 = vor.u32 %v15306_v49, %v10852_v48  ;;  %v15298_v37 = vld [vmem:[%s17079_s13 + $0x414] sm:$0xf0]  ;;  %v10812_v49 = vld [vmem:[%s17079_s13 + $0x400] sm:$0xf] }
  0xa9   : > { %8087 = vmatpush.bf16.msrb.mxu0 %v10565_v60  ;;  %v10981_v59 = vor.u32 %v15338_v54, %v10980_v53  ;;  %v10844_v60 = vld [vmem:[%s17079_s13 + $0x440] sm:$0xf]  ;;  %v10884_v38 = vld [vmem:[%s17079_s13 + $0x490] sm:$0xf]  ;;  %v15314_v41 = vld [vmem:[%s17079_s13 + $0x494] sm:$0xf0]  ;;  %v10821_v50 = vor.u32 %v15298_v37, %v10820_v36 }
  0xaa   : > { %8100 = vmatpush.bf16.msrb.mxu1 %v10629_v0  ;;  %v15320_v0 = vld [vmem:[%s17079_s13 + $0x4c4] sm:$0xf0]  ;;  %v15346_v48 = vld [vmem:[%s17079_s13 + $0x594] sm:$0xf0]  ;;  %v10876_v52 = vld [vmem:[%s17079_s13 + $0x480] sm:$0xf]  ;;  %v10885_v54 = vor.u32 %v15314_v41, %v10884_v38 }
  0xab   : > { %8113 = vmatpush.bf16.msrb.mxu2 %v10693_v1  ;;  %v10972_v1 = vld [vmem:[%s17079_s13 + $0x540] sm:$0xf]  ;;  %v10909_v8 = vor.u32 %v15320_v0, %v10908_v62  ;;  %v15312_v53 = vld [vmem:[%s17079_s13 + $0x484] sm:$0xf0]  ;;  %v15374_v0 = vld [vmem:[%s17079_s13 + $0x674] sm:$0xf0] }
  0xac   : > { %8126 = vmatpush.bf16.msrb.mxu3 %v10757_v6  ;;  %v10845_v6 = vor.u32 %v15304_v61, %v10844_v60  ;;  %v10973_v9 = vor.u32 %v15336_v2, %v10972_v1  ;;  %v10940_v56 = vld [vmem:[%s17079_s13 + $0x500] sm:$0xf]  ;;  %v15344_v61 = vld [vmem:[%s17079_s13 + $0x584] sm:$0xf0]  ;;  %v11188_v1 = vld [vmem:[%s17079_s13 + $0x6f0] sm:$0xf] }
  0xad   : > { %8088 = vmatpush.bf16.msrb.mxu0 %v10557_v14  ;;  %v15318_v14 = vld [vmem:[%s17079_s13 + $0x4b4] sm:$0xf0]  ;;  %v11004_v60 = vld [vmem:[%s17079_s13 + $0x580] sm:$0xf]  ;;  %v11252_v4 = vld [vmem:[%s17079_s13 + $0x770] sm:$0xf] }
  0xae   : > { %8101 = vmatpush.bf16.msrb.mxu1 %v10621_v19  ;;  %v10837_v19 = vor.u32 %v15302_v11, %v10836_v10  ;;  %v434_v62 = vld [vmem:[%s17070_s27 + $0x28] sm:$0xff]  ;;  %v11316_v11 = vld [vmem:[%s17079_s13 + $0x7f0] sm:$0xf]  ;;  %v11005_v15 = vor.u32 %v15344_v61, %v11004_v60  ;;  %v11180_v24 = vld [vmem:[%s17079_s13 + $0x6e0] sm:$0xf] }
  0xaf   : > { %8114 = vmatpush.bf16.msrb.mxu2 %v10685_v20  ;;  %v10901_v20 = vor.u32 %v15318_v14, %v10900_v12  ;;  %v15390_v3 = vld [vmem:[%s17079_s13 + $0x6f4] sm:$0xf0]  ;;  %v11108_v38 = vld [vmem:[%s17079_s13 + $0x650] sm:$0xf]  ;;  %v15400_v60 = vld [vmem:[%s17079_s13 + $0x744] sm:$0xf0] }
  0xb0   : > { %8127 = vmatpush.bf16.msrb.mxu3 %v10749_v27  ;;  %8089 = vmatmul.bf16.vlgmr.msrb.gmra.mxu0 %v17270_v42  ;;  %v11029_v27 = vor.u32 %v15350_v18, %v11028_v17  ;;  %v15422_v12 = vld [vmem:[%s17079_s13 + $0x7f4] sm:$0xf0]  ;;  %v1732_v17 = vunpack.c.h.b16 %v434_v62  ;;  %v11189_v18 = vor.u32 %v15390_v3, %v11188_v1  ;;  %v11172_v41 = vld [vmem:[%s17079_s13 + $0x6d0] sm:$0xf]  ;;  %v11292_v61 = vld [vmem:[%s17079_s13 + $0x7c0] sm:$0xf] }
  0xb1   : > { %8133 = vmatpush.bf16.msra.mxu0 %v10869_v28  ;;  %8102 = vmatmul.bf16.vlgmr.msrb.gmra.mxu1 %v17274_v45  ;;  %v15316_v28 = vld [vmem:[%s17079_s13 + $0x4a4] sm:$0xf0]  ;;  %v11317_v25 = vor.u32 %v15422_v12, %v11316_v11  ;;  %v15366_v3 = vld [vmem:[%s17079_s13 + $0x634] sm:$0xf0]  ;;  %v11284_v11 = vld [vmem:[%s17079_s13 + $0x7b0] sm:$0xf] }
  0xb2   : > { %8146 = vmatpush.bf16.msra.mxu1 %v10933_v30  ;;  %8115 = vmatmul.bf16.vlgmr.msrb.gmra.mxu2 %v17266_v39  ;;  %v15332_v30 = vld [vmem:[%s17079_s13 + $0x524] sm:$0xf0]  ;;  %v10893_v34 = vor.u32 %v15316_v28, %v10892_v26  ;;  %v11244_v28 = vld [vmem:[%s17079_s13 + $0x760] sm:$0xf]  ;;  %v15414_v12 = vld [vmem:[%s17079_s13 + $0x7b4] sm:$0xf0] }
  0xb3   : > { %8159 = vmatpush.bf16.msra.mxu2 %v10997_v31  ;;  %8128 = vmatmul.bf16.vlgmr.msrb.gmra.mxu3 %v17272_v43  ;;  %v11020_v31 = vld [vmem:[%s17079_s13 + $0x5a0] sm:$0xf] }
  0xb4   : > { %8172 = vmatpush.bf16.msra.mxu3 %v11061_v35  ;;  %v10957_v35 = vor.u32 %v15332_v30, %v10956_v29  ;;  %v11021_v40 = vor.u32 %v15348_v32, %v11020_v31  ;;  %v15404_v29 = vld [vmem:[%s17079_s13 + $0x764] sm:$0xf0]  ;;  %v11308_v32 = vld [vmem:[%s17079_s13 + $0x7e0] sm:$0xf] }
  0xb5   : > { %8134 = vmatpush.bf16.msra.mxu0 %v10861_v44  ;;  %v10948_v44 = vld [vmem:[%s17079_s13 + $0x510] sm:$0xf]  ;;  %v11245_v37 = vor.u32 %v15404_v29, %v11244_v28 }
  0xb6   : > { %8147 = vmatpush.bf16.msra.mxu1 %v10925_v46  ;;  %v15330_v46 = vld [vmem:[%s17079_s13 + $0x514] sm:$0xf0] }
  0xb7   : > { %8160 = vmatpush.bf16.msra.mxu2 %v10989_v47  ;;  %v11012_v47 = vld [vmem:[%s17079_s13 + $0x590] sm:$0xf]  ;;  %v10949_v55 = vor.u32 %v15330_v46, %v10948_v44  ;;  %v15386_v46 = vld [vmem:[%s17079_s13 + $0x6d4] sm:$0xf0] }
  0xb8   : > { %8173 = vmatpush.bf16.msra.mxu3 %v11053_v51  ;;  %v15296_v51 = vld [vmem:[%s17079_s13 + $0x404] sm:$0xf0] }
  0xb9   : > { %8135 = vmatpush.bf16.msra.mxu0 %v10853_v57  ;;  %v15328_v57 = vld [vmem:[%s17079_s13 + $0x504] sm:$0xf0]  ;;  %v10813_v2 = vor.u32 %v15296_v51, %v10812_v49  ;;  %v11300_v49 = vld [vmem:[%s17079_s13 + $0x7d0] sm:$0xf] }
  0xba   : > { %8148 = vmatpush.bf16.msra.mxu1 %v10917_v58  ;;  %v433_v58 = vld [vmem:[%s17070_s27 + $0x20] sm:$0xff]  ;;  %v10941_v10 = vor.u32 %v15328_v57, %v10940_v56 }
  0xbb   : > { %8161 = vmatpush.bf16.msra.mxu2 %v10981_v59  ;;  %v11013_v59 = vor.u32 %v15346_v48, %v11012_v47  ;;  %v1730_v14 = vunpack.c.h.b16 %v433_v58  ;;  %v11236_v47 = vld [vmem:[%s17079_s13 + $0x750] sm:$0xf]  ;;  %v15402_v48 = vld [vmem:[%s17079_s13 + $0x754] sm:$0xf0]  ;;  %v11164_v56 = vld [vmem:[%s17079_s13 + $0x6c0] sm:$0xf] }
  0xbc   : > { %8174 = vmatpush.bf16.msra.mxu3 %v11045_v63  ;;  %v11124_v63 = vld [vmem:[%s17079_s13 + $0x670] sm:$0xf] }
  0xbd   : > { %8136 = vmatpush.bf16.msra.mxu0 %v10845_v6  ;;  %v15406_v6 = vld [vmem:[%s17079_s13 + $0x774] sm:$0xf0]  ;;  %v11125_v16 = vor.u32 %v15374_v0, %v11124_v63  ;;  %v17348_v31 = vpack.c.b16 %v1730_v14, %v1730_v14 }
  0xbe   : > { %8149 = vmatpush.bf16.msra.mxu1 %v10909_v8  ;;  %v1729_v8 = vunpack.c.l.b16 %v433_v58  ;;  %v15384_v58 = vld [vmem:[%s17079_s13 + $0x6c4] sm:$0xf0] }
  0xbf   : > { %8162 = vmatpush.bf16.msra.mxu2 %v10973_v9  ;;  %v10877_v9 = vor.u32 %v15312_v53, %v10876_v52  ;;  %v11173_v52 = vor.u32 %v15386_v46, %v11172_v41  ;;  %v11237_v53 = vor.u32 %v15402_v48, %v11236_v47  ;;  %v11165_v0 = vor.u32 %v15384_v58, %v11164_v56  ;;  %v15394_v41 = vld [vmem:[%s17079_s13 + $0x714] sm:$0xf0]  ;;  %v11068_v47 = vld [vmem:[%s17079_s13 + $0x600] sm:$0xf] }
  0xc0   : > { %8175 = vmatpush.bf16.msra.mxu3 %v11037_v13  ;;  %v1731_v13 = vunpack.c.l.b16 %v434_v62  ;;  %v17341_v26 = vpack.c.b16 %v1729_v8, %v1729_v8  ;;  %v15416_v62 = vld [vmem:[%s17079_s13 + $0x7c4] sm:$0xf0]  ;;  %v15382_v8 = vld [vmem:[%s17079_s13 + $0x6b4] sm:$0xf0]  ;;  %v435_v56 = vld [vmem:[%s17070_s27 + $0x30] sm:$0xff] }
  0xc1   : > { %8137 = vmatpush.bf16.msra.mxu0 %v10837_v19  ;;  %v11253_v19 = vor.u32 %v15406_v6, %v11252_v4  ;;  %v11156_v4 = vld [vmem:[%s17079_s13 + $0x6b0] sm:$0xf]  ;;  %v11293_v6 = vor.u32 %v15416_v62, %v11292_v61  ;;  %v15410_v46 = vld [vmem:[%s17079_s13 + $0x794] sm:$0xf0]  ;;  %v11260_v58 = vld [vmem:[%s17079_s13 + $0x780] sm:$0xf] }
  0xc2   : > { %8150 = vmatpush.bf16.msra.mxu1 %v10901_v20  ;;  %v11116_v20 = vld [vmem:[%s17079_s13 + $0x660] sm:$0xf]  ;;  %v17346_v30 = vpack.c.b16 %v1731_v13, %v1731_v13  ;;  %v11157_v14 = vor.u32 %v15382_v8, %v11156_v4  ;;  %v11380_v61 = vld [vmem:[%s17079_s13 + $0x870] sm:$0xf]  ;;  %v15438_v62 = vld [vmem:[%s17079_s13 + $0x874] sm:$0xf0]  ;;  %v1733_v4 = vunpack.c.l.b16 %v435_v56 }
  0xc3   : > { %8163 = vmatpush.bf16.msra.mxu2 %v10965_v23  ;;  %v15372_v23 = vld [vmem:[%s17079_s13 + $0x664] sm:$0xf0] }
  0xc4   : > { %8176 = vmatpush.bf16.msra.mxu3 %v11029_v27  ;;  %v15388_v27 = vld [vmem:[%s17079_s13 + $0x6e4] sm:$0xf0] }
  0xc5   : > { %8138 = vmatpush.bf16.msra.mxu0 %v10829_v33  ;;  %v15420_v33 = vld [vmem:[%s17079_s13 + $0x7e4] sm:$0xf0]  ;;  %v11181_v36 = vor.u32 %v15388_v27, %v11180_v24 }
  0xc6   : > { %8151 = vmatpush.bf16.msra.mxu1 %v10893_v34  ;;  %v17352_v34 = vpack.c.b16 %v1732_v17, %v1732_v17  ;;  %v11309_v44 = vor.u32 %v15420_v33, %v11308_v32  ;;  %v15364_v17 = vld [vmem:[%s17079_s13 + $0x624] sm:$0xf0]  ;;  %v11076_v33 = vld [vmem:[%s17079_s13 + $0x610] sm:$0xf] }
  0xc7   : > { %8164 = vmatpush.bf16.msra.mxu2 %v10957_v35  ;;  %v11117_v35 = vor.u32 %v15372_v23, %v11116_v20  ;;  %v15380_v20 = vld [vmem:[%s17079_s13 + $0x6a4] sm:$0xf0]  ;;  %v11212_v23 = vld [vmem:[%s17079_s13 + $0x720] sm:$0xf] }
  0xc8   : > { %8177 = vmatpush.bf16.msra.mxu3 %v11021_v40  ;;  %v15370_v40 = vld [vmem:[%s17079_s13 + $0x654] sm:$0xf0]  ;;  %v15396_v24 = vld [vmem:[%s17079_s13 + $0x724] sm:$0xf0] }
  0xc9   : > { %8139 = vmatpush.bf16.msra.mxu0 %v10821_v50  ;;  %v15418_v50 = vld [vmem:[%s17079_s13 + $0x7d4] sm:$0xf0]  ;;  %v11109_v51 = vor.u32 %v15370_v40, %v11108_v38  ;;  %v15412_v27 = vld [vmem:[%s17079_s13 + $0x7a4] sm:$0xf0]  ;;  %v11213_v32 = vor.u32 %v15396_v24, %v11212_v23  ;;  %v11204_v40 = vld [vmem:[%s17079_s13 + $0x710] sm:$0xf]  ;;  %v17419_v24 = vpack.c.b16 %v1733_v4, %v1733_v4 }
  0xca   : > { %8152 = vmatpush.bf16.msra.mxu1 %v10885_v54  ;;  %v11100_v54 = vld [vmem:[%s17079_s13 + $0x640] sm:$0xf]  ;;  %v11301_v57 = vor.u32 %v15418_v50, %v11300_v49  ;;  %v15378_v38 = vld [vmem:[%s17079_s13 + $0x694] sm:$0xf0]  ;;  %v15360_v49 = vld [vmem:[%s17079_s13 + $0x604] sm:$0xf0] }
  0xcb   : > { %8165 = vmatpush.bf16.msra.mxu2 %v10949_v55  ;;  %v15368_v55 = vld [vmem:[%s17079_s13 + $0x644] sm:$0xf0]  ;;  %v11132_v50 = vld [vmem:[%s17079_s13 + $0x680] sm:$0xf]  ;;  %v11348_v4 = vld [vmem:[%s17079_s13 + $0x830] sm:$0xf] }
  0xcc   : > { %8178 = vmatpush.bf16.msra.mxu3 %v11013_v59  ;;  %v11228_v59 = vld [vmem:[%s17079_s13 + $0x740] sm:$0xf]  ;;  %v11101_v63 = vor.u32 %v15368_v55, %v11100_v54  ;;  %v15392_v55 = vld [vmem:[%s17079_s13 + $0x704] sm:$0xf0] }
  0xcd   : > { %8140 = vmatpush.bf16.msra.mxu0 %v10813_v2  ;;  %v11229_v1 = vor.u32 %v15400_v60, %v11228_v59  ;;  %v11092_v2 = vld [vmem:[%s17079_s13 + $0x630] sm:$0xf]  ;;  %v11196_v54 = vld [vmem:[%s17079_s13 + $0x700] sm:$0xf]  ;;  %v15408_v59 = vld [vmem:[%s17079_s13 + $0x784] sm:$0xf0] }
  0xce   : > { %8153 = vmatpush.bf16.msra.mxu1 %v10877_v9  ;;  %v11220_v9 = vld [vmem:[%s17079_s13 + $0x730] sm:$0xf]  ;;  %v11093_v13 = vor.u32 %v15366_v3, %v11092_v2  ;;  %v436_v60 = vld [vmem:[%s17070_s27 + $0x38] sm:$0xff]  ;;  %v11197_v8 = vor.u32 %v15392_v55, %v11196_v54 }
  0xcf   : > { %8166 = vmatpush.bf16.msra.mxu2 %v10941_v10  ;;  %v15398_v10 = vld [vmem:[%s17079_s13 + $0x734] sm:$0xf0]  ;;  %v11508_v2 = vld [vmem:[%s17079_s13 + $0x970] sm:$0xf] }
  0xd0   : > { %8179 = vmatpush.bf16.msra.mxu3 %v11005_v15  ;;  %8141 = vmatmul.bf16.vlgmr.msra.gmra.mxu0 %v17341_v26  ;;  %v11221_v15 = vor.u32 %v15398_v10, %v11220_v9  ;;  %v15470_v3 = vld [vmem:[%s17079_s13 + $0x974] sm:$0xf0]  ;;  %v11572_v9 = vld [vmem:[%s17079_s13 + $0x9f0] sm:$0xf] }
  0xd1   : > { %8185 = vmatpush.bf16.msrb.mxu0 %v11125_v16  ;;  %8154 = vmatmul.bf16.vlgmr.msra.gmra.mxu1 %v17348_v31  ;;  %v11084_v16 = vld [vmem:[%s17079_s13 + $0x620] sm:$0xf]  ;;  %v15486_v10 = vld [vmem:[%s17079_s13 + $0x9f4] sm:$0xf0] }
  0xd2   : > { %8198 = vmatpush.bf16.msrb.mxu1 %v11189_v18  ;;  %8167 = vmatmul.bf16.vlgmr.msra.gmra.mxu2 %v17346_v30  ;;  %v11148_v18 = vld [vmem:[%s17079_s13 + $0x6a0] sm:$0xf]  ;;  %v11085_v28 = vor.u32 %v15364_v17, %v11084_v16  ;;  %v11509_v17 = vor.u32 %v15470_v3, %v11508_v2  ;;  %v11573_v23 = vor.u32 %v15486_v10, %v11572_v9  ;;  %v15446_v10 = vld [vmem:[%s17079_s13 + $0x8b4] sm:$0xf0] }
  0xd3   : > { %8211 = vmatpush.bf16.msrb.mxu2 %v11253_v19  ;;  %8180 = vmatmul.bf16.vlgmr.msra.gmra.mxu3 %v17352_v34  ;;  %v11285_v19 = vor.u32 %v15414_v12, %v11284_v11  ;;  %v11149_v29 = vor.u32 %v15380_v20, %v11148_v18  ;;  %v1735_v11 = vunpack.c.l.b16 %v436_v60  ;;  %v1734_v12 = vunpack.c.h.b16 %v435_v56  ;;  %v11372_v18 = vld [vmem:[%s17079_s13 + $0x860] sm:$0xf] }
  0xd4   : > { %8224 = vmatpush.bf16.msrb.mxu3 %v11317_v25  ;;  %v11276_v25 = vld [vmem:[%s17079_s13 + $0x7a0] sm:$0xf] }
  0xd5   : > { %8186 = vmatpush.bf16.msrb.mxu0 %v11117_v35  ;;  %v15362_v35 = vld [vmem:[%s17079_s13 + $0x614] sm:$0xf0]  ;;  %v11436_v20 = vld [vmem:[%s17079_s13 + $0x8e0] sm:$0xf] }
  0xd6   : > { %8199 = vmatpush.bf16.msrb.mxu1 %v11181_v36  ;;  %v11140_v36 = vld [vmem:[%s17079_s13 + $0x690] sm:$0xf]  ;;  %v11077_v48 = vor.u32 %v15362_v35, %v11076_v33  ;;  %v11564_v33 = vld [vmem:[%s17079_s13 + $0x9e0] sm:$0xf]  ;;  %v15484_v35 = vld [vmem:[%s17079_s13 + $0x9e4] sm:$0xf0] }
  0xd7   : > { %8212 = vmatpush.bf16.msrb.mxu2 %v11245_v37  ;;  %v11277_v37 = vor.u32 %v15412_v27, %v11276_v25  ;;  %v15452_v25 = vld [vmem:[%s17079_s13 + $0x8e4] sm:$0xf0]  ;;  %v11500_v27 = vld [vmem:[%s17079_s13 + $0x960] sm:$0xf] }
  0xd8   : > { %8225 = vmatpush.bf16.msrb.mxu3 %v11309_v44  ;;  %v11268_v44 = vld [vmem:[%s17079_s13 + $0x790] sm:$0xf]  ;;  %v11356_v56 = vld [vmem:[%s17079_s13 + $0x840] sm:$0xf] }
  0xd9   : > { %8187 = vmatpush.bf16.msrb.mxu0 %v11109_v51  ;;  %v15376_v51 = vld [vmem:[%s17079_s13 + $0x684] sm:$0xf0] }
  0xda   : > { %8200 = vmatpush.bf16.msrb.mxu1 %v11173_v52  ;;  %v11141_v52 = vor.u32 %v15378_v38, %v11140_v36  ;;  %v11437_v38 = vor.u32 %v15452_v25, %v11436_v20  ;;  %v11404_v20 = vld [vmem:[%s17079_s13 + $0x8a0] sm:$0xf]  ;;  %v15444_v25 = vld [vmem:[%s17079_s13 + $0x8a4] sm:$0xf0] }
  0xdb   : > { %8213 = vmatpush.bf16.msrb.mxu2 %v11237_v53  ;;  %v11205_v53 = vor.u32 %v15394_v41, %v11204_v40  ;;  %v11364_v41 = vld [vmem:[%s17079_s13 + $0x850] sm:$0xf] }
  0xdc   : > { %8226 = vmatpush.bf16.msrb.mxu3 %v11301_v57  ;;  %v11269_v57 = vor.u32 %v15410_v46, %v11268_v44  ;;  %v15434_v44 = vld [vmem:[%s17079_s13 + $0x854] sm:$0xf0]  ;;  %v11428_v46 = vld [vmem:[%s17079_s13 + $0x8d0] sm:$0xf] }
  0xdd   : > { %8188 = vmatpush.bf16.msrb.mxu0 %v11101_v63  ;;  %v11444_v63 = vld [vmem:[%s17079_s13 + $0x8f0] sm:$0xf] }
  0xde   : > { %8201 = vmatpush.bf16.msrb.mxu1 %v11165_v0  ;;  %v11069_v0 = vor.u32 %v15360_v49, %v11068_v47  ;;  %v11565_v47 = vor.u32 %v15484_v35, %v11564_v33  ;;  %v11492_v49 = vld [vmem:[%s17079_s13 + $0x950] sm:$0xf]  ;;  %v11532_v33 = vld [vmem:[%s17079_s13 + $0x9a0] sm:$0xf]  ;;  %v15476_v35 = vld [vmem:[%s17079_s13 + $0x9a4] sm:$0xf0] }
  0xdf   : > { %8214 = vmatpush.bf16.msrb.mxu2 %v11229_v1  ;;  %v15454_v1 = vld [vmem:[%s17079_s13 + $0x8f4] sm:$0xf0] }
  0xe0   : > { %8227 = vmatpush.bf16.msrb.mxu3 %v11293_v6  ;;  %v11133_v6 = vor.u32 %v15376_v51, %v11132_v50  ;;  %v11445_v16 = vor.u32 %v15454_v1, %v11444_v63  ;;  %v15466_v50 = vld [vmem:[%s17079_s13 + $0x954] sm:$0xf0]  ;;  %v11556_v51 = vld [vmem:[%s17079_s13 + $0x9d0] sm:$0xf]  ;;  %v11548_v63 = vld [vmem:[%s17079_s13 + $0x9c0] sm:$0xf] }
  0xe1   : > { %8189 = vmatpush.bf16.msrb.mxu0 %v11093_v13  ;;  %v11261_v13 = vor.u32 %v15408_v59, %v11260_v58  ;;  %v11493_v55 = vor.u32 %v15466_v50, %v11492_v49  ;;  %v11420_v58 = vld [vmem:[%s17079_s13 + $0x8c0] sm:$0xf]  ;;  %v11460_v49 = vld [vmem:[%s17079_s13 + $0x910] sm:$0xf]  ;;  %v15458_v50 = vld [vmem:[%s17079_s13 + $0x914] sm:$0xf0] }
  0xe2   : > { %8202 = vmatpush.bf16.msrb.mxu1 %v11157_v14  ;;  %v11381_v14 = vor.u32 %v15438_v62, %v11380_v61  ;;  %v11484_v61 = vld [vmem:[%s17079_s13 + $0x940] sm:$0xf]  ;;  %v15464_v62 = vld [vmem:[%s17079_s13 + $0x944] sm:$0xf0] }
  0xe3   : > { %8215 = vmatpush.bf16.msrb.mxu2 %v11221_v15  ;;  %v1736_v15 = vunpack.c.h.b16 %v436_v60  ;;  %v15448_v60 = vld [vmem:[%s17079_s13 + $0x8c4] sm:$0xf0]  ;;  %v11485_v3 = vor.u32 %v15464_v62, %v11484_v61  ;;  %v437_v62 = vld [vmem:[%s17070_s27 + $0x40] sm:$0xff] }
  0xe4   : > { %8228 = vmatpush.bf16.msrb.mxu3 %v11285_v19  ;;  %v15436_v19 = vld [vmem:[%s17079_s13 + $0x864] sm:$0xf0]  ;;  %v11421_v2 = vor.u32 %v15448_v60, %v11420_v58  ;;  %v11452_v60 = vld [vmem:[%s17079_s13 + $0x900] sm:$0xf] }
  0xe5   : > { %8190 = vmatpush.bf16.msrb.mxu0 %v11085_v28  ;;  %v15468_v28 = vld [vmem:[%s17079_s13 + $0x964] sm:$0xf0]  ;;  %v17430_v36 = vpack.c.b16 %v1736_v15, %v1736_v15 }
  0xe6   : > { %8203 = vmatpush.bf16.msrb.mxu1 %v11149_v29  ;;  %v17424_v29 = vpack.c.b16 %v1735_v11, %v1735_v11  ;;  %v11501_v40 = vor.u32 %v15468_v28, %v11500_v27  ;;  %v11476_v11 = vld [vmem:[%s17079_s13 + $0x930] sm:$0xf]  ;;  %v11468_v27 = vld [vmem:[%s17079_s13 + $0x920] sm:$0xf]  ;;  %v15460_v28 = vld [vmem:[%s17079_s13 + $0x924] sm:$0xf0] }
  0xe7   : > { %8216 = vmatpush.bf16.msrb.mxu2 %v11213_v32  ;;  %v17426_v32 = vpack.c.b16 %v1734_v12, %v1734_v12  ;;  %v15462_v12 = vld [vmem:[%s17079_s13 + $0x934] sm:$0xf0]  ;;  %v15456_v61 = vld [vmem:[%s17079_s13 + $0x904] sm:$0xf0] }
  0xe8   : > { %8229 = vmatpush.bf16.msrb.mxu3 %v11277_v37  ;;  %v11373_v37 = vor.u32 %v15436_v19, %v11372_v18  ;;  %v11340_v18 = vld [vmem:[%s17079_s13 + $0x820] sm:$0xf]  ;;  %v15428_v19 = vld [vmem:[%s17079_s13 + $0x824] sm:$0xf0] }
  0xe9   : > { %8191 = vmatpush.bf16.msrb.mxu0 %v11077_v48  ;;  %v15450_v48 = vld [vmem:[%s17079_s13 + $0x8d4] sm:$0xf0] }
  0xea   : > { %8204 = vmatpush.bf16.msrb.mxu1 %v11141_v52  ;;  %v15482_v52 = vld [vmem:[%s17079_s13 + $0x9d4] sm:$0xf0]  ;;  %v11429_v54 = vor.u32 %v15450_v48, %v11428_v46  ;;  %v11396_v46 = vld [vmem:[%s17079_s13 + $0x890] sm:$0xf] }
  0xeb   : > { %8217 = vmatpush.bf16.msrb.mxu2 %v11205_v53  ;;  %v11365_v53 = vor.u32 %v15434_v44, %v11364_v41  ;;  %v11557_v59 = vor.u32 %v15482_v52, %v11556_v51  ;;  %v11332_v41 = vld [vmem:[%s17079_s13 + $0x810] sm:$0xf]  ;;  %v15426_v44 = vld [vmem:[%s17079_s13 + $0x814] sm:$0xf0] }
  0xec   : > { %8230 = vmatpush.bf16.msrb.mxu3 %v11269_v57  ;;  %v15432_v57 = vld [vmem:[%s17079_s13 + $0x844] sm:$0xf0]  ;;  %v15442_v48 = vld [vmem:[%s17079_s13 + $0x894] sm:$0xf0]  ;;  %v11524_v51 = vld [vmem:[%s17079_s13 + $0x990] sm:$0xf] }
  0xed   : > { %8192 = vmatpush.bf16.msrb.mxu0 %v11069_v0  ;;  %v15480_v0 = vld [vmem:[%s17079_s13 + $0x9c4] sm:$0xf0]  ;;  %v11357_v1 = vor.u32 %v15432_v57, %v11356_v56  ;;  %v15474_v52 = vld [vmem:[%s17079_s13 + $0x994] sm:$0xf0]  ;;  %v11388_v56 = vld [vmem:[%s17079_s13 + $0x880] sm:$0xf]  ;;  %v11397_v58 = vor.u32 %v15442_v48, %v11396_v46 }
  0xee   : > { %8205 = vmatpush.bf16.msrb.mxu1 %v11133_v6  ;;  %v15430_v6 = vld [vmem:[%s17079_s13 + $0x834] sm:$0xf0]  ;;  %v11549_v9 = vor.u32 %v15480_v0, %v11548_v63  ;;  %v15440_v57 = vld [vmem:[%s17079_s13 + $0x884] sm:$0xf0]  ;;  %v11525_v63 = vor.u32 %v15474_v52, %v11524_v51  ;;  %v11516_v0 = vld [vmem:[%s17079_s13 + $0x980] sm:$0xf] }
  0xef   : > { %8218 = vmatpush.bf16.msrb.mxu2 %v11197_v8  ;;  %v11412_v8 = vld [vmem:[%s17079_s13 + $0x8b0] sm:$0xf]  ;;  %v11349_v15 = vor.u32 %v15430_v6, %v11348_v4  ;;  %v15502_v4 = vld [vmem:[%s17079_s13 + $0xa74] sm:$0xf0]  ;;  %v11820_v48 = vld [vmem:[%s17079_s13 + $0xbe0] sm:$0xf] }
  0xf0   : > { %8231 = vmatpush.bf16.msrb.mxu3 %v11261_v13  ;;  %8193 = vmatmul.bf16.vlgmr.msrb.gmra.mxu0 %v17419_v24  ;;  %v11540_v13 = vld [vmem:[%s17079_s13 + $0x9b0] sm:$0xf] }
  0xf1   : > { %8237 = vmatpush.bf16.msra.mxu0 %v11381_v14  ;;  %8206 = vmatmul.bf16.vlgmr.msrb.gmra.mxu1 %v17426_v32  ;;  %v15478_v14 = vld [vmem:[%s17079_s13 + $0x9b4] sm:$0xf0]  ;;  %v11700_v6 = vld [vmem:[%s17079_s13 + $0xaf0] sm:$0xf] }
  0xf2   : > { %8250 = vmatpush.bf16.msra.mxu1 %v11445_v16  ;;  %8219 = vmatmul.bf16.vlgmr.msrb.gmra.mxu2 %v17424_v29  ;;  %v11413_v16 = vor.u32 %v15446_v10, %v11412_v8  ;;  %v11764_v10 = vld [vmem:[%s17079_s13 + $0xb70] sm:$0xf] }
  0xf3   : > { %8263 = vmatpush.bf16.msra.mxu2 %v11509_v17  ;;  %8232 = vmatmul.bf16.vlgmr.msrb.gmra.mxu3 %v17430_v36  ;;  %v11477_v17 = vor.u32 %v15462_v12, %v11476_v11  ;;  %v15534_v11 = vld [vmem:[%s17079_s13 + $0xb74] sm:$0xf0]  ;;  %v1737_v12 = vunpack.c.l.b16 %v437_v62 }
  0xf4   : > { %8276 = vmatpush.bf16.msra.mxu3 %v11573_v23  ;;  %v11541_v23 = vor.u32 %v15478_v14, %v11540_v13  ;;  %v11389_v13 = vor.u32 %v15440_v57, %v11388_v56  ;;  %v11453_v14 = vor.u32 %v15456_v61, %v11452_v60  ;;  %v11684_v56 = vld [vmem:[%s17079_s13 + $0xad0] sm:$0xf]  ;;  %v15530_v60 = vld [vmem:[%s17079_s13 + $0xb54] sm:$0xf0] }
  0xf5   : > { %8238 = vmatpush.bf16.msra.mxu0 %v11373_v37  ;;  %v11341_v37 = vor.u32 %v15428_v19, %v11340_v18  ;;  %v1738_v18 = vunpack.c.h.b16 %v437_v62  ;;  %v11812_v61 = vld [vmem:[%s17079_s13 + $0xbd0] sm:$0xf]  ;;  %v15546_v62 = vld [vmem:[%s17079_s13 + $0xbd4] sm:$0xf0] }
  0xf6   : > { %8251 = vmatpush.bf16.msra.mxu1 %v11437_v38  ;;  %v11405_v38 = vor.u32 %v15444_v25, %v11404_v20 }
  0xf7   : > { %8264 = vmatpush.bf16.msra.mxu2 %v11501_v40  ;;  %v11469_v40 = vor.u32 %v15460_v28, %v11468_v27  ;;  %v11765_v27 = vor.u32 %v15534_v11, %v11764_v10  ;;  %v11628_v28 = vld [vmem:[%s17079_s13 + $0xa60] sm:$0xf]  ;;  %v15528_v10 = vld [vmem:[%s17079_s13 + $0xb44] sm:$0xf0] }
  0xf8   : > { %8277 = vmatpush.bf16.msra.mxu3 %v11565_v47  ;;  %v11533_v47 = vor.u32 %v15476_v35, %v11532_v33  ;;  %v15500_v33 = vld [vmem:[%s17079_s13 + $0xa64] sm:$0xf0]  ;;  %v11692_v35 = vld [vmem:[%s17079_s13 + $0xae0] sm:$0xf] }
  0xf9   : > { %8239 = vmatpush.bf16.msra.mxu0 %v11365_v53  ;;  %v11324_v53 = vld [vmem:[%s17079_s13 + $0x800] sm:$0xf]  ;;  %v11629_v51 = vor.u32 %v15500_v33, %v11628_v28  ;;  %v15542_v28 = vld [vmem:[%s17079_s13 + $0xbb4] sm:$0xf0] }
  0xfa   : > { %8252 = vmatpush.bf16.msra.mxu1 %v11429_v54  ;;  %v11333_v54 = vor.u32 %v15426_v44, %v11332_v41  ;;  %v11756_v41 = vld [vmem:[%s17079_s13 + $0xb60] sm:$0xf]  ;;  %v15532_v44 = vld [vmem:[%s17079_s13 + $0xb64] sm:$0xf0] }
  0xfb   : > { %8265 = vmatpush.bf16.msra.mxu2 %v11493_v55  ;;  %v15424_v55 = vld [vmem:[%s17079_s13 + $0x804] sm:$0xf0]  ;;  %v11804_v11 = vld [vmem:[%s17079_s13 + $0xbc0] sm:$0xf] }
  0xfc   : > { %8278 = vmatpush.bf16.msra.mxu3 %v11557_v59  ;;  %v11461_v59 = vor.u32 %v15458_v50, %v11460_v49  ;;  %v11325_v8 = vor.u32 %v15424_v55, %v11324_v53  ;;  %v15548_v49 = vld [vmem:[%s17079_s13 + $0xbe4] sm:$0xf0]  ;;  %v11757_v53 = vor.u32 %v15532_v44, %v11756_v41  ;;  %v15498_v55 = vld [vmem:[%s17079_s13 + $0xa54] sm:$0xf0]  ;;  %v11660_v44 = vld [vmem:[%s17079_s13 + $0xaa0] sm:$0xf] }
  0xfd   : > { %8240 = vmatpush.bf16.msra.mxu0 %v11357_v1  ;;  %v15472_v1 = vld [vmem:[%s17079_s13 + $0x984] sm:$0xf0]  ;;  %v11821_v57 = vor.u32 %v15548_v49, %v11820_v48 }
  0xfe   : > { %8253 = vmatpush.bf16.msra.mxu1 %v11421_v2  ;;  %v438_v2 = vld [vmem:[%s17070_s27 + $0x48] sm:$0xff]  ;;  %v11517_v19 = vor.u32 %v15472_v1, %v11516_v0 }
  0xff   : > { %8266 = vmatpush.bf16.msra.mxu2 %v11485_v3  ;;  %v11636_v3 = vld [vmem:[%s17079_s13 + $0xa70] sm:$0xf]  ;;  %v15492_v41 = vld [vmem:[%s17079_s13 + $0xa24] sm:$0xf0] }
 0x100   : > { %8279 = vmatpush.bf16.msra.mxu3 %v11549_v9  ;;  %v15518_v9 = vld [vmem:[%s17079_s13 + $0xaf4] sm:$0xf0]  ;;  %v11637_v20 = vor.u32 %v15502_v4, %v11636_v3  ;;  %v15496_v3 = vld [vmem:[%s17079_s13 + $0xa44] sm:$0xf0]  ;;  %v11676_v4 = vld [vmem:[%s17079_s13 + $0xac0] sm:$0xf] }
 0x101   : > { %8241 = vmatpush.bf16.msra.mxu0 %v11349_v15  ;;  %v11828_v15 = vld [vmem:[%s17079_s13 + $0xbf0] sm:$0xf]  ;;  %v11701_v25 = vor.u32 %v15518_v9, %v11700_v6  ;;  %v11813_v6 = vor.u32 %v15546_v62, %v11812_v61  ;;  %v11740_v9 = vld [vmem:[%s17079_s13 + $0xb40] sm:$0xf]  ;;  %v15508_v49 = vld [vmem:[%s17079_s13 + $0xaa4] sm:$0xf0] }
 0x102   : > { %8254 = vmatpush.bf16.msra.mxu1 %v11413_v16  ;;  %v15550_v16 = vld [vmem:[%s17079_s13 + $0xbf4] sm:$0xf0]  ;;  %v11652_v62 = vld [vmem:[%s17079_s13 + $0xa90] sm:$0xf] }
 0x103   : > { %8267 = vmatpush.bf16.msra.mxu2 %v11477_v17  ;;  %v1739_v17 = vunpack.c.l.b16 %v438_v2  ;;  %v15490_v61 = vld [vmem:[%s17079_s13 + $0xa14] sm:$0xf0] }
 0x104   : > { %8280 = vmatpush.bf16.msra.mxu3 %v11541_v23  ;;  %v1740_v23 = vunpack.c.h.b16 %v438_v2  ;;  %v11612_v2 = vld [vmem:[%s17079_s13 + $0xa40] sm:$0xf] }
 0x105   : > { %8242 = vmatpush.bf16.msra.mxu0 %v11341_v37  ;;  %v11829_v37 = vor.u32 %v15550_v16, %v11828_v15  ;;  %v17502_v46 = vpack.c.b16 %v1739_v17, %v1739_v17  ;;  %v11741_v15 = vor.u32 %v15528_v10, %v11740_v9  ;;  %v11604_v16 = vld [vmem:[%s17079_s13 + $0xa30] sm:$0xf]  ;;  %v15494_v17 = vld [vmem:[%s17079_s13 + $0xa34] sm:$0xf0]  ;;  %v11580_v10 = vld [vmem:[%s17079_s13 + $0xa00] sm:$0xf] }
 0x106   : > { %8255 = vmatpush.bf16.msra.mxu1 %v11405_v38  ;;  %v17497_v38 = vpack.c.b16 %v1737_v12, %v1737_v12  ;;  %v17508_v50 = vpack.c.b16 %v1740_v23, %v1740_v23  ;;  %v15544_v12 = vld [vmem:[%s17079_s13 + $0xbc4] sm:$0xf0]  ;;  %v11732_v23 = vld [vmem:[%s17079_s13 + $0xb30] sm:$0xf]  ;;  %v11605_v33 = vor.u32 %v15494_v17, %v11604_v16  ;;  %v15538_v9 = vld [vmem:[%s17079_s13 + $0xb94] sm:$0xf0] }
 0x107   : > { %8268 = vmatpush.bf16.msra.mxu2 %v11469_v40  ;;  %v15516_v40 = vld [vmem:[%s17079_s13 + $0xae4] sm:$0xf0] }
 0x108   : > { %8281 = vmatpush.bf16.msra.mxu3 %v11533_v47  ;;  %v17504_v47 = vpack.c.b16 %v1738_v18, %v1738_v18  ;;  %v11693_v52 = vor.u32 %v15516_v40, %v11692_v35  ;;  %v11668_v18 = vld [vmem:[%s17079_s13 + $0xab0] sm:$0xf]  ;;  %v11596_v40 = vld [vmem:[%s17079_s13 + $0xa20] sm:$0xf] }
 0x109   : > { %8243 = vmatpush.bf16.msra.mxu0 %v11333_v54  ;;  %v11620_v54 = vld [vmem:[%s17079_s13 + $0xa50] sm:$0xf] }
 0x10a   : > { %8256 = vmatpush.bf16.msra.mxu1 %v11397_v58  ;;  %v15514_v58 = vld [vmem:[%s17079_s13 + $0xad4] sm:$0xf0] }
 0x10b   : > { %8269 = vmatpush.bf16.msra.mxu2 %v11461_v59  ;;  %v11748_v59 = vld [vmem:[%s17079_s13 + $0xb50] sm:$0xf]  ;;  %v11685_v0 = vor.u32 %v15514_v58, %v11684_v56  ;;  %v11597_v56 = vor.u32 %v15492_v41, %v11596_v40  ;;  %v11661_v58 = vor.u32 %v15508_v49, %v11660_v44 }
 0x10c   : > { %8282 = vmatpush.bf16.msra.mxu3 %v11525_v63  ;;  %v11621_v63 = vor.u32 %v15498_v55, %v11620_v54  ;;  %v11749_v1 = vor.u32 %v15530_v60, %v11748_v59  ;;  %v15540_v54 = vld [vmem:[%s17079_s13 + $0xba4] sm:$0xf0]  ;;  %v11588_v60 = vld [vmem:[%s17079_s13 + $0xa10] sm:$0xf] }
 0x10d   : > { %8244 = vmatpush.bf16.msra.mxu0 %v11325_v8  ;;  %v15512_v8 = vld [vmem:[%s17079_s13 + $0xac4] sm:$0xf0]  ;;  %v11956_v40 = vld [vmem:[%s17079_s13 + $0xcf0] sm:$0xf] }
 0x10e   : > { %8257 = vmatpush.bf16.msra.mxu1 %v11389_v13  ;;  %v11613_v13 = vor.u32 %v15496_v3, %v11612_v2  ;;  %v15506_v2 = vld [vmem:[%s17079_s13 + $0xa94] sm:$0xf0]  ;;  %v11716_v3 = vld [vmem:[%s17079_s13 + $0xb10] sm:$0xf] }
 0x10f   : > { %8270 = vmatpush.bf16.msra.mxu2 %v11453_v14  ;;  %v11677_v14 = vor.u32 %v15512_v8, %v11676_v4  ;;  %v15522_v4 = vld [vmem:[%s17079_s13 + $0xb14] sm:$0xf0]  ;;  %v11780_v8 = vld [vmem:[%s17079_s13 + $0xb90] sm:$0xf]  ;;  %v11653_v16 = vor.u32 %v15506_v2, %v11652_v62 }
 0x110   : > { %8283 = vmatpush.bf16.msra.mxu3 %v11517_v19  ;;  %8245 = vmatmul.bf16.vlgmr.msra.gmra.mxu0 %v17497_v38  ;;  %v11805_v19 = vor.u32 %v15544_v12, %v11804_v11  ;;  %v11589_v12 = vor.u32 %v15490_v61, %v11588_v60  ;;  %v11717_v17 = vor.u32 %v15522_v4, %v11716_v3  ;;  %v12020_v49 = vld [vmem:[%s17079_s13 + $0xd70] sm:$0xf]  ;;  %v11884_v3 = vld [vmem:[%s17079_s13 + $0xc60] sm:$0xf]  ;;  %v15564_v4 = vld [vmem:[%s17079_s13 + $0xc64] sm:$0xf0] }
 0x111   : > { %8289 = vmatpush.bf16.msrb.mxu0 %v11637_v20  ;;  %8258 = vmatmul.bf16.vlgmr.msra.gmra.mxu1 %v17504_v47  ;;  %v15510_v20 = vld [vmem:[%s17079_s13 + $0xab4] sm:$0xf0]  ;;  %v8038_v55 = vpop.f32.mrf.mxu0 }
 0x112   : > { %8302 = vmatpush.bf16.msrb.mxu1 %v11701_v25  ;;  %8271 = vmatmul.bf16.vlgmr.msra.gmra.mxu2 %v17502_v46  ;;  %v15526_v25 = vld [vmem:[%s17079_s13 + $0xb34] sm:$0xf0]  ;;  %v11669_v35 = vor.u32 %v15510_v20, %v11668_v18  ;;  %v11708_v18 = vld [vmem:[%s17079_s13 + $0xb00] sm:$0xf] }
 0x113   : > { %8315 = vmatpush.bf16.msrb.mxu2 %v11765_v27  ;;  %8284 = vmatmul.bf16.vlgmr.msra.gmra.mxu3 %v17508_v50  ;;  %v11796_v27 = vld [vmem:[%s17079_s13 + $0xbb0] sm:$0xf] }
 0x114   : > { %8328 = vmatpush.bf16.msrb.mxu3 %v11829_v37  ;;  %v11733_v37 = vor.u32 %v15526_v25, %v11732_v23  ;;  %v11797_v48 = vor.u32 %v15542_v28, %v11796_v27  ;;  %v439_v20 = vld [vmem:[%s17070_s27 + $0x50] sm:$0xff]  ;;  %v11781_v25 = vor.u32 %v15538_v9, %v11780_v8  ;;  %v15536_v28 = vld [vmem:[%s17079_s13 + $0xb84] sm:$0xf0] }
 0x115   : > { %8290 = vmatpush.bf16.msrb.mxu0 %v11629_v51  ;;  %v11724_v51 = vld [vmem:[%s17079_s13 + $0xb20] sm:$0xf] }
 0x116   : > { %8303 = vmatpush.bf16.msrb.mxu1 %v11693_v52  ;;  %v15524_v52 = vld [vmem:[%s17079_s13 + $0xb24] sm:$0xf0]  ;;  %v11772_v27 = vld [vmem:[%s17079_s13 + $0xb80] sm:$0xf] }
 0x117   : > { %8316 = vmatpush.bf16.msrb.mxu2 %v11757_v53  ;;  %v11788_v53 = vld [vmem:[%s17079_s13 + $0xba0] sm:$0xf]  ;;  %v11725_v59 = vor.u32 %v15524_v52, %v11724_v51  ;;  %v15598_v51 = vld [vmem:[%s17079_s13 + $0xd74] sm:$0xf0]  ;;  %v1741_v52 = vunpack.c.l.b16 %v439_v20  ;;  %v11773_v61 = vor.u32 %v15536_v28, %v11772_v27  ;;  %v11940_v28 = vld [vmem:[%s17079_s13 + $0xcd0] sm:$0xf] }
 0x118   : > { %8329 = vmatpush.bf16.msrb.mxu3 %v11821_v57  ;;  %v8051_v57 = vpop.f32.mrf.mxu1  ;;  %v12021_v2 = vor.u32 %v15598_v51, %v12020_v49  ;;  %v15562_v27 = vld [vmem:[%s17079_s13 + $0xc54] sm:$0xf0] }
 0x119   : > { %8291 = vmatpush.bf16.msrb.mxu0 %v11621_v63  ;;  %v8052_v63 = vadd.f32 %v8051_v57, %v8038_v55  ;;  %v8040_v41 = vpop.f32.mrf.mxu0  ;;  %v15614_v57 = vld [vmem:[%s17079_s13 + $0xdf4] sm:$0xf0]  ;;  %v17577_v9 = vpack.c.b16 %v1741_v52, %v1741_v52  ;;  %v11868_v52 = vld [vmem:[%s17079_s13 + $0xc40] sm:$0xf] }
 0x11a   : > { %8304 = vmatpush.bf16.msrb.mxu1 %v11685_v0  ;;  %v8064_v0 = vpop.f32.mrf.mxu2  ;;  %v12068_v41 = vld [vmem:[%s17079_s13 + $0xdd0] sm:$0xf] }
 0x11b   : > { %8317 = vmatpush.bf16.msrb.mxu2 %v11749_v1  ;;  %v11789_v1 = vor.u32 %v15540_v54, %v11788_v53  ;;  %v8065_v11 = vadd.f32 %v8064_v0, %v8052_v63 }
 0x11c   : > { %8330 = vmatpush.bf16.msrb.mxu3 %v11813_v6  ;;  %v8077_v6 = vpop.f32.mrf.mxu3 }
 0x11d   : > { %8292 = vmatpush.bf16.msrb.mxu0 %v11613_v13  ;;  %v15488_v13 = vld [vmem:[%s17079_s13 + $0xa04] sm:$0xf0]  ;;  %v17561_v23 = vadd.f32 %v8077_v6, %v8065_v11  ;;  %v11948_v6 = vld [vmem:[%s17079_s13 + $0xce0] sm:$0xf] }
 0x11e   : > { %8305 = vmatpush.bf16.msrb.mxu1 %v11677_v14  ;;  %v11644_v14 = vld [vmem:[%s17079_s13 + $0xa80] sm:$0xf]  ;;  %v11581_v44 = vor.u32 %v15488_v13, %v11580_v10  ;;  %v15580_v10 = vld [vmem:[%s17079_s13 + $0xce4] sm:$0xf0] }
 0x11f   : > { %8318 = vmatpush.bf16.msrb.mxu2 %v11741_v15  ;;  %v15504_v15 = vld [vmem:[%s17079_s13 + $0xa84] sm:$0xf0]  ;;  %v12012_v11 = vld [vmem:[%s17079_s13 + $0xd60] sm:$0xf] }
 0x120   : > { %8331 = vmatpush.bf16.msrb.mxu3 %v11805_v19  ;;  %v15520_v19 = vld [vmem:[%s17079_s13 + $0xb04] sm:$0xf0]  ;;  %v8053_v53 = vpop.f32.mrf.mxu1  ;;  %v11645_v54 = vor.u32 %v15504_v15, %v11644_v14  ;;  %v12076_v15 = vld [vmem:[%s17079_s13 + $0xde0] sm:$0xf] }
 0x121   : > { %8293 = vmatpush.bf16.msrb.mxu0 %v11605_v33  ;;  %v440_v33 = vld [vmem:[%s17070_s27 + $0x58] sm:$0xff]  ;;  %v11709_v55 = vor.u32 %v15520_v19, %v11708_v18  ;;  %v11885_v18 = vor.u32 %v15564_v4, %v11884_v3  ;;  %v11949_v19 = vor.u32 %v15580_v10, %v11948_v6  ;;  %v11924_v3 = vld [vmem:[%s17079_s13 + $0xcb0] sm:$0xf] }
 0x122   : > { %8306 = vmatpush.bf16.msrb.mxu1 %v11669_v35  ;;  %v11892_v35 = vld [vmem:[%s17079_s13 + $0xc70] sm:$0xf]  ;;  %v8066_v60 = vpop.f32.mrf.mxu2  ;;  %v1744_v63 = vunpack.c.h.b16 %v440_v33  ;;  %v15560_v53 = vld [vmem:[%s17079_s13 + $0xc44] sm:$0xf0]  ;;  %v15574_v10 = vld [vmem:[%s17079_s13 + $0xcb4] sm:$0xf0] }
 0x123   : > { %8319 = vmatpush.bf16.msrb.mxu2 %v11733_v37  ;;  %v15566_v37 = vld [vmem:[%s17079_s13 + $0xc74] sm:$0xf0]  ;;  %v15608_v60 = vld [vmem:[%s17079_s13 + $0xdc4] sm:$0xf0] }
 0x124   : > { %8332 = vmatpush.bf16.msrb.mxu3 %v11797_v48  ;;  %v15582_v48 = vld [vmem:[%s17079_s13 + $0xcf4] sm:$0xf0]  ;;  %v11893_v62 = vor.u32 %v15566_v37, %v11892_v35  ;;  %v8079_v0 = vpop.f32.mrf.mxu3  ;;  %v12004_v37 = vld [vmem:[%s17079_s13 + $0xd50] sm:$0xf] }
 0x125   : > { %8294 = vmatpush.bf16.msrb.mxu0 %v11597_v56  ;;  %v12084_v56 = vld [vmem:[%s17079_s13 + $0xdf0] sm:$0xf]  ;;  %v15578_v35 = vld [vmem:[%s17079_s13 + $0xcd4] sm:$0xf0] }
 0x126   : > { %8307 = vmatpush.bf16.msrb.mxu1 %v11661_v58  ;;  %v1743_v58 = vunpack.c.l.b16 %v440_v33  ;;  %v12085_v8 = vor.u32 %v15614_v57, %v12084_v56  ;;  %v11941_v49 = vor.u32 %v15578_v35, %v11940_v28  ;;  %v15576_v56 = vld [vmem:[%s17079_s13 + $0xcc4] sm:$0xf0]  ;;  %v11996_v57 = vld [vmem:[%s17079_s13 + $0xd40] sm:$0xf] }
 0x127   : > { %8320 = vmatpush.bf16.msrb.mxu2 %v11725_v59  ;;  %v1742_v59 = vunpack.c.h.b16 %v439_v20  ;;  %v11916_v28 = vld [vmem:[%s17079_s13 + $0xca0] sm:$0xf] }
 0x128   : > { %8333 = vmatpush.bf16.msrb.mxu3 %v11789_v1  ;;  %v11957_v1 = vor.u32 %v15582_v48, %v11956_v40  ;;  %v17582_v13 = vpack.c.b16 %v1743_v58, %v1743_v58  ;;  %v15594_v40 = vld [vmem:[%s17079_s13 + $0xd54] sm:$0xf0]  ;;  %v15592_v58 = vld [vmem:[%s17079_s13 + $0xd44] sm:$0xf0] }
 0x129   : > { %8295 = vmatpush.bf16.msrb.mxu0 %v11589_v12  ;;  %v15596_v12 = vld [vmem:[%s17079_s13 + $0xd64] sm:$0xf0]  ;;  %v17584_v14 = vpack.c.b16 %v1742_v59, %v1742_v59  ;;  %v12005_v51 = vor.u32 %v15594_v40, %v12004_v37  ;;  %v12060_v59 = vld [vmem:[%s17079_s13 + $0xdc0] sm:$0xf]  ;;  %v11997_v0 = vor.u32 %v15592_v58, %v11996_v57  ;;  %v11844_v57 = vld [vmem:[%s17079_s13 + $0xc10] sm:$0xf] }
 0x12a   : > { %8308 = vmatpush.bf16.msrb.mxu1 %v11653_v16  ;;  %v15612_v16 = vld [vmem:[%s17079_s13 + $0xde4] sm:$0xf0]  ;;  %v12013_v20 = vor.u32 %v15596_v12, %v12012_v11  ;;  %v11988_v11 = vld [vmem:[%s17079_s13 + $0xd30] sm:$0xf]  ;;  %v15590_v12 = vld [vmem:[%s17079_s13 + $0xd34] sm:$0xf0] }
 0x12b   : > { %8321 = vmatpush.bf16.msrb.mxu2 %v11717_v17  ;;  %v17588_v17 = vpack.c.b16 %v1744_v63, %v1744_v63  ;;  %v12077_v33 = vor.u32 %v15612_v16, %v12076_v15  ;;  %v12052_v15 = vld [vmem:[%s17079_s13 + $0xdb0] sm:$0xf]  ;;  %v15606_v16 = vld [vmem:[%s17079_s13 + $0xdb4] sm:$0xf0]  ;;  %v15572_v37 = vld [vmem:[%s17079_s13 + $0xca4] sm:$0xf0] }
 0x12c   : > { %8334 = vmatpush.bf16.msrb.mxu3 %v11781_v25  ;;  %v11876_v25 = vld [vmem:[%s17079_s13 + $0xc50] sm:$0xf]  ;;  %v12053_v35 = vor.u32 %v15606_v16, %v12052_v15  ;;  %v11980_v40 = vld [vmem:[%s17079_s13 + $0xd20] sm:$0xf]  ;;  %v15554_v58 = vld [vmem:[%s17079_s13 + $0xc14] sm:$0xf0] }
 0x12d   : > { %8296 = vmatpush.bf16.msrb.mxu0 %v11581_v44  ;;  %v15610_v44 = vld [vmem:[%s17079_s13 + $0xdd4] sm:$0xf0]  ;;  %v11877_v48 = vor.u32 %v15562_v27, %v11876_v25  ;;  %v11852_v25 = vld [vmem:[%s17079_s13 + $0xc20] sm:$0xf]  ;;  %v15556_v27 = vld [vmem:[%s17079_s13 + $0xc24] sm:$0xf0] }
 0x12e   : > { %8309 = vmatpush.bf16.msrb.mxu1 %v11645_v54  ;;  %v11932_v54 = vld [vmem:[%s17079_s13 + $0xcc0] sm:$0xf]  ;;  %v8103_v6 = vpop.f32.mrf.mxu1  ;;  %v15584_v16 = vld [vmem:[%s17079_s13 + $0xd04] sm:$0xf0] }
 0x12f   : > { %8322 = vmatpush.bf16.msrb.mxu2 %v11709_v55  ;;  %v12069_v55 = vor.u32 %v15610_v44, %v12068_v41  ;;  %v11933_v63 = vor.u32 %v15576_v56, %v11932_v54  ;;  %v15588_v41 = vld [vmem:[%s17079_s13 + $0xd24] sm:$0xf0]  ;;  %v11964_v15 = vld [vmem:[%s17079_s13 + $0xd00] sm:$0xf] }
 0x130   : > { %8335 = vmatpush.bf16.msrb.mxu3 %v11773_v61  ;;  %8297 = vmatmul.bf16.vlgmr.msrb.gmra.mxu0 %v17577_v9  ;;  %v11869_v61 = vor.u32 %v15560_v53, %v11868_v52  ;;  %v11853_v52 = vor.u32 %v15556_v27, %v11852_v25  ;;  %v11981_v56 = vor.u32 %v15588_v41, %v11980_v40  ;;  %v15600_v25 = vld [vmem:[%s17079_s13 + $0xd84] sm:$0xf0]  ;;  %v15646_v41 = vld [vmem:[%s17079_s13 + $0xef4] sm:$0xf0] }
 0x131   : > { %8341 = vmatpush.bf16.msra.mxu0 %v11893_v62  ;;  %8310 = vmatmul.bf16.vlgmr.msrb.gmra.mxu1 %v17584_v14  ;;  %v8090_v62 = vpop.f32.mrf.mxu0  ;;  %v442_v27 = vld [vmem:[%s17070_s27 + $0x68] sm:$0xff] }
 0x132   : > { %8354 = vmatpush.bf16.msra.mxu1 %v11957_v1  ;;  %8323 = vmatmul.bf16.vlgmr.msrb.gmra.mxu2 %v17582_v13  ;;  %v11860_v1 = vld [vmem:[%s17079_s13 + $0xc30] sm:$0xf]  ;;  %v8091_v4 = vadd.f32 %v8090_v62, %v17561_v23  ;;  %v11925_v23 = vor.u32 %v15574_v10, %v11924_v3  ;;  %v15570_v62 = vld [vmem:[%s17079_s13 + $0xc94] sm:$0xf0]  ;;  %v11836_v3 = vld [vmem:[%s17079_s13 + $0xc00] sm:$0xf] }
 0x133   : > { %8367 = vmatpush.bf16.msra.mxu2 %v12021_v2  ;;  %8336 = vmatmul.bf16.vlgmr.msrb.gmra.mxu3 %v17588_v17  ;;  %v15558_v2 = vld [vmem:[%s17079_s13 + $0xc34] sm:$0xf0]  ;;  %v15568_v10 = vld [vmem:[%s17079_s13 + $0xc84] sm:$0xf0] }
 0x134   : > { %8380 = vmatpush.bf16.msra.mxu3 %v12085_v8  ;;  %v12061_v8 = vor.u32 %v15608_v60, %v12060_v59  ;;  %v11908_v59 = vld [vmem:[%s17079_s13 + $0xc90] sm:$0xf] }
 0x135   : > { %8342 = vmatpush.bf16.msra.mxu0 %v11885_v18  ;;  %v8104_v18 = vadd.f32 %v8103_v6, %v8091_v4  ;;  %v11845_v4 = vor.u32 %v15554_v58, %v11844_v57  ;;  %v15552_v6 = vld [vmem:[%s17079_s13 + $0xc04] sm:$0xf0] }
 0x136   : > { %8355 = vmatpush.bf16.msra.mxu1 %v11949_v19  ;;  %v11861_v19 = vor.u32 %v15558_v2, %v11860_v1  ;;  %v8105_v60 = vpop.f32.mrf.mxu1  ;;  %v12036_v1 = vld [vmem:[%s17079_s13 + $0xd90] sm:$0xf]  ;;  %v15602_v2 = vld [vmem:[%s17079_s13 + $0xd94] sm:$0xf0]  ;;  %v11837_v40 = vor.u32 %v15552_v6, %v11836_v3  ;;  %v12268_v6 = vld [vmem:[%s17079_s13 + $0xf60] sm:$0xf] }
 0x137   : > { %8368 = vmatpush.bf16.msra.mxu2 %v12013_v20  ;;  %v11989_v20 = vor.u32 %v15590_v12, %v11988_v11  ;;  %v11909_v11 = vor.u32 %v15570_v62, %v11908_v59  ;;  %v1748_v60 = vunpack.c.h.b16 %v442_v27 }
 0x138   : > { %8381 = vmatpush.bf16.msra.mxu3 %v12077_v33  ;;  %v8116_v33 = vpop.f32.mrf.mxu2 }
 0x139   : > { %8343 = vmatpush.bf16.msra.mxu0 %v11877_v48  ;;  %v8117_v44 = vadd.f32 %v8116_v33, %v8104_v18  ;;  %v8129_v48 = vpop.f32.mrf.mxu3  ;;  %v8092_v54 = vpop.f32.mrf.mxu0  ;;  %v441_v18 = vld [vmem:[%s17070_s27 + $0x60] sm:$0xff] }
 0x13a   : > { %8356 = vmatpush.bf16.msra.mxu1 %v11941_v49  ;;  %v12044_v49 = vld [vmem:[%s17079_s13 + $0xda0] sm:$0xf]  ;;  %v12148_v33 = vld [vmem:[%s17079_s13 + $0xe70] sm:$0xf]  ;;  %v1746_v57 = vunpack.c.h.b16 %v441_v18 }
 0x13b   : > { %8369 = vmatpush.bf16.msra.mxu2 %v12005_v51  ;;  %v15604_v51 = vld [vmem:[%s17079_s13 + $0xda4] sm:$0xf0]  ;;  %v17627_v53 = vadd.f32 %v8129_v48, %v8117_v44  ;;  %v12276_v44 = vld [vmem:[%s17079_s13 + $0xf70] sm:$0xf]  ;;  %v15662_v48 = vld [vmem:[%s17079_s13 + $0xf74] sm:$0xf0] }
 0x13c   : > { %8382 = vmatpush.bf16.msra.mxu3 %v12069_v55  ;;  %v11917_v55 = vor.u32 %v15572_v37, %v11916_v28  ;;  %v12212_v37 = vld [vmem:[%s17079_s13 + $0xef0] sm:$0xf]  ;;  %v12277_v62 = vor.u32 %v15662_v48, %v12276_v44 }
 0x13d   : > { %8344 = vmatpush.bf16.msra.mxu0 %v11869_v61  ;;  %v12045_v61 = vor.u32 %v15604_v51, %v12044_v49  ;;  %v1745_v49 = vunpack.c.l.b16 %v441_v18  ;;  %v12340_v54 = vld [vmem:[%s17079_s13 + $0xff0] sm:$0xf] }
 0x13e   : > { %8357 = vmatpush.bf16.msra.mxu1 %v11933_v63  ;;  %v11972_v63 = vld [vmem:[%s17079_s13 + $0xd10] sm:$0xf] }
 0x13f   : > { %8370 = vmatpush.bf16.msra.mxu2 %v11997_v0  ;;  %v15586_v0 = vld [vmem:[%s17079_s13 + $0xd14] sm:$0xf0]  ;;  %v17658_v3 = vpack.c.b16 %v1745_v49, %v1745_v49 }
 0x140   : > { %8383 = vmatpush.bf16.msra.mxu3 %v12061_v8  ;;  %v11900_v8 = vld [vmem:[%s17079_s13 + $0xc80] sm:$0xf]  ;;  %v11973_v12 = vor.u32 %v15586_v0, %v11972_v63  ;;  %v15628_v0 = vld [vmem:[%s17079_s13 + $0xe64] sm:$0xf0] }
 0x141   : > { %8345 = vmatpush.bf16.msra.mxu0 %v11861_v19  ;;  %v8118_v19 = vpop.f32.mrf.mxu2  ;;  %v8131_v28 = vpop.f32.mrf.mxu3  ;;  %v11901_v51 = vor.u32 %v15568_v10, %v11900_v8  ;;  %v12140_v63 = vld [vmem:[%s17079_s13 + $0xe60] sm:$0xf]  ;;  %v15660_v8 = vld [vmem:[%s17079_s13 + $0xf64] sm:$0xf0] }
 0x142   : > { %8358 = vmatpush.bf16.msra.mxu1 %v11925_v23  ;;  %v12037_v23 = vor.u32 %v15602_v2, %v12036_v1  ;;  %v12204_v1 = vld [vmem:[%s17079_s13 + $0xee0] sm:$0xf]  ;;  %v12141_v18 = vor.u32 %v15628_v0, %v12140_v63 }
 0x143   : > { %8371 = vmatpush.bf16.msra.mxu2 %v11989_v20  ;;  %v12028_v20 = vld [vmem:[%s17079_s13 + $0xd80] sm:$0xf] }
 0x144   : > { %8384 = vmatpush.bf16.msra.mxu3 %v12053_v35  ;;  %v15630_v35 = vld [vmem:[%s17079_s13 + $0xe74] sm:$0xf0]  ;;  %v12029_v58 = vor.u32 %v15600_v25, %v12028_v20  ;;  %v12132_v20 = vld [vmem:[%s17079_s13 + $0xe50] sm:$0xf] }
 0x145   : > { %8346 = vmatpush.bf16.msra.mxu0 %v11853_v52  ;;  %v11965_v52 = vor.u32 %v15584_v16, %v11964_v15  ;;  %v12149_v59 = vor.u32 %v15630_v35, %v12148_v33  ;;  %v15676_v15 = vld [vmem:[%s17079_s13 + $0xfe4] sm:$0xf0]  ;;  %v17669_v16 = vpack.c.b16 %v1748_v60, %v1748_v60  ;;  %v15626_v25 = vld [vmem:[%s17079_s13 + $0xe54] sm:$0xf0]  ;;  %v12260_v35 = vld [vmem:[%s17079_s13 + $0xf50] sm:$0xf] }
 0x146   : > { %8359 = vmatpush.bf16.msra.mxu1 %v11917_v55  ;;  %v15678_v55 = vld [vmem:[%s17079_s13 + $0xff4] sm:$0xf0]  ;;  %v12133_v44 = vor.u32 %v15626_v25, %v12132_v20  ;;  %v12316_v60 = vld [vmem:[%s17079_s13 + $0xfc0] sm:$0xf] }
 0x147   : > { %8372 = vmatpush.bf16.msra.mxu2 %v11981_v56  ;;  %v1747_v56 = vunpack.c.l.b16 %v442_v27  ;;  %v12341_v2 = vor.u32 %v15678_v55, %v12340_v54  ;;  %v12196_v27 = vld [vmem:[%s17079_s13 + $0xed0] sm:$0xf]  ;;  %v15642_v33 = vld [vmem:[%s17079_s13 + $0xed4] sm:$0xf0]  ;;  %v12188_v54 = vld [vmem:[%s17079_s13 + $0xec0] sm:$0xf] }
 0x148   : > { %8385 = vmatpush.bf16.msra.mxu3 %v12045_v61  ;;  %v12213_v61 = vor.u32 %v15646_v41, %v12212_v37  ;;  %v15658_v37 = vld [vmem:[%s17079_s13 + $0xf54] sm:$0xf0]  ;;  %v12197_v48 = vor.u32 %v15642_v33, %v12196_v27  ;;  %v12108_v33 = vld [vmem:[%s17079_s13 + $0xe20] sm:$0xf] }
 0x149   : > { %8347 = vmatpush.bf16.msra.mxu0 %v11845_v4  ;;  %v15644_v4 = vld [vmem:[%s17079_s13 + $0xee4] sm:$0xf0]  ;;  %v17663_v10 = vpack.c.b16 %v1747_v56, %v1747_v56  ;;  %v15674_v41 = vld [vmem:[%s17079_s13 + $0xfd4] sm:$0xf0]  ;;  %v12261_v49 = vor.u32 %v15658_v37, %v12260_v35  ;;  %v12172_v37 = vld [vmem:[%s17079_s13 + $0xea0] sm:$0xf] }
 0x14a   : > { %8360 = vmatpush.bf16.msra.mxu1 %v11909_v11  ;;  %v17665_v11 = vpack.c.b16 %v1746_v57, %v1746_v57  ;;  %v12205_v19 = vor.u32 %v15644_v4, %v12204_v1  ;;  %v15640_v56 = vld [vmem:[%s17079_s13 + $0xec4] sm:$0xf0]  ;;  %v12252_v57 = vld [vmem:[%s17079_s13 + $0xf40] sm:$0xf]  ;;  %v12116_v4 = vld [vmem:[%s17079_s13 + $0xe30] sm:$0xf] }
 0x14b   : > { %8373 = vmatpush.bf16.msra.mxu2 %v11973_v12  ;;  %v12332_v12 = vld [vmem:[%s17079_s13 + $0xfe0] sm:$0xf]  ;;  %v12189_v1 = vor.u32 %v15640_v56, %v12188_v54  ;;  %v15670_v20 = vld [vmem:[%s17079_s13 + $0xfb4] sm:$0xf0]  ;;  %v15620_v35 = vld [vmem:[%s17079_s13 + $0xe24] sm:$0xf0] }
 0x14c   : > { %8386 = vmatpush.bf16.msra.mxu3 %v12037_v23  ;;  %v12269_v23 = vor.u32 %v15660_v8, %v12268_v6  ;;  %v12333_v28 = vor.u32 %v15676_v15, %v12332_v12  ;;  %v15622_v6 = vld [vmem:[%s17079_s13 + $0xe34] sm:$0xf0]  ;;  %v12180_v8 = vld [vmem:[%s17079_s13 + $0xeb0] sm:$0xf]  ;;  %v12300_v54 = vld [vmem:[%s17079_s13 + $0xfa0] sm:$0xf] }
 0x14d   : > { %8348 = vmatpush.bf16.msra.mxu0 %v11837_v40  ;;  %v12324_v40 = vld [vmem:[%s17079_s13 + $0xfd0] sm:$0xf]  ;;  %v12117_v25 = vor.u32 %v15622_v6, %v12116_v4  ;;  %v15650_v6 = vld [vmem:[%s17079_s13 + $0xf14] sm:$0xf0] }
 0x14e   : > { %8361 = vmatpush.bf16.msra.mxu1 %v11901_v51  ;;  %v12124_v51 = vld [vmem:[%s17079_s13 + $0xe40] sm:$0xf]  ;;  %v12325_v55 = vor.u32 %v15674_v41, %v12324_v40  ;;  %v8155_v0 = vpop.f32.mrf.mxu1  ;;  %v12228_v4 = vld [vmem:[%s17079_s13 + $0xf10] sm:$0xf] }
 0x14f   : > { %8374 = vmatpush.bf16.msra.mxu2 %v11965_v52  ;;  %v15624_v52 = vld [vmem:[%s17079_s13 + $0xe44] sm:$0xf0] }
 0x150   : > { %8387 = vmatpush.bf16.msra.mxu3 %v12029_v58  ;;  %8349 = vmatmul.bf16.vlgmr.msra.gmra.mxu0 %v17658_v3  ;;  %v15656_v58 = vld [vmem:[%s17079_s13 + $0xf44] sm:$0xf0]  ;;  %v12125_v63 = vor.u32 %v15624_v52, %v12124_v51 }
 0x151   : > { %8393 = vmatpush.bf16.msrb.mxu0 %v12149_v59  ;;  %8362 = vmatmul.bf16.vlgmr.msra.gmra.mxu1 %v17665_v11  ;;  %v8142_v59 = vpop.f32.mrf.mxu0 }
 0x152   : > { %8406 = vmatpush.bf16.msrb.mxu1 %v12213_v61  ;;  %8375 = vmatmul.bf16.vlgmr.msra.gmra.mxu2 %v17663_v10  ;;  %v15672_v61 = vld [vmem:[%s17079_s13 + $0xfc4] sm:$0xf0] }
 0x153   : > { %8419 = vmatpush.bf16.msrb.mxu2 %v12277_v62  ;;  %8388 = vmatmul.bf16.vlgmr.msra.gmra.mxu3 %v17669_v16  ;;  %v8143_v62 = vadd.f32 %v8142_v59, %v17627_v53  ;;  %v12317_v12 = vor.u32 %v15672_v61, %v12316_v60  ;;  %v15654_v53 = vld [vmem:[%s17079_s13 + $0xf34] sm:$0xf0] }
 0x154   : > { %8432 = vmatpush.bf16.msrb.mxu3 %v12341_v2  ;;  %v12253_v2 = vor.u32 %v15656_v58, %v12252_v57  ;;  %v12109_v57 = vor.u32 %v15620_v35, %v12108_v33  ;;  %v443_v33 = vld [vmem:[%s17070_s27 + $0x70] sm:$0xff] }
 0x155   : > { %8394 = vmatpush.bf16.msrb.mxu0 %v12141_v18  ;;  %v8156_v15 = vadd.f32 %v8155_v0, %v8143_v62  ;;  %v15638_v18 = vld [vmem:[%s17079_s13 + $0xeb4] sm:$0xf0]  ;;  %v8168_v41 = vpop.f32.mrf.mxu2  ;;  %v12100_v62 = vld [vmem:[%s17079_s13 + $0xe10] sm:$0xf] }
 0x156   : > { %8407 = vmatpush.bf16.msrb.mxu1 %v12205_v19  ;;  %v12244_v19 = vld [vmem:[%s17079_s13 + $0xf30] sm:$0xf]  ;;  %v12181_v27 = vor.u32 %v15638_v18, %v12180_v8  ;;  %v8181_v52 = vpop.f32.mrf.mxu3  ;;  %v8157_v58 = vpop.f32.mrf.mxu1 }
 0x157   : > { %8420 = vmatpush.bf16.msrb.mxu2 %v12269_v23  ;;  %v12308_v23 = vld [vmem:[%s17079_s13 + $0xfb0] sm:$0xf]  ;;  %v8169_v51 = vadd.f32 %v8168_v41, %v8156_v15  ;;  %v12092_v15 = vld [vmem:[%s17079_s13 + $0xe00] sm:$0xf]  ;;  %v444_v41 = vld [vmem:[%s17070_s27 + $0x78] sm:$0xff]  ;;  %v1749_v58 = vunpack.c.l.b16 %v443_v33 }
 0x158   : > { %8433 = vmatpush.bf16.msrb.mxu3 %v12333_v28  ;;  %v12245_v28 = vor.u32 %v15654_v53, %v12244_v19  ;;  %v12309_v40 = vor.u32 %v15670_v20, %v12308_v23  ;;  %v12164_v0 = vld [vmem:[%s17079_s13 + $0xe90] sm:$0xf]  ;;  %v15616_v19 = vld [vmem:[%s17079_s13 + $0xe04] sm:$0xf0]  ;;  %v12156_v53 = vld [vmem:[%s17079_s13 + $0xe80] sm:$0xf] }
 0x159   : > { %8395 = vmatpush.bf16.msrb.mxu0 %v12133_v44  ;;  %v15636_v44 = vld [vmem:[%s17079_s13 + $0xea4] sm:$0xf0]  ;;  %v8144_v56 = vpop.f32.mrf.mxu0  ;;  %v17708_v59 = vadd.f32 %v8181_v52, %v8169_v51  ;;  %v12292_v8 = vld [vmem:[%s17079_s13 + $0xf90] sm:$0xf] }
 0x15a   : > { %8408 = vmatpush.bf16.msrb.mxu1 %v12197_v48  ;;  %v12236_v48 = vld [vmem:[%s17079_s13 + $0xf20] sm:$0xf]  ;;  %v12173_v60 = vor.u32 %v15636_v44, %v12172_v37  ;;  %v15632_v23 = vld [vmem:[%s17079_s13 + $0xe84] sm:$0xf0]  ;;  %v12468_v51 = vld [vmem:[%s17079_s13 + $0x10f0] sm:$0xf] }
 0x15b   : > { %8421 = vmatpush.bf16.msrb.mxu2 %v12261_v49  ;;  %v15652_v49 = vld [vmem:[%s17079_s13 + $0xf24] sm:$0xf0]  ;;  %v12284_v37 = vld [vmem:[%s17079_s13 + $0xf80] sm:$0xf]  ;;  %v12532_v56 = vld [vmem:[%s17079_s13 + $0x1170] sm:$0xf] }
 0x15c   : > { %8434 = vmatpush.bf16.msrb.mxu3 %v12325_v55  ;;  %v15668_v55 = vld [vmem:[%s17079_s13 + $0xfa4] sm:$0xf0]  ;;  %v12237_v61 = vor.u32 %v15652_v49, %v12236_v48  ;;  %v12404_v48 = vld [vmem:[%s17079_s13 + $0x1070] sm:$0xf]  ;;  %v15694_v49 = vld [vmem:[%s17079_s13 + $0x1074] sm:$0xf0] }
 0x15d   : > { %8396 = vmatpush.bf16.msrb.mxu0 %v12125_v63  ;;  %v15618_v63 = vld [vmem:[%s17079_s13 + $0xe14] sm:$0xf0]  ;;  %v8170_v44 = vpop.f32.mrf.mxu2 }
 0x15e   : > { %8409 = vmatpush.bf16.msrb.mxu1 %v12189_v1  ;;  %v12301_v1 = vor.u32 %v15668_v55, %v12300_v54  ;;  %v12101_v18 = vor.u32 %v15618_v63, %v12100_v62  ;;  %v8183_v52 = vpop.f32.mrf.mxu3  ;;  %v12093_v54 = vor.u32 %v15616_v19, %v12092_v15  ;;  %v15710_v55 = vld [vmem:[%s17079_s13 + $0x10f4] sm:$0xf0]  ;;  %v12596_v62 = vld [vmem:[%s17079_s13 + $0x11f0] sm:$0xf]  ;;  %v12396_v15 = vld [vmem:[%s17079_s13 + $0x1060] sm:$0xf] }
 0x15f   : > { %8422 = vmatpush.bf16.msrb.mxu2 %v12253_v2  ;;  %v15634_v2 = vld [vmem:[%s17079_s13 + $0xe94] sm:$0xf0]  ;;  %v12460_v19 = vld [vmem:[%s17079_s13 + $0x10e0] sm:$0xf]  ;;  %v12452_v52 = vld [vmem:[%s17079_s13 + $0x10d0] sm:$0xf] }
 0x160   : > { %8435 = vmatpush.bf16.msrb.mxu3 %v12317_v12  ;;  %v15666_v12 = vld [vmem:[%s17079_s13 + $0xf94] sm:$0xf0]  ;;  %v12165_v20 = vor.u32 %v15634_v2, %v12164_v0  ;;  %v1751_v0 = vunpack.c.l.b16 %v444_v41 }
 0x161   : > { %8397 = vmatpush.bf16.msrb.mxu0 %v12117_v25  ;;  %v12229_v25 = vor.u32 %v15650_v6, %v12228_v4  ;;  %v12293_v35 = vor.u32 %v15666_v12, %v12292_v8  ;;  %v15742_v63 = vld [vmem:[%s17079_s13 + $0x11f4] sm:$0xf0]  ;;  %v12405_v4 = vor.u32 %v15694_v49, %v12404_v48  ;;  %v1752_v6 = vunpack.c.h.b16 %v444_v41  ;;  %v12388_v49 = vld [vmem:[%s17079_s13 + $0x1050] sm:$0xf] }
 0x162   : > { %8410 = vmatpush.bf16.msrb.mxu1 %v12181_v27  ;;  %v12220_v27 = vld [vmem:[%s17079_s13 + $0xf00] sm:$0xf]  ;;  %v12469_v8 = vor.u32 %v15710_v55, %v12468_v51  ;;  %v15690_v51 = vld [vmem:[%s17079_s13 + $0x1054] sm:$0xf0] }
 0x163   : > { %8423 = vmatpush.bf16.msrb.mxu2 %v12245_v28  ;;  %v15648_v28 = vld [vmem:[%s17079_s13 + $0xf04] sm:$0xf0]  ;;  %v15706_v55 = vld [vmem:[%s17079_s13 + $0x10d4] sm:$0xf0] }
 0x164   : > { %8436 = vmatpush.bf16.msrb.mxu3 %v12309_v40  ;;  %v15664_v40 = vld [vmem:[%s17079_s13 + $0xf84] sm:$0xf0] }
 0x165   : > { %8398 = vmatpush.bf16.msrb.mxu0 %v12109_v57  ;;  %v15726_v57 = vld [vmem:[%s17079_s13 + $0x1174] sm:$0xf0]  ;;  %v12285_v2 = vor.u32 %v15664_v40, %v12284_v37  ;;  %v15740_v37 = vld [vmem:[%s17079_s13 + $0x11e4] sm:$0xf0]  ;;  %v17750_v40 = vpack.c.b16 %v1752_v6, %v1752_v6 }
 0x166   : > { %8411 = vmatpush.bf16.msrb.mxu1 %v12173_v60  ;;  %v12157_v60 = vor.u32 %v15632_v23, %v12156_v53  ;;  %v12533_v12 = vor.u32 %v15726_v57, %v12532_v56  ;;  %v12597_v53 = vor.u32 %v15742_v63, %v12596_v62  ;;  %v17739_v23 = vpack.c.b16 %v1749_v58, %v1749_v58  ;;  %v12516_v56 = vld [vmem:[%s17079_s13 + $0x1150] sm:$0xf]  ;;  %v15722_v57 = vld [vmem:[%s17079_s13 + $0x1154] sm:$0xf0]  ;;  %v15704_v6 = vld [vmem:[%s17079_s13 + $0x10c4] sm:$0xf0] }
 0x167   : > { %8424 = vmatpush.bf16.msrb.mxu2 %v12237_v61  ;;  %v12221_v61 = vor.u32 %v15648_v28, %v12220_v27  ;;  %v15724_v27 = vld [vmem:[%s17079_s13 + $0x1164] sm:$0xf0]  ;;  %v17744_v28 = vpack.c.b16 %v1751_v0, %v1751_v0  ;;  %20150 = vst [vmem:[#allocation26_spill] sm:$0xff] %v17750_v40  ;;  %v12580_v58 = vld [vmem:[%s17079_s13 + $0x11d0] sm:$0xf]  ;;  %v12453_v62 = vor.u32 %v15706_v55, %v12452_v52 }
 0x168   : > { %8437 = vmatpush.bf16.msrb.mxu3 %v12301_v1  ;;  %v1750_v1 = vunpack.c.h.b16 %v443_v33  ;;  %v12517_v63 = vor.u32 %v15722_v57, %v12516_v56  ;;  %v12380_v0 = vld [vmem:[%s17079_s13 + $0x1040] sm:$0xf]  ;;  %v12500_v52 = vld [vmem:[%s17079_s13 + $0x1130] sm:$0xf]  ;;  %v15734_v55 = vld [vmem:[%s17079_s13 + $0x11b4] sm:$0xf0] }
 0x169   : > { %8399 = vmatpush.bf16.msrb.mxu0 %v12101_v18  ;;  %v15692_v18 = vld [vmem:[%s17079_s13 + $0x1064] sm:$0xf0] }
 0x16a   : > { %8412 = vmatpush.bf16.msrb.mxu1 %v12165_v20  ;;  %v15708_v20 = vld [vmem:[%s17079_s13 + $0x10e4] sm:$0xf0]  ;;  %v17746_v33 = vpack.c.b16 %v1750_v1, %v1750_v1  ;;  %v12397_v41 = vor.u32 %v15692_v18, %v12396_v15  ;;  %v12572_v18 = vld [vmem:[%s17079_s13 + $0x11c0] sm:$0xf] }
 0x16b   : > { %8425 = vmatpush.bf16.msrb.mxu2 %v12229_v25  ;;  %v12524_v25 = vld [vmem:[%s17079_s13 + $0x1160] sm:$0xf]  ;;  %v12461_v44 = vor.u32 %v15708_v20, %v12460_v19  ;;  %v15688_v1 = vld [vmem:[%s17079_s13 + $0x1044] sm:$0xf0] }
 0x16c   : > { %8438 = vmatpush.bf16.msrb.mxu3 %v12293_v35  ;;  %v12588_v35 = vld [vmem:[%s17079_s13 + $0x11e0] sm:$0xf]  ;;  %v12525_v48 = vor.u32 %v15724_v27, %v12524_v25  ;;  %v15736_v19 = vld [vmem:[%s17079_s13 + $0x11c4] sm:$0xf0]  ;;  %v12381_v20 = vor.u32 %v15688_v1, %v12380_v0 }
 0x16d   : > { %8400 = vmatpush.bf16.msrb.mxu0 %v12093_v54  ;;  %v12589_v54 = vor.u32 %v15740_v37, %v12588_v35  ;;  %v8194_v15 = vpop.f32.mrf.mxu0  ;;  %v12372_v37 = vld [vmem:[%s17079_s13 + $0x1030] sm:$0xf]  ;;  %v15700_v1 = vld [vmem:[%s17079_s13 + $0x10a4] sm:$0xf0] }
 0x16e   : > { %8413 = vmatpush.bf16.msrb.mxu1 %v12157_v60  ;;  %v15738_v60 = vld [vmem:[%s17079_s13 + $0x11d4] sm:$0xf0]  ;;  %v8207_v25 = vpop.f32.mrf.mxu1 }
 0x16f   : > { %8426 = vmatpush.bf16.msrb.mxu2 %v12221_v61  ;;  %v12389_v61 = vor.u32 %v15690_v51, %v12388_v49  ;;  %v15702_v51 = vld [vmem:[%s17079_s13 + $0x10b4] sm:$0xf0] }
 0x170   : > { %8439 = vmatpush.bf16.msrb.mxu3 %v12285_v2  ;;  %8401 = vmatmul.bf16.vlgmr.msrb.gmra.mxu0 %v17739_v23  ;;  %v12444_v2 = vld [vmem:[%s17079_s13 + $0x10c0] sm:$0xf] }
 0x171   : > { %8445 = vmatpush.bf16.msra.mxu0 %v12405_v4  ;;  %8414 = vmatmul.bf16.vlgmr.msrb.gmra.mxu1 %v17746_v33  ;;  %v12581_v4 = vor.u32 %v15738_v60, %v12580_v58  ;;  %v12445_v27 = vor.u32 %v15704_v6, %v12444_v2  ;;  %v12364_v60 = vld [vmem:[%s17079_s13 + $0x1020] sm:$0xf] }
 0x172   : > { %8458 = vmatpush.bf16.msra.mxu1 %v12469_v8  ;;  %8427 = vmatmul.bf16.vlgmr.msrb.gmra.mxu2 %v17744_v28  ;;  %v12508_v8 = vld [vmem:[%s17079_s13 + $0x1140] sm:$0xf] }
 0x173   : > { %8471 = vmatpush.bf16.msra.mxu2 %v12533_v12  ;;  %8440 = vmatmul.bf16.vlgmr.msrb.gmra.mxu3 %v17750_v40  ;;  %v15720_v12 = vld [vmem:[%s17079_s13 + $0x1144] sm:$0xf0]  ;;  %v12492_v2 = vld [vmem:[%s17079_s13 + $0x1120] sm:$0xf] }
 0x174   : > { %8484 = vmatpush.bf16.msra.mxu3 %v12597_v53  ;;  %v8195_v53 = vadd.f32 %v8194_v15, %v17708_v59  ;;  %v12509_v35 = vor.u32 %v15720_v12, %v12508_v8  ;;  %v15718_v59 = vld [vmem:[%s17079_s13 + $0x1134] sm:$0xf0]  ;;  %v12556_v12 = vld [vmem:[%s17079_s13 + $0x11a0] sm:$0xf]  ;;  %v15732_v15 = vld [vmem:[%s17079_s13 + $0x11a4] sm:$0xf0] }
 0x175   : > { %8446 = vmatpush.bf16.msra.mxu0 %v12397_v41  ;;  %v15686_v41 = vld [vmem:[%s17079_s13 + $0x1034] sm:$0xf0]  ;;  %v12501_v58 = vor.u32 %v15718_v59, %v12500_v52  ;;  %v8220_v0 = vpop.f32.mrf.mxu2  ;;  %v12548_v52 = vld [vmem:[%s17079_s13 + $0x1190] sm:$0xf]  ;;  %v15788_v40 = vld [vmem:[%s17079_s13 + $0x1364] sm:$0xf0] }
 0x176   : > { %8459 = vmatpush.bf16.msra.mxu1 %v12461_v44  ;;  %v12436_v44 = vld [vmem:[%s17079_s13 + $0x10b0] sm:$0xf]  ;;  %v8208_v49 = vadd.f32 %v8207_v25, %v8195_v53  ;;  %v12373_v56 = vor.u32 %v15686_v41, %v12372_v37  ;;  %v8233_v8 = vpop.f32.mrf.mxu3  ;;  %v8209_v53 = vpop.f32.mrf.mxu1  ;;  %v15682_v37 = vld [vmem:[%s17079_s13 + $0x1014] sm:$0xf0] }
 0x177   : > { %8472 = vmatpush.bf16.msra.mxu2 %v12525_v48  ;;  %v12573_v48 = vor.u32 %v15736_v19, %v12572_v18  ;;  %v12437_v57 = vor.u32 %v15702_v51, %v12436_v44  ;;  %v8196_v18 = vpop.f32.mrf.mxu0  ;;  %v12420_v41 = vld [vmem:[%s17079_s13 + $0x1090] sm:$0xf]  ;;  %v12557_v44 = vor.u32 %v15732_v15, %v12556_v12  ;;  %v15714_v51 = vld [vmem:[%s17079_s13 + $0x1114] sm:$0xf0] }
 0x178   : > { %8485 = vmatpush.bf16.msra.mxu3 %v12589_v54  ;;  %v12564_v54 = vld [vmem:[%s17079_s13 + $0x11b0] sm:$0xf]  ;;  %v8221_v6 = vadd.f32 %v8220_v0, %v8208_v49  ;;  %v15730_v59 = vld [vmem:[%s17079_s13 + $0x1194] sm:$0xf0] }
 0x179   : > { %8447 = vmatpush.bf16.msra.mxu0 %v12389_v61  ;;  %v15684_v61 = vld [vmem:[%s17079_s13 + $0x1024] sm:$0xf0]  ;;  %v12484_v49 = vld [vmem:[%s17079_s13 + $0x1110] sm:$0xf]  ;;  %v15758_v15 = vld [vmem:[%s17079_s13 + $0x1274] sm:$0xf0] }
 0x17a   : > { %8460 = vmatpush.bf16.msra.mxu1 %v12453_v62  ;;  %v12428_v62 = vld [vmem:[%s17079_s13 + $0x10a0] sm:$0xf]  ;;  %v12365_v19 = vor.u32 %v15684_v61, %v12364_v60  ;;  %v12485_v61 = vor.u32 %v15714_v51, %v12484_v49  ;;  %v12660_v12 = vld [vmem:[%s17079_s13 + $0x1270] sm:$0xf]  ;;  %v15806_v49 = vld [vmem:[%s17079_s13 + $0x13f4] sm:$0xf0] }
 0x17b   : > { %8473 = vmatpush.bf16.msra.mxu2 %v12517_v63  ;;  %v12565_v63 = vor.u32 %v15734_v55, %v12564_v54  ;;  %v12429_v25 = vor.u32 %v15700_v1, %v12428_v62  ;;  %v12348_v54 = vld [vmem:[%s17079_s13 + $0x1000] sm:$0xf]  ;;  %v12549_v1 = vor.u32 %v15730_v59, %v12548_v52  ;;  %v12724_v18 = vld [vmem:[%s17079_s13 + $0x12f0] sm:$0xf] }
 0x17c   : > { %8486 = vmatpush.bf16.msra.mxu3 %v12581_v4  ;;  %v15716_v4 = vld [vmem:[%s17079_s13 + $0x1124] sm:$0xf0]  ;;  %v12476_v62 = vld [vmem:[%s17079_s13 + $0x1100] sm:$0xf] }
 0x17d   : > { %8448 = vmatpush.bf16.msra.mxu0 %v12381_v20  ;;  %v17789_v20 = vadd.f32 %v8233_v8, %v8221_v6  ;;  %v445_v0 = vld [vmem:[%s17070_s27 + $0x80] sm:$0xff]  ;;  %v446_v6 = vld [vmem:[%s17070_s27 + $0x88] sm:$0xff]  ;;  %v8222_v8 = vpop.f32.mrf.mxu2 }
 0x17e   : > { %8461 = vmatpush.bf16.msra.mxu1 %v12445_v27  ;;  %v12493_v27 = vor.u32 %v15716_v4, %v12492_v2  ;;  %v12540_v2 = vld [vmem:[%s17079_s13 + $0x1180] sm:$0xf]  ;;  %v15728_v4 = vld [vmem:[%s17079_s13 + $0x1184] sm:$0xf0]  ;;  %v1755_v51 = vunpack.c.l.b16 %v446_v6  ;;  %v1754_v52 = vunpack.c.h.b16 %v445_v0 }
 0x17f   : > { %8474 = vmatpush.bf16.msra.mxu2 %v12509_v35  ;;  %v12356_v35 = vld [vmem:[%s17079_s13 + $0x1010] sm:$0xf]  ;;  %v12541_v59 = vor.u32 %v15728_v4, %v12540_v2  ;;  %v12844_v2 = vld [vmem:[%s17079_s13 + $0x13e0] sm:$0xf]  ;;  %v15804_v4 = vld [vmem:[%s17079_s13 + $0x13e4] sm:$0xf0] }
 0x180   : > { %8487 = vmatpush.bf16.msra.mxu3 %v12573_v48  ;;  %v15698_v48 = vld [vmem:[%s17079_s13 + $0x1094] sm:$0xf0]  ;;  %v12357_v55 = vor.u32 %v15682_v37, %v12356_v35  ;;  %v1753_v37 = vunpack.c.l.b16 %v445_v0  ;;  %v17825_v0 = vpack.c.b16 %v1755_v51, %v1755_v51 }
 0x181   : > { %8449 = vmatpush.bf16.msra.mxu0 %v12373_v56  ;;  %v15680_v56 = vld [vmem:[%s17079_s13 + $0x1004] sm:$0xf0]  ;;  %v12421_v60 = vor.u32 %v15698_v48, %v12420_v41  ;;  %v15790_v35 = vld [vmem:[%s17079_s13 + $0x1374] sm:$0xf0]  ;;  %v12852_v48 = vld [vmem:[%s17079_s13 + $0x13f0] sm:$0xf] }
 0x182   : > { %8462 = vmatpush.bf16.msra.mxu1 %v12437_v57  ;;  %v12412_v57 = vld [vmem:[%s17079_s13 + $0x1080] sm:$0xf]  ;;  %v12349_v53 = vor.u32 %v15680_v56, %v12348_v54  ;;  %v12661_v54 = vor.u32 %v15758_v15, %v12660_v12  ;;  %20152 = vst [vmem:[#allocation28_spill] sm:$0xff] %v17825_v0 }
 0x183   : > { %8475 = vmatpush.bf16.msra.mxu2 %v12501_v58  ;;  %v15696_v58 = vld [vmem:[%s17079_s13 + $0x1084] sm:$0xf0] }
 0x184   : > { %8488 = vmatpush.bf16.msra.mxu3 %v12565_v63  ;;  %v15712_v63 = vld [vmem:[%s17079_s13 + $0x1104] sm:$0xf0]  ;;  %v12413_v41 = vor.u32 %v15696_v58, %v12412_v57  ;;  %v12853_v57 = vor.u32 %v15806_v49, %v12852_v48  ;;  %v17820_v58 = vpack.c.b16 %v1753_v37, %v1753_v37  ;;  %v15770_v37 = vld [vmem:[%s17079_s13 + $0x12d4] sm:$0xf0] }
 0x185   : > { %8450 = vmatpush.bf16.msra.mxu0 %v12365_v19  ;;  %v8235_v19 = vpop.f32.mrf.mxu3  ;;  %v15802_v48 = vld [vmem:[%s17079_s13 + $0x13d4] sm:$0xf0] }
 0x186   : > { %8463 = vmatpush.bf16.msra.mxu1 %v12429_v25  ;;  %v15774_v25 = vld [vmem:[%s17079_s13 + $0x12f4] sm:$0xf0]  ;;  %v15756_v19 = vld [vmem:[%s17079_s13 + $0x1264] sm:$0xf0]  ;;  %20151 = vst [vmem:[#allocation27_spill] sm:$0xff] %v17820_v58 }
 0x187   : > { %8476 = vmatpush.bf16.msra.mxu2 %v12493_v27  ;;  %v12788_v27 = vld [vmem:[%s17079_s13 + $0x1370] sm:$0xf]  ;;  %v12725_v56 = vor.u32 %v15774_v25, %v12724_v18  ;;  %v15754_v25 = vld [vmem:[%s17079_s13 + $0x1254] sm:$0xf0] }
 0x188   : > { %8489 = vmatpush.bf16.msra.mxu3 %v12557_v44  ;;  %v12477_v44 = vor.u32 %v15712_v63, %v12476_v62  ;;  %v12789_v8 = vor.u32 %v15790_v35, %v12788_v27  ;;  %v15772_v62 = vld [vmem:[%s17079_s13 + $0x12e4] sm:$0xf0]  ;;  %v12780_v63 = vld [vmem:[%s17079_s13 + $0x1360] sm:$0xf]  ;;  %v12708_v27 = vld [vmem:[%s17079_s13 + $0x12d0] sm:$0xf]  ;;  %v12845_v35 = vor.u32 %v15804_v4, %v12844_v2 }
 0x189   : > { %8451 = vmatpush.bf16.msra.mxu0 %v12357_v55  ;;  %v1756_v55 = vunpack.c.h.b16 %v446_v6  ;;  %v12781_v18 = vor.u32 %v15788_v40, %v12780_v63  ;;  %v12836_v40 = vld [vmem:[%s17079_s13 + $0x13d0] sm:$0xf]  ;;  %v12709_v51 = vor.u32 %v15770_v37, %v12708_v27  ;;  %v15766_v37 = vld [vmem:[%s17079_s13 + $0x12b4] sm:$0xf0] }
 0x18a   : > { %8464 = vmatpush.bf16.msra.mxu1 %v12421_v60  ;;  %v12652_v60 = vld [vmem:[%s17079_s13 + $0x1260] sm:$0xf] }
 0x18b   : > { %8477 = vmatpush.bf16.msra.mxu2 %v12485_v61  ;;  %v12716_v61 = vld [vmem:[%s17079_s13 + $0x12e0] sm:$0xf]  ;;  %v17831_v6 = vpack.c.b16 %v1756_v55, %v1756_v55  ;;  %v12653_v12 = vor.u32 %v15756_v19, %v12652_v60  ;;  %v15784_v19 = vld [vmem:[%s17079_s13 + $0x1344] sm:$0xf0] }
 0x18c   : > { %8490 = vmatpush.bf16.msra.mxu3 %v12549_v1  ;;  %v17827_v1 = vpack.c.b16 %v1754_v52, %v1754_v52  ;;  %v12717_v15 = vor.u32 %v15772_v62, %v12716_v61  ;;  %v12700_v55 = vld [vmem:[%s17079_s13 + $0x12c0] sm:$0xf]  ;;  %v15800_v62 = vld [vmem:[%s17079_s13 + $0x13c4] sm:$0xf0] }
 0x18d   : > { %8452 = vmatpush.bf16.msra.mxu0 %v12349_v53  ;;  %20154 = vst [vmem:[#allocation30_spill] sm:$0xff] %v17831_v6  ;;  %v12644_v53 = vld [vmem:[%s17079_s13 + $0x1250] sm:$0xf]  ;;  %v12764_v60 = vld [vmem:[%s17079_s13 + $0x1340] sm:$0xf]  ;;  %v8246_v61 = vpop.f32.mrf.mxu0 }
 0x18e   : > { %8465 = vmatpush.bf16.msra.mxu1 %v12413_v41  ;;  %20153 = vst [vmem:[#allocation29_spill] sm:$0xff] %v17827_v1  ;;  %v12772_v41 = vld [vmem:[%s17079_s13 + $0x1350] sm:$0xf]  ;;  %v12645_v49 = vor.u32 %v15754_v25, %v12644_v53  ;;  %v8247_v63 = vadd.f32 %v8246_v61, %v17789_v20  ;;  %v8259_v4 = vpop.f32.mrf.mxu1  ;;  %v15750_v53 = vld [vmem:[%s17079_s13 + $0x1234] sm:$0xf0] }
 0x18f   : > { %8478 = vmatpush.bf16.msra.mxu2 %v12477_v44  ;;  %v15786_v44 = vld [vmem:[%s17079_s13 + $0x1354] sm:$0xf0]  ;;  %v12692_v25 = vld [vmem:[%s17079_s13 + $0x12b0] sm:$0xf] }
 0x190   : > { %8491 = vmatpush.bf16.msra.mxu3 %v12541_v59  ;;  %8453 = vmatmul.bf16.vlgmr.msra.gmra.mxu0 %v17820_v58  ;;  %v12773_v52 = vor.u32 %v15786_v44, %v12772_v41  ;;  %v12636_v59 = vld [vmem:[%s17079_s13 + $0x1240] sm:$0xf]  ;;  %v12756_v41 = vld [vmem:[%s17079_s13 + $0x1330] sm:$0xf]  ;;  %v15782_v20 = vld [vmem:[%s17079_s13 + $0x1334] sm:$0xf0] }
 0x191   : > { %8497 = vmatpush.bf16.msrb.mxu0 %v12661_v54  ;;  %8466 = vmatmul.bf16.vlgmr.msra.gmra.mxu1 %v17827_v1  ;;  %v15752_v54 = vld [vmem:[%s17079_s13 + $0x1244] sm:$0xf0]  ;;  %v12820_v44 = vld [vmem:[%s17079_s13 + $0x13b0] sm:$0xf] }
 0x192   : > { %8510 = vmatpush.bf16.msrb.mxu1 %v12725_v56  ;;  %8479 = vmatmul.bf16.vlgmr.msra.gmra.mxu2 %v17825_v0  ;;  %v12837_v56 = vor.u32 %v15802_v48, %v12836_v40  ;;  %v12637_v2 = vor.u32 %v15752_v54, %v12636_v59  ;;  %v15798_v40 = vld [vmem:[%s17079_s13 + $0x13b4] sm:$0xf0]  ;;  %v15748_v59 = vld [vmem:[%s17079_s13 + $0x1224] sm:$0xf0]  ;;  %v12684_v54 = vld [vmem:[%s17079_s13 + $0x12a0] sm:$0xf] }
 0x193   : > { %8523 = vmatpush.bf16.msrb.mxu2 %v12789_v8  ;;  %8492 = vmatmul.bf16.vlgmr.msra.gmra.mxu3 %v17831_v6  ;;  %v15768_v8 = vld [vmem:[%s17079_s13 + $0x12c4] sm:$0xf0] }
 0x194   : > { %8536 = vmatpush.bf16.msrb.mxu3 %v12853_v57  ;;  %v12828_v57 = vld [vmem:[%s17079_s13 + $0x13c0] sm:$0xf]  ;;  %v15820_v0 = vld [vmem:[%s17079_s13 + $0x1464] sm:$0xf0] }
 0x195   : > { %8498 = vmatpush.bf16.msrb.mxu0 %v12653_v12  ;;  %v12701_v12 = vor.u32 %v15768_v8, %v12700_v55  ;;  %v12829_v27 = vor.u32 %v15800_v62, %v12828_v57  ;;  %v12821_v55 = vor.u32 %v15798_v40, %v12820_v44  ;;  %v15764_v8 = vld [vmem:[%s17079_s13 + $0x12a4] sm:$0xf0]  ;;  %v12812_v62 = vld [vmem:[%s17079_s13 + $0x13a0] sm:$0xf]  ;;  %v15778_v44 = vld [vmem:[%s17079_s13 + $0x1314] sm:$0xf0] }
 0x196   : > { %8511 = vmatpush.bf16.msrb.mxu1 %v12717_v15  ;;  %v12765_v15 = vor.u32 %v15784_v19, %v12764_v60  ;;  %v12748_v60 = vld [vmem:[%s17079_s13 + $0x1320] sm:$0xf]  ;;  %v15780_v19 = vld [vmem:[%s17079_s13 + $0x1324] sm:$0xf0]  ;;  %v8285_v57 = vpop.f32.mrf.mxu3  ;;  %v12804_v40 = vld [vmem:[%s17079_s13 + $0x1390] sm:$0xf] }
 0x197   : > { %8524 = vmatpush.bf16.msrb.mxu2 %v12781_v18  ;;  %v12628_v18 = vld [vmem:[%s17079_s13 + $0x1230] sm:$0xf]  ;;  %v15852_v58 = vld [vmem:[%s17079_s13 + $0x1564] sm:$0xf0] }
 0x198   : > { %8537 = vmatpush.bf16.msrb.mxu3 %v12845_v35  ;;  %v8260_v35 = vadd.f32 %v8259_v4, %v8247_v63  ;;  %v12629_v48 = vor.u32 %v15750_v53, %v12628_v18  ;;  %v15796_v63 = vld [vmem:[%s17079_s13 + $0x13a4] sm:$0xf0]  ;;  %v12685_v18 = vor.u32 %v15764_v8, %v12684_v54  ;;  %v12749_v53 = vor.u32 %v15780_v19, %v12748_v60  ;;  %v12732_v8 = vld [vmem:[%s17079_s13 + $0x1300] sm:$0xf] }
 0x199   : > { %8499 = vmatpush.bf16.msrb.mxu0 %v12645_v49  ;;  %v12693_v49 = vor.u32 %v15766_v37, %v12692_v25  ;;  %v12612_v25 = vld [vmem:[%s17079_s13 + $0x1210] sm:$0xf]  ;;  %v12813_v37 = vor.u32 %v15796_v63, %v12812_v62  ;;  %v15760_v54 = vld [vmem:[%s17079_s13 + $0x1284] sm:$0xf0] }
 0x19a   : > { %8512 = vmatpush.bf16.msrb.mxu1 %v12709_v51  ;;  %v12757_v51 = vor.u32 %v15782_v20, %v12756_v41  ;;  %v15762_v41 = vld [vmem:[%s17079_s13 + $0x1294] sm:$0xf0]  ;;  %v12740_v20 = vld [vmem:[%s17079_s13 + $0x1310] sm:$0xf]  ;;  %v15776_v60 = vld [vmem:[%s17079_s13 + $0x1304] sm:$0xf0] }
 0x19b   : > { %8525 = vmatpush.bf16.msrb.mxu2 %v12773_v52  ;;  %v12620_v52 = vld [vmem:[%s17079_s13 + $0x1220] sm:$0xf]  ;;  %v15792_v62 = vld [vmem:[%s17079_s13 + $0x1384] sm:$0xf0] }
 0x19c   : > { %8538 = vmatpush.bf16.msrb.mxu3 %v12837_v56  ;;  %v8272_v56 = vpop.f32.mrf.mxu2  ;;  %v12621_v4 = vor.u32 %v15748_v59, %v12620_v52  ;;  %v15744_v52 = vld [vmem:[%s17079_s13 + $0x1204] sm:$0xf0]  ;;  %v12668_v59 = vld [vmem:[%s17079_s13 + $0x1280] sm:$0xf] }
 0x19d   : > { %8500 = vmatpush.bf16.msrb.mxu0 %v12637_v2  ;;  %v8273_v61 = vadd.f32 %v8272_v56, %v8260_v35  ;;  %v8248_v2 = vpop.f32.mrf.mxu0  ;;  %v12676_v35 = vld [vmem:[%s17079_s13 + $0x1290] sm:$0xf]  ;;  %v12741_v56 = vor.u32 %v15778_v44, %v12740_v20  ;;  %v448_v63 = vld [vmem:[%s17070_s27 + $0x98] sm:$0xff]  ;;  %v12733_v44 = vor.u32 %v15776_v60, %v12732_v8  ;;  %v13036_v60 = vld [vmem:[%s17079_s13 + $0x1560] sm:$0xf] }
 0x19e   : > { %8513 = vmatpush.bf16.msrb.mxu1 %v12701_v12  ;;  %v8261_v12 = vpop.f32.mrf.mxu1  ;;  %v447_v19 = vld [vmem:[%s17070_s27 + $0x90] sm:$0xff]  ;;  %v15836_v8 = vld [vmem:[%s17079_s13 + $0x14e4] sm:$0xf0] }
 0x19f   : > { %8526 = vmatpush.bf16.msrb.mxu2 %v12765_v15  ;;  %v17870_v15 = vadd.f32 %v8285_v57, %v8273_v61  ;;  %v12796_v57 = vld [vmem:[%s17079_s13 + $0x1380] sm:$0xf]  ;;  %v15822_v12 = vld [vmem:[%s17079_s13 + $0x1474] sm:$0xf0]  ;;  %v1757_v20 = vunpack.c.l.b16 %v447_v19 }
 0x1a0   : > { %8539 = vmatpush.bf16.msrb.mxu3 %v12829_v27  ;;  %v15746_v27 = vld [vmem:[%s17079_s13 + $0x1214] sm:$0xf0] }
 0x1a1   : > { %8501 = vmatpush.bf16.msrb.mxu0 %v12629_v48  ;;  %v15794_v48 = vld [vmem:[%s17079_s13 + $0x1394] sm:$0xf0] }
 0x1a2   : > { %8514 = vmatpush.bf16.msrb.mxu1 %v12693_v49  ;;  %v12604_v49 = vld [vmem:[%s17079_s13 + $0x1200] sm:$0xf]  ;;  %v12805_v61 = vor.u32 %v15794_v48, %v12804_v40  ;;  %v13108_v40 = vld [vmem:[%s17079_s13 + $0x15f0] sm:$0xf]  ;;  %v15870_v48 = vld [vmem:[%s17079_s13 + $0x15f4] sm:$0xf0] }
 0x1a3   : > { %8527 = vmatpush.bf16.msrb.mxu2 %v12757_v51  ;;  %v12613_v51 = vor.u32 %v15746_v27, %v12612_v25  ;;  %v12605_v25 = vor.u32 %v15744_v52, %v12604_v49  ;;  %v15838_v27 = vld [vmem:[%s17079_s13 + $0x14f4] sm:$0xf0]  ;;  %v12797_v49 = vor.u32 %v15792_v62, %v12796_v57  ;;  %v1760_v52 = vunpack.c.h.b16 %v448_v63  ;;  %v13100_v57 = vld [vmem:[%s17079_s13 + $0x15e0] sm:$0xf]  ;;  %v15868_v62 = vld [vmem:[%s17079_s13 + $0x15e4] sm:$0xf0] }
 0x1a4   : > { %8540 = vmatpush.bf16.msrb.mxu3 %v12821_v55  ;;  %v12677_v55 = vor.u32 %v15762_v41, %v12676_v35  ;;  %v8274_v2 = vpop.f32.mrf.mxu2  ;;  %v13044_v35 = vld [vmem:[%s17079_s13 + $0x1570] sm:$0xf]  ;;  %v15854_v41 = vld [vmem:[%s17079_s13 + $0x1574] sm:$0xf0] }
 0x1a5   : > { %8502 = vmatpush.bf16.msrb.mxu0 %v12621_v4  ;;  %v12916_v4 = vld [vmem:[%s17079_s13 + $0x1470] sm:$0xf]  ;;  %v1759_v2 = vunpack.c.l.b16 %v448_v63  ;;  %v13045_v1 = vor.u32 %v15854_v41, %v13044_v35  ;;  %v17912_v63 = vpack.c.b16 %v1760_v52, %v1760_v52  ;;  %v13101_v41 = vor.u32 %v15868_v62, %v13100_v57  ;;  %v13020_v52 = vld [vmem:[%s17079_s13 + $0x1540] sm:$0xf] }
 0x1a6   : > { %8515 = vmatpush.bf16.msrb.mxu1 %v12685_v18  ;;  %v12980_v18 = vld [vmem:[%s17079_s13 + $0x14f0] sm:$0xf] }
 0x1a7   : > { %8528 = vmatpush.bf16.msrb.mxu2 %v12749_v53  ;;  %v8287_v53 = vpop.f32.mrf.mxu3  ;;  %v12981_v6 = vor.u32 %v15838_v27, %v12980_v18  ;;  %20158 = vst [vmem:[#allocation34_spill] sm:$0xff] %v17912_v63  ;;  %v13037_v18 = vor.u32 %v15852_v58, %v13036_v60  ;;  %v15818_v27 = vld [vmem:[%s17079_s13 + $0x1454] sm:$0xf0]  ;;  %v12964_v35 = vld [vmem:[%s17079_s13 + $0x14d0] sm:$0xf] }
 0x1a8   : > { %8541 = vmatpush.bf16.msrb.mxu3 %v12813_v37  ;;  %v12669_v37 = vor.u32 %v15760_v54, %v12668_v59  ;;  %v1758_v53 = vunpack.c.h.b16 %v447_v19  ;;  %v13109_v59 = vor.u32 %v15870_v48, %v13108_v40  ;;  %v17901_v54 = vpack.c.b16 %v1757_v20, %v1757_v20  ;;  %v15834_v20 = vld [vmem:[%s17079_s13 + $0x14d4] sm:$0xf0]  ;;  %v13092_v58 = vld [vmem:[%s17079_s13 + $0x15d0] sm:$0xf]  ;;  %v12892_v48 = vld [vmem:[%s17079_s13 + $0x1440] sm:$0xf] }
 0x1a9   : > { %8503 = vmatpush.bf16.msrb.mxu0 %v12613_v51  ;;  %v12917_v51 = vor.u32 %v15822_v12, %v12916_v4  ;;  %v17906_v19 = vpack.c.b16 %v1759_v2, %v1759_v2  ;;  %v15816_v2 = vld [vmem:[%s17079_s13 + $0x1444] sm:$0xf0] }
 0x1aa   : > { %8516 = vmatpush.bf16.msrb.mxu1 %v12677_v55  ;;  %v12908_v55 = vld [vmem:[%s17079_s13 + $0x1460] sm:$0xf]  ;;  %20155 = vst [vmem:[#allocation31_spill] sm:$0xff] %v17901_v54  ;;  %v12893_v57 = vor.u32 %v15816_v2, %v12892_v48  ;;  %v15812_v48 = vld [vmem:[%s17079_s13 + $0x1424] sm:$0xf0] }
 0x1ab   : > { %8529 = vmatpush.bf16.msrb.mxu2 %v12741_v56  ;;  %v12972_v56 = vld [vmem:[%s17079_s13 + $0x14e0] sm:$0xf]  ;;  %20156 = vst [vmem:[#allocation32_spill] sm:$0xff] %v17906_v19  ;;  %v12909_v4 = vor.u32 %v15820_v0, %v12908_v55  ;;  %v15866_v0 = vld [vmem:[%s17079_s13 + $0x15d4] sm:$0xf0] }
 0x1ac   : > { %8542 = vmatpush.bf16.msrb.mxu3 %v12805_v61  ;;  %v17908_v61 = vpack.c.b16 %v1758_v53, %v1758_v53  ;;  %v12973_v12 = vor.u32 %v15836_v8, %v12972_v56  ;;  %v12956_v53 = vld [vmem:[%s17079_s13 + $0x14c0] sm:$0xf]  ;;  %v15848_v55 = vld [vmem:[%s17079_s13 + $0x1544] sm:$0xf0] }
 0x1ad   : > { %8504 = vmatpush.bf16.msrb.mxu0 %v12605_v25  ;;  %v12900_v25 = vld [vmem:[%s17079_s13 + $0x1450] sm:$0xf]  ;;  %v8298_v56 = vpop.f32.mrf.mxu0  ;;  %v15864_v8 = vld [vmem:[%s17079_s13 + $0x15c4] sm:$0xf0]  ;;  %v12940_v2 = vld [vmem:[%s17079_s13 + $0x14a0] sm:$0xf] }
 0x1ae   : > { %8517 = vmatpush.bf16.msrb.mxu1 %v12669_v37  ;;  %20157 = vst [vmem:[#allocation33_spill] sm:$0xff] %v17908_v61  ;;  %v13028_v37 = vld [vmem:[%s17079_s13 + $0x1550] sm:$0xf]  ;;  %v8299_v60 = vadd.f32 %v8298_v56, %v17870_v15  ;;  %v8311_v62 = vpop.f32.mrf.mxu1  ;;  %v15846_v15 = vld [vmem:[%s17079_s13 + $0x1534] sm:$0xf0] }
 0x1af   : > { %8530 = vmatpush.bf16.msrb.mxu2 %v12733_v44  ;;  %v15850_v44 = vld [vmem:[%s17079_s13 + $0x1554] sm:$0xf0] }
 0x1b0   : > { %8543 = vmatpush.bf16.msrb.mxu3 %v12797_v49  ;;  %8505 = vmatmul.bf16.vlgmr.msrb.gmra.mxu0 %v17901_v54  ;;  %v13029_v40 = vor.u32 %v15850_v44, %v13028_v37  ;;  %v13093_v49 = vor.u32 %v15866_v0, %v13092_v58  ;;  %v13012_v37 = vld [vmem:[%s17079_s13 + $0x1530] sm:$0xf]  ;;  %v15862_v58 = vld [vmem:[%s17079_s13 + $0x15b4] sm:$0xf0]  ;;  %v15916_v54 = vld [vmem:[%s17079_s13 + $0x1764] sm:$0xf0] }
 0x1b1   : > { %8549 = vmatpush.bf16.msra.mxu0 %v12917_v51  ;;  %8518 = vmatmul.bf16.vlgmr.msrb.gmra.mxu1 %v17908_v61  ;;  %v15832_v51 = vld [vmem:[%s17079_s13 + $0x14c4] sm:$0xf0]  ;;  %v13076_v44 = vld [vmem:[%s17079_s13 + $0x15b0] sm:$0xf] }
 0x1b2   : > { %8562 = vmatpush.bf16.msra.mxu1 %v12981_v6  ;;  %8531 = vmatmul.bf16.vlgmr.msrb.gmra.mxu2 %v17906_v19  ;;  %v12965_v6 = vor.u32 %v15834_v20, %v12964_v35  ;;  %v15830_v20 = vld [vmem:[%s17079_s13 + $0x14b4] sm:$0xf0]  ;;  %v15884_v19 = vld [vmem:[%s17079_s13 + $0x1664] sm:$0xf0] }
 0x1b3   : > { %8575 = vmatpush.bf16.msra.mxu2 %v13045_v1  ;;  %8544 = vmatmul.bf16.vlgmr.msrb.gmra.mxu3 %v17912_v63  ;;  %v12901_v1 = vor.u32 %v15818_v27, %v12900_v25  ;;  %v15814_v25 = vld [vmem:[%s17079_s13 + $0x1434] sm:$0xf0]  ;;  %v12948_v27 = vld [vmem:[%s17079_s13 + $0x14b0] sm:$0xf] }
 0x1b4   : > { %8588 = vmatpush.bf16.msra.mxu3 %v13109_v59  ;;  %v13084_v59 = vld [vmem:[%s17079_s13 + $0x15c0] sm:$0xf] }
 0x1b5   : > { %8550 = vmatpush.bf16.msra.mxu0 %v12909_v4  ;;  %v12957_v4 = vor.u32 %v15832_v51, %v12956_v53  ;;  %v13085_v35 = vor.u32 %v15864_v8, %v13084_v59  ;;  %v13077_v53 = vor.u32 %v15862_v58, %v13076_v44  ;;  %v15828_v51 = vld [vmem:[%s17079_s13 + $0x14a4] sm:$0xf0]  ;;  %v13068_v8 = vld [vmem:[%s17079_s13 + $0x15a0] sm:$0xf]  ;;  %v15842_v44 = vld [vmem:[%s17079_s13 + $0x1514] sm:$0xf0] }
 0x1b6   : > { %8563 = vmatpush.bf16.msra.mxu1 %v12973_v12  ;;  %v13021_v12 = vor.u32 %v15848_v55, %v13020_v52  ;;  %v13004_v52 = vld [vmem:[%s17079_s13 + $0x1520] sm:$0xf]  ;;  %v15844_v55 = vld [vmem:[%s17079_s13 + $0x1524] sm:$0xf0]  ;;  %v8337_v59 = vpop.f32.mrf.mxu3  ;;  %v13060_v58 = vld [vmem:[%s17079_s13 + $0x1590] sm:$0xf] }
 0x1b7   : > { %8576 = vmatpush.bf16.msra.mxu2 %v13037_v18  ;;  %v12884_v18 = vld [vmem:[%s17079_s13 + $0x1430] sm:$0xf] }
 0x1b8   : > { %8589 = vmatpush.bf16.msra.mxu3 %v13101_v41  ;;  %v8312_v41 = vadd.f32 %v8311_v62, %v8299_v60  ;;  %v12885_v0 = vor.u32 %v15814_v25, %v12884_v18  ;;  %v15860_v60 = vld [vmem:[%s17079_s13 + $0x15a4] sm:$0xf0]  ;;  %v12941_v18 = vor.u32 %v15828_v51, %v12940_v2  ;;  %v13005_v25 = vor.u32 %v15844_v55, %v13004_v52  ;;  %v12988_v51 = vld [vmem:[%s17079_s13 + $0x1500] sm:$0xf] }
 0x1b9   : > { %8551 = vmatpush.bf16.msra.mxu0 %v12901_v1  ;;  %v12949_v1 = vor.u32 %v15830_v20, %v12948_v27  ;;  %v12868_v27 = vld [vmem:[%s17079_s13 + $0x1410] sm:$0xf]  ;;  %v13069_v20 = vor.u32 %v15860_v60, %v13068_v8  ;;  %v15824_v2 = vld [vmem:[%s17079_s13 + $0x1484] sm:$0xf0] }
 0x1ba   : > { %8564 = vmatpush.bf16.msra.mxu1 %v12965_v6  ;;  %v13013_v6 = vor.u32 %v15846_v15, %v13012_v37  ;;  %v15826_v37 = vld [vmem:[%s17079_s13 + $0x1494] sm:$0xf0]  ;;  %v12996_v15 = vld [vmem:[%s17079_s13 + $0x1510] sm:$0xf]  ;;  %v15840_v52 = vld [vmem:[%s17079_s13 + $0x1504] sm:$0xf0] }
 0x1bb   : > { %8577 = vmatpush.bf16.msra.mxu2 %v13029_v40  ;;  %v12876_v40 = vld [vmem:[%s17079_s13 + $0x1420] sm:$0xf]  ;;  %v15856_v8 = vld [vmem:[%s17079_s13 + $0x1584] sm:$0xf0] }
 0x1bc   : > { %8590 = vmatpush.bf16.msra.mxu3 %v13093_v49  ;;  %v8324_v49 = vpop.f32.mrf.mxu2  ;;  %v12877_v62 = vor.u32 %v15812_v48, %v12876_v40  ;;  %v15808_v40 = vld [vmem:[%s17079_s13 + $0x1404] sm:$0xf0]  ;;  %v12924_v48 = vld [vmem:[%s17079_s13 + $0x1480] sm:$0xf] }
 0x1bd   : > { %8552 = vmatpush.bf16.msra.mxu0 %v12893_v57  ;;  %v8325_v56 = vadd.f32 %v8324_v49, %v8312_v41  ;;  %v8300_v57 = vpop.f32.mrf.mxu0  ;;  %v12932_v41 = vld [vmem:[%s17079_s13 + $0x1490] sm:$0xf]  ;;  %v12997_v49 = vor.u32 %v15842_v44, %v12996_v15  ;;  %v450_v60 = vld [vmem:[%s17070_s27 + $0xa8] sm:$0xff]  ;;  %v12989_v44 = vor.u32 %v15840_v52, %v12988_v51  ;;  %v13292_v52 = vld [vmem:[%s17079_s13 + $0x1760] sm:$0xf] }
 0x1be   : > { %8565 = vmatpush.bf16.msra.mxu1 %v12957_v4  ;;  %v8313_v4 = vpop.f32.mrf.mxu1  ;;  %v449_v55 = vld [vmem:[%s17070_s27 + $0xa0] sm:$0xff]  ;;  %v15900_v51 = vld [vmem:[%s17079_s13 + $0x16e4] sm:$0xf0] }
 0x1bf   : > { %8578 = vmatpush.bf16.msra.mxu2 %v13021_v12  ;;  %v17951_v12 = vadd.f32 %v8337_v59, %v8325_v56  ;;  %v13052_v59 = vld [vmem:[%s17079_s13 + $0x1580] sm:$0xf]  ;;  %v15886_v4 = vld [vmem:[%s17079_s13 + $0x1674] sm:$0xf0]  ;;  %v1761_v15 = vunpack.c.l.b16 %v449_v55 }
 0x1c0   : > { %8591 = vmatpush.bf16.msra.mxu3 %v13085_v35  ;;  %v15810_v35 = vld [vmem:[%s17079_s13 + $0x1414] sm:$0xf0] }
 0x1c1   : > { %8553 = vmatpush.bf16.msra.mxu0 %v12885_v0  ;;  %v15858_v0 = vld [vmem:[%s17079_s13 + $0x1594] sm:$0xf0] }
 0x1c2   : > { %8566 = vmatpush.bf16.msra.mxu1 %v12949_v1  ;;  %v12860_v1 = vld [vmem:[%s17079_s13 + $0x1400] sm:$0xf]  ;;  %v13061_v56 = vor.u32 %v15858_v0, %v13060_v58  ;;  %v13364_v58 = vld [vmem:[%s17079_s13 + $0x17f0] sm:$0xf]  ;;  %v15934_v0 = vld [vmem:[%s17079_s13 + $0x17f4] sm:$0xf0] }
 0x1c3   : > { %8579 = vmatpush.bf16.msra.mxu2 %v13013_v6  ;;  %v12869_v6 = vor.u32 %v15810_v35, %v12868_v27  ;;  %v12861_v27 = vor.u32 %v15808_v40, %v12860_v1  ;;  %v15902_v35 = vld [vmem:[%s17079_s13 + $0x16f4] sm:$0xf0]  ;;  %v13053_v1 = vor.u32 %v15856_v8, %v13052_v59  ;;  %v1764_v40 = vunpack.c.h.b16 %v450_v60  ;;  %v13356_v59 = vld [vmem:[%s17079_s13 + $0x17e0] sm:$0xf]  ;;  %v15932_v8 = vld [vmem:[%s17079_s13 + $0x17e4] sm:$0xf0] }
 0x1c4   : > { %8592 = vmatpush.bf16.msra.mxu3 %v13077_v53  ;;  %v12933_v53 = vor.u32 %v15826_v37, %v12932_v41  ;;  %v8326_v57 = vpop.f32.mrf.mxu2  ;;  %v13300_v41 = vld [vmem:[%s17079_s13 + $0x1770] sm:$0xf]  ;;  %v15918_v37 = vld [vmem:[%s17079_s13 + $0x1774] sm:$0xf0] }
 0x1c5   : > { %8554 = vmatpush.bf16.msra.mxu0 %v12877_v62  ;;  %v13172_v62 = vld [vmem:[%s17079_s13 + $0x1670] sm:$0xf]  ;;  %v1763_v57 = vunpack.c.l.b16 %v450_v60  ;;  %v13301_v61 = vor.u32 %v15918_v37, %v13300_v41  ;;  %v17993_v60 = vpack.c.b16 %v1764_v40, %v1764_v40  ;;  %v13357_v37 = vor.u32 %v15932_v8, %v13356_v59  ;;  %v13276_v40 = vld [vmem:[%s17079_s13 + $0x1740] sm:$0xf] }
 0x1c6   : > { %8567 = vmatpush.bf16.msra.mxu1 %v12941_v18  ;;  %v13236_v18 = vld [vmem:[%s17079_s13 + $0x16f0] sm:$0xf] }
 0x1c7   : > { %8580 = vmatpush.bf16.msra.mxu2 %v13005_v25  ;;  %v8339_v25 = vpop.f32.mrf.mxu3  ;;  %v13237_v63 = vor.u32 %v15902_v35, %v13236_v18  ;;  %20162 = vst [vmem:[#allocation38_spill] sm:$0xff] %v17993_v60  ;;  %v13293_v18 = vor.u32 %v15916_v54, %v13292_v52  ;;  %v15882_v35 = vld [vmem:[%s17079_s13 + $0x1654] sm:$0xf0]  ;;  %v13220_v41 = vld [vmem:[%s17079_s13 + $0x16d0] sm:$0xf] }
 0x1c8   : > { %8593 = vmatpush.bf16.msra.mxu3 %v13069_v20  ;;  %v12925_v20 = vor.u32 %v15824_v2, %v12924_v48  ;;  %v1762_v25 = vunpack.c.h.b16 %v449_v55  ;;  %v13365_v48 = vor.u32 %v15934_v0, %v13364_v58  ;;  %v17982_v2 = vpack.c.b16 %v1761_v15, %v1761_v15  ;;  %v15898_v15 = vld [vmem:[%s17079_s13 + $0x16d4] sm:$0xf0]  ;;  %v13348_v54 = vld [vmem:[%s17079_s13 + $0x17d0] sm:$0xf]  ;;  %v13148_v0 = vld [vmem:[%s17079_s13 + $0x1640] sm:$0xf] }
 0x1c9   : > { %8555 = vmatpush.bf16.msra.mxu0 %v12869_v6  ;;  %v13173_v6 = vor.u32 %v15886_v4, %v13172_v62  ;;  %v17987_v55 = vpack.c.b16 %v1763_v57, %v1763_v57  ;;  %v15880_v57 = vld [vmem:[%s17079_s13 + $0x1644] sm:$0xf0] }
 0x1ca   : > { %8568 = vmatpush.bf16.msra.mxu1 %v12933_v53  ;;  %v13164_v53 = vld [vmem:[%s17079_s13 + $0x1660] sm:$0xf]  ;;  %20159 = vst [vmem:[#allocation35_spill] sm:$0xff] %v17982_v2  ;;  %v13149_v59 = vor.u32 %v15880_v57, %v13148_v0  ;;  %v15876_v0 = vld [vmem:[%s17079_s13 + $0x1624] sm:$0xf0] }
 0x1cb   : > { %8581 = vmatpush.bf16.msra.mxu2 %v12997_v49  ;;  %v13228_v49 = vld [vmem:[%s17079_s13 + $0x16e0] sm:$0xf]  ;;  %20160 = vst [vmem:[#allocation36_spill] sm:$0xff] %v17987_v55  ;;  %v13165_v62 = vor.u32 %v15884_v19, %v13164_v53  ;;  %v15930_v19 = vld [vmem:[%s17079_s13 + $0x17d4] sm:$0xf0] }
 0x1cc   : > { %8594 = vmatpush.bf16.msra.mxu3 %v13061_v56  ;;  %v17989_v56 = vpack.c.b16 %v1762_v25, %v1762_v25  ;;  %v13229_v4 = vor.u32 %v15900_v51, %v13228_v49  ;;  %v13212_v25 = vld [vmem:[%s17079_s13 + $0x16c0] sm:$0xf]  ;;  %v15912_v53 = vld [vmem:[%s17079_s13 + $0x1744] sm:$0xf0] }
 0x1cd   : > { %8556 = vmatpush.bf16.msra.mxu0 %v12861_v27  ;;  %v13156_v27 = vld [vmem:[%s17079_s13 + $0x1650] sm:$0xf]  ;;  %v8350_v49 = vpop.f32.mrf.mxu0  ;;  %v15928_v51 = vld [vmem:[%s17079_s13 + $0x17c4] sm:$0xf0]  ;;  %v13196_v57 = vld [vmem:[%s17079_s13 + $0x16a0] sm:$0xf] }
 0x1ce   : > { %8569 = vmatpush.bf16.msra.mxu1 %v12925_v20  ;;  %20161 = vst [vmem:[#allocation37_spill] sm:$0xff] %v17989_v56  ;;  %v13284_v20 = vld [vmem:[%s17079_s13 + $0x1750] sm:$0xf]  ;;  %v8351_v52 = vadd.f32 %v8350_v49, %v17951_v12  ;;  %v8363_v8 = vpop.f32.mrf.mxu1  ;;  %v15910_v12 = vld [vmem:[%s17079_s13 + $0x1734] sm:$0xf0] }
 0x1cf   : > { %8582 = vmatpush.bf16.msra.mxu2 %v12989_v44  ;;  %v15914_v44 = vld [vmem:[%s17079_s13 + $0x1754] sm:$0xf0] }
 0x1d0   : > { %8595 = vmatpush.bf16.msra.mxu3 %v13053_v1  ;;  %8557 = vmatmul.bf16.vlgmr.msra.gmra.mxu0 %v17982_v2  ;;  %v13285_v58 = vor.u32 %v15914_v44, %v13284_v20  ;;  %v13349_v1 = vor.u32 %v15930_v19, %v13348_v54  ;;  %v13268_v20 = vld [vmem:[%s17079_s13 + $0x1730] sm:$0xf]  ;;  %v15926_v54 = vld [vmem:[%s17079_s13 + $0x17b4] sm:$0xf0]  ;;  %v15980_v2 = vld [vmem:[%s17079_s13 + $0x1964] sm:$0xf0] }
 0x1d1   : > { %8601 = vmatpush.bf16.msrb.mxu0 %v13173_v6  ;;  %8570 = vmatmul.bf16.vlgmr.msra.gmra.mxu1 %v17989_v56  ;;  %v15896_v6 = vld [vmem:[%s17079_s13 + $0x16c4] sm:$0xf0]  ;;  %v13332_v44 = vld [vmem:[%s17079_s13 + $0x17b0] sm:$0xf] }
 0x1d2   : > { %8614 = vmatpush.bf16.msrb.mxu1 %v13237_v63  ;;  %8583 = vmatmul.bf16.vlgmr.msra.gmra.mxu2 %v17987_v55  ;;  %v13221_v63 = vor.u32 %v15898_v15, %v13220_v41  ;;  %v15894_v15 = vld [vmem:[%s17079_s13 + $0x16b4] sm:$0xf0]  ;;  %v15948_v55 = vld [vmem:[%s17079_s13 + $0x1864] sm:$0xf0] }
 0x1d3   : > { %8627 = vmatpush.bf16.msrb.mxu2 %v13301_v61  ;;  %8596 = vmatmul.bf16.vlgmr.msra.gmra.mxu3 %v17993_v60  ;;  %v13157_v61 = vor.u32 %v15882_v35, %v13156_v27  ;;  %v15878_v27 = vld [vmem:[%s17079_s13 + $0x1634] sm:$0xf0]  ;;  %v13204_v35 = vld [vmem:[%s17079_s13 + $0x16b0] sm:$0xf] }
 0x1d4   : > { %8640 = vmatpush.bf16.msrb.mxu3 %v13365_v48  ;;  %v13340_v48 = vld [vmem:[%s17079_s13 + $0x17c0] sm:$0xf] }
 0x1d5   : > { %8602 = vmatpush.bf16.msrb.mxu0 %v13165_v62  ;;  %v13213_v62 = vor.u32 %v15896_v6, %v13212_v25  ;;  %v13341_v41 = vor.u32 %v15928_v51, %v13340_v48  ;;  %v13333_v25 = vor.u32 %v15926_v54, %v13332_v44  ;;  %v15892_v6 = vld [vmem:[%s17079_s13 + $0x16a4] sm:$0xf0]  ;;  %v13324_v51 = vld [vmem:[%s17079_s13 + $0x17a0] sm:$0xf]  ;;  %v15906_v44 = vld [vmem:[%s17079_s13 + $0x1714] sm:$0xf0] }
 0x1d6   : > { %8615 = vmatpush.bf16.msrb.mxu1 %v13229_v4  ;;  %v13277_v4 = vor.u32 %v15912_v53, %v13276_v40  ;;  %v13260_v40 = vld [vmem:[%s17079_s13 + $0x1720] sm:$0xf]  ;;  %v15908_v53 = vld [vmem:[%s17079_s13 + $0x1724] sm:$0xf0]  ;;  %v8389_v48 = vpop.f32.mrf.mxu3  ;;  %v13316_v54 = vld [vmem:[%s17079_s13 + $0x1790] sm:$0xf] }
 0x1d7   : > { %8628 = vmatpush.bf16.msrb.mxu2 %v13293_v18  ;;  %v13140_v18 = vld [vmem:[%s17079_s13 + $0x1630] sm:$0xf] }
 0x1d8   : > { %8641 = vmatpush.bf16.msrb.mxu3 %v13357_v37  ;;  %v8364_v37 = vadd.f32 %v8363_v8, %v8351_v52  ;;  %v13141_v19 = vor.u32 %v15878_v27, %v13140_v18  ;;  %v15924_v52 = vld [vmem:[%s17079_s13 + $0x17a4] sm:$0xf0]  ;;  %v13197_v18 = vor.u32 %v15892_v6, %v13196_v57  ;;  %v13261_v27 = vor.u32 %v15908_v53, %v13260_v40  ;;  %v13244_v6 = vld [vmem:[%s17079_s13 + $0x1700] sm:$0xf] }
 0x1d9   : > { %8603 = vmatpush.bf16.msrb.mxu0 %v13157_v61  ;;  %v13205_v61 = vor.u32 %v15894_v15, %v13204_v35  ;;  %v13124_v35 = vld [vmem:[%s17079_s13 + $0x1610] sm:$0xf]  ;;  %v13325_v15 = vor.u32 %v15924_v52, %v13324_v51  ;;  %v15888_v57 = vld [vmem:[%s17079_s13 + $0x1684] sm:$0xf0] }
 0x1da   : > { %8616 = vmatpush.bf16.msrb.mxu1 %v13221_v63  ;;  %v13269_v63 = vor.u32 %v15910_v12, %v13268_v20  ;;  %v15890_v20 = vld [vmem:[%s17079_s13 + $0x1694] sm:$0xf0]  ;;  %v13252_v12 = vld [vmem:[%s17079_s13 + $0x1710] sm:$0xf]  ;;  %v15904_v40 = vld [vmem:[%s17079_s13 + $0x1704] sm:$0xf0] }
 0x1db   : > { %8629 = vmatpush.bf16.msrb.mxu2 %v13285_v58  ;;  %v13132_v58 = vld [vmem:[%s17079_s13 + $0x1620] sm:$0xf]  ;;  %v15920_v51 = vld [vmem:[%s17079_s13 + $0x1784] sm:$0xf0] }
 0x1dc   : > { %8642 = vmatpush.bf16.msrb.mxu3 %v13349_v1  ;;  %v8376_v1 = vpop.f32.mrf.mxu2  ;;  %v13133_v8 = vor.u32 %v15876_v0, %v13132_v58  ;;  %v15872_v58 = vld [vmem:[%s17079_s13 + $0x1604] sm:$0xf0]  ;;  %v13180_v0 = vld [vmem:[%s17079_s13 + $0x1680] sm:$0xf] }
 0x1dd   : > { %8604 = vmatpush.bf16.msrb.mxu0 %v13149_v59  ;;  %v8377_v49 = vadd.f32 %v8376_v1, %v8364_v37  ;;  %v8352_v59 = vpop.f32.mrf.mxu0  ;;  %v13188_v37 = vld [vmem:[%s17079_s13 + $0x1690] sm:$0xf]  ;;  %v13253_v1 = vor.u32 %v15906_v44, %v13252_v12  ;;  %v452_v52 = vld [vmem:[%s17070_s27 + $0xb8] sm:$0xff]  ;;  %v13245_v44 = vor.u32 %v15904_v40, %v13244_v6  ;;  %v13548_v40 = vld [vmem:[%s17079_s13 + $0x1960] sm:$0xf] }
 0x1de   : > { %8617 = vmatpush.bf16.msrb.mxu1 %v13213_v62  ;;  %v8365_v62 = vpop.f32.mrf.mxu1  ;;  %v451_v53 = vld [vmem:[%s17070_s27 + $0xb0] sm:$0xff]  ;;  %v15964_v6 = vld [vmem:[%s17079_s13 + $0x18e4] sm:$0xf0] }
 0x1df   : > { %8630 = vmatpush.bf16.msrb.mxu2 %v13277_v4  ;;  %v18032_v4 = vadd.f32 %v8389_v48, %v8377_v49  ;;  %v13308_v48 = vld [vmem:[%s17079_s13 + $0x1780] sm:$0xf]  ;;  %v15950_v62 = vld [vmem:[%s17079_s13 + $0x1874] sm:$0xf0]  ;;  %v1765_v12 = vunpack.c.l.b16 %v451_v53 }
 0x1e0   : > { %8643 = vmatpush.bf16.msrb.mxu3 %v13341_v41  ;;  %v15874_v41 = vld [vmem:[%s17079_s13 + $0x1614] sm:$0xf0] }
 0x1e1   : > { %8605 = vmatpush.bf16.msrb.mxu0 %v13141_v19  ;;  %v15922_v19 = vld [vmem:[%s17079_s13 + $0x1794] sm:$0xf0] }
 0x1e2   : > { %8618 = vmatpush.bf16.msrb.mxu1 %v13205_v61  ;;  %v13116_v61 = vld [vmem:[%s17079_s13 + $0x1600] sm:$0xf]  ;;  %v13317_v49 = vor.u32 %v15922_v19, %v13316_v54  ;;  %v13620_v54 = vld [vmem:[%s17079_s13 + $0x19f0] sm:$0xf]  ;;  %v15998_v19 = vld [vmem:[%s17079_s13 + $0x19f4] sm:$0xf0] }
 0x1e3   : > { %8631 = vmatpush.bf16.msrb.mxu2 %v13269_v63  ;;  %v13125_v63 = vor.u32 %v15874_v41, %v13124_v35  ;;  %v13117_v35 = vor.u32 %v15872_v58, %v13116_v61  ;;  %v15966_v41 = vld [vmem:[%s17079_s13 + $0x18f4] sm:$0xf0]  ;;  %v13309_v61 = vor.u32 %v15920_v51, %v13308_v48  ;;  %v1768_v58 = vunpack.c.h.b16 %v452_v52  ;;  %v13612_v48 = vld [vmem:[%s17079_s13 + $0x19e0] sm:$0xf]  ;;  %v15996_v51 = vld [vmem:[%s17079_s13 + $0x19e4] sm:$0xf0] }
 0x1e4   : > { %8644 = vmatpush.bf16.msrb.mxu3 %v13333_v25  ;;  %v13189_v25 = vor.u32 %v15890_v20, %v13188_v37  ;;  %v8378_v59 = vpop.f32.mrf.mxu2  ;;  %v13556_v37 = vld [vmem:[%s17079_s13 + $0x1970] sm:$0xf]  ;;  %v15982_v20 = vld [vmem:[%s17079_s13 + $0x1974] sm:$0xf0] }
 0x1e5   : > { %8606 = vmatpush.bf16.msrb.mxu0 %v13133_v8  ;;  %v13428_v8 = vld [vmem:[%s17079_s13 + $0x1870] sm:$0xf]  ;;  %v1767_v59 = vunpack.c.l.b16 %v452_v52  ;;  %v13557_v56 = vor.u32 %v15982_v20, %v13556_v37  ;;  %v18074_v52 = vpack.c.b16 %v1768_v58, %v1768_v58  ;;  %v13613_v20 = vor.u32 %v15996_v51, %v13612_v48  ;;  %v13532_v58 = vld [vmem:[%s17079_s13 + $0x1940] sm:$0xf] }
 0x1e6   : > { %8619 = vmatpush.bf16.msrb.mxu1 %v13197_v18  ;;  %v13492_v18 = vld [vmem:[%s17079_s13 + $0x18f0] sm:$0xf] }
 0x1e7   : > { %8632 = vmatpush.bf16.msrb.mxu2 %v13261_v27  ;;  %v8391_v27 = vpop.f32.mrf.mxu3  ;;  %v13493_v60 = vor.u32 %v15966_v41, %v13492_v18  ;;  %20166 = vst [vmem:[#allocation42_spill] sm:$0xff] %v18074_v52  ;;  %v13549_v18 = vor.u32 %v15980_v2, %v13548_v40  ;;  %v15946_v41 = vld [vmem:[%s17079_s13 + $0x1854] sm:$0xf0]  ;;  %v13476_v37 = vld [vmem:[%s17079_s13 + $0x18d0] sm:$0xf] }
 0x1e8   : > { %8645 = vmatpush.bf16.msrb.mxu3 %v13325_v15  ;;  %v13181_v15 = vor.u32 %v15888_v57, %v13180_v0  ;;  %v1766_v27 = vunpack.c.h.b16 %v451_v53  ;;  %v13621_v0 = vor.u32 %v15998_v19, %v13620_v54  ;;  %v18063_v57 = vpack.c.b16 %v1765_v12, %v1765_v12  ;;  %v15962_v12 = vld [vmem:[%s17079_s13 + $0x18d4] sm:$0xf0]  ;;  %v13604_v2 = vld [vmem:[%s17079_s13 + $0x19d0] sm:$0xf]  ;;  %v13404_v19 = vld [vmem:[%s17079_s13 + $0x1840] sm:$0xf] }
 0x1e9   : > { %8607 = vmatpush.bf16.msrb.mxu0 %v13125_v63  ;;  %v13429_v63 = vor.u32 %v15950_v62, %v13428_v8  ;;  %v18068_v53 = vpack.c.b16 %v1767_v59, %v1767_v59  ;;  %v15944_v59 = vld [vmem:[%s17079_s13 + $0x1844] sm:$0xf0] }
 0x1ea   : > { %8620 = vmatpush.bf16.msrb.mxu1 %v13189_v25  ;;  %v13420_v25 = vld [vmem:[%s17079_s13 + $0x1860] sm:$0xf]  ;;  %20163 = vst [vmem:[#allocation39_spill] sm:$0xff] %v18063_v57  ;;  %v13405_v48 = vor.u32 %v15944_v59, %v13404_v19  ;;  %v15940_v19 = vld [vmem:[%s17079_s13 + $0x1824] sm:$0xf0] }
 0x1eb   : > { %8633 = vmatpush.bf16.msrb.mxu2 %v13253_v1  ;;  %v13484_v1 = vld [vmem:[%s17079_s13 + $0x18e0] sm:$0xf]  ;;  %20164 = vst [vmem:[#allocation40_spill] sm:$0xff] %v18068_v53  ;;  %v13421_v8 = vor.u32 %v15948_v55, %v13420_v25  ;;  %v15994_v55 = vld [vmem:[%s17079_s13 + $0x19d4] sm:$0xf0] }
 0x1ec   : > { %8646 = vmatpush.bf16.msrb.mxu3 %v13317_v49  ;;  %v18070_v49 = vpack.c.b16 %v1766_v27, %v1766_v27  ;;  %v13485_v62 = vor.u32 %v15964_v6, %v13484_v1  ;;  %v13468_v27 = vld [vmem:[%s17079_s13 + $0x18c0] sm:$0xf]  ;;  %v15976_v25 = vld [vmem:[%s17079_s13 + $0x1944] sm:$0xf0] }
 0x1ed   : > { %8608 = vmatpush.bf16.msrb.mxu0 %v13117_v35  ;;  %v13412_v35 = vld [vmem:[%s17079_s13 + $0x1850] sm:$0xf]  ;;  %v8402_v1 = vpop.f32.mrf.mxu0  ;;  %v15992_v6 = vld [vmem:[%s17079_s13 + $0x19c4] sm:$0xf0]  ;;  %v13452_v59 = vld [vmem:[%s17079_s13 + $0x18a0] sm:$0xf] }
 0x1ee   : > { %8621 = vmatpush.bf16.msrb.mxu1 %v13181_v15  ;;  %20165 = vst [vmem:[#allocation41_spill] sm:$0xff] %v18070_v49  ;;  %v13540_v15 = vld [vmem:[%s17079_s13 + $0x1950] sm:$0xf]  ;;  %v8403_v40 = vadd.f32 %v8402_v1, %v18032_v4  ;;  %v8415_v51 = vpop.f32.mrf.mxu1  ;;  %v15974_v4 = vld [vmem:[%s17079_s13 + $0x1934] sm:$0xf0] }
 0x1ef   : > { %8634 = vmatpush.bf16.msrb.mxu2 %v13245_v44  ;;  %v15978_v44 = vld [vmem:[%s17079_s13 + $0x1954] sm:$0xf0] }
 0x1f0   : > { %8647 = vmatpush.bf16.msrb.mxu3 %v13309_v61  ;;  %8609 = vmatmul.bf16.vlgmr.msrb.gmra.mxu0 %v18063_v57  ;;  %v13541_v54 = vor.u32 %v15978_v44, %v13540_v15  ;;  %v13605_v61 = vor.u32 %v15994_v55, %v13604_v2  ;;  %v13524_v15 = vld [vmem:[%s17079_s13 + $0x1930] sm:$0xf]  ;;  %v15990_v2 = vld [vmem:[%s17079_s13 + $0x19b4] sm:$0xf0]  ;;  %v16044_v57 = vld [vmem:[%s17079_s13 + $0x1b64] sm:$0xf0] }
 0x1f1   : > { %8653 = vmatpush.bf16.msra.mxu0 %v13429_v63  ;;  %8622 = vmatmul.bf16.vlgmr.msrb.gmra.mxu1 %v18070_v49  ;;  %v15960_v63 = vld [vmem:[%s17079_s13 + $0x18c4] sm:$0xf0]  ;;  %v13588_v44 = vld [vmem:[%s17079_s13 + $0x19b0] sm:$0xf] }
 0x1f2   : > { %8666 = vmatpush.bf16.msra.mxu1 %v13493_v60  ;;  %8635 = vmatmul.bf16.vlgmr.msrb.gmra.mxu2 %v18068_v53  ;;  %v13477_v60 = vor.u32 %v15962_v12, %v13476_v37  ;;  %v15958_v12 = vld [vmem:[%s17079_s13 + $0x18b4] sm:$0xf0]  ;;  %v16012_v53 = vld [vmem:[%s17079_s13 + $0x1a64] sm:$0xf0] }
 0x1f3   : > { %8679 = vmatpush.bf16.msra.mxu2 %v13557_v56  ;;  %8648 = vmatmul.bf16.vlgmr.msrb.gmra.mxu3 %v18074_v52  ;;  %v13413_v56 = vor.u32 %v15946_v41, %v13412_v35  ;;  %v15942_v35 = vld [vmem:[%s17079_s13 + $0x1834] sm:$0xf0]  ;;  %v13460_v41 = vld [vmem:[%s17079_s13 + $0x18b0] sm:$0xf] }
 0x1f4   : > { %8692 = vmatpush.bf16.msra.mxu3 %v13621_v0  ;;  %v13596_v0 = vld [vmem:[%s17079_s13 + $0x19c0] sm:$0xf] }
 0x1f5   : > { %8654 = vmatpush.bf16.msra.mxu0 %v13421_v8  ;;  %v13469_v8 = vor.u32 %v15960_v63, %v13468_v27  ;;  %v13597_v37 = vor.u32 %v15992_v6, %v13596_v0  ;;  %v13589_v27 = vor.u32 %v15990_v2, %v13588_v44  ;;  %v15956_v63 = vld [vmem:[%s17079_s13 + $0x18a4] sm:$0xf0]  ;;  %v13580_v6 = vld [vmem:[%s17079_s13 + $0x19a0] sm:$0xf]  ;;  %v15970_v44 = vld [vmem:[%s17079_s13 + $0x1914] sm:$0xf0] }
 0x1f6   : > { %8667 = vmatpush.bf16.msra.mxu1 %v13485_v62  ;;  %v13533_v62 = vor.u32 %v15976_v25, %v13532_v58  ;;  %v13516_v58 = vld [vmem:[%s17079_s13 + $0x1920] sm:$0xf]  ;;  %v15972_v25 = vld [vmem:[%s17079_s13 + $0x1924] sm:$0xf0]  ;;  %v8441_v0 = vpop.f32.mrf.mxu3  ;;  %v13572_v2 = vld [vmem:[%s17079_s13 + $0x1990] sm:$0xf] }
 0x1f7   : > { %8680 = vmatpush.bf16.msra.mxu2 %v13549_v18  ;;  %v13396_v18 = vld [vmem:[%s17079_s13 + $0x1830] sm:$0xf] }
 0x1f8   : > { %8693 = vmatpush.bf16.msra.mxu3 %v13613_v20  ;;  %v8416_v20 = vadd.f32 %v8415_v51, %v8403_v40  ;;  %v13397_v55 = vor.u32 %v15942_v35, %v13396_v18  ;;  %v15988_v40 = vld [vmem:[%s17079_s13 + $0x19a4] sm:$0xf0]  ;;  %v13453_v18 = vor.u32 %v15956_v63, %v13452_v59  ;;  %v13517_v35 = vor.u32 %v15972_v25, %v13516_v58  ;;  %v13500_v63 = vld [vmem:[%s17079_s13 + $0x1900] sm:$0xf] }
 0x1f9   : > { %8655 = vmatpush.bf16.msra.mxu0 %v13413_v56  ;;  %v13461_v56 = vor.u32 %v15958_v12, %v13460_v41  ;;  %v13380_v41 = vld [vmem:[%s17079_s13 + $0x1810] sm:$0xf]  ;;  %v13581_v12 = vor.u32 %v15988_v40, %v13580_v6  ;;  %v15952_v59 = vld [vmem:[%s17079_s13 + $0x1884] sm:$0xf0] }
 0x1fa   : > { %8668 = vmatpush.bf16.msra.mxu1 %v13477_v60  ;;  %v13525_v60 = vor.u32 %v15974_v4, %v13524_v15  ;;  %v15954_v15 = vld [vmem:[%s17079_s13 + $0x1894] sm:$0xf0]  ;;  %v13508_v4 = vld [vmem:[%s17079_s13 + $0x1910] sm:$0xf]  ;;  %v15968_v58 = vld [vmem:[%s17079_s13 + $0x1904] sm:$0xf0] }
 0x1fb   : > { %8681 = vmatpush.bf16.msra.mxu2 %v13541_v54  ;;  %v13388_v54 = vld [vmem:[%s17079_s13 + $0x1820] sm:$0xf]  ;;  %v15984_v6 = vld [vmem:[%s17079_s13 + $0x1984] sm:$0xf0] }
 0x1fc   : > { %8694 = vmatpush.bf16.msra.mxu3 %v13605_v61  ;;  %v8428_v61 = vpop.f32.mrf.mxu2  ;;  %v13389_v51 = vor.u32 %v15940_v19, %v13388_v54  ;;  %v15936_v54 = vld [vmem:[%s17079_s13 + $0x1804] sm:$0xf0]  ;;  %v13436_v19 = vld [vmem:[%s17079_s13 + $0x1880] sm:$0xf] }
 0x1fd   : > { %8656 = vmatpush.bf16.msra.mxu0 %v13405_v48  ;;  %v8429_v1 = vadd.f32 %v8428_v61, %v8416_v20  ;;  %v8404_v48 = vpop.f32.mrf.mxu0  ;;  %v13444_v20 = vld [vmem:[%s17079_s13 + $0x1890] sm:$0xf]  ;;  %v13509_v61 = vor.u32 %v15970_v44, %v13508_v4  ;;  %v454_v40 = vld [vmem:[%s17070_s27 + $0xc8] sm:$0xff]  ;;  %v13501_v44 = vor.u32 %v15968_v58, %v13500_v63  ;;  %v13804_v58 = vld [vmem:[%s17079_s13 + $0x1b60] sm:$0xf] }
 0x1fe   : > { %8669 = vmatpush.bf16.msra.mxu1 %v13469_v8  ;;  %v8417_v8 = vpop.f32.mrf.mxu1  ;;  %v453_v25 = vld [vmem:[%s17070_s27 + $0xc0] sm:$0xff]  ;;  %v16028_v63 = vld [vmem:[%s17079_s13 + $0x1ae4] sm:$0xf0] }
 0x1ff   : > { %8682 = vmatpush.bf16.msra.mxu2 %v13533_v62  ;;  %v18113_v62 = vadd.f32 %v8441_v0, %v8429_v1  ;;  %v13564_v0 = vld [vmem:[%s17079_s13 + $0x1980] sm:$0xf]  ;;  %v16014_v8 = vld [vmem:[%s17079_s13 + $0x1a74] sm:$0xf0]  ;;  %v1769_v4 = vunpack.c.l.b16 %v453_v25 }
 0x200   : > { %8695 = vmatpush.bf16.msra.mxu3 %v13597_v37  ;;  %v15938_v37 = vld [vmem:[%s17079_s13 + $0x1814] sm:$0xf0] }
 0x201   : > { %8657 = vmatpush.bf16.msra.mxu0 %v13397_v55  ;;  %v15986_v55 = vld [vmem:[%s17079_s13 + $0x1994] sm:$0xf0] }
 0x202   : > { %8670 = vmatpush.bf16.msra.mxu1 %v13461_v56  ;;  %v13372_v56 = vld [vmem:[%s17079_s13 + $0x1800] sm:$0xf]  ;;  %v13573_v1 = vor.u32 %v15986_v55, %v13572_v2  ;;  %v13876_v2 = vld [vmem:[%s17079_s13 + $0x1bf0] sm:$0xf]  ;;  %v16062_v55 = vld [vmem:[%s17079_s13 + $0x1bf4] sm:$0xf0] }
 0x203   : > { %8683 = vmatpush.bf16.msra.mxu2 %v13525_v60  ;;  %v13381_v60 = vor.u32 %v15938_v37, %v13380_v41  ;;  %v13373_v41 = vor.u32 %v15936_v54, %v13372_v56  ;;  %v16030_v37 = vld [vmem:[%s17079_s13 + $0x1af4] sm:$0xf0]  ;;  %v13565_v56 = vor.u32 %v15984_v6, %v13564_v0  ;;  %v1772_v54 = vunpack.c.h.b16 %v454_v40  ;;  %v13868_v0 = vld [vmem:[%s17079_s13 + $0x1be0] sm:$0xf]  ;;  %v16060_v6 = vld [vmem:[%s17079_s13 + $0x1be4] sm:$0xf0] }
 0x204   : > { %8696 = vmatpush.bf16.msra.mxu3 %v13589_v27  ;;  %v13445_v27 = vor.u32 %v15954_v15, %v13444_v20  ;;  %v8430_v48 = vpop.f32.mrf.mxu2  ;;  %v13812_v20 = vld [vmem:[%s17079_s13 + $0x1b70] sm:$0xf]  ;;  %v16046_v15 = vld [vmem:[%s17079_s13 + $0x1b74] sm:$0xf0] }
 0x205   : > { %8658 = vmatpush.bf16.msra.mxu0 %v13389_v51  ;;  %v13684_v51 = vld [vmem:[%s17079_s13 + $0x1a70] sm:$0xf]  ;;  %v1771_v48 = vunpack.c.l.b16 %v454_v40  ;;  %v13813_v49 = vor.u32 %v16046_v15, %v13812_v20  ;;  %v18155_v40 = vpack.c.b16 %v1772_v54, %v1772_v54  ;;  %v13869_v15 = vor.u32 %v16060_v6, %v13868_v0  ;;  %v13788_v54 = vld [vmem:[%s17079_s13 + $0x1b40] sm:$0xf] }
 0x206   : > { %8671 = vmatpush.bf16.msra.mxu1 %v13453_v18  ;;  %v13748_v18 = vld [vmem:[%s17079_s13 + $0x1af0] sm:$0xf] }
 0x207   : > { %8684 = vmatpush.bf16.msra.mxu2 %v13517_v35  ;;  %v8443_v35 = vpop.f32.mrf.mxu3  ;;  %v13749_v52 = vor.u32 %v16030_v37, %v13748_v18  ;;  %20170 = vst [vmem:[#allocation46_spill] sm:$0xff] %v18155_v40  ;;  %v13805_v18 = vor.u32 %v16044_v57, %v13804_v58  ;;  %v16010_v37 = vld [vmem:[%s17079_s13 + $0x1a54] sm:$0xf0]  ;;  %v13732_v20 = vld [vmem:[%s17079_s13 + $0x1ad0] sm:$0xf] }
 0x208   : > { %8697 = vmatpush.bf16.msra.mxu3 %v13581_v12  ;;  %v13437_v12 = vor.u32 %v15952_v59, %v13436_v19  ;;  %v1770_v35 = vunpack.c.h.b16 %v453_v25  ;;  %v13877_v19 = vor.u32 %v16062_v55, %v13876_v2  ;;  %v18144_v59 = vpack.c.b16 %v1769_v4, %v1769_v4  ;;  %v16026_v4 = vld [vmem:[%s17079_s13 + $0x1ad4] sm:$0xf0]  ;;  %v13860_v57 = vld [vmem:[%s17079_s13 + $0x1bd0] sm:$0xf]  ;;  %v13660_v55 = vld [vmem:[%s17079_s13 + $0x1a40] sm:$0xf] }
 0x209   : > { %8659 = vmatpush.bf16.msra.mxu0 %v13381_v60  ;;  %v13685_v60 = vor.u32 %v16014_v8, %v13684_v51  ;;  %v18149_v25 = vpack.c.b16 %v1771_v48, %v1771_v48  ;;  %v16008_v48 = vld [vmem:[%s17079_s13 + $0x1a44] sm:$0xf0] }
 0x20a   : > { %8672 = vmatpush.bf16.msra.mxu1 %v13445_v27  ;;  %v13676_v27 = vld [vmem:[%s17079_s13 + $0x1a60] sm:$0xf]  ;;  %20167 = vst [vmem:[#allocation43_spill] sm:$0xff] %v18144_v59  ;;  %v13661_v0 = vor.u32 %v16008_v48, %v13660_v55  ;;  %v16004_v55 = vld [vmem:[%s17079_s13 + $0x1a24] sm:$0xf0] }
 0x20b   : > { %8685 = vmatpush.bf16.msra.mxu2 %v13509_v61  ;;  %v13740_v61 = vld [vmem:[%s17079_s13 + $0x1ae0] sm:$0xf]  ;;  %20168 = vst [vmem:[#allocation44_spill] sm:$0xff] %v18149_v25  ;;  %v13677_v51 = vor.u32 %v16012_v53, %v13676_v27  ;;  %v16058_v53 = vld [vmem:[%s17079_s13 + $0x1bd4] sm:$0xf0] }
 0x20c   : > { %8698 = vmatpush.bf16.msra.mxu3 %v13573_v1  ;;  %v18151_v1 = vpack.c.b16 %v1770_v35, %v1770_v35  ;;  %v13741_v8 = vor.u32 %v16028_v63, %v13740_v61  ;;  %v13724_v35 = vld [vmem:[%s17079_s13 + $0x1ac0] sm:$0xf]  ;;  %v16040_v27 = vld [vmem:[%s17079_s13 + $0x1b44] sm:$0xf0] }
 0x20d   : > { %8660 = vmatpush.bf16.msra.mxu0 %v13373_v41  ;;  %v13668_v41 = vld [vmem:[%s17079_s13 + $0x1a50] sm:$0xf]  ;;  %v8454_v61 = vpop.f32.mrf.mxu0  ;;  %v16056_v63 = vld [vmem:[%s17079_s13 + $0x1bc4] sm:$0xf0]  ;;  %v13708_v48 = vld [vmem:[%s17079_s13 + $0x1aa0] sm:$0xf] }
 0x20e   : > { %8673 = vmatpush.bf16.msra.mxu1 %v13437_v12  ;;  %20169 = vst [vmem:[#allocation45_spill] sm:$0xff] %v18151_v1  ;;  %v13796_v12 = vld [vmem:[%s17079_s13 + $0x1b50] sm:$0xf]  ;;  %v8455_v58 = vadd.f32 %v8454_v61, %v18113_v62  ;;  %v8467_v6 = vpop.f32.mrf.mxu1  ;;  %v16038_v62 = vld [vmem:[%s17079_s13 + $0x1b34] sm:$0xf0] }
 0x20f   : > { %8686 = vmatpush.bf16.msra.mxu2 %v13501_v44  ;;  %v16042_v44 = vld [vmem:[%s17079_s13 + $0x1b54] sm:$0xf0] }
 0x210   : > { %8699 = vmatpush.bf16.msra.mxu3 %v13565_v56  ;;  %8661 = vmatmul.bf16.vlgmr.msra.gmra.mxu0 %v18144_v59  ;;  %v13797_v2 = vor.u32 %v16042_v44, %v13796_v12  ;;  %v13861_v56 = vor.u32 %v16058_v53, %v13860_v57  ;;  %v13780_v12 = vld [vmem:[%s17079_s13 + $0x1b30] sm:$0xf]  ;;  %v16054_v57 = vld [vmem:[%s17079_s13 + $0x1bb4] sm:$0xf0]  ;;  %v16108_v59 = vld [vmem:[%s17079_s13 + $0x1d64] sm:$0xf0] }
 0x211   : > { %8705 = vmatpush.bf16.msrb.mxu0 %v13685_v60  ;;  %8674 = vmatmul.bf16.vlgmr.msra.gmra.mxu1 %v18151_v1  ;;  %v16024_v60 = vld [vmem:[%s17079_s13 + $0x1ac4] sm:$0xf0]  ;;  %v13844_v44 = vld [vmem:[%s17079_s13 + $0x1bb0] sm:$0xf] }
 0x212   : > { %8718 = vmatpush.bf16.msrb.mxu1 %v13749_v52  ;;  %8687 = vmatmul.bf16.vlgmr.msra.gmra.mxu2 %v18149_v25  ;;  %v13733_v52 = vor.u32 %v16026_v4, %v13732_v20  ;;  %v16022_v4 = vld [vmem:[%s17079_s13 + $0x1ab4] sm:$0xf0]  ;;  %v16076_v25 = vld [vmem:[%s17079_s13 + $0x1c64] sm:$0xf0] }
 0x213   : > { %8731 = vmatpush.bf16.msrb.mxu2 %v13813_v49  ;;  %8700 = vmatmul.bf16.vlgmr.msra.gmra.mxu3 %v18155_v40  ;;  %v13669_v49 = vor.u32 %v16010_v37, %v13668_v41  ;;  %v16006_v41 = vld [vmem:[%s17079_s13 + $0x1a34] sm:$0xf0]  ;;  %v13716_v37 = vld [vmem:[%s17079_s13 + $0x1ab0] sm:$0xf] }
 0x214   : > { %8744 = vmatpush.bf16.msrb.mxu3 %v13877_v19  ;;  %v13852_v19 = vld [vmem:[%s17079_s13 + $0x1bc0] sm:$0xf] }
 0x215   : > { %8706 = vmatpush.bf16.msrb.mxu0 %v13677_v51  ;;  %v13725_v51 = vor.u32 %v16024_v60, %v13724_v35  ;;  %v13853_v20 = vor.u32 %v16056_v63, %v13852_v19  ;;  %v13845_v35 = vor.u32 %v16054_v57, %v13844_v44  ;;  %v16020_v60 = vld [vmem:[%s17079_s13 + $0x1aa4] sm:$0xf0]  ;;  %v13836_v63 = vld [vmem:[%s17079_s13 + $0x1ba0] sm:$0xf]  ;;  %v16034_v44 = vld [vmem:[%s17079_s13 + $0x1b14] sm:$0xf0] }
 0x216   : > { %8719 = vmatpush.bf16.msrb.mxu1 %v13741_v8  ;;  %v13789_v8 = vor.u32 %v16040_v27, %v13788_v54  ;;  %v13772_v54 = vld [vmem:[%s17079_s13 + $0x1b20] sm:$0xf]  ;;  %v16036_v27 = vld [vmem:[%s17079_s13 + $0x1b24] sm:$0xf0]  ;;  %v8493_v19 = vpop.f32.mrf.mxu3  ;;  %v13828_v57 = vld [vmem:[%s17079_s13 + $0x1b90] sm:$0xf] }
 0x217   : > { %8732 = vmatpush.bf16.msrb.mxu2 %v13805_v18  ;;  %v13652_v18 = vld [vmem:[%s17079_s13 + $0x1a30] sm:$0xf] }
 0x218   : > { %8745 = vmatpush.bf16.msrb.mxu3 %v13869_v15  ;;  %v8468_v15 = vadd.f32 %v8467_v6, %v8455_v58  ;;  %v13653_v53 = vor.u32 %v16006_v41, %v13652_v18  ;;  %v16052_v58 = vld [vmem:[%s17079_s13 + $0x1ba4] sm:$0xf0]  ;;  %v13709_v18 = vor.u32 %v16020_v60, %v13708_v48  ;;  %v13773_v41 = vor.u32 %v16036_v27, %v13772_v54  ;;  %v13756_v60 = vld [vmem:[%s17079_s13 + $0x1b00] sm:$0xf] }
 0x219   : > { %8707 = vmatpush.bf16.msrb.mxu0 %v13669_v49  ;;  %v13717_v49 = vor.u32 %v16022_v4, %v13716_v37  ;;  %v13636_v37 = vld [vmem:[%s17079_s13 + $0x1a10] sm:$0xf]  ;;  %v13837_v4 = vor.u32 %v16052_v58, %v13836_v63  ;;  %v16016_v48 = vld [vmem:[%s17079_s13 + $0x1a84] sm:$0xf0] }
 0x21a   : > { %8720 = vmatpush.bf16.msrb.mxu1 %v13733_v52  ;;  %v13781_v52 = vor.u32 %v16038_v62, %v13780_v12  ;;  %v16018_v12 = vld [vmem:[%s17079_s13 + $0x1a94] sm:$0xf0]  ;;  %v13764_v62 = vld [vmem:[%s17079_s13 + $0x1b10] sm:$0xf]  ;;  %v16032_v54 = vld [vmem:[%s17079_s13 + $0x1b04] sm:$0xf0] }
 0x21b   : > { %8733 = vmatpush.bf16.msrb.mxu2 %v13797_v2  ;;  %v13644_v2 = vld [vmem:[%s17079_s13 + $0x1a20] sm:$0xf]  ;;  %v16048_v63 = vld [vmem:[%s17079_s13 + $0x1b84] sm:$0xf0] }
 0x21c   : > { %8746 = vmatpush.bf16.msrb.mxu3 %v13861_v56  ;;  %v8480_v56 = vpop.f32.mrf.mxu2  ;;  %v13645_v6 = vor.u32 %v16004_v55, %v13644_v2  ;;  %v16000_v2 = vld [vmem:[%s17079_s13 + $0x1a04] sm:$0xf0]  ;;  %v13692_v55 = vld [vmem:[%s17079_s13 + $0x1a80] sm:$0xf] }
 0x21d   : > { %8708 = vmatpush.bf16.msrb.mxu0 %v13661_v0  ;;  %v8481_v61 = vadd.f32 %v8480_v56, %v8468_v15  ;;  %v8456_v0 = vpop.f32.mrf.mxu0  ;;  %v13700_v15 = vld [vmem:[%s17079_s13 + $0x1a90] sm:$0xf]  ;;  %v13765_v56 = vor.u32 %v16034_v44, %v13764_v62  ;;  %v456_v58 = vld [vmem:[%s17070_s27 + $0xd8] sm:$0xff]  ;;  %v13757_v44 = vor.u32 %v16032_v54, %v13756_v60  ;;  %v14060_v54 = vld [vmem:[%s17079_s13 + $0x1d60] sm:$0xf] }
 0x21e   : > { %8721 = vmatpush.bf16.msrb.mxu1 %v13725_v51  ;;  %v8469_v51 = vpop.f32.mrf.mxu1  ;;  %v455_v27 = vld [vmem:[%s17070_s27 + $0xd0] sm:$0xff]  ;;  %v16092_v60 = vld [vmem:[%s17079_s13 + $0x1ce4] sm:$0xf0] }
 0x21f   : > { %8734 = vmatpush.bf16.msrb.mxu2 %v13789_v8  ;;  %v18194_v8 = vadd.f32 %v8493_v19, %v8481_v61  ;;  %v13820_v19 = vld [vmem:[%s17079_s13 + $0x1b80] sm:$0xf]  ;;  %v16078_v51 = vld [vmem:[%s17079_s13 + $0x1c74] sm:$0xf0]  ;;  %v1773_v62 = vunpack.c.l.b16 %v455_v27 }
 0x220   : > { %8747 = vmatpush.bf16.msrb.mxu3 %v13853_v20  ;;  %v16002_v20 = vld [vmem:[%s17079_s13 + $0x1a14] sm:$0xf0] }
 0x221   : > { %8709 = vmatpush.bf16.msrb.mxu0 %v13653_v53  ;;  %v16050_v53 = vld [vmem:[%s17079_s13 + $0x1b94] sm:$0xf0] }
 0x222   : > { %8722 = vmatpush.bf16.msrb.mxu1 %v13717_v49  ;;  %v13628_v49 = vld [vmem:[%s17079_s13 + $0x1a00] sm:$0xf]  ;;  %v13829_v61 = vor.u32 %v16050_v53, %v13828_v57  ;;  %v14132_v57 = vld [vmem:[%s17079_s13 + $0x1df0] sm:$0xf]  ;;  %v16126_v53 = vld [vmem:[%s17079_s13 + $0x1df4] sm:$0xf0] }
 0x223   : > { %8735 = vmatpush.bf16.msrb.mxu2 %v13781_v52  ;;  %v13637_v52 = vor.u32 %v16002_v20, %v13636_v37  ;;  %v13629_v37 = vor.u32 %v16000_v2, %v13628_v49  ;;  %v16094_v20 = vld [vmem:[%s17079_s13 + $0x1cf4] sm:$0xf0]  ;;  %v13821_v49 = vor.u32 %v16048_v63, %v13820_v19  ;;  %v1776_v2 = vunpack.c.h.b16 %v456_v58  ;;  %v14124_v19 = vld [vmem:[%s17079_s13 + $0x1de0] sm:$0xf]  ;;  %v16124_v63 = vld [vmem:[%s17079_s13 + $0x1de4] sm:$0xf0] }
 0x224   : > { %8748 = vmatpush.bf16.msrb.mxu3 %v13845_v35  ;;  %v13701_v35 = vor.u32 %v16018_v12, %v13700_v15  ;;  %v8482_v0 = vpop.f32.mrf.mxu2  ;;  %v14068_v15 = vld [vmem:[%s17079_s13 + $0x1d70] sm:$0xf]  ;;  %v16110_v12 = vld [vmem:[%s17079_s13 + $0x1d74] sm:$0xf0] }
 0x225   : > { %8710 = vmatpush.bf16.msrb.mxu0 %v13645_v6  ;;  %v13940_v6 = vld [vmem:[%s17079_s13 + $0x1c70] sm:$0xf]  ;;  %v1775_v0 = vunpack.c.l.b16 %v456_v58  ;;  %v14069_v1 = vor.u32 %v16110_v12, %v14068_v15  ;;  %v18236_v58 = vpack.c.b16 %v1776_v2, %v1776_v2  ;;  %v14125_v12 = vor.u32 %v16124_v63, %v14124_v19  ;;  %v14044_v2 = vld [vmem:[%s17079_s13 + $0x1d40] sm:$0xf] }
 0x226   : > { %8723 = vmatpush.bf16.msrb.mxu1 %v13709_v18  ;;  %v14004_v18 = vld [vmem:[%s17079_s13 + $0x1cf0] sm:$0xf] }
 0x227   : > { %8736 = vmatpush.bf16.msrb.mxu2 %v13773_v41  ;;  %v8495_v41 = vpop.f32.mrf.mxu3  ;;  %v14005_v40 = vor.u32 %v16094_v20, %v14004_v18  ;;  %20174 = vst [vmem:[#allocation50_spill] sm:$0xff] %v18236_v58  ;;  %v14061_v18 = vor.u32 %v16108_v59, %v14060_v54  ;;  %v16074_v20 = vld [vmem:[%s17079_s13 + $0x1c54] sm:$0xf0]  ;;  %v13988_v15 = vld [vmem:[%s17079_s13 + $0x1cd0] sm:$0xf] }
 0x228   : > { %8749 = vmatpush.bf16.msrb.mxu3 %v13837_v4  ;;  %v13693_v4 = vor.u32 %v16016_v48, %v13692_v55  ;;  %v1774_v41 = vunpack.c.h.b16 %v455_v27  ;;  %v14133_v55 = vor.u32 %v16126_v53, %v14132_v57  ;;  %v18225_v48 = vpack.c.b16 %v1773_v62, %v1773_v62  ;;  %v16090_v62 = vld [vmem:[%s17079_s13 + $0x1cd4] sm:$0xf0]  ;;  %v14116_v59 = vld [vmem:[%s17079_s13 + $0x1dd0] sm:$0xf]  ;;  %v13916_v53 = vld [vmem:[%s17079_s13 + $0x1c40] sm:$0xf] }
 0x229   : > { %8711 = vmatpush.bf16.msrb.mxu0 %v13637_v52  ;;  %v13941_v52 = vor.u32 %v16078_v51, %v13940_v6  ;;  %v18230_v27 = vpack.c.b16 %v1775_v0, %v1775_v0  ;;  %v16072_v0 = vld [vmem:[%s17079_s13 + $0x1c44] sm:$0xf0] }
 0x22a   : > { %8724 = vmatpush.bf16.msrb.mxu1 %v13701_v35  ;;  %v13932_v35 = vld [vmem:[%s17079_s13 + $0x1c60] sm:$0xf]  ;;  %20171 = vst [vmem:[#allocation47_spill] sm:$0xff] %v18225_v48  ;;  %v13917_v19 = vor.u32 %v16072_v0, %v13916_v53  ;;  %v16068_v53 = vld [vmem:[%s17079_s13 + $0x1c24] sm:$0xf0] }
 0x22b   : > { %8737 = vmatpush.bf16.msrb.mxu2 %v13765_v56  ;;  %v13996_v56 = vld [vmem:[%s17079_s13 + $0x1ce0] sm:$0xf]  ;;  %20172 = vst [vmem:[#allocation48_spill] sm:$0xff] %v18230_v27  ;;  %v13933_v6 = vor.u32 %v16076_v25, %v13932_v35  ;;  %v16122_v25 = vld [vmem:[%s17079_s13 + $0x1dd4] sm:$0xf0] }
 0x22c   : > { %8750 = vmatpush.bf16.msrb.mxu3 %v13829_v61  ;;  %v18232_v61 = vpack.c.b16 %v1774_v41, %v1774_v41  ;;  %v13997_v51 = vor.u32 %v16092_v60, %v13996_v56  ;;  %v13980_v41 = vld [vmem:[%s17079_s13 + $0x1cc0] sm:$0xf]  ;;  %v16104_v35 = vld [vmem:[%s17079_s13 + $0x1d44] sm:$0xf0] }
 0x22d   : > { %8712 = vmatpush.bf16.msrb.mxu0 %v13629_v37  ;;  %v13924_v37 = vld [vmem:[%s17079_s13 + $0x1c50] sm:$0xf]  ;;  %v8506_v56 = vpop.f32.mrf.mxu0  ;;  %v16120_v60 = vld [vmem:[%s17079_s13 + $0x1dc4] sm:$0xf0]  ;;  %v13964_v0 = vld [vmem:[%s17079_s13 + $0x1ca0] sm:$0xf] }
 0x22e   : > { %8725 = vmatpush.bf16.msrb.mxu1 %v13693_v4  ;;  %20173 = vst [vmem:[#allocation49_spill] sm:$0xff] %v18232_v61  ;;  %v14052_v4 = vld [vmem:[%s17079_s13 + $0x1d50] sm:$0xf]  ;;  %v8507_v54 = vadd.f32 %v8506_v56, %v18194_v8  ;;  %v8519_v63 = vpop.f32.mrf.mxu1  ;;  %v16102_v8 = vld [vmem:[%s17079_s13 + $0x1d34] sm:$0xf0] }
 0x22f   : > { %8738 = vmatpush.bf16.msrb.mxu2 %v13757_v44  ;;  %v16106_v44 = vld [vmem:[%s17079_s13 + $0x1d54] sm:$0xf0] }
 0x230   : > { %8751 = vmatpush.bf16.msrb.mxu3 %v13821_v49  ;;  %8713 = vmatmul.bf16.vlgmr.msrb.gmra.mxu0 %v18225_v48  ;;  %v14053_v57 = vor.u32 %v16106_v44, %v14052_v4  ;;  %v14117_v49 = vor.u32 %v16122_v25, %v14116_v59  ;;  %v14036_v4 = vld [vmem:[%s17079_s13 + $0x1d30] sm:$0xf]  ;;  %v16118_v59 = vld [vmem:[%s17079_s13 + $0x1db4] sm:$0xf0]  ;;  %v16172_v48 = vld [vmem:[%s17079_s13 + $0x1f64] sm:$0xf0] }
 0x231   : > { %8757 = vmatpush.bf16.msra.mxu0 %v13941_v52  ;;  %8726 = vmatmul.bf16.vlgmr.msrb.gmra.mxu1 %v18232_v61  ;;  %v16088_v52 = vld [vmem:[%s17079_s13 + $0x1cc4] sm:$0xf0]  ;;  %v14100_v44 = vld [vmem:[%s17079_s13 + $0x1db0] sm:$0xf] }
 0x232   : > { %8770 = vmatpush.bf16.msra.mxu1 %v14005_v40  ;;  %8739 = vmatmul.bf16.vlgmr.msrb.gmra.mxu2 %v18230_v27  ;;  %v13989_v40 = vor.u32 %v16090_v62, %v13988_v15  ;;  %v16086_v62 = vld [vmem:[%s17079_s13 + $0x1cb4] sm:$0xf0]  ;;  %v16140_v27 = vld [vmem:[%s17079_s13 + $0x1e64] sm:$0xf0] }
 0x233   : > { %8783 = vmatpush.bf16.msra.mxu2 %v14069_v1  ;;  %8752 = vmatmul.bf16.vlgmr.msrb.gmra.mxu3 %v18236_v58  ;;  %v13925_v1 = vor.u32 %v16074_v20, %v13924_v37  ;;  %v16070_v37 = vld [vmem:[%s17079_s13 + $0x1c34] sm:$0xf0]  ;;  %v13972_v20 = vld [vmem:[%s17079_s13 + $0x1cb0] sm:$0xf] }
 0x234   : > { %8796 = vmatpush.bf16.msra.mxu3 %v14133_v55  ;;  %v14108_v55 = vld [vmem:[%s17079_s13 + $0x1dc0] sm:$0xf] }
 0x235   : > { %8758 = vmatpush.bf16.msra.mxu0 %v13933_v6  ;;  %v13981_v6 = vor.u32 %v16088_v52, %v13980_v41  ;;  %v14109_v15 = vor.u32 %v16120_v60, %v14108_v55  ;;  %v14101_v41 = vor.u32 %v16118_v59, %v14100_v44  ;;  %v16084_v52 = vld [vmem:[%s17079_s13 + $0x1ca4] sm:$0xf0]  ;;  %v14092_v60 = vld [vmem:[%s17079_s13 + $0x1da0] sm:$0xf]  ;;  %v16098_v44 = vld [vmem:[%s17079_s13 + $0x1d14] sm:$0xf0] }
 0x236   : > { %8771 = vmatpush.bf16.msra.mxu1 %v13997_v51  ;;  %v14045_v51 = vor.u32 %v16104_v35, %v14044_v2  ;;  %v14028_v2 = vld [vmem:[%s17079_s13 + $0x1d20] sm:$0xf]  ;;  %v16100_v35 = vld [vmem:[%s17079_s13 + $0x1d24] sm:$0xf0]  ;;  %v8545_v55 = vpop.f32.mrf.mxu3  ;;  %v14084_v59 = vld [vmem:[%s17079_s13 + $0x1d90] sm:$0xf] }
 0x237   : > { %8784 = vmatpush.bf16.msra.mxu2 %v14061_v18  ;;  %v13908_v18 = vld [vmem:[%s17079_s13 + $0x1c30] sm:$0xf] }
 0x238   : > { %8797 = vmatpush.bf16.msra.mxu3 %v14125_v12  ;;  %v8520_v12 = vadd.f32 %v8519_v63, %v8507_v54  ;;  %v13909_v25 = vor.u32 %v16070_v37, %v13908_v18  ;;  %v16116_v54 = vld [vmem:[%s17079_s13 + $0x1da4] sm:$0xf0]  ;;  %v13965_v18 = vor.u32 %v16084_v52, %v13964_v0  ;;  %v14029_v37 = vor.u32 %v16100_v35, %v14028_v2  ;;  %v14012_v52 = vld [vmem:[%s17079_s13 + $0x1d00] sm:$0xf] }
 0x239   : > { %8759 = vmatpush.bf16.msra.mxu0 %v13925_v1  ;;  %v13973_v1 = vor.u32 %v16086_v62, %v13972_v20  ;;  %v13892_v20 = vld [vmem:[%s17079_s13 + $0x1c10] sm:$0xf]  ;;  %v14093_v62 = vor.u32 %v16116_v54, %v14092_v60  ;;  %v16080_v0 = vld [vmem:[%s17079_s13 + $0x1c84] sm:$0xf0] }
 0x23a   : > { %8772 = vmatpush.bf16.msra.mxu1 %v13989_v40  ;;  %v14037_v40 = vor.u32 %v16102_v8, %v14036_v4  ;;  %v16082_v4 = vld [vmem:[%s17079_s13 + $0x1c94] sm:$0xf0]  ;;  %v14020_v8 = vld [vmem:[%s17079_s13 + $0x1d10] sm:$0xf]  ;;  %v16096_v2 = vld [vmem:[%s17079_s13 + $0x1d04] sm:$0xf0] }
 0x23b   : > { %8785 = vmatpush.bf16.msra.mxu2 %v14053_v57  ;;  %v13900_v57 = vld [vmem:[%s17079_s13 + $0x1c20] sm:$0xf]  ;;  %v16112_v60 = vld [vmem:[%s17079_s13 + $0x1d84] sm:$0xf0] }
 0x23c   : > { %8798 = vmatpush.bf16.msra.mxu3 %v14117_v49  ;;  %v8532_v49 = vpop.f32.mrf.mxu2  ;;  %v13901_v63 = vor.u32 %v16068_v53, %v13900_v57  ;;  %v16064_v57 = vld [vmem:[%s17079_s13 + $0x1c04] sm:$0xf0]  ;;  %v13948_v53 = vld [vmem:[%s17079_s13 + $0x1c80] sm:$0xf] }
 0x23d   : > { %8760 = vmatpush.bf16.msra.mxu0 %v13917_v19  ;;  %v8533_v56 = vadd.f32 %v8532_v49, %v8520_v12  ;;  %v8508_v19 = vpop.f32.mrf.mxu0  ;;  %v13956_v12 = vld [vmem:[%s17079_s13 + $0x1c90] sm:$0xf]  ;;  %v14021_v49 = vor.u32 %v16098_v44, %v14020_v8  ;;  %v458_v54 = vld [vmem:[%s17070_s27 + $0xe8] sm:$0xff]  ;;  %v14013_v44 = vor.u32 %v16096_v2, %v14012_v52  ;;  %v14316_v2 = vld [vmem:[%s17079_s13 + $0x1f60] sm:$0xf] }
 0x23e   : > { %8773 = vmatpush.bf16.msra.mxu1 %v13981_v6  ;;  %v8521_v6 = vpop.f32.mrf.mxu1  ;;  %v457_v35 = vld [vmem:[%s17070_s27 + $0xe0] sm:$0xff]  ;;  %v16156_v52 = vld [vmem:[%s17079_s13 + $0x1ee4] sm:$0xf0] }
 0x23f   : > { %8786 = vmatpush.bf16.msra.mxu2 %v14045_v51  ;;  %v18275_v51 = vadd.f32 %v8545_v55, %v8533_v56  ;;  %v14076_v55 = vld [vmem:[%s17079_s13 + $0x1d80] sm:$0xf]  ;;  %v16142_v6 = vld [vmem:[%s17079_s13 + $0x1e74] sm:$0xf0]  ;;  %v1777_v8 = vunpack.c.l.b16 %v457_v35 }
 0x240   : > { %8799 = vmatpush.bf16.msra.mxu3 %v14109_v15  ;;  %v16066_v15 = vld [vmem:[%s17079_s13 + $0x1c14] sm:$0xf0] }
 0x241   : > { %8761 = vmatpush.bf16.msra.mxu0 %v13909_v25  ;;  %v16114_v25 = vld [vmem:[%s17079_s13 + $0x1d94] sm:$0xf0] }
 0x242   : > { %8774 = vmatpush.bf16.msra.mxu1 %v13973_v1  ;;  %v13884_v1 = vld [vmem:[%s17079_s13 + $0x1c00] sm:$0xf]  ;;  %v14085_v56 = vor.u32 %v16114_v25, %v14084_v59  ;;  %v14388_v59 = vld [vmem:[%s17079_s13 + $0x1ff0] sm:$0xf]  ;;  %v16190_v25 = vld [vmem:[%s17079_s13 + $0x1ff4] sm:$0xf0] }
 0x243   : > { %8787 = vmatpush.bf16.msra.mxu2 %v14037_v40  ;;  %v13893_v40 = vor.u32 %v16066_v15, %v13892_v20  ;;  %v13885_v20 = vor.u32 %v16064_v57, %v13884_v1  ;;  %v16158_v15 = vld [vmem:[%s17079_s13 + $0x1ef4] sm:$0xf0]  ;;  %v14077_v1 = vor.u32 %v16112_v60, %v14076_v55  ;;  %v1780_v57 = vunpack.c.h.b16 %v458_v54  ;;  %v14380_v55 = vld [vmem:[%s17079_s13 + $0x1fe0] sm:$0xf]  ;;  %v16188_v60 = vld [vmem:[%s17079_s13 + $0x1fe4] sm:$0xf0] }
 0x244   : > { %8800 = vmatpush.bf16.msra.mxu3 %v14101_v41  ;;  %v13957_v41 = vor.u32 %v16082_v4, %v13956_v12  ;;  %v8534_v19 = vpop.f32.mrf.mxu2  ;;  %v14324_v12 = vld [vmem:[%s17079_s13 + $0x1f70] sm:$0xf]  ;;  %v16174_v4 = vld [vmem:[%s17079_s13 + $0x1f74] sm:$0xf0] }
 0x245   : > { %8762 = vmatpush.bf16.msra.mxu0 %v13901_v63  ;;  %v14196_v63 = vld [vmem:[%s17079_s13 + $0x1e70] sm:$0xf]  ;;  %v1779_v19 = vunpack.c.l.b16 %v458_v54  ;;  %v14325_v61 = vor.u32 %v16174_v4, %v14324_v12  ;;  %v18317_v54 = vpack.c.b16 %v1780_v57, %v1780_v57  ;;  %v14381_v4 = vor.u32 %v16188_v60, %v14380_v55  ;;  %v14300_v57 = vld [vmem:[%s17079_s13 + $0x1f40] sm:$0xf] }
 0x246   : > { %8775 = vmatpush.bf16.msra.mxu1 %v13965_v18  ;;  %v14260_v18 = vld [vmem:[%s17079_s13 + $0x1ef0] sm:$0xf] }
 0x247   : > { %8788 = vmatpush.bf16.msra.mxu2 %v14029_v37  ;;  %v8547_v37 = vpop.f32.mrf.mxu3  ;;  %v14261_v58 = vor.u32 %v16158_v15, %v14260_v18  ;;  %20178 = vst [vmem:[#allocation54_spill] sm:$0xff] %v18317_v54  ;;  %v14317_v18 = vor.u32 %v16172_v48, %v14316_v2  ;;  %v16138_v15 = vld [vmem:[%s17079_s13 + $0x1e54] sm:$0xf0]  ;;  %v14244_v12 = vld [vmem:[%s17079_s13 + $0x1ed0] sm:$0xf] }
 0x248   : > { %8801 = vmatpush.bf16.msra.mxu3 %v14093_v62  ;;  %v13949_v62 = vor.u32 %v16080_v0, %v13948_v53  ;;  %v1778_v37 = vunpack.c.h.b16 %v457_v35  ;;  %v14389_v53 = vor.u32 %v16190_v25, %v14388_v59  ;;  %v18306_v0 = vpack.c.b16 %v1777_v8, %v1777_v8  ;;  %v16154_v8 = vld [vmem:[%s17079_s13 + $0x1ed4] sm:$0xf0]  ;;  %v14372_v48 = vld [vmem:[%s17079_s13 + $0x1fd0] sm:$0xf]  ;;  %v14172_v25 = vld [vmem:[%s17079_s13 + $0x1e40] sm:$0xf] }
 0x249   : > { %8763 = vmatpush.bf16.msra.mxu0 %v13893_v40  ;;  %v14197_v40 = vor.u32 %v16142_v6, %v14196_v63  ;;  %v18311_v35 = vpack.c.b16 %v1779_v19, %v1779_v19  ;;  %v16136_v19 = vld [vmem:[%s17079_s13 + $0x1e44] sm:$0xf0] }
 0x24a   : > { %8776 = vmatpush.bf16.msra.mxu1 %v13957_v41  ;;  %v14188_v41 = vld [vmem:[%s17079_s13 + $0x1e60] sm:$0xf]  ;;  %20175 = vst [vmem:[#allocation51_spill] sm:$0xff] %v18306_v0  ;;  %v14173_v55 = vor.u32 %v16136_v19, %v14172_v25  ;;  %v16132_v25 = vld [vmem:[%s17079_s13 + $0x1e24] sm:$0xf0] }
 0x24b   : > { %8789 = vmatpush.bf16.msra.mxu2 %v14021_v49  ;;  %v14252_v49 = vld [vmem:[%s17079_s13 + $0x1ee0] sm:$0xf]  ;;  %20176 = vst [vmem:[#allocation52_spill] sm:$0xff] %v18311_v35  ;;  %v14189_v63 = vor.u32 %v16140_v27, %v14188_v41  ;;  %v16186_v27 = vld [vmem:[%s17079_s13 + $0x1fd4] sm:$0xf0] }
 0x24c   : > { %8802 = vmatpush.bf16.msra.mxu3 %v14085_v56  ;;  %v18313_v56 = vpack.c.b16 %v1778_v37, %v1778_v37  ;;  %v14253_v6 = vor.u32 %v16156_v52, %v14252_v49  ;;  %v14236_v37 = vld [vmem:[%s17079_s13 + $0x1ec0] sm:$0xf]  ;;  %v16168_v41 = vld [vmem:[%s17079_s13 + $0x1f44] sm:$0xf0] }
 0x24d   : > { %8764 = vmatpush.bf16.msra.mxu0 %v13885_v20  ;;  %v14180_v20 = vld [vmem:[%s17079_s13 + $0x1e50] sm:$0xf]  ;;  %v8558_v49 = vpop.f32.mrf.mxu0  ;;  %v16184_v52 = vld [vmem:[%s17079_s13 + $0x1fc4] sm:$0xf0]  ;;  %v14220_v19 = vld [vmem:[%s17079_s13 + $0x1ea0] sm:$0xf] }
 0x24e   : > { %8777 = vmatpush.bf16.msra.mxu1 %v13949_v62  ;;  %20177 = vst [vmem:[#allocation53_spill] sm:$0xff] %v18313_v56  ;;  %v14308_v62 = vld [vmem:[%s17079_s13 + $0x1f50] sm:$0xf]  ;;  %v8559_v2 = vadd.f32 %v8558_v49, %v18275_v51  ;;  %v8571_v60 = vpop.f32.mrf.mxu1  ;;  %v16166_v51 = vld [vmem:[%s17079_s13 + $0x1f34] sm:$0xf0] }
 0x24f   : > { %8790 = vmatpush.bf16.msra.mxu2 %v14013_v44  ;;  %v16170_v44 = vld [vmem:[%s17079_s13 + $0x1f54] sm:$0xf0] }
 0x250   : > { %8803 = vmatpush.bf16.msra.mxu3 %v14077_v1  ;;  %8765 = vmatmul.bf16.vlgmr.msra.gmra.mxu0 %v18306_v0  ;;  %v14309_v59 = vor.u32 %v16170_v44, %v14308_v62  ;;  %v14373_v1 = vor.u32 %v16186_v27, %v14372_v48  ;;  %v14292_v62 = vld [vmem:[%s17079_s13 + $0x1f30] sm:$0xf]  ;;  %v16182_v48 = vld [vmem:[%s17079_s13 + $0x1fb4] sm:$0xf0]  ;;  %v16236_v0 = vld [vmem:[%s17079_s13 + $0x2164] sm:$0xf0] }
 0x251   : > { %8809 = vmatpush.bf16.msrb.mxu0 %v14197_v40  ;;  %8778 = vmatmul.bf16.vlgmr.msra.gmra.mxu1 %v18313_v56  ;;  %v16152_v40 = vld [vmem:[%s17079_s13 + $0x1ec4] sm:$0xf0]  ;;  %v14356_v44 = vld [vmem:[%s17079_s13 + $0x1fb0] sm:$0xf] }
 0x252   : > { %8822 = vmatpush.bf16.msrb.mxu1 %v14261_v58  ;;  %8791 = vmatmul.bf16.vlgmr.msra.gmra.mxu2 %v18311_v35  ;;  %v14245_v58 = vor.u32 %v16154_v8, %v14244_v12  ;;  %v16150_v8 = vld [vmem:[%s17079_s13 + $0x1eb4] sm:$0xf0]  ;;  %v16204_v35 = vld [vmem:[%s17079_s13 + $0x2064] sm:$0xf0] }
 0x253   : > { %8835 = vmatpush.bf16.msrb.mxu2 %v14325_v61  ;;  %8804 = vmatmul.bf16.vlgmr.msra.gmra.mxu3 %v18317_v54  ;;  %v14181_v61 = vor.u32 %v16138_v15, %v14180_v20  ;;  %v16134_v20 = vld [vmem:[%s17079_s13 + $0x1e34] sm:$0xf0]  ;;  %v14228_v15 = vld [vmem:[%s17079_s13 + $0x1eb0] sm:$0xf] }
 0x254   : > { %8848 = vmatpush.bf16.msrb.mxu3 %v14389_v53  ;;  %v14364_v53 = vld [vmem:[%s17079_s13 + $0x1fc0] sm:$0xf] }
 0x255   : > { %8810 = vmatpush.bf16.msrb.mxu0 %v14189_v63  ;;  %v14237_v63 = vor.u32 %v16152_v40, %v14236_v37  ;;  %v14365_v12 = vor.u32 %v16184_v52, %v14364_v53  ;;  %v14357_v37 = vor.u32 %v16182_v48, %v14356_v44  ;;  %v16148_v40 = vld [vmem:[%s17079_s13 + $0x1ea4] sm:$0xf0]  ;;  %v14348_v52 = vld [vmem:[%s17079_s13 + $0x1fa0] sm:$0xf]  ;;  %v16162_v44 = vld [vmem:[%s17079_s13 + $0x1f14] sm:$0xf0] }
 0x256   : > { %8823 = vmatpush.bf16.msrb.mxu1 %v14253_v6  ;;  %v14301_v6 = vor.u32 %v16168_v41, %v14300_v57  ;;  %v14284_v57 = vld [vmem:[%s17079_s13 + $0x1f20] sm:$0xf]  ;;  %v16164_v41 = vld [vmem:[%s17079_s13 + $0x1f24] sm:$0xf0]  ;;  %v8597_v53 = vpop.f32.mrf.mxu3  ;;  %v14340_v48 = vld [vmem:[%s17079_s13 + $0x1f90] sm:$0xf] }
 0x257   : > { %8836 = vmatpush.bf16.msrb.mxu2 %v14317_v18  ;;  %v14164_v18 = vld [vmem:[%s17079_s13 + $0x1e30] sm:$0xf] }
 0x258   : > { %8849 = vmatpush.bf16.msrb.mxu3 %v14381_v4  ;;  %v8572_v4 = vadd.f32 %v8571_v60, %v8559_v2  ;;  %v14165_v27 = vor.u32 %v16134_v20, %v14164_v18  ;;  %v16180_v2 = vld [vmem:[%s17079_s13 + $0x1fa4] sm:$0xf0]  ;;  %v14221_v18 = vor.u32 %v16148_v40, %v14220_v19  ;;  %v14285_v20 = vor.u32 %v16164_v41, %v14284_v57  ;;  %v14268_v40 = vld [vmem:[%s17079_s13 + $0x1f00] sm:$0xf] }
 0x259   : > { %8811 = vmatpush.bf16.msrb.mxu0 %v14181_v61  ;;  %v14229_v61 = vor.u32 %v16150_v8, %v14228_v15  ;;  %v14148_v15 = vld [vmem:[%s17079_s13 + $0x1e10] sm:$0xf]  ;;  %v14349_v8 = vor.u32 %v16180_v2, %v14348_v52  ;;  %v16144_v19 = vld [vmem:[%s17079_s13 + $0x1e84] sm:$0xf0] }
 0x25a   : > { %8824 = vmatpush.bf16.msrb.mxu1 %v14245_v58  ;;  %v14293_v58 = vor.u32 %v16166_v51, %v14292_v62  ;;  %v16146_v62 = vld [vmem:[%s17079_s13 + $0x1e94] sm:$0xf0]  ;;  %v14276_v51 = vld [vmem:[%s17079_s13 + $0x1f10] sm:$0xf]  ;;  %v16160_v57 = vld [vmem:[%s17079_s13 + $0x1f04] sm:$0xf0] }
 0x25b   : > { %8837 = vmatpush.bf16.msrb.mxu2 %v14309_v59  ;;  %v14156_v59 = vld [vmem:[%s17079_s13 + $0x1e20] sm:$0xf]  ;;  %v16176_v52 = vld [vmem:[%s17079_s13 + $0x1f84] sm:$0xf0] }
 0x25c   : > { %8850 = vmatpush.bf16.msrb.mxu3 %v14373_v1  ;;  %v8584_v1 = vpop.f32.mrf.mxu2  ;;  %v14157_v60 = vor.u32 %v16132_v25, %v14156_v59  ;;  %v16128_v59 = vld [vmem:[%s17079_s13 + $0x1e04] sm:$0xf0]  ;;  %v14204_v25 = vld [vmem:[%s17079_s13 + $0x1e80] sm:$0xf] }
 0x25d   : > { %8812 = vmatpush.bf16.msrb.mxu0 %v14173_v55  ;;  %v8585_v49 = vadd.f32 %v8584_v1, %v8572_v4  ;;  %v8560_v55 = vpop.f32.mrf.mxu0  ;;  %v14212_v4 = vld [vmem:[%s17079_s13 + $0x1e90] sm:$0xf]  ;;  %v14277_v1 = vor.u32 %v16162_v44, %v14276_v51  ;;  %v460_v2 = vld [vmem:[%s17070_s27 + $0xf8] sm:$0xff]  ;;  %v14269_v44 = vor.u32 %v16160_v57, %v14268_v40  ;;  %v14572_v57 = vld [vmem:[%s17079_s13 + $0x2160] sm:$0xf] }
 0x25e   : > { %8825 = vmatpush.bf16.msrb.mxu1 %v14237_v63  ;;  %v8573_v63 = vpop.f32.mrf.mxu1  ;;  %v459_v41 = vld [vmem:[%s17070_s27 + $0xf0] sm:$0xff]  ;;  %v16220_v40 = vld [vmem:[%s17079_s13 + $0x20e4] sm:$0xf0] }
 0x25f   : > { %8838 = vmatpush.bf16.msrb.mxu2 %v14301_v6  ;;  %v18356_v6 = vadd.f32 %v8597_v53, %v8585_v49  ;;  %v14332_v53 = vld [vmem:[%s17079_s13 + $0x1f80] sm:$0xf]  ;;  %v16206_v63 = vld [vmem:[%s17079_s13 + $0x2074] sm:$0xf0]  ;;  %v1781_v51 = vunpack.c.l.b16 %v459_v41 }
 0x260   : > { %8851 = vmatpush.bf16.msrb.mxu3 %v14365_v12  ;;  %v16130_v12 = vld [vmem:[%s17079_s13 + $0x1e14] sm:$0xf0] }
 0x261   : > { %8813 = vmatpush.bf16.msrb.mxu0 %v14165_v27  ;;  %v16178_v27 = vld [vmem:[%s17079_s13 + $0x1f94] sm:$0xf0] }
 0x262   : > { %8826 = vmatpush.bf16.msrb.mxu1 %v14229_v61  ;;  %v14140_v61 = vld [vmem:[%s17079_s13 + $0x1e00] sm:$0xf]  ;;  %v14341_v49 = vor.u32 %v16178_v27, %v14340_v48  ;;  %v14644_v48 = vld [vmem:[%s17079_s13 + $0x21f0] sm:$0xf]  ;;  %v16254_v27 = vld [vmem:[%s17079_s13 + $0x21f4] sm:$0xf0] }
 0x263   : > { %8839 = vmatpush.bf16.msrb.mxu2 %v14293_v58  ;;  %v14149_v58 = vor.u32 %v16130_v12, %v14148_v15  ;;  %v14141_v15 = vor.u32 %v16128_v59, %v14140_v61  ;;  %v16222_v12 = vld [vmem:[%s17079_s13 + $0x20f4] sm:$0xf0]  ;;  %v14333_v61 = vor.u32 %v16176_v52, %v14332_v53  ;;  %v1784_v59 = vunpack.c.h.b16 %v460_v2  ;;  %v14636_v53 = vld [vmem:[%s17079_s13 + $0x21e0] sm:$0xf]  ;;  %v16252_v52 = vld [vmem:[%s17079_s13 + $0x21e4] sm:$0xf0] }
 0x264   : > { %8852 = vmatpush.bf16.msrb.mxu3 %v14357_v37  ;;  %v14213_v37 = vor.u32 %v16146_v62, %v14212_v4  ;;  %v8586_v55 = vpop.f32.mrf.mxu2  ;;  %v14580_v4 = vld [vmem:[%s17079_s13 + $0x2170] sm:$0xf]  ;;  %v16238_v62 = vld [vmem:[%s17079_s13 + $0x2174] sm:$0xf0] }
 0x265   : > { %8814 = vmatpush.bf16.msrb.mxu0 %v14157_v60  ;;  %v14452_v60 = vld [vmem:[%s17079_s13 + $0x2070] sm:$0xf]  ;;  %v1783_v55 = vunpack.c.l.b16 %v460_v2  ;;  %v14581_v56 = vor.u32 %v16238_v62, %v14580_v4  ;;  %v18398_v2 = vpack.c.b16 %v1784_v59, %v1784_v59  ;;  %v14637_v62 = vor.u32 %v16252_v52, %v14636_v53  ;;  %v14556_v59 = vld [vmem:[%s17079_s13 + $0x2140] sm:$0xf] }
 0x266   : > { %8827 = vmatpush.bf16.msrb.mxu1 %v14221_v18  ;;  %v14516_v18 = vld [vmem:[%s17079_s13 + $0x20f0] sm:$0xf] }
 0x267   : > { %8840 = vmatpush.bf16.msrb.mxu2 %v14285_v20  ;;  %v8599_v20 = vpop.f32.mrf.mxu3  ;;  %v14517_v54 = vor.u32 %v16222_v12, %v14516_v18  ;;  %20182 = vst [vmem:[#allocation58_spill] sm:$0xff] %v18398_v2  ;;  %v14573_v18 = vor.u32 %v16236_v0, %v14572_v57  ;;  %v16202_v12 = vld [vmem:[%s17079_s13 + $0x2054] sm:$0xf0]  ;;  %v14500_v4 = vld [vmem:[%s17079_s13 + $0x20d0] sm:$0xf] }
 0x268   : > { %8853 = vmatpush.bf16.msrb.mxu3 %v14349_v8  ;;  %v14205_v8 = vor.u32 %v16144_v19, %v14204_v25  ;;  %v1782_v20 = vunpack.c.h.b16 %v459_v41  ;;  %v14645_v25 = vor.u32 %v16254_v27, %v14644_v48  ;;  %v18387_v19 = vpack.c.b16 %v1781_v51, %v1781_v51  ;;  %v16218_v51 = vld [vmem:[%s17079_s13 + $0x20d4] sm:$0xf0]  ;;  %v14628_v0 = vld [vmem:[%s17079_s13 + $0x21d0] sm:$0xf]  ;;  %v14428_v27 = vld [vmem:[%s17079_s13 + $0x2040] sm:$0xf] }
 0x269   : > { %8815 = vmatpush.bf16.msrb.mxu0 %v14149_v58  ;;  %v14453_v58 = vor.u32 %v16206_v63, %v14452_v60  ;;  %v18392_v41 = vpack.c.b16 %v1783_v55, %v1783_v55  ;;  %v16200_v55 = vld [vmem:[%s17079_s13 + $0x2044] sm:$0xf0] }
 0x26a   : > { %8828 = vmatpush.bf16.msrb.mxu1 %v14213_v37  ;;  %v14444_v37 = vld [vmem:[%s17079_s13 + $0x2060] sm:$0xf]  ;;  %20179 = vst [vmem:[#allocation55_spill] sm:$0xff] %v18387_v19  ;;  %v14429_v53 = vor.u32 %v16200_v55, %v14428_v27  ;;  %v16196_v27 = vld [vmem:[%s17079_s13 + $0x2024] sm:$0xf0] }
 0x26b   : > { %8841 = vmatpush.bf16.msrb.mxu2 %v14277_v1  ;;  %v14508_v1 = vld [vmem:[%s17079_s13 + $0x20e0] sm:$0xf]  ;;  %20180 = vst [vmem:[#allocation56_spill] sm:$0xff] %v18392_v41  ;;  %v14445_v60 = vor.u32 %v16204_v35, %v14444_v37  ;;  %v16250_v35 = vld [vmem:[%s17079_s13 + $0x21d4] sm:$0xf0] }
 0x26c   : > { %8854 = vmatpush.bf16.msrb.mxu3 %v14341_v49  ;;  %v18394_v49 = vpack.c.b16 %v1782_v20, %v1782_v20  ;;  %v14509_v63 = vor.u32 %v16220_v40, %v14508_v1  ;;  %v14492_v20 = vld [vmem:[%s17079_s13 + $0x20c0] sm:$0xf]  ;;  %v16232_v37 = vld [vmem:[%s17079_s13 + $0x2144] sm:$0xf0] }
 0x26d   : > { %8816 = vmatpush.bf16.msrb.mxu0 %v14141_v15  ;;  %v14436_v15 = vld [vmem:[%s17079_s13 + $0x2050] sm:$0xf]  ;;  %v8610_v1 = vpop.f32.mrf.mxu0  ;;  %v16248_v40 = vld [vmem:[%s17079_s13 + $0x21c4] sm:$0xf0]  ;;  %v14476_v55 = vld [vmem:[%s17079_s13 + $0x20a0] sm:$0xf] }
 0x26e   : > { %8829 = vmatpush.bf16.msrb.mxu1 %v14205_v8  ;;  %20181 = vst [vmem:[#allocation57_spill] sm:$0xff] %v18394_v49  ;;  %v14564_v8 = vld [vmem:[%s17079_s13 + $0x2150] sm:$0xf]  ;;  %v8611_v57 = vadd.f32 %v8610_v1, %v18356_v6  ;;  %v8623_v52 = vpop.f32.mrf.mxu1  ;;  %v16230_v6 = vld [vmem:[%s17079_s13 + $0x2134] sm:$0xf0] }
 0x26f   : > { %8842 = vmatpush.bf16.msrb.mxu2 %v14269_v44  ;;  %v16234_v44 = vld [vmem:[%s17079_s13 + $0x2154] sm:$0xf0] }
 0x270   : > { %8855 = vmatpush.bf16.msrb.mxu3 %v14333_v61  ;;  %8817 = vmatmul.bf16.vlgmr.msrb.gmra.mxu0 %v18387_v19  ;;  %v14565_v48 = vor.u32 %v16234_v44, %v14564_v8  ;;  %v14629_v61 = vor.u32 %v16250_v35, %v14628_v0  ;;  %v14548_v8 = vld [vmem:[%s17079_s13 + $0x2130] sm:$0xf]  ;;  %v16246_v0 = vld [vmem:[%s17079_s13 + $0x21b4] sm:$0xf0]  ;;  %v16300_v19 = vld [vmem:[%s17079_s13 + $0x2364] sm:$0xf0] }
 0x271   : > { %8861 = vmatpush.bf16.msra.mxu0 %v14453_v58  ;;  %8830 = vmatmul.bf16.vlgmr.msrb.gmra.mxu1 %v18394_v49  ;;  %v16216_v58 = vld [vmem:[%s17079_s13 + $0x20c4] sm:$0xf0]  ;;  %v14612_v44 = vld [vmem:[%s17079_s13 + $0x21b0] sm:$0xf] }
 0x272   : > { %8874 = vmatpush.bf16.msra.mxu1 %v14517_v54  ;;  %8843 = vmatmul.bf16.vlgmr.msrb.gmra.mxu2 %v18392_v41  ;;  %v14501_v54 = vor.u32 %v16218_v51, %v14500_v4  ;;  %v16214_v51 = vld [vmem:[%s17079_s13 + $0x20b4] sm:$0xf0]  ;;  %v16268_v41 = vld [vmem:[%s17079_s13 + $0x2264] sm:$0xf0] }
 0x273   : > { %8887 = vmatpush.bf16.msra.mxu2 %v14581_v56  ;;  %8856 = vmatmul.bf16.vlgmr.msrb.gmra.mxu3 %v18398_v2  ;;  %v14437_v56 = vor.u32 %v16202_v12, %v14436_v15  ;;  %v16198_v15 = vld [vmem:[%s17079_s13 + $0x2034] sm:$0xf0]  ;;  %v14484_v12 = vld [vmem:[%s17079_s13 + $0x20b0] sm:$0xf] }
 0x274   : > { %8900 = vmatpush.bf16.msra.mxu3 %v14645_v25  ;;  %v14620_v25 = vld [vmem:[%s17079_s13 + $0x21c0] sm:$0xf] }
 0x275   : > { %8862 = vmatpush.bf16.msra.mxu0 %v14445_v60  ;;  %v14493_v60 = vor.u32 %v16216_v58, %v14492_v20  ;;  %v14621_v4 = vor.u32 %v16248_v40, %v14620_v25  ;;  %v14613_v20 = vor.u32 %v16246_v0, %v14612_v44  ;;  %v16212_v58 = vld [vmem:[%s17079_s13 + $0x20a4] sm:$0xf0]  ;;  %v14604_v40 = vld [vmem:[%s17079_s13 + $0x21a0] sm:$0xf]  ;;  %v16226_v44 = vld [vmem:[%s17079_s13 + $0x2114] sm:$0xf0] }
 0x276   : > { %8875 = vmatpush.bf16.msra.mxu1 %v14509_v63  ;;  %v14557_v63 = vor.u32 %v16232_v37, %v14556_v59  ;;  %v14540_v59 = vld [vmem:[%s17079_s13 + $0x2120] sm:$0xf]  ;;  %v16228_v37 = vld [vmem:[%s17079_s13 + $0x2124] sm:$0xf0]  ;;  %v8649_v25 = vpop.f32.mrf.mxu3  ;;  %v14596_v0 = vld [vmem:[%s17079_s13 + $0x2190] sm:$0xf] }
 0x277   : > { %8888 = vmatpush.bf16.msra.mxu2 %v14573_v18  ;;  %v14420_v18 = vld [vmem:[%s17079_s13 + $0x2030] sm:$0xf] }
 0x278   : > { %8901 = vmatpush.bf16.msra.mxu3 %v14637_v62  ;;  %v8624_v62 = vadd.f32 %v8623_v52, %v8611_v57  ;;  %v14421_v35 = vor.u32 %v16198_v15, %v14420_v18  ;;  %v16244_v57 = vld [vmem:[%s17079_s13 + $0x21a4] sm:$0xf0]  ;;  %v14477_v18 = vor.u32 %v16212_v58, %v14476_v55  ;;  %v14541_v15 = vor.u32 %v16228_v37, %v14540_v59  ;;  %v14524_v58 = vld [vmem:[%s17079_s13 + $0x2100] sm:$0xf] }
 0x279   : > { %8863 = vmatpush.bf16.msra.mxu0 %v14437_v56  ;;  %v14485_v56 = vor.u32 %v16214_v51, %v14484_v12  ;;  %v14404_v12 = vld [vmem:[%s17079_s13 + $0x2010] sm:$0xf]  ;;  %v14605_v51 = vor.u32 %v16244_v57, %v14604_v40  ;;  %v16208_v55 = vld [vmem:[%s17079_s13 + $0x2084] sm:$0xf0] }
 0x27a   : > { %8876 = vmatpush.bf16.msra.mxu1 %v14501_v54  ;;  %v14549_v54 = vor.u32 %v16230_v6, %v14548_v8  ;;  %v16210_v8 = vld [vmem:[%s17079_s13 + $0x2094] sm:$0xf0]  ;;  %v14532_v6 = vld [vmem:[%s17079_s13 + $0x2110] sm:$0xf]  ;;  %v16224_v59 = vld [vmem:[%s17079_s13 + $0x2104] sm:$0xf0] }
 0x27b   : > { %8889 = vmatpush.bf16.msra.mxu2 %v14565_v48  ;;  %v14412_v48 = vld [vmem:[%s17079_s13 + $0x2020] sm:$0xf]  ;;  %v16240_v40 = vld [vmem:[%s17079_s13 + $0x2184] sm:$0xf0] }
 0x27c   : > { %8902 = vmatpush.bf16.msra.mxu3 %v14629_v61  ;;  %v8636_v61 = vpop.f32.mrf.mxu2  ;;  %v14413_v52 = vor.u32 %v16196_v27, %v14412_v48  ;;  %v16192_v48 = vld [vmem:[%s17079_s13 + $0x2004] sm:$0xf0]  ;;  %v14460_v27 = vld [vmem:[%s17079_s13 + $0x2080] sm:$0xf] }
 0x27d   : > { %8864 = vmatpush.bf16.msra.mxu0 %v14429_v53  ;;  %v8637_v1 = vadd.f32 %v8636_v61, %v8624_v62  ;;  %v8612_v53 = vpop.f32.mrf.mxu0  ;;  %v14468_v62 = vld [vmem:[%s17079_s13 + $0x2090] sm:$0xf]  ;;  %v14533_v61 = vor.u32 %v16226_v44, %v14532_v6  ;;  %v462_v57 = vld [vmem:[%s17070_s27 + $0x108] sm:$0xff]  ;;  %v14525_v44 = vor.u32 %v16224_v59, %v14524_v58  ;;  %v14828_v59 = vld [vmem:[%s17079_s13 + $0x2360] sm:$0xf] }
 0x27e   : > { %8877 = vmatpush.bf16.msra.mxu1 %v14493_v60  ;;  %v8625_v60 = vpop.f32.mrf.mxu1  ;;  %v461_v37 = vld [vmem:[%s17070_s27 + $0x100] sm:$0xff]  ;;  %v16284_v58 = vld [vmem:[%s17079_s13 + $0x22e4] sm:$0xf0] }
 0x27f   : > { %8890 = vmatpush.bf16.msra.mxu2 %v14557_v63  ;;  %v18437_v63 = vadd.f32 %v8649_v25, %v8637_v1  ;;  %v14588_v25 = vld [vmem:[%s17079_s13 + $0x2180] sm:$0xf]  ;;  %v16270_v60 = vld [vmem:[%s17079_s13 + $0x2274] sm:$0xf0]  ;;  %v1785_v6 = vunpack.c.l.b16 %v461_v37 }
 0x280   : > { %8903 = vmatpush.bf16.msra.mxu3 %v14621_v4  ;;  %v16194_v4 = vld [vmem:[%s17079_s13 + $0x2014] sm:$0xf0] }
 0x281   : > { %8865 = vmatpush.bf16.msra.mxu0 %v14421_v35  ;;  %v16242_v35 = vld [vmem:[%s17079_s13 + $0x2194] sm:$0xf0] }
 0x282   : > { %8878 = vmatpush.bf16.msra.mxu1 %v14485_v56  ;;  %v14396_v56 = vld [vmem:[%s17079_s13 + $0x2000] sm:$0xf]  ;;  %v14597_v1 = vor.u32 %v16242_v35, %v14596_v0  ;;  %v14900_v0 = vld [vmem:[%s17079_s13 + $0x23f0] sm:$0xf]  ;;  %v16318_v35 = vld [vmem:[%s17079_s13 + $0x23f4] sm:$0xf0] }
 0x283   : > { %8891 = vmatpush.bf16.msra.mxu2 %v14549_v54  ;;  %v14405_v54 = vor.u32 %v16194_v4, %v14404_v12  ;;  %v14397_v12 = vor.u32 %v16192_v48, %v14396_v56  ;;  %v16286_v4 = vld [vmem:[%s17079_s13 + $0x22f4] sm:$0xf0]  ;;  %v14589_v56 = vor.u32 %v16240_v40, %v14588_v25  ;;  %v1788_v48 = vunpack.c.h.b16 %v462_v57  ;;  %v14892_v25 = vld [vmem:[%s17079_s13 + $0x23e0] sm:$0xf]  ;;  %v16316_v40 = vld [vmem:[%s17079_s13 + $0x23e4] sm:$0xf0] }
 0x284   : > { %8904 = vmatpush.bf16.msra.mxu3 %v14613_v20  ;;  %v14469_v20 = vor.u32 %v16210_v8, %v14468_v62  ;;  %v8638_v53 = vpop.f32.mrf.mxu2  ;;  %v14836_v62 = vld [vmem:[%s17079_s13 + $0x2370] sm:$0xf]  ;;  %v16302_v8 = vld [vmem:[%s17079_s13 + $0x2374] sm:$0xf0] }
 0x285   : > { %8866 = vmatpush.bf16.msra.mxu0 %v14413_v52  ;;  %v14708_v52 = vld [vmem:[%s17079_s13 + $0x2270] sm:$0xf]  ;;  %v1787_v53 = vunpack.c.l.b16 %v462_v57  ;;  %v14837_v49 = vor.u32 %v16302_v8, %v14836_v62  ;;  %v18479_v57 = vpack.c.b16 %v1788_v48, %v1788_v48  ;;  %v14893_v8 = vor.u32 %v16316_v40, %v14892_v25  ;;  %v14812_v48 = vld [vmem:[%s17079_s13 + $0x2340] sm:$0xf] }
 0x286   : > { %8879 = vmatpush.bf16.msra.mxu1 %v14477_v18  ;;  %v14772_v18 = vld [vmem:[%s17079_s13 + $0x22f0] sm:$0xf] }
 0x287   : > { %8892 = vmatpush.bf16.msra.mxu2 %v14541_v15  ;;  %v8651_v15 = vpop.f32.mrf.mxu3  ;;  %v14773_v2 = vor.u32 %v16286_v4, %v14772_v18  ;;  %20186 = vst [vmem:[#allocation62_spill] sm:$0xff] %v18479_v57  ;;  %v14829_v18 = vor.u32 %v16300_v19, %v14828_v59  ;;  %v16266_v4 = vld [vmem:[%s17079_s13 + $0x2254] sm:$0xf0]  ;;  %v14756_v62 = vld [vmem:[%s17079_s13 + $0x22d0] sm:$0xf] }
 0x288   : > { %8905 = vmatpush.bf16.msra.mxu3 %v14605_v51  ;;  %v14461_v51 = vor.u32 %v16208_v55, %v14460_v27  ;;  %v1786_v15 = vunpack.c.h.b16 %v461_v37  ;;  %v14901_v27 = vor.u32 %v16318_v35, %v14900_v0  ;;  %v18468_v55 = vpack.c.b16 %v1785_v6, %v1785_v6  ;;  %v16282_v6 = vld [vmem:[%s17079_s13 + $0x22d4] sm:$0xf0]  ;;  %v14884_v19 = vld [vmem:[%s17079_s13 + $0x23d0] sm:$0xf]  ;;  %v14684_v35 = vld [vmem:[%s17079_s13 + $0x2240] sm:$0xf] }
 0x289   : > { %8867 = vmatpush.bf16.msra.mxu0 %v14405_v54  ;;  %v14709_v54 = vor.u32 %v16270_v60, %v14708_v52  ;;  %v18473_v37 = vpack.c.b16 %v1787_v53, %v1787_v53  ;;  %v16264_v53 = vld [vmem:[%s17079_s13 + $0x2244] sm:$0xf0] }
 0x28a   : > { %8880 = vmatpush.bf16.msra.mxu1 %v14469_v20  ;;  %v14700_v20 = vld [vmem:[%s17079_s13 + $0x2260] sm:$0xf]  ;;  %20183 = vst [vmem:[#allocation59_spill] sm:$0xff] %v18468_v55  ;;  %v14685_v25 = vor.u32 %v16264_v53, %v14684_v35  ;;  %v16260_v35 = vld [vmem:[%s17079_s13 + $0x2224] sm:$0xf0] }
 0x28b   : > { %8893 = vmatpush.bf16.msra.mxu2 %v14533_v61  ;;  %v14764_v61 = vld [vmem:[%s17079_s13 + $0x22e0] sm:$0xf]  ;;  %20184 = vst [vmem:[#allocation60_spill] sm:$0xff] %v18473_v37  ;;  %v14701_v52 = vor.u32 %v16268_v41, %v14700_v20  ;;  %v16314_v41 = vld [vmem:[%s17079_s13 + $0x23d4] sm:$0xf0] }
 0x28c   : > { %8906 = vmatpush.bf16.msra.mxu3 %v14597_v1  ;;  %v18475_v1 = vpack.c.b16 %v1786_v15, %v1786_v15  ;;  %v14765_v60 = vor.u32 %v16284_v58, %v14764_v61  ;;  %v14748_v15 = vld [vmem:[%s17079_s13 + $0x22c0] sm:$0xf]  ;;  %v16296_v20 = vld [vmem:[%s17079_s13 + $0x2344] sm:$0xf0] }
 0x28d   : > { %8868 = vmatpush.bf16.msra.mxu0 %v14397_v12  ;;  %v14692_v12 = vld [vmem:[%s17079_s13 + $0x2250] sm:$0xf]  ;;  %v8662_v61 = vpop.f32.mrf.mxu0  ;;  %v16312_v58 = vld [vmem:[%s17079_s13 + $0x23c4] sm:$0xf0]  ;;  %v14732_v53 = vld [vmem:[%s17079_s13 + $0x22a0] sm:$0xf] }
 0x28e   : > { %8881 = vmatpush.bf16.msra.mxu1 %v14461_v51  ;;  %20185 = vst [vmem:[#allocation61_spill] sm:$0xff] %v18475_v1  ;;  %v14820_v51 = vld [vmem:[%s17079_s13 + $0x2350] sm:$0xf]  ;;  %v8663_v59 = vadd.f32 %v8662_v61, %v18437_v63  ;;  %v8675_v40 = vpop.f32.mrf.mxu1  ;;  %v16294_v63 = vld [vmem:[%s17079_s13 + $0x2334] sm:$0xf0] }
 0x28f   : > { %8894 = vmatpush.bf16.msra.mxu2 %v14525_v44  ;;  %v16298_v44 = vld [vmem:[%s17079_s13 + $0x2354] sm:$0xf0] }
 0x290   : > { %8907 = vmatpush.bf16.msra.mxu3 %v14589_v56  ;;  %8869 = vmatmul.bf16.vlgmr.msra.gmra.mxu0 %v18468_v55  ;;  %v14821_v0 = vor.u32 %v16298_v44, %v14820_v51  ;;  %v14885_v56 = vor.u32 %v16314_v41, %v14884_v19  ;;  %v14804_v51 = vld [vmem:[%s17079_s13 + $0x2330] sm:$0xf]  ;;  %v16310_v19 = vld [vmem:[%s17079_s13 + $0x23b4] sm:$0xf0]  ;;  %v16364_v55 = vld [vmem:[%s17079_s13 + $0x2564] sm:$0xf0] }
 0x291   : > { %8913 = vmatpush.bf16.msrb.mxu0 %v14709_v54  ;;  %8882 = vmatmul.bf16.vlgmr.msra.gmra.mxu1 %v18475_v1  ;;  %v16280_v54 = vld [vmem:[%s17079_s13 + $0x22c4] sm:$0xf0]  ;;  %v14868_v44 = vld [vmem:[%s17079_s13 + $0x23b0] sm:$0xf] }
 0x292   : > { %8926 = vmatpush.bf16.msrb.mxu1 %v14773_v2  ;;  %8895 = vmatmul.bf16.vlgmr.msra.gmra.mxu2 %v18473_v37  ;;  %v14757_v2 = vor.u32 %v16282_v6, %v14756_v62  ;;  %v16278_v6 = vld [vmem:[%s17079_s13 + $0x22b4] sm:$0xf0]  ;;  %v16332_v37 = vld [vmem:[%s17079_s13 + $0x2464] sm:$0xf0] }
 0x293   : > { %8939 = vmatpush.bf16.msrb.mxu2 %v14837_v49  ;;  %8908 = vmatmul.bf16.vlgmr.msra.gmra.mxu3 %v18479_v57  ;;  %v14693_v49 = vor.u32 %v16266_v4, %v14692_v12  ;;  %v16262_v12 = vld [vmem:[%s17079_s13 + $0x2234] sm:$0xf0]  ;;  %v14740_v4 = vld [vmem:[%s17079_s13 + $0x22b0] sm:$0xf] }
 0x294   : > { %8952 = vmatpush.bf16.msrb.mxu3 %v14901_v27  ;;  %v14876_v27 = vld [vmem:[%s17079_s13 + $0x23c0] sm:$0xf] }
 0x295   : > { %8914 = vmatpush.bf16.msrb.mxu0 %v14701_v52  ;;  %v14749_v52 = vor.u32 %v16280_v54, %v14748_v15  ;;  %v14877_v62 = vor.u32 %v16312_v58, %v14876_v27  ;;  %v14869_v15 = vor.u32 %v16310_v19, %v14868_v44  ;;  %v16276_v54 = vld [vmem:[%s17079_s13 + $0x22a4] sm:$0xf0]  ;;  %v14860_v58 = vld [vmem:[%s17079_s13 + $0x23a0] sm:$0xf]  ;;  %v16290_v44 = vld [vmem:[%s17079_s13 + $0x2314] sm:$0xf0] }
 0x296   : > { %8927 = vmatpush.bf16.msrb.mxu1 %v14765_v60  ;;  %v14813_v60 = vor.u32 %v16296_v20, %v14812_v48  ;;  %v14796_v48 = vld [vmem:[%s17079_s13 + $0x2320] sm:$0xf]  ;;  %v16292_v20 = vld [vmem:[%s17079_s13 + $0x2324] sm:$0xf0]  ;;  %v8701_v27 = vpop.f32.mrf.mxu3  ;;  %v14852_v19 = vld [vmem:[%s17079_s13 + $0x2390] sm:$0xf] }
 0x297   : > { %8940 = vmatpush.bf16.msrb.mxu2 %v14829_v18  ;;  %v14676_v18 = vld [vmem:[%s17079_s13 + $0x2230] sm:$0xf] }
 0x298   : > { %8953 = vmatpush.bf16.msrb.mxu3 %v14893_v8  ;;  %v8676_v8 = vadd.f32 %v8675_v40, %v8663_v59  ;;  %v14677_v41 = vor.u32 %v16262_v12, %v14676_v18  ;;  %v16308_v59 = vld [vmem:[%s17079_s13 + $0x23a4] sm:$0xf0]  ;;  %v14733_v18 = vor.u32 %v16276_v54, %v14732_v53  ;;  %v14797_v12 = vor.u32 %v16292_v20, %v14796_v48  ;;  %v14780_v54 = vld [vmem:[%s17079_s13 + $0x2300] sm:$0xf] }
 0x299   : > { %8915 = vmatpush.bf16.msrb.mxu0 %v14693_v49  ;;  %v14741_v49 = vor.u32 %v16278_v6, %v14740_v4  ;;  %v14660_v4 = vld [vmem:[%s17079_s13 + $0x2210] sm:$0xf]  ;;  %v14861_v6 = vor.u32 %v16308_v59, %v14860_v58  ;;  %v16272_v53 = vld [vmem:[%s17079_s13 + $0x2284] sm:$0xf0] }
 0x29a   : > { %8928 = vmatpush.bf16.msrb.mxu1 %v14757_v2  ;;  %v14805_v2 = vor.u32 %v16294_v63, %v14804_v51  ;;  %v16274_v51 = vld [vmem:[%s17079_s13 + $0x2294] sm:$0xf0]  ;;  %v14788_v63 = vld [vmem:[%s17079_s13 + $0x2310] sm:$0xf]  ;;  %v16288_v48 = vld [vmem:[%s17079_s13 + $0x2304] sm:$0xf0] }
 0x29b   : > { %8941 = vmatpush.bf16.msrb.mxu2 %v14821_v0  ;;  %v14668_v0 = vld [vmem:[%s17079_s13 + $0x2220] sm:$0xf]  ;;  %v16304_v58 = vld [vmem:[%s17079_s13 + $0x2384] sm:$0xf0] }
 0x29c   : > { %8954 = vmatpush.bf16.msrb.mxu3 %v14885_v56  ;;  %v8688_v56 = vpop.f32.mrf.mxu2  ;;  %v14669_v40 = vor.u32 %v16260_v35, %v14668_v0  ;;  %v16256_v0 = vld [vmem:[%s17079_s13 + $0x2204] sm:$0xf0]  ;;  %v14716_v35 = vld [vmem:[%s17079_s13 + $0x2280] sm:$0xf] }
 0x29d   : > { %8916 = vmatpush.bf16.msrb.mxu0 %v14685_v25  ;;  %v8689_v61 = vadd.f32 %v8688_v56, %v8676_v8  ;;  %v8664_v25 = vpop.f32.mrf.mxu0  ;;  %v14724_v8 = vld [vmem:[%s17079_s13 + $0x2290] sm:$0xf]  ;;  %v14789_v56 = vor.u32 %v16290_v44, %v14788_v63  ;;  %v464_v59 = vld [vmem:[%s17070_s27 + $0x118] sm:$0xff]  ;;  %v14781_v44 = vor.u32 %v16288_v48, %v14780_v54  ;;  %v15084_v48 = vld [vmem:[%s17079_s13 + $0x2560] sm:$0xf] }
 0x29e   : > { %8929 = vmatpush.bf16.msrb.mxu1 %v14749_v52  ;;  %v8677_v52 = vpop.f32.mrf.mxu1  ;;  %v463_v20 = vld [vmem:[%s17070_s27 + $0x110] sm:$0xff]  ;;  %v16348_v54 = vld [vmem:[%s17079_s13 + $0x24e4] sm:$0xf0] }
 0x29f   : > { %8942 = vmatpush.bf16.msrb.mxu2 %v14813_v60  ;;  %v18518_v60 = vadd.f32 %v8701_v27, %v8689_v61  ;;  %v14844_v27 = vld [vmem:[%s17079_s13 + $0x2380] sm:$0xf]  ;;  %v16334_v52 = vld [vmem:[%s17079_s13 + $0x2474] sm:$0xf0]  ;;  %v1789_v63 = vunpack.c.l.b16 %v463_v20 }
 0x2a0   : > { %8955 = vmatpush.bf16.msrb.mxu3 %v14877_v62  ;;  %v16258_v62 = vld [vmem:[%s17079_s13 + $0x2214] sm:$0xf0] }
 0x2a1   : > { %8917 = vmatpush.bf16.msrb.mxu0 %v14677_v41  ;;  %v16306_v41 = vld [vmem:[%s17079_s13 + $0x2394] sm:$0xf0] }
 0x2a2   : > { %8930 = vmatpush.bf16.msrb.mxu1 %v14741_v49  ;;  %v14652_v49 = vld [vmem:[%s17079_s13 + $0x2200] sm:$0xf]  ;;  %v14853_v61 = vor.u32 %v16306_v41, %v14852_v19  ;;  %v15156_v19 = vld [vmem:[%s17079_s13 + $0x25f0] sm:$0xf]  ;;  %v16382_v41 = vld [vmem:[%s17079_s13 + $0x25f4] sm:$0xf0] }
 0x2a3   : > { %8943 = vmatpush.bf16.msrb.mxu2 %v14805_v2  ;;  %v14661_v2 = vor.u32 %v16258_v62, %v14660_v4  ;;  %v14653_v4 = vor.u32 %v16256_v0, %v14652_v49  ;;  %v16350_v62 = vld [vmem:[%s17079_s13 + $0x24f4] sm:$0xf0]  ;;  %v14845_v49 = vor.u32 %v16304_v58, %v14844_v27  ;;  %v1792_v0 = vunpack.c.h.b16 %v464_v59  ;;  %v15148_v27 = vld [vmem:[%s17079_s13 + $0x25e0] sm:$0xf]  ;;  %v16380_v58 = vld [vmem:[%s17079_s13 + $0x25e4] sm:$0xf0] }
 0x2a4   : > { %8956 = vmatpush.bf16.msrb.mxu3 %v14869_v15  ;;  %v14725_v15 = vor.u32 %v16274_v51, %v14724_v8  ;;  %v8690_v25 = vpop.f32.mrf.mxu2  ;;  %v15092_v8 = vld [vmem:[%s17079_s13 + $0x2570] sm:$0xf]  ;;  %v16366_v51 = vld [vmem:[%s17079_s13 + $0x2574] sm:$0xf0] }
 0x2a5   : > { %8918 = vmatpush.bf16.msrb.mxu0 %v14669_v40  ;;  %v14964_v40 = vld [vmem:[%s17079_s13 + $0x2470] sm:$0xf]  ;;  %v1791_v25 = vunpack.c.l.b16 %v464_v59  ;;  %v15093_v1 = vor.u32 %v16366_v51, %v15092_v8  ;;  %v18560_v59 = vpack.c.b16 %v1792_v0, %v1792_v0  ;;  %v15149_v51 = vor.u32 %v16380_v58, %v15148_v27  ;;  %v15068_v0 = vld [vmem:[%s17079_s13 + $0x2540] sm:$0xf] }
 0x2a6   : > { %8931 = vmatpush.bf16.msrb.mxu1 %v14733_v18  ;;  %v15028_v18 = vld [vmem:[%s17079_s13 + $0x24f0] sm:$0xf] }
 0x2a7   : > { %8944 = vmatpush.bf16.msrb.mxu2 %v14797_v12  ;;  %v8703_v12 = vpop.f32.mrf.mxu3  ;;  %v15029_v57 = vor.u32 %v16350_v62, %v15028_v18  ;;  %20190 = vst [vmem:[#allocation66_spill] sm:$0xff] %v18560_v59  ;;  %v15085_v18 = vor.u32 %v16364_v55, %v15084_v48  ;;  %v16330_v62 = vld [vmem:[%s17079_s13 + $0x2454] sm:$0xf0]  ;;  %v15012_v8 = vld [vmem:[%s17079_s13 + $0x24d0] sm:$0xf] }
 0x2a8   : > { %8957 = vmatpush.bf16.msrb.mxu3 %v14861_v6  ;;  %v14717_v6 = vor.u32 %v16272_v53, %v14716_v35  ;;  %v1790_v12 = vunpack.c.h.b16 %v463_v20  ;;  %v15157_v35 = vor.u32 %v16382_v41, %v15156_v19  ;;  %v18549_v53 = vpack.c.b16 %v1789_v63, %v1789_v63  ;;  %v16346_v63 = vld [vmem:[%s17079_s13 + $0x24d4] sm:$0xf0]  ;;  %v15140_v55 = vld [vmem:[%s17079_s13 + $0x25d0] sm:$0xf]  ;;  %v14940_v41 = vld [vmem:[%s17079_s13 + $0x2440] sm:$0xf] }
 0x2a9   : > { %8919 = vmatpush.bf16.msrb.mxu0 %v14661_v2  ;;  %v14965_v2 = vor.u32 %v16334_v52, %v14964_v40  ;;  %v18554_v20 = vpack.c.b16 %v1791_v25, %v1791_v25  ;;  %v16328_v25 = vld [vmem:[%s17079_s13 + $0x2444] sm:$0xf0] }
 0x2aa   : > { %8932 = vmatpush.bf16.msrb.mxu1 %v14725_v15  ;;  %v14956_v15 = vld [vmem:[%s17079_s13 + $0x2460] sm:$0xf]  ;;  %20187 = vst [vmem:[#allocation63_spill] sm:$0xff] %v18549_v53  ;;  %v14941_v27 = vor.u32 %v16328_v25, %v14940_v41  ;;  %v16324_v41 = vld [vmem:[%s17079_s13 + $0x2424] sm:$0xf0] }
 0x2ab   : > { %8945 = vmatpush.bf16.msrb.mxu2 %v14789_v56  ;;  %v15020_v56 = vld [vmem:[%s17079_s13 + $0x24e0] sm:$0xf]  ;;  %20188 = vst [vmem:[#allocation64_spill] sm:$0xff] %v18554_v20  ;;  %v14957_v40 = vor.u32 %v16332_v37, %v14956_v15  ;;  %v16378_v37 = vld [vmem:[%s17079_s13 + $0x25d4] sm:$0xf0] }
 0x2ac   : > { %8958 = vmatpush.bf16.msrb.mxu3 %v14853_v61  ;;  %v18556_v61 = vpack.c.b16 %v1790_v12, %v1790_v12  ;;  %v15021_v52 = vor.u32 %v16348_v54, %v15020_v56  ;;  %v15004_v12 = vld [vmem:[%s17079_s13 + $0x24c0] sm:$0xf]  ;;  %v16360_v15 = vld [vmem:[%s17079_s13 + $0x2544] sm:$0xf0] }
 0x2ad   : > { %8920 = vmatpush.bf16.msrb.mxu0 %v14653_v4  ;;  %v14948_v4 = vld [vmem:[%s17079_s13 + $0x2450] sm:$0xf]  ;;  %v8714_v56 = vpop.f32.mrf.mxu0  ;;  %v16376_v54 = vld [vmem:[%s17079_s13 + $0x25c4] sm:$0xf0]  ;;  %v14988_v25 = vld [vmem:[%s17079_s13 + $0x24a0] sm:$0xf] }
 0x2ae   : > { %8933 = vmatpush.bf16.msrb.mxu1 %v14717_v6  ;;  %20189 = vst [vmem:[#allocation65_spill] sm:$0xff] %v18556_v61  ;;  %v15076_v6 = vld [vmem:[%s17079_s13 + $0x2550] sm:$0xf]  ;;  %v8715_v48 = vadd.f32 %v8714_v56, %v18518_v60  ;;  %v8727_v58 = vpop.f32.mrf.mxu1  ;;  %v16358_v60 = vld [vmem:[%s17079_s13 + $0x2534] sm:$0xf0] }
 0x2af   : > { %8946 = vmatpush.bf16.msrb.mxu2 %v14781_v44  ;;  %v16362_v44 = vld [vmem:[%s17079_s13 + $0x2554] sm:$0xf0] }
 0x2b0   : > { %8959 = vmatpush.bf16.msrb.mxu3 %v14845_v49  ;;  %8921 = vmatmul.bf16.vlgmr.msrb.gmra.mxu0 %v18549_v53  ;;  %v15077_v19 = vor.u32 %v16362_v44, %v15076_v6  ;;  %v15141_v49 = vor.u32 %v16378_v37, %v15140_v55  ;;  %v15060_v6 = vld [vmem:[%s17079_s13 + $0x2530] sm:$0xf]  ;;  %v16374_v55 = vld [vmem:[%s17079_s13 + $0x25b4] sm:$0xf0]  ;;  %v10478_v53 = vld [vmem:[%s17079_s13 + $0x168] sm:$0xf0] }
 0x2b1   : > { %8965 = vmatpush.bf16.msra.mxu0 %v14965_v2  ;;  %8934 = vmatmul.bf16.vlgmr.msrb.gmra.mxu1 %v18556_v61  ;;  %v16344_v2 = vld [vmem:[%s17079_s13 + $0x24c4] sm:$0xf0]  ;;  %v15124_v44 = vld [vmem:[%s17079_s13 + $0x25b0] sm:$0xf] }
 0x2b2   : > { %8978 = vmatpush.bf16.msra.mxu1 %v15029_v57  ;;  %8947 = vmatmul.bf16.vlgmr.msrb.gmra.mxu2 %v18554_v20  ;;  %v15013_v57 = vor.u32 %v16346_v63, %v15012_v8  ;;  %v16342_v63 = vld [vmem:[%s17079_s13 + $0x24b4] sm:$0xf0]  ;;  %v10350_v20 = vld [vmem:[%s17079_s13 + $0x68] sm:$0xf0] }
 0x2b3   : > { %8991 = vmatpush.bf16.msra.mxu2 %v15093_v1  ;;  %8960 = vmatmul.bf16.vlgmr.msrb.gmra.mxu3 %v18560_v59  ;;  %v14949_v1 = vor.u32 %v16330_v62, %v14948_v4  ;;  %v16326_v4 = vld [vmem:[%s17079_s13 + $0x2434] sm:$0xf0]  ;;  %v14996_v62 = vld [vmem:[%s17079_s13 + $0x24b0] sm:$0xf] }
 0x2b4   : > { %9004 = vmatpush.bf16.msra.mxu3 %v15157_v35  ;;  %v15132_v35 = vld [vmem:[%s17079_s13 + $0x25c0] sm:$0xf] }
 0x2b5   : > { %8966 = vmatpush.bf16.msra.mxu0 %v14957_v40  ;;  %v15005_v40 = vor.u32 %v16344_v2, %v15004_v12  ;;  %v15133_v8 = vor.u32 %v16376_v54, %v15132_v35  ;;  %v15125_v12 = vor.u32 %v16374_v55, %v15124_v44  ;;  %v16340_v2 = vld [vmem:[%s17079_s13 + $0x24a4] sm:$0xf0]  ;;  %v15116_v54 = vld [vmem:[%s17079_s13 + $0x25a0] sm:$0xf]  ;;  %v16354_v44 = vld [vmem:[%s17079_s13 + $0x2514] sm:$0xf0] }
 0x2b6   : > { %8979 = vmatpush.bf16.msra.mxu1 %v15021_v52  ;;  %v15069_v52 = vor.u32 %v16360_v15, %v15068_v0  ;;  %v15052_v0 = vld [vmem:[%s17079_s13 + $0x2520] sm:$0xf]  ;;  %v16356_v15 = vld [vmem:[%s17079_s13 + $0x2524] sm:$0xf0]  ;;  %v8753_v35 = vpop.f32.mrf.mxu3  ;;  %v15108_v55 = vld [vmem:[%s17079_s13 + $0x2590] sm:$0xf] }
 0x2b7   : > { %8992 = vmatpush.bf16.msra.mxu2 %v15085_v18  ;;  %v14932_v18 = vld [vmem:[%s17079_s13 + $0x2430] sm:$0xf] }
 0x2b8   : > { %9005 = vmatpush.bf16.msra.mxu3 %v15149_v51  ;;  %v8728_v51 = vadd.f32 %v8727_v58, %v8715_v48  ;;  %v14933_v37 = vor.u32 %v16326_v4, %v14932_v18  ;;  %v16372_v48 = vld [vmem:[%s17079_s13 + $0x25a4] sm:$0xf0]  ;;  %v14989_v18 = vor.u32 %v16340_v2, %v14988_v25  ;;  %v15053_v4 = vor.u32 %v16356_v15, %v15052_v0  ;;  %v15036_v2 = vld [vmem:[%s17079_s13 + $0x2500] sm:$0xf] }
 0x2b9   : > { %8967 = vmatpush.bf16.msra.mxu0 %v14949_v1  ;;  %v14997_v1 = vor.u32 %v16342_v63, %v14996_v62  ;;  %v14916_v62 = vld [vmem:[%s17079_s13 + $0x2410] sm:$0xf]  ;;  %v15117_v63 = vor.u32 %v16372_v48, %v15116_v54  ;;  %v16336_v25 = vld [vmem:[%s17079_s13 + $0x2484] sm:$0xf0] }
 0x2ba   : > { %8980 = vmatpush.bf16.msra.mxu1 %v15013_v57  ;;  %v15061_v57 = vor.u32 %v16358_v60, %v15060_v6  ;;  %v16338_v6 = vld [vmem:[%s17079_s13 + $0x2494] sm:$0xf0]  ;;  %v15044_v60 = vld [vmem:[%s17079_s13 + $0x2510] sm:$0xf]  ;;  %v16352_v0 = vld [vmem:[%s17079_s13 + $0x2504] sm:$0xf0] }
 0x2bb   : > { %8993 = vmatpush.bf16.msra.mxu2 %v15077_v19  ;;  %v14924_v19 = vld [vmem:[%s17079_s13 + $0x2420] sm:$0xf]  ;;  %v16368_v54 = vld [vmem:[%s17079_s13 + $0x2584] sm:$0xf0] }
 0x2bc   : > { %9006 = vmatpush.bf16.msra.mxu3 %v15141_v49  ;;  %v8740_v49 = vpop.f32.mrf.mxu2  ;;  %v14925_v58 = vor.u32 %v16324_v41, %v14924_v19  ;;  %v16320_v19 = vld [vmem:[%s17079_s13 + $0x2404] sm:$0xf0]  ;;  %v14972_v41 = vld [vmem:[%s17079_s13 + $0x2480] sm:$0xf] }
 0x2bd   : > { %8968 = vmatpush.bf16.msra.mxu0 %v14941_v27  ;;  %v8741_v56 = vadd.f32 %v8740_v49, %v8728_v51  ;;  %v8716_v27 = vpop.f32.mrf.mxu0  ;;  %v14980_v51 = vld [vmem:[%s17079_s13 + $0x2490] sm:$0xf]  ;;  %v15045_v49 = vor.u32 %v16354_v44, %v15044_v60  ;;  %v466_v48 = vld [vmem:[%s17070_s27 + $0x128] sm:$0xff]  ;;  %v15037_v44 = vor.u32 %v16352_v0, %v15036_v2  ;;  %v15211_v0 = vld [vmem:[%s17079_s13 + $0x164] sm:$0xf] }
 0x2be   : > { %8981 = vmatpush.bf16.msra.mxu1 %v15005_v40  ;;  %v8729_v40 = vpop.f32.mrf.mxu1  ;;  %v465_v15 = vld [vmem:[%s17070_s27 + $0x120] sm:$0xff]  ;;  %v10414_v2 = vld [vmem:[%s17079_s13 + $0xe8] sm:$0xf0] }
 0x2bf   : > { %8994 = vmatpush.bf16.msra.mxu2 %v15069_v52  ;;  %v18599_v52 = vadd.f32 %v8753_v35, %v8741_v56  ;;  %v15100_v35 = vld [vmem:[%s17079_s13 + $0x2580] sm:$0xf]  ;;  %v10358_v40 = vld [vmem:[%s17079_s13 + $0x78] sm:$0xf0]  ;;  %v1793_v60 = vunpack.c.l.b16 %v465_v15 }
 0x2c0   : > { %9007 = vmatpush.bf16.msra.mxu3 %v15133_v8  ;;  %v16322_v8 = vld [vmem:[%s17079_s13 + $0x2414] sm:$0xf0] }
 0x2c1   : > { %8969 = vmatpush.bf16.msra.mxu0 %v14933_v37  ;;  %v16370_v37 = vld [vmem:[%s17079_s13 + $0x2594] sm:$0xf0] }
 0x2c2   : > { %8982 = vmatpush.bf16.msra.mxu1 %v14997_v1  ;;  %v14908_v1 = vld [vmem:[%s17079_s13 + $0x2400] sm:$0xf]  ;;  %v15109_v56 = vor.u32 %v16370_v37, %v15108_v55  ;;  %v15229_v55 = vld [vmem:[%s17079_s13 + $0x1f4] sm:$0xf]  ;;  %v10550_v37 = vld [vmem:[%s17079_s13 + $0x1f8] sm:$0xf0] }
 0x2c3   : > { %8995 = vmatpush.bf16.msra.mxu2 %v15061_v57  ;;  %v14917_v57 = vor.u32 %v16322_v8, %v14916_v62  ;;  %v14909_v62 = vor.u32 %v16320_v19, %v14908_v1  ;;  %v10422_v8 = vld [vmem:[%s17079_s13 + $0xf8] sm:$0xf0]  ;;  %v15101_v1 = vor.u32 %v16368_v54, %v15100_v35  ;;  %v1796_v19 = vunpack.c.h.b16 %v466_v48  ;;  %v15227_v35 = vld [vmem:[%s17079_s13 + $0x1e4] sm:$0xf]  ;;  %v10542_v54 = vld [vmem:[%s17079_s13 + $0x1e8] sm:$0xf0] }
 0x2c4   : > { %9008 = vmatpush.bf16.msra.mxu3 %v15125_v12  ;;  %v14981_v12 = vor.u32 %v16338_v6, %v14980_v51  ;;  %v8742_v27 = vpop.f32.mrf.mxu2  ;;  %v15213_v51 = vld [vmem:[%s17079_s13 + $0x174] sm:$0xf]  ;;  %v10486_v6 = vld [vmem:[%s17079_s13 + $0x178] sm:$0xf0] }
 0x2c5   : > { %8970 = vmatpush.bf16.msra.mxu0 %v14925_v58  ;;  %v15181_v58 = vld [vmem:[%s17079_s13 + $0x74] sm:$0xf]  ;;  %v1795_v27 = vunpack.c.l.b16 %v466_v48  ;;  %v10489_v61 = vor.u32 %v15213_v51, %v10486_v6  ;;  %v18641_v48 = vpack.c.b16 %v1796_v19, %v1796_v19  ;;  %v10545_v6 = vor.u32 %v15227_v35, %v10542_v54  ;;  %v15207_v19 = vld [vmem:[%s17079_s13 + $0x144] sm:$0xf] }
 0x2c6   : > { %8983 = vmatpush.bf16.msra.mxu1 %v14989_v18  ;;  %v15197_v18 = vld [vmem:[%s17079_s13 + $0xf4] sm:$0xf] }
 0x2c7   : > { %8996 = vmatpush.bf16.msra.mxu2 %v15053_v4  ;;  %v8755_v4 = vpop.f32.mrf.mxu3  ;;  %v10425_v59 = vor.u32 %v15197_v18, %v10422_v8  ;;  %v10481_v18 = vor.u32 %v15211_v0, %v10478_v53  ;;  %v10342_v8 = vld [vmem:[%s17079_s13 + $0x58] sm:$0xf0]  ;;  %v15193_v51 = vld [vmem:[%s17079_s13 + $0xd4] sm:$0xf] }
 0x2c8   : > { %9009 = vmatpush.bf16.msra.mxu3 %v15117_v63  ;;  %v14973_v63 = vor.u32 %v16336_v25, %v14972_v41  ;;  %v1794_v4 = vunpack.c.h.b16 %v465_v15  ;;  %v10553_v41 = vor.u32 %v15229_v55, %v10550_v37  ;;  %v18630_v25 = vpack.c.b16 %v1793_v60, %v1793_v60  ;;  %v10406_v60 = vld [vmem:[%s17079_s13 + $0xd8] sm:$0xf0]  ;;  %v15225_v53 = vld [vmem:[%s17079_s13 + $0x1d4] sm:$0xf]  ;;  %v15175_v37 = vld [vmem:[%s17079_s13 + $0x44] sm:$0xf] }
 0x2c9   : > { %8971 = vmatpush.bf16.msra.mxu0 %v14917_v57  ;;  %v10361_v57 = vor.u32 %v15181_v58, %v10358_v40  ;;  %v18635_v15 = vpack.c.b16 %v1795_v27, %v1795_v27  ;;  %v10334_v27 = vld [vmem:[%s17079_s13 + $0x48] sm:$0xf0] }
 0x2ca   : > { %8984 = vmatpush.bf16.msra.mxu1 %v14981_v12  ;;  %v15179_v12 = vld [vmem:[%s17079_s13 + $0x64] sm:$0xf]  ;;  %v10337_v35 = vor.u32 %v15175_v37, %v10334_v27  ;;  %v10318_v37 = vld [vmem:[%s17079_s13 + $0x28] sm:$0xf0] }
 0x2cb   : > { %8997 = vmatpush.bf16.msra.mxu2 %v15045_v49  ;;  %v15195_v49 = vld [vmem:[%s17079_s13 + $0xe4] sm:$0xf]  ;;  %v10353_v58 = vor.u32 %v15179_v12, %v10350_v20  ;;  %v10534_v20 = vld [vmem:[%s17079_s13 + $0x1d8] sm:$0xf0]  ;;  %v10462_v12 = vld [vmem:[%s17079_s13 + $0x148] sm:$0xf0] }
 0x2cc   : > { %9010 = vmatpush.bf16.msra.mxu3 %v15109_v56  ;;  %v18637_v56 = vpack.c.b16 %v1794_v4, %v1794_v4  ;;  %v10417_v40 = vor.u32 %v15195_v49, %v10414_v2  ;;  %v15191_v4 = vld [vmem:[%s17079_s13 + $0xc4] sm:$0xf]  ;;  %v10526_v2 = vld [vmem:[%s17079_s13 + $0x1c8] sm:$0xf0] }
 0x2cd   : > { %8972 = vmatpush.bf16.msra.mxu0 %v14909_v62  ;;  %v15177_v62 = vld [vmem:[%s17079_s13 + $0x54] sm:$0xf]  ;;  %v8766_v49 = vpop.f32.mrf.mxu0  ;;  %v15187_v27 = vld [vmem:[%s17079_s13 + $0xa4] sm:$0xf] }
 0x2ce   : > { %8985 = vmatpush.bf16.msra.mxu1 %v14973_v63  ;;  %v15209_v63 = vld [vmem:[%s17079_s13 + $0x154] sm:$0xf]  ;;  %v8767_v0 = vadd.f32 %v8766_v49, %v18599_v52  ;;  %v8779_v54 = vpop.f32.mrf.mxu1  ;;  %v10454_v52 = vld [vmem:[%s17079_s13 + $0x138] sm:$0xf0] }
 0x2cf   : > { %8998 = vmatpush.bf16.msra.mxu2 %v15037_v44  ;;  %v10470_v44 = vld [vmem:[%s17079_s13 + $0x158] sm:$0xf0] }
 0x2d0   : > { %9011 = vmatpush.bf16.msra.mxu3 %v15101_v1  ;;  %8973 = vmatmul.bf16.vlgmr.msra.gmra.mxu0 %v18630_v25  ;;  %v10473_v55 = vor.u32 %v15209_v63, %v10470_v44  ;;  %v10537_v1 = vor.u32 %v15225_v53, %v10534_v20  ;;  %v15205_v63 = vld [vmem:[%s17079_s13 + $0x134] sm:$0xf]  ;;  %v10518_v53 = vld [vmem:[%s17079_s13 + $0x1b8] sm:$0xf0] }
 0x2d1   : > { %9017 = vmatpush.bf16.msrb.mxu0 %v10361_v57  ;;  %8986 = vmatmul.bf16.vlgmr.msra.gmra.mxu1 %v18637_v56  ;;  %v10398_v57 = vld [vmem:[%s17079_s13 + $0xc8] sm:$0xf0]  ;;  %v15221_v44 = vld [vmem:[%s17079_s13 + $0x1b4] sm:$0xf] }
 0x2d2   : > { %9030 = vmatpush.bf16.msrb.mxu1 %v10425_v59  ;;  %8999 = vmatmul.bf16.vlgmr.msra.gmra.mxu2 %v18635_v15  ;;  %v10409_v59 = vor.u32 %v15193_v51, %v10406_v60  ;;  %v10390_v60 = vld [vmem:[%s17079_s13 + $0xb8] sm:$0xf0] }
 0x2d3   : > { %9043 = vmatpush.bf16.msrb.mxu2 %v10489_v61  ;;  %9012 = vmatmul.bf16.vlgmr.msra.gmra.mxu3 %v18641_v48  ;;  %v10345_v61 = vor.u32 %v15177_v62, %v10342_v8  ;;  %v10326_v62 = vld [vmem:[%s17079_s13 + $0x38] sm:$0xf0]  ;;  %v15189_v8 = vld [vmem:[%s17079_s13 + $0xb4] sm:$0xf] }
 0x2d4   : > { %9056 = vmatpush.bf16.msrb.mxu3 %v10553_v41  ;;  %v15223_v41 = vld [vmem:[%s17079_s13 + $0x1c4] sm:$0xf] }
 0x2d5   : > { %9018 = vmatpush.bf16.msrb.mxu0 %v10353_v58  ;;  %v10401_v58 = vor.u32 %v15191_v4, %v10398_v57  ;;  %v10529_v51 = vor.u32 %v15223_v41, %v10526_v2  ;;  %v10521_v4 = vor.u32 %v15221_v44, %v10518_v53  ;;  %v10382_v57 = vld [vmem:[%s17079_s13 + $0xa8] sm:$0xf0]  ;;  %v15219_v2 = vld [vmem:[%s17079_s13 + $0x1a4] sm:$0xf]  ;;  %v10438_v44 = vld [vmem:[%s17079_s13 + $0x118] sm:$0xf0] }
 0x2d6   : > { %9031 = vmatpush.bf16.msrb.mxu1 %v10417_v40  ;;  %v10465_v40 = vor.u32 %v15207_v19, %v10462_v12  ;;  %v15203_v19 = vld [vmem:[%s17079_s13 + $0x124] sm:$0xf]  ;;  %v10446_v12 = vld [vmem:[%s17079_s13 + $0x128] sm:$0xf0]  ;;  %v8805_v41 = vpop.f32.mrf.mxu3  ;;  %v15217_v53 = vld [vmem:[%s17079_s13 + $0x194] sm:$0xf] }
 0x2d7   : > { %9044 = vmatpush.bf16.msrb.mxu2 %v10481_v18  ;;  %v15173_v18 = vld [vmem:[%s17079_s13 + $0x34] sm:$0xf] }
 0x2d8   : > { %9057 = vmatpush.bf16.msrb.mxu3 %v10545_v6  ;;  %v8780_v6 = vadd.f32 %v8779_v54, %v8767_v0  ;;  %v10329_v20 = vor.u32 %v15173_v18, %v10326_v62  ;;  %v10510_v0 = vld [vmem:[%s17079_s13 + $0x1a8] sm:$0xf0]  ;;  %v10385_v18 = vor.u32 %v15187_v27, %v10382_v57  ;;  %v10449_v62 = vor.u32 %v15203_v19, %v10446_v12  ;;  %v15199_v57 = vld [vmem:[%s17079_s13 + $0x104] sm:$0xf] }
 0x2d9   : > { %9019 = vmatpush.bf16.msrb.mxu0 %v10345_v61  ;;  %v10393_v61 = vor.u32 %v15189_v8, %v10390_v60  ;;  %v15169_v8 = vld [vmem:[%s17079_s13 + $0x14] sm:$0xf]  ;;  %v10513_v60 = vor.u32 %v15219_v2, %v10510_v0  ;;  %v10430_v12 = vld [vmem:[%s17079_s13 + $0x108] sm:$0xf0] }
 0x2da   : > { %9032 = vmatpush.bf16.msrb.mxu1 %v10409_v59  ;;  %v10457_v59 = vor.u32 %v15205_v63, %v10454_v52  ;;  %v10374_v63 = vld [vmem:[%s17079_s13 + $0x98] sm:$0xf0]  ;;  %v15201_v52 = vld [vmem:[%s17079_s13 + $0x114] sm:$0xf] }
 0x2db   : > { %9045 = vmatpush.bf16.msrb.mxu2 %v10473_v55  ;;  %v15171_v55 = vld [vmem:[%s17079_s13 + $0x24] sm:$0xf]  ;;  %v10441_v27 = vor.u32 %v15201_v52, %v10438_v44  ;;  %v15245_v0 = vld [vmem:[%s17079_s13 + $0x274] sm:$0xf]  ;;  %v10806_v52 = vld [vmem:[%s17079_s13 + $0x3f8] sm:$0xf0] }
 0x2dc   : > { %9058 = vmatpush.bf16.msrb.mxu3 %v10537_v1  ;;  %v8792_v1 = vpop.f32.mrf.mxu2  ;;  %v10321_v54 = vor.u32 %v15171_v55, %v10318_v37  ;;  %v10302_v55 = vld [vmem:[%s17079_s13 + $0x8] sm:$0xf0] }
 0x2dd   : > { %9020 = vmatpush.bf16.msrb.mxu0 %v10337_v35  ;;  %v8793_v49 = vadd.f32 %v8792_v1, %v8780_v6  ;;  %v8768_v35 = vpop.f32.mrf.mxu0  ;;  %v15185_v6 = vld [vmem:[%s17079_s13 + $0x94] sm:$0xf]  ;;  %v10366_v1 = vld [vmem:[%s17079_s13 + $0x88] sm:$0xf0] }
 0x2de   : > { %9033 = vmatpush.bf16.msrb.mxu1 %v10401_v58  ;;  %v8781_v58 = vpop.f32.mrf.mxu1  ;;  %v10377_v37 = vor.u32 %v15185_v6, %v10374_v63  ;;  %v10614_v35 = vld [vmem:[%s17079_s13 + $0x278] sm:$0xf0]  ;;  %v15293_v63 = vld [vmem:[%s17079_s13 + $0x3f4] sm:$0xf] }
 0x2df   : > { %9046 = vmatpush.bf16.msrb.mxu2 %v10465_v40  ;;  %v18680_v40 = vadd.f32 %v8805_v41, %v8793_v49  ;;  %v15215_v49 = vld [vmem:[%s17079_s13 + $0x184] sm:$0xf]  ;;  %v10494_v41 = vld [vmem:[%s17079_s13 + $0x188] sm:$0xf0]  ;;  %v8807_v58 = vpop.f32.mrf.mxu3 }
 0x2e0   : > { %9059 = vmatpush.bf16.msrb.mxu3 %v10529_v51  ;;  %v10310_v51 = vld [vmem:[%s17079_s13 + $0x18] sm:$0xf0]  ;;  %v10497_v44 = vor.u32 %v15215_v49, %v10494_v41 }
 0x2e1   : > { %9021 = vmatpush.bf16.msrb.mxu0 %v10329_v20  ;;  %v10502_v20 = vld [vmem:[%s17079_s13 + $0x198] sm:$0xf0] }
 0x2e2   : > { %9034 = vmatpush.bf16.msrb.mxu1 %v10393_v61  ;;  %v10313_v61 = vor.u32 %v15169_v8, %v10310_v51  ;;  %v10505_v19 = vor.u32 %v15217_v53, %v10502_v20  ;;  %v15277_v8 = vld [vmem:[%s17079_s13 + $0x374] sm:$0xf]  ;;  %v10742_v51 = vld [vmem:[%s17079_s13 + $0x378] sm:$0xf0]  ;;  %v10617_v53 = vor.u32 %v15245_v0, %v10614_v35 }
 0x2e3   : > { %9047 = vmatpush.bf16.msrb.mxu2 %v10457_v59  ;;  %v15167_v59 = vld [vmem:[%s17079_s13 + $0x4] sm:$0xf]  ;;  %v15241_v0 = vld [vmem:[%s17079_s13 + $0x254] sm:$0xf]  ;;  %v10598_v35 = vld [vmem:[%s17079_s13 + $0x258] sm:$0xf0] }
 0x2e4   : > { %9060 = vmatpush.bf16.msrb.mxu3 %v10521_v4  ;;  %v15183_v4 = vld [vmem:[%s17079_s13 + $0x84] sm:$0xf]  ;;  %v8794_v2 = vpop.f32.mrf.mxu2 }
 0x2e5   : > { %9022 = vmatpush.bf16.msrb.mxu0 %v10321_v54  ;;  %v15261_v54 = vld [vmem:[%s17079_s13 + $0x2f4] sm:$0xf]  ;;  %v10369_v6 = vor.u32 %v15183_v4, %v10366_v1  ;;  %v15259_v2 = vld [vmem:[%s17079_s13 + $0x2e4] sm:$0xf]  ;;  %v10734_v1 = vld [vmem:[%s17079_s13 + $0x368] sm:$0xf0] }
 0x2e6   : > { %9035 = vmatpush.bf16.msrb.mxu1 %v10385_v18  ;;  %v10305_v18 = vor.u32 %v15167_v59, %v10302_v55  ;;  %v15243_v59 = vld [vmem:[%s17079_s13 + $0x264] sm:$0xf]  ;;  %v10606_v55 = vld [vmem:[%s17079_s13 + $0x268] sm:$0xf0] }
 0x2e7   : > { %9048 = vmatpush.bf16.msrb.mxu2 %v10449_v62  ;;  %v10678_v62 = vld [vmem:[%s17079_s13 + $0x2f8] sm:$0xf0]  ;;  %v15275_v4 = vld [vmem:[%s17079_s13 + $0x364] sm:$0xf] }
 0x2e8   : > { %9061 = vmatpush.bf16.msrb.mxu3 %v10513_v60  ;;  %v10433_v60 = vor.u32 %v15199_v57, %v10430_v12  ;;  %v10681_v20 = vor.u32 %v15261_v54, %v10678_v62  ;;  %v15291_v57 = vld [vmem:[%s17079_s13 + $0x3e4] sm:$0xf]  ;;  %v10609_v12 = vor.u32 %v15243_v59, %v10606_v55  ;;  %v10737_v41 = vor.u32 %v15275_v4, %v10734_v1  ;;  %v15257_v54 = vld [vmem:[%s17079_s13 + $0x2d4] sm:$0xf] }
 0x2e9   : > { %9023 = vmatpush.bf16.msrb.mxu0 %v10313_v61  ;;  %v10745_v61 = vor.u32 %v15277_v8, %v10742_v51  ;;  %v15273_v62 = vld [vmem:[%s17079_s13 + $0x354] sm:$0xf]  ;;  %v10726_v8 = vld [vmem:[%s17079_s13 + $0x358] sm:$0xf0]  ;;  %v15287_v55 = vld [vmem:[%s17079_s13 + $0x3c4] sm:$0xf] }
 0x2ea   : > { %9036 = vmatpush.bf16.msrb.mxu1 %v10377_v37  ;;  %v10809_v37 = vor.u32 %v15293_v63, %v10806_v52  ;;  %v15289_v51 = vld [vmem:[%s17079_s13 + $0x3d4] sm:$0xf]  ;;  %v10729_v52 = vor.u32 %v15273_v62, %v10726_v8 }
 0x2eb   : > { %9049 = vmatpush.bf16.msrb.mxu2 %v10441_v27  ;;  %v10670_v27 = vld [vmem:[%s17079_s13 + $0x2e8] sm:$0xf0] }
 0x2ec   : > { %9062 = vmatpush.bf16.msrb.mxu3 %v10505_v19  ;;  %v10798_v19 = vld [vmem:[%s17079_s13 + $0x3e8] sm:$0xf0]  ;;  %v10673_v49 = vor.u32 %v15259_v2, %v10670_v27 }
 0x2ed   : > { %9024 = vmatpush.bf16.msrb.mxu0 %v10305_v18  ;;  %v10801_v58 = vor.u32 %v15291_v57, %v10798_v19  ;;  %v10662_v18 = vld [vmem:[%s17079_s13 + $0x2d8] sm:$0xf0]  ;;  %v8818_v59 = vpop.f32.mrf.mxu0  ;;  %v10782_v2 = vld [vmem:[%s17079_s13 + $0x3c8] sm:$0xf0]  ;;  %v15237_v57 = vld [vmem:[%s17079_s13 + $0x234] sm:$0xf] }
 0x2ee   : > { %9037 = vmatpush.bf16.msrb.mxu1 %v10369_v6  ;;  %v10790_v6 = vld [vmem:[%s17079_s13 + $0x3d8] sm:$0xf0]  ;;  %v10665_v63 = vor.u32 %v15257_v54, %v10662_v18  ;;  %v8831_v27 = vpop.f32.mrf.mxu1  ;;  %v15285_v54 = vld [vmem:[%s17079_s13 + $0x3b4] sm:$0xf] }
 0x2ef   : > { %9050 = vmatpush.bf16.msrb.mxu2 %v10433_v60  ;;  %v10601_v60 = vor.u32 %v15241_v0, %v10598_v35  ;;  %v10582_v19 = vld [vmem:[%s17079_s13 + $0x238] sm:$0xf0]  ;;  %v15269_v35 = vld [vmem:[%s17079_s13 + $0x334] sm:$0xf] }
 0x2f0   : > { %9063 = vmatpush.bf16.msrb.mxu3 %v10497_v44  ;;  %9025 = vmatmul.bf16.vlgmr.msrb.gmra.mxu0 %v17211_v21  ;;  %v10590_v44 = vld [vmem:[%s17079_s13 + $0x248] sm:$0xf0]  ;;  %v10646_v0 = vld [vmem:[%s17079_s13 + $0x2b8] sm:$0xf0]  ;;  %v10585_v18 = vor.u32 %v15237_v57, %v10582_v19  ;;  %v15249_v57 = vld [vmem:[%s17079_s13 + $0x294] sm:$0xf] }
 0x2f1   : > { %9069 = vmatpush.bf16.msra.mxu0 %v10617_v53  ;;  %9038 = vmatmul.bf16.vlgmr.msrb.gmra.mxu1 %v17214_v22  ;;  %v15255_v53 = vld [vmem:[%s17079_s13 + $0x2c4] sm:$0xf]  ;;  %v10654_v21 = vld [vmem:[%s17079_s13 + $0x2c8] sm:$0xf0]  ;;  %v8819_v22 = vadd.f32 %v8818_v59, %v18680_v40  ;;  %v10710_v40 = vld [vmem:[%s17079_s13 + $0x338] sm:$0xf0] }
 0x2f2   : > { %9082 = vmatpush.bf16.msra.mxu1 %v10681_v20  ;;  %9051 = vmatmul.bf16.vlgmr.msrb.gmra.mxu2 %v17197_v5  ;;  %v15239_v5 = vld [vmem:[%s17079_s13 + $0x244] sm:$0xf]  ;;  %v10793_v20 = vor.u32 %v15289_v51, %v10790_v6  ;;  %v10657_v4 = vor.u32 %v15255_v53, %v10654_v21  ;;  %v10713_v8 = vor.u32 %v15269_v35, %v10710_v40  ;;  %v10574_v6 = vld [vmem:[%s17079_s13 + $0x228] sm:$0xf0]  ;;  %v10758_v35 = vld [vmem:[%s17079_s13 + $0x398] sm:$0xf0] }
 0x2f3   : > { %9095 = vmatpush.bf16.msra.mxu2 %v10745_v61  ;;  %9064 = vmatmul.bf16.vlgmr.msrb.gmra.mxu3 %v17200_v7  ;;  %v15271_v7 = vld [vmem:[%s17079_s13 + $0x344] sm:$0xf]  ;;  %v10718_v61 = vld [vmem:[%s17079_s13 + $0x348] sm:$0xf0] }
 0x2f4   : > { %9108 = vmatpush.bf16.msra.mxu3 %v10809_v37  ;;  %v10593_v37 = vor.u32 %v15239_v5, %v10590_v44  ;;  %v10721_v1 = vor.u32 %v15271_v7, %v10718_v61  ;;  %v15235_v51 = vld [vmem:[%s17079_s13 + $0x224] sm:$0xf]  ;;  %v10638_v5 = vld [vmem:[%s17079_s13 + $0x2a8] sm:$0xf0] }
 0x2f5   : > { %9070 = vmatpush.bf16.msra.mxu0 %v10609_v12  ;;  %v15253_v12 = vld [vmem:[%s17079_s13 + $0x2b4] sm:$0xf]  ;;  %v15267_v44 = vld [vmem:[%s17079_s13 + $0x324] sm:$0xf]  ;;  %v10702_v53 = vld [vmem:[%s17079_s13 + $0x328] sm:$0xf0]  ;;  %v8820_v59 = vpop.f32.mrf.mxu0 }
 0x2f6   : > { %9083 = vmatpush.bf16.msra.mxu1 %v10673_v49  ;;  %v10785_v49 = vor.u32 %v15287_v55, %v10782_v2  ;;  %v10649_v62 = vor.u32 %v15253_v12, %v10646_v0  ;;  %v8857_v21 = vpop.f32.mrf.mxu3  ;;  %v15283_v7 = vld [vmem:[%s17079_s13 + $0x3a4] sm:$0xf]  ;;  %v10766_v61 = vld [vmem:[%s17079_s13 + $0x3a8] sm:$0xf0]  ;;  %v10577_v55 = vor.u32 %v15235_v51, %v10574_v6  ;;  %v8833_v2 = vpop.f32.mrf.mxu1  ;;  %v10630_v12 = vld [vmem:[%s17079_s13 + $0x298] sm:$0xf0] }
 0x2f7   : > { %9096 = vmatpush.bf16.msra.mxu2 %v10737_v41  ;;  %v8832_v41 = vadd.f32 %v8831_v27, %v8819_v22  ;;  %v10705_v27 = vor.u32 %v15267_v44, %v10702_v53  ;;  %v10769_v19 = vor.u32 %v15283_v7, %v10766_v61  ;;  %v15281_v0 = vld [vmem:[%s17079_s13 + $0x394] sm:$0xf]  ;;  %v10622_v51 = vld [vmem:[%s17079_s13 + $0x288] sm:$0xf0]  ;;  %v15263_v6 = vld [vmem:[%s17079_s13 + $0x304] sm:$0xf] }
 0x2f8   : > { %9109 = vmatpush.bf16.msra.mxu3 %v10801_v58  ;;  %v10774_v58 = vld [vmem:[%s17079_s13 + $0x3b8] sm:$0xf0]  ;;  %v15309_v53 = vld [vmem:[%s17079_s13 + $0x474] sm:$0xf] }
 0x2f9   : > { %9071 = vmatpush.bf16.msra.mxu0 %v10601_v60  ;;  %v15251_v60 = vld [vmem:[%s17079_s13 + $0x2a4] sm:$0xf]  ;;  %v10934_v59 = vld [vmem:[%s17079_s13 + $0x4f8] sm:$0xf0] }
 0x2fa   : > { %9084 = vmatpush.bf16.msra.mxu1 %v10665_v63  ;;  %v10777_v63 = vor.u32 %v15285_v54, %v10774_v58  ;;  %v15231_v54 = vld [vmem:[%s17079_s13 + $0x204] sm:$0xf]  ;;  %v10558_v58 = vld [vmem:[%s17079_s13 + $0x208] sm:$0xf0]  ;;  %v10998_v2 = vld [vmem:[%s17079_s13 + $0x578] sm:$0xf0] }
 0x2fb   : > { %9097 = vmatpush.bf16.msra.mxu2 %v10729_v52  ;;  %v8844_v52 = vpop.f32.mrf.mxu2  ;;  %v10561_v61 = vor.u32 %v15231_v54, %v10558_v58  ;;  %v10926_v54 = vld [vmem:[%s17079_s13 + $0x4e8] sm:$0xf0]  ;;  %v15339_v58 = vld [vmem:[%s17079_s13 + $0x564] sm:$0xf] }
 0x2fc   : > { %9110 = vmatpush.bf16.msra.mxu3 %v10793_v20  ;;  %v8845_v20 = vadd.f32 %v8844_v52, %v8832_v41  ;;  %v10694_v41 = vld [vmem:[%s17079_s13 + $0x318] sm:$0xf0]  ;;  %v15279_v52 = vld [vmem:[%s17079_s13 + $0x384] sm:$0xf] }
 0x2fd   : > { %9072 = vmatpush.bf16.msra.mxu0 %v10593_v37  ;;  %v10641_v37 = vor.u32 %v15251_v60, %v10638_v5  ;;  %v10761_v60 = vor.u32 %v15281_v0, %v10758_v35  ;;  %v10750_v5 = vld [vmem:[%s17079_s13 + $0x388] sm:$0xf0]  ;;  %v15323_v35 = vld [vmem:[%s17079_s13 + $0x4e4] sm:$0xf] }
 0x2fe   : > { %9085 = vmatpush.bf16.msra.mxu1 %v10657_v4  ;;  %v18751_v22 = vadd.f32 %v8857_v21, %v8845_v20  ;;  %v15233_v4 = vld [vmem:[%s17079_s13 + $0x214] sm:$0xf]  ;;  %v10870_v20 = vld [vmem:[%s17079_s13 + $0x478] sm:$0xf0]  ;;  %v8859_v7 = vpop.f32.mrf.mxu3  ;;  %v10862_v0 = vld [vmem:[%s17079_s13 + $0x468] sm:$0xf0] }
 0x2ff   : > { %9098 = vmatpush.bf16.msra.mxu2 %v10721_v1  ;;  %v10566_v1 = vld [vmem:[%s17079_s13 + $0x218] sm:$0xf0]  ;;  %v15325_v21 = vld [vmem:[%s17079_s13 + $0x4f4] sm:$0xf] }
 0x300   : > { %9111 = vmatpush.bf16.msra.mxu3 %v10785_v49  ;;  %v15265_v49 = vld [vmem:[%s17079_s13 + $0x314] sm:$0xf]  ;;  %v10569_v40 = vor.u32 %v15233_v4, %v10566_v1  ;;  %v11062_v1 = vld [vmem:[%s17079_s13 + $0x5f8] sm:$0xf0] }
 0x301   : > { %9073 = vmatpush.bf16.msra.mxu0 %v10585_v18  ;;  %v10633_v18 = vor.u32 %v15249_v57, %v10630_v12  ;;  %v15357_v4 = vld [vmem:[%s17079_s13 + $0x5f4] sm:$0xf]  ;;  %v10753_v57 = vor.u32 %v15279_v52, %v10750_v5  ;;  %v10937_v12 = vor.u32 %v15325_v21, %v10934_v59  ;;  %v10854_v52 = vld [vmem:[%s17079_s13 + $0x458] sm:$0xf0] }
 0x302   : > { %9086 = vmatpush.bf16.msra.mxu1 %v10649_v62  ;;  %v10697_v62 = vor.u32 %v15265_v49, %v10694_v41  ;;  %v15307_v41 = vld [vmem:[%s17079_s13 + $0x464] sm:$0xf]  ;;  %v15321_v5 = vld [vmem:[%s17079_s13 + $0x4d4] sm:$0xf]  ;;  %v10982_v21 = vld [vmem:[%s17079_s13 + $0x558] sm:$0xf0] }
 0x303   : > { %9099 = vmatpush.bf16.msra.mxu2 %v10713_v8  ;;  %v15247_v8 = vld [vmem:[%s17079_s13 + $0x284] sm:$0xf]  ;;  %v8846_v44 = vpop.f32.mrf.mxu2  ;;  %v15353_v7 = vld [vmem:[%s17079_s13 + $0x5d4] sm:$0xf] }
 0x304   : > { %9112 = vmatpush.bf16.msra.mxu3 %v10777_v63  ;;  %v10686_v63 = vld [vmem:[%s17079_s13 + $0x308] sm:$0xf0] }
 0x305   : > { %9074 = vmatpush.bf16.msra.mxu0 %v10577_v55  ;;  %v15341_v55 = vld [vmem:[%s17079_s13 + $0x574] sm:$0xf] }
 0x306   : > { %9087 = vmatpush.bf16.msra.mxu1 %v10641_v37  ;;  %v10625_v37 = vor.u32 %v15247_v8, %v10622_v51  ;;  %v11001_v49 = vor.u32 %v15341_v55, %v10998_v2  ;;  %v11054_v8 = vld [vmem:[%s17079_s13 + $0x5e8] sm:$0xf0]  ;;  %v10865_v51 = vor.u32 %v15307_v41, %v10862_v0  ;;  %v15303_v2 = vld [vmem:[%s17079_s13 + $0x444] sm:$0xf] }
 0x307   : > { %9100 = vmatpush.bf16.msra.mxu2 %v10705_v27  ;;  %v10689_v27 = vor.u32 %v15263_v6, %v10686_v63  ;;  %v10929_v6 = vor.u32 %v15323_v35, %v10926_v54  ;;  %v15305_v63 = vld [vmem:[%s17079_s13 + $0x454] sm:$0xf] }
 0x308   : > { %9113 = vmatpush.bf16.msra.mxu3 %v10769_v19  ;;  %v10873_v19 = vor.u32 %v15309_v53, %v10870_v20  ;;  %v10918_v53 = vld [vmem:[%s17079_s13 + $0x4d8] sm:$0xf0]  ;;  %v15337_v20 = vld [vmem:[%s17079_s13 + $0x554] sm:$0xf]  ;;  %v10857_v59 = vor.u32 %v15305_v63, %v10854_v52 }
 0x309   : > { %9075 = vmatpush.bf16.msra.mxu0 %v10569_v40  ;;  %v11065_v40 = vor.u32 %v15357_v4, %v11062_v1  ;;  %v10985_v55 = vor.u32 %v15337_v20, %v10982_v21  ;;  %v15335_v4 = vld [vmem:[%s17079_s13 + $0x544] sm:$0xf]  ;;  %v10974_v1 = vld [vmem:[%s17079_s13 + $0x548] sm:$0xf0]  ;;  %v15301_v35 = vld [vmem:[%s17079_s13 + $0x434] sm:$0xf] }
 0x30a   : > { %9088 = vmatpush.bf16.msra.mxu1 %v10633_v18  ;;  %v10990_v18 = vld [vmem:[%s17079_s13 + $0x568] sm:$0xf0]  ;;  %v10977_v0 = vor.u32 %v15335_v4, %v10974_v1  ;;  %v15317_v54 = vld [vmem:[%s17079_s13 + $0x4b4] sm:$0xf] }
 0x30b   : > { %9101 = vmatpush.bf16.msra.mxu2 %v10697_v62  ;;  %v15355_v62 = vld [vmem:[%s17079_s13 + $0x5e4] sm:$0xf]  ;;  %v15297_v1 = vld [vmem:[%s17079_s13 + $0x414] sm:$0xf] }
 0x30c   : > { %9114 = vmatpush.bf16.msra.mxu3 %v10761_v60  ;;  %v10993_v60 = vor.u32 %v15339_v58, %v10990_v18  ;;  %v11057_v44 = vor.u32 %v15355_v62, %v11054_v8  ;;  %v10902_v18 = vld [vmem:[%s17079_s13 + $0x4b8] sm:$0xf0]  ;;  %v15333_v62 = vld [vmem:[%s17079_s13 + $0x534] sm:$0xf] }
 0x30d   : > { %9076 = vmatpush.bf16.msra.mxu0 %v10561_v61  ;;  %v11046_v61 = vld [vmem:[%s17079_s13 + $0x5d8] sm:$0xf0]  ;;  %v10905_v63 = vor.u32 %v15317_v54, %v10902_v18  ;;  %v15295_v18 = vld [vmem:[%s17079_s13 + $0x404] sm:$0xf] }
 0x30e   : > { %9089 = vmatpush.bf16.msra.mxu1 %v10625_v37  ;;  %v10846_v37 = vld [vmem:[%s17079_s13 + $0x448] sm:$0xf0]  ;;  %v10966_v8 = vld [vmem:[%s17079_s13 + $0x538] sm:$0xf0] }
 0x30f   : > { %9102 = vmatpush.bf16.msra.mxu2 %v10689_v27  ;;  %v10910_v27 = vld [vmem:[%s17079_s13 + $0x4c8] sm:$0xf0]  ;;  %v10969_v52 = vor.u32 %v15333_v62, %v10966_v8  ;;  %v11014_v54 = vld [vmem:[%s17079_s13 + $0x598] sm:$0xf0] }
 0x310   : > { %9115 = vmatpush.bf16.msra.mxu3 %v10753_v57  ;;  %9077 = vmatmul.bf16.vlgmr.msra.gmra.mxu0 %v17270_v42  ;;  %v15319_v42 = vld [vmem:[%s17079_s13 + $0x4c4] sm:$0xf]  ;;  %v18803_v57 = vpop.f32.mrf.mxu0  ;;  %v10814_v62 = vld [vmem:[%s17079_s13 + $0x408] sm:$0xf0] }
 0x311   : > { %9121 = vmatpush.bf16.msrb.mxu0 %v10873_v19  ;;  %9090 = vmatmul.bf16.vlgmr.msra.gmra.mxu1 %v17274_v45  ;;  %v15351_v45 = vld [vmem:[%s17079_s13 + $0x5c4] sm:$0xf]  ;;  %v11038_v19 = vld [vmem:[%s17079_s13 + $0x5c8] sm:$0xf0]  ;;  %v10913_v41 = vor.u32 %v15319_v42, %v10910_v27 }
 0x312   : > { %9134 = vmatpush.bf16.msrb.mxu1 %v10937_v12  ;;  %9103 = vmatmul.bf16.vlgmr.msra.gmra.mxu2 %v17266_v39  ;;  %v10921_v39 = vor.u32 %v15321_v5, %v10918_v53  ;;  %v10849_v12 = vor.u32 %v15303_v2, %v10846_v37  ;;  %v11041_v58 = vor.u32 %v15351_v45, %v11038_v19  ;;  %v15299_v5 = vld [vmem:[%s17079_s13 + $0x424] sm:$0xf]  ;;  %v11022_v2 = vld [vmem:[%s17079_s13 + $0x5a8] sm:$0xf0]  ;;  %v10822_v45 = vld [vmem:[%s17079_s13 + $0x418] sm:$0xf0] }
 0x313   : > { %9147 = vmatpush.bf16.msrb.mxu2 %v11001_v49  ;;  %9116 = vmatmul.bf16.vlgmr.msra.gmra.mxu3 %v17272_v43  ;;  %v11049_v43 = vor.u32 %v15353_v7, %v11046_v61  ;;  %v18807_v49 = vpop.f32.mrf.mxu1  ;;  %v15315_v53 = vld [vmem:[%s17079_s13 + $0x4a4] sm:$0xf]  ;;  %v10894_v7 = vld [vmem:[%s17079_s13 + $0x4a8] sm:$0xf0]  ;;  %v15313_v19 = vld [vmem:[%s17079_s13 + $0x494] sm:$0xf] }
 0x314   : > { %9160 = vmatpush.bf16.msrb.mxu3 %v11065_v40  ;;  %v10838_v40 = vld [vmem:[%s17079_s13 + $0x438] sm:$0xf0]  ;;  %v15331_v61 = vld [vmem:[%s17079_s13 + $0x524] sm:$0xf]  ;;  %v10897_v27 = vor.u32 %v15315_v53, %v10894_v7  ;;  %v11006_v53 = vld [vmem:[%s17079_s13 + $0x588] sm:$0xf0] }
 0x315   : > { %9122 = vmatpush.bf16.msrb.mxu0 %v10865_v51  ;;  %v15349_v51 = vld [vmem:[%s17079_s13 + $0x5b4] sm:$0xf]  ;;  %v18820_v21 = vpop.f32.mrf.mxu2 }
 0x316   : > { %9135 = vmatpush.bf16.msrb.mxu1 %v10929_v6  ;;  %v11030_v6 = vld [vmem:[%s17079_s13 + $0x5b8] sm:$0xf0]  ;;  %v15373_v7 = vld [vmem:[%s17079_s13 + $0x674] sm:$0xf] }
 0x317   : > { %9148 = vmatpush.bf16.msrb.mxu2 %v10993_v60  ;;  %v10841_v60 = vor.u32 %v15301_v35, %v10838_v40  ;;  %v11033_v20 = vor.u32 %v15349_v51, %v11030_v6  ;;  %v10950_v35 = vld [vmem:[%s17079_s13 + $0x518] sm:$0xf0]  ;;  %v15345_v40 = vld [vmem:[%s17079_s13 + $0x594] sm:$0xf]  ;;  %v15311_v6 = vld [vmem:[%s17079_s13 + $0x484] sm:$0xf] }
 0x318   : > { %9161 = vmatpush.bf16.msrb.mxu3 %v11057_v44  ;;  %v10830_v44 = vld [vmem:[%s17079_s13 + $0x428] sm:$0xf0]  ;;  %v8872_v37 = vpop.f32.mrf.mxu0 }
 0x319   : > { %9123 = vmatpush.bf16.msrb.mxu0 %v10857_v59  ;;  %v10958_v59 = vld [vmem:[%s17079_s13 + $0x528] sm:$0xf0]  ;;  %v10833_v42 = vor.u32 %v15299_v5, %v10830_v44  ;;  %v15343_v44 = vld [vmem:[%s17079_s13 + $0x584] sm:$0xf]  ;;  %v11190_v37 = vld [vmem:[%s17079_s13 + $0x6f8] sm:$0xf0] }
 0x31a   : > { %9136 = vmatpush.bf16.msrb.mxu1 %v10921_v39  ;;  %v18825_v39 = vpop.f32.mrf.mxu3  ;;  %v10961_v4 = vor.u32 %v15331_v61, %v10958_v59  ;;  %v10942_v5 = vld [vmem:[%s17079_s13 + $0x508] sm:$0xf0]  ;;  %v11126_v61 = vld [vmem:[%s17079_s13 + $0x678] sm:$0xf0]  ;;  %v15389_v59 = vld [vmem:[%s17079_s13 + $0x6f4] sm:$0xf] }
 0x31b   : > { %9149 = vmatpush.bf16.msrb.mxu2 %v10985_v55  ;;  %v15347_v55 = vld [vmem:[%s17079_s13 + $0x5a4] sm:$0xf] }
 0x31c   : > { %9162 = vmatpush.bf16.msrb.mxu3 %v11049_v43  ;;  %v8885_v43 = vpop.f32.mrf.mxu1 }
 0x31d   : > { %9124 = vmatpush.bf16.msrb.mxu0 %v10849_v12  ;;  %v11025_v12 = vor.u32 %v15347_v55, %v11022_v2  ;;  %v10817_v2 = vor.u32 %v15295_v18, %v10814_v62  ;;  %v11254_v43 = vld [vmem:[%s17079_s13 + $0x778] sm:$0xf0]  ;;  %v11182_v18 = vld [vmem:[%s17079_s13 + $0x6e8] sm:$0xf0]  ;;  %v15403_v62 = vld [vmem:[%s17079_s13 + $0x764] sm:$0xf] }
 0x31e   : > { %9137 = vmatpush.bf16.msrb.mxu1 %v10913_v41  ;;  %v10886_v41 = vld [vmem:[%s17079_s13 + $0x498] sm:$0xf0] }
 0x31f   : > { %9150 = vmatpush.bf16.msrb.mxu2 %v10977_v0  ;;  %v15329_v0 = vld [vmem:[%s17079_s13 + $0x514] sm:$0xf]  ;;  %v10889_v8 = vor.u32 %v15313_v19, %v10886_v41  ;;  %v11009_v19 = vor.u32 %v15343_v44, %v11006_v53  ;;  %v11193_v41 = vor.u32 %v15389_v59, %v11190_v37  ;;  %v11110_v44 = vld [vmem:[%s17079_s13 + $0x658] sm:$0xf0] }
 0x320   : > { %9163 = vmatpush.bf16.msrb.mxu3 %v11041_v58  ;;  %v10825_v58 = vor.u32 %v15297_v1, %v10822_v45  ;;  %v10953_v51 = vor.u32 %v15329_v0, %v10950_v35  ;;  %v15421_v1 = vld [vmem:[%s17079_s13 + $0x7f4] sm:$0xf]  ;;  %v11318_v45 = vld [vmem:[%s17079_s13 + $0x7f8] sm:$0xf0]  ;;  %v15371_v35 = vld [vmem:[%s17079_s13 + $0x664] sm:$0xf] }
 0x321   : > { %9125 = vmatpush.bf16.msrb.mxu0 %v10841_v60  ;;  %v10878_v60 = vld [vmem:[%s17079_s13 + $0x488] sm:$0xf0]  ;;  %v15385_v53 = vld [vmem:[%s17079_s13 + $0x6d4] sm:$0xf]  ;;  %v11238_v59 = vld [vmem:[%s17079_s13 + $0x758] sm:$0xf0] }
 0x322   : > { %9138 = vmatpush.bf16.msrb.mxu1 %v10905_v63  ;;  %v15327_v63 = vld [vmem:[%s17079_s13 + $0x504] sm:$0xf]  ;;  %v8911_v55 = vpop.f32.mrf.mxu3 }
 0x323   : > { %9151 = vmatpush.bf16.msrb.mxu2 %v10969_v52  ;;  %v11017_v52 = vor.u32 %v15345_v40, %v11014_v54  ;;  %v11118_v40 = vld [vmem:[%s17079_s13 + $0x668] sm:$0xf0]  ;;  %v15387_v54 = vld [vmem:[%s17079_s13 + $0x6e4] sm:$0xf]  ;;  %v15417_v55 = vld [vmem:[%s17079_s13 + $0x7d4] sm:$0xf] }
 0x324   : > { %9164 = vmatpush.bf16.msrb.mxu3 %v11033_v20  ;;  %v8898_v20 = vpop.f32.mrf.mxu2 }
 0x325   : > { %9126 = vmatpush.bf16.msrb.mxu0 %v10833_v42  ;;  %v15405_v42 = vld [vmem:[%s17079_s13 + $0x774] sm:$0xf] }
 0x326   : > { %9139 = vmatpush.bf16.msrb.mxu1 %v10897_v27  ;;  %v10881_v27 = vor.u32 %v15311_v6, %v10878_v60  ;;  %v11257_v0 = vor.u32 %v15405_v42, %v11254_v43  ;;  %v11310_v6 = vld [vmem:[%s17079_s13 + $0x7e8] sm:$0xf0]  ;;  %v11121_v60 = vor.u32 %v15371_v35, %v11118_v40  ;;  %v15367_v43 = vld [vmem:[%s17079_s13 + $0x644] sm:$0xf] }
 0x327   : > { %9152 = vmatpush.bf16.msrb.mxu2 %v10961_v4  ;;  %v10945_v4 = vor.u32 %v15327_v63, %v10942_v5  ;;  %v11185_v63 = vor.u32 %v15387_v54, %v11182_v18  ;;  %v15369_v5 = vld [vmem:[%s17079_s13 + $0x654] sm:$0xf] }
 0x328   : > { %9165 = vmatpush.bf16.msrb.mxu3 %v11025_v12  ;;  %v11129_v12 = vor.u32 %v15373_v7, %v11126_v61  ;;  %v11174_v7 = vld [vmem:[%s17079_s13 + $0x6d8] sm:$0xf0]  ;;  %v15401_v61 = vld [vmem:[%s17079_s13 + $0x754] sm:$0xf] }
 0x329   : > { %9127 = vmatpush.bf16.msrb.mxu0 %v10825_v58  ;;  %v11321_v58 = vor.u32 %v15421_v1, %v11318_v45  ;;  %v11177_v37 = vor.u32 %v15385_v53, %v11174_v7  ;;  %v11241_v42 = vor.u32 %v15401_v61, %v11238_v59  ;;  %v15399_v1 = vld [vmem:[%s17079_s13 + $0x744] sm:$0xf]  ;;  %v11230_v45 = vld [vmem:[%s17079_s13 + $0x748] sm:$0xf0]  ;;  %v15365_v54 = vld [vmem:[%s17079_s13 + $0x634] sm:$0xf] }
 0x32a   : > { %9140 = vmatpush.bf16.msrb.mxu1 %v10889_v8  ;;  %v11246_v8 = vld [vmem:[%s17079_s13 + $0x768] sm:$0xf0]  ;;  %v11233_v40 = vor.u32 %v15399_v1, %v11230_v45  ;;  %v15381_v18 = vld [vmem:[%s17079_s13 + $0x6b4] sm:$0xf]  ;;  %v15363_v53 = vld [vmem:[%s17079_s13 + $0x624] sm:$0xf] }
 0x32b   : > { %9153 = vmatpush.bf16.msrb.mxu2 %v10953_v51  ;;  %v15419_v51 = vld [vmem:[%s17079_s13 + $0x7e4] sm:$0xf] }
 0x32c   : > { %9166 = vmatpush.bf16.msrb.mxu3 %v11017_v52  ;;  %v11249_v52 = vor.u32 %v15403_v62, %v11246_v8  ;;  %v11313_v20 = vor.u32 %v15419_v51, %v11310_v6  ;;  %v11158_v8 = vld [vmem:[%s17079_s13 + $0x6b8] sm:$0xf0]  ;;  %v15397_v51 = vld [vmem:[%s17079_s13 + $0x734] sm:$0xf]  ;;  %v15379_v7 = vld [vmem:[%s17079_s13 + $0x6a4] sm:$0xf] }
 0x32d   : > { %9128 = vmatpush.bf16.msrb.mxu0 %v10817_v2  ;;  %v11302_v2 = vld [vmem:[%s17079_s13 + $0x7d8] sm:$0xf0] }
 0x32e   : > { %9141 = vmatpush.bf16.msrb.mxu1 %v10881_v27  ;;  %v11102_v27 = vld [vmem:[%s17079_s13 + $0x648] sm:$0xf0]  ;;  %v11222_v6 = vld [vmem:[%s17079_s13 + $0x738] sm:$0xf0] }
 0x32f   : > { %9154 = vmatpush.bf16.msrb.mxu2 %v10945_v4  ;;  %v11166_v4 = vld [vmem:[%s17079_s13 + $0x6c8] sm:$0xf0] }
 0x330   : > { %9167 = vmatpush.bf16.msrb.mxu3 %v11009_v19  ;;  %9129 = vmatmul.bf16.vlgmr.msrb.gmra.mxu0 %v17341_v26  ;;  %v11113_v26 = vor.u32 %v15369_v5, %v11110_v44  ;;  %v15415_v19 = vld [vmem:[%s17079_s13 + $0x7c4] sm:$0xf]  ;;  %v11161_v5 = vor.u32 %v15381_v18, %v11158_v8  ;;  %v11225_v44 = vor.u32 %v15397_v51, %v11222_v6  ;;  %v11270_v18 = vld [vmem:[%s17079_s13 + $0x798] sm:$0xf0]  ;;  %v11070_v51 = vld [vmem:[%s17079_s13 + $0x608] sm:$0xf0] }
 0x331   : > { %9173 = vmatpush.bf16.msra.mxu0 %v11129_v12  ;;  %9142 = vmatmul.bf16.vlgmr.msrb.gmra.mxu1 %v17348_v31  ;;  %v11305_v31 = vor.u32 %v15417_v55, %v11302_v2  ;;  %v11294_v12 = vld [vmem:[%s17079_s13 + $0x7c8] sm:$0xf0]  ;;  %v15395_v2 = vld [vmem:[%s17079_s13 + $0x724] sm:$0xf] }
 0x332   : > { %9186 = vmatpush.bf16.msra.mxu1 %v11193_v41  ;;  %9155 = vmatmul.bf16.vlgmr.msrb.gmra.mxu2 %v17346_v30  ;;  %v15383_v30 = vld [vmem:[%s17079_s13 + $0x6c4] sm:$0xf]  ;;  %v11105_v41 = vor.u32 %v15367_v43, %v11102_v27  ;;  %v11297_v62 = vor.u32 %v15415_v19, %v11294_v12  ;;  %v11150_v55 = vld [vmem:[%s17079_s13 + $0x6a8] sm:$0xf0]  ;;  %v15377_v19 = vld [vmem:[%s17079_s13 + $0x694] sm:$0xf] }
 0x333   : > { %9199 = vmatpush.bf16.msra.mxu2 %v11257_v0  ;;  %9168 = vmatmul.bf16.vlgmr.msrb.gmra.mxu3 %v17352_v34  ;;  %v18879_v34 = vpop.f32.mrf.mxu0  ;;  %v18883_v0 = vpop.f32.mrf.mxu1  ;;  %v11169_v35 = vor.u32 %v15383_v30, %v11166_v4  ;;  %v15411_v43 = vld [vmem:[%s17079_s13 + $0x7a4] sm:$0xf]  ;;  %v11278_v27 = vld [vmem:[%s17079_s13 + $0x7a8] sm:$0xf0]  ;;  %v11153_v1 = vor.u32 %v15379_v7, %v11150_v55  ;;  %v11382_v55 = vld [vmem:[%s17079_s13 + $0x878] sm:$0xf0] }
 0x334   : > { %9212 = vmatpush.bf16.msra.mxu3 %v11321_v58  ;;  %v11094_v58 = vld [vmem:[%s17079_s13 + $0x638] sm:$0xf0]  ;;  %v11281_v12 = vor.u32 %v15411_v43, %v11278_v27  ;;  %v15359_v8 = vld [vmem:[%s17079_s13 + $0x604] sm:$0xf]  ;;  %v11262_v7 = vld [vmem:[%s17079_s13 + $0x788] sm:$0xf0] }
 0x335   : > { %9174 = vmatpush.bf16.msra.mxu0 %v11121_v60  ;;  %v15413_v60 = vld [vmem:[%s17079_s13 + $0x7b4] sm:$0xf]  ;;  %v18896_v59 = vpop.f32.mrf.mxu2  ;;  %v11446_v43 = vld [vmem:[%s17079_s13 + $0x8f8] sm:$0xf0] }
 0x336   : > { %9187 = vmatpush.bf16.msra.mxu1 %v11185_v63  ;;  %v11286_v63 = vld [vmem:[%s17079_s13 + $0x7b8] sm:$0xf0]  ;;  %v15469_v27 = vld [vmem:[%s17079_s13 + $0x974] sm:$0xf] }
 0x337   : > { %9200 = vmatpush.bf16.msra.mxu2 %v11249_v52  ;;  %v11097_v52 = vor.u32 %v15365_v54, %v11094_v58  ;;  %v11289_v61 = vor.u32 %v15413_v60, %v11286_v63  ;;  %v15409_v58 = vld [vmem:[%s17079_s13 + $0x794] sm:$0xf] }
 0x338   : > { %9213 = vmatpush.bf16.msra.mxu3 %v11313_v20  ;;  %v11086_v20 = vld [vmem:[%s17079_s13 + $0x628] sm:$0xf0] }
 0x339   : > { %9175 = vmatpush.bf16.msra.mxu0 %v11113_v26  ;;  %v11214_v26 = vld [vmem:[%s17079_s13 + $0x728] sm:$0xf0] }
 0x33a   : > { %9188 = vmatpush.bf16.msra.mxu1 %v11177_v37  ;;  %v8871_v37 = vadd.f32 %v18803_v57, %v18751_v22  ;;  %v11217_v45 = vor.u32 %v15395_v2, %v11214_v26  ;;  %v15361_v22 = vld [vmem:[%s17079_s13 + $0x614] sm:$0xf]  ;;  %v11078_v57 = vld [vmem:[%s17079_s13 + $0x618] sm:$0xf0] }
 0x33b   : > { %9201 = vmatpush.bf16.msra.mxu2 %v11241_v42  ;;  %v18903_v42 = vpop.f32.mrf.mxu3  ;;  %v8924_v30 = vpop.f32.mrf.mxu0  ;;  %v15453_v2 = vld [vmem:[%s17079_s13 + $0x8f4] sm:$0xf] }
 0x33c   : > { %9214 = vmatpush.bf16.msra.mxu3 %v11305_v31  ;;  %v11089_v31 = vor.u32 %v15363_v53, %v11086_v20  ;;  %v8937_v4 = vpop.f32.mrf.mxu1  ;;  %v8884_v54 = vadd.f32 %v18807_v49, %v8871_v37  ;;  %v15375_v49 = vld [vmem:[%s17079_s13 + $0x684] sm:$0xf]  ;;  %v11198_v53 = vld [vmem:[%s17079_s13 + $0x708] sm:$0xf0]  ;;  %v11073_v37 = vor.u32 %v15359_v8, %v11070_v51  ;;  %v11510_v30 = vld [vmem:[%s17079_s13 + $0x978] sm:$0xf0] }
 0x33d   : > { %9176 = vmatpush.bf16.msra.mxu0 %v11105_v41  ;;  %v11142_v41 = vld [vmem:[%s17079_s13 + $0x698] sm:$0xf0]  ;;  %v15407_v20 = vld [vmem:[%s17079_s13 + $0x784] sm:$0xf]  ;;  %v11502_v8 = vld [vmem:[%s17079_s13 + $0x968] sm:$0xf0] }
 0x33e   : > { %9189 = vmatpush.bf16.msra.mxu1 %v11169_v35  ;;  %v15393_v35 = vld [vmem:[%s17079_s13 + $0x714] sm:$0xf]  ;;  %v8897_v6 = vadd.f32 %v18820_v21, %v8884_v54  ;;  %v11145_v60 = vor.u32 %v15377_v19, %v11142_v41  ;;  %v11449_v41 = vor.u32 %v15453_v2, %v11446_v43  ;;  %v15451_v54 = vld [vmem:[%s17079_s13 + $0x8e4] sm:$0xf] }
 0x33f   : > { %9202 = vmatpush.bf16.msra.mxu2 %v11233_v40  ;;  %v11206_v40 = vld [vmem:[%s17079_s13 + $0x718] sm:$0xf0]  ;;  %v15437_v21 = vld [vmem:[%s17079_s13 + $0x874] sm:$0xf]  ;;  %v15483_v51 = vld [vmem:[%s17079_s13 + $0x9e4] sm:$0xf] }
 0x340   : > { %9215 = vmatpush.bf16.msra.mxu3 %v11297_v62  ;;  %v11081_v62 = vor.u32 %v15361_v22, %v11078_v57  ;;  %v11209_v63 = vor.u32 %v15393_v35, %v11206_v40  ;;  %v11574_v22 = vld [vmem:[%s17079_s13 + $0x9f8] sm:$0xf0]  ;;  %v11265_v57 = vor.u32 %v15407_v20, %v11262_v7  ;;  %v11385_v19 = vor.u32 %v15437_v21, %v11382_v55  ;;  %v15435_v40 = vld [vmem:[%s17079_s13 + $0x864] sm:$0xf]  ;;  %v15465_v7 = vld [vmem:[%s17079_s13 + $0x954] sm:$0xf] }
 0x341   : > { %9177 = vmatpush.bf16.msra.mxu0 %v11097_v52  ;;  %v11134_v52 = vld [vmem:[%s17079_s13 + $0x688] sm:$0xf0]  ;;  %v11513_v35 = vor.u32 %v15469_v27, %v11510_v30  ;;  %v11430_v20 = vld [vmem:[%s17079_s13 + $0x8d8] sm:$0xf0]  ;;  %v15481_v21 = vld [vmem:[%s17079_s13 + $0x9d4] sm:$0xf] }
 0x342   : > { %9190 = vmatpush.bf16.msra.mxu1 %v11161_v5  ;;  %v15391_v5 = vld [vmem:[%s17079_s13 + $0x704] sm:$0xf]  ;;  %v11137_v4 = vor.u32 %v15375_v49, %v11134_v52  ;;  %v15433_v52 = vld [vmem:[%s17079_s13 + $0x854] sm:$0xf]  ;;  %v11558_v55 = vld [vmem:[%s17079_s13 + $0x9d8] sm:$0xf0] }
 0x343   : > { %9203 = vmatpush.bf16.msra.mxu2 %v11225_v44  ;;  %v11273_v44 = vor.u32 %v15409_v58, %v11270_v18  ;;  %v8963_v26 = vpop.f32.mrf.mxu3  ;;  %v11438_v18 = vld [vmem:[%s17079_s13 + $0x8e8] sm:$0xf0]  ;;  %v11561_v43 = vor.u32 %v15481_v21, %v11558_v55  ;;  %v15463_v27 = vld [vmem:[%s17079_s13 + $0x944] sm:$0xf] }
 0x344   : > { %9216 = vmatpush.bf16.msra.mxu3 %v11289_v61  ;;  %v8950_v61 = vpop.f32.mrf.mxu2  ;;  %v11486_v30 = vld [vmem:[%s17079_s13 + $0x948] sm:$0xf0] }
 0x345   : > { %9178 = vmatpush.bf16.msra.mxu0 %v11089_v31  ;;  %v8910_v31 = vadd.f32 %v18825_v39, %v8897_v6  ;;  %v11374_v39 = vld [vmem:[%s17079_s13 + $0x868] sm:$0xf0]  ;;  %v11494_v61 = vld [vmem:[%s17079_s13 + $0x958] sm:$0xf0] }
 0x346   : > { %9191 = vmatpush.bf16.msra.mxu1 %v11153_v1  ;;  %v11201_v1 = vor.u32 %v15391_v5, %v11198_v53  ;;  %v11566_v6 = vld [vmem:[%s17079_s13 + $0x9e8] sm:$0xf0]  ;;  %v11366_v5 = vld [vmem:[%s17079_s13 + $0x858] sm:$0xf0]  ;;  %v11497_v26 = vor.u32 %v15465_v7, %v11494_v61 }
 0x347   : > { %9204 = vmatpush.bf16.msra.mxu2 %v11217_v45  ;;  %v15485_v45 = vld [vmem:[%s17079_s13 + $0x9f4] sm:$0xf]  ;;  %v11569_v53 = vor.u32 %v15483_v51, %v11566_v6  ;;  %v11534_v21 = vld [vmem:[%s17079_s13 + $0x9a8] sm:$0xf0] }
 0x348   : > { %9217 = vmatpush.bf16.msra.mxu3 %v11281_v12  ;;  %v8923_v12 = vadd.f32 %v18879_v34, %v8910_v31  ;;  %v11577_v58 = vor.u32 %v15485_v45, %v11574_v22  ;;  %v11377_v34 = vor.u32 %v15435_v40, %v11374_v39  ;;  %v11414_v39 = vld [vmem:[%s17079_s13 + $0x8b8] sm:$0xf0] }
 0x349   : > { %9179 = vmatpush.bf16.msra.mxu0 %v11081_v62  ;;  %v15467_v62 = vld [vmem:[%s17079_s13 + $0x964] sm:$0xf] }
 0x34a   : > { %9192 = vmatpush.bf16.msra.mxu1 %v11145_v60  ;;  %v8936_v60 = vadd.f32 %v18883_v0, %v8923_v12  ;;  %v11505_v49 = vor.u32 %v15467_v62, %v11502_v8  ;;  %v11489_v12 = vor.u32 %v15463_v27, %v11486_v30  ;;  %v11542_v62 = vld [vmem:[%s17079_s13 + $0x9b8] sm:$0xf0]  ;;  %v15441_v27 = vld [vmem:[%s17079_s13 + $0x894] sm:$0xf] }
 0x34b   : > { %9205 = vmatpush.bf16.msra.mxu2 %v11209_v63  ;;  %v11441_v63 = vor.u32 %v15451_v54, %v11438_v18  ;;  %v15461_v54 = vld [vmem:[%s17079_s13 + $0x934] sm:$0xf]  ;;  %v11398_v30 = vld [vmem:[%s17079_s13 + $0x898] sm:$0xf0] }
 0x34c   : > { %9218 = vmatpush.bf16.msra.mxu3 %v11273_v44  ;;  %v15449_v44 = vld [vmem:[%s17079_s13 + $0x8d4] sm:$0xf]  ;;  %v8949_v0 = vadd.f32 %v18896_v59, %v8936_v60  ;;  %v15431_v59 = vld [vmem:[%s17079_s13 + $0x844] sm:$0xf] }
 0x34d   : > { %9180 = vmatpush.bf16.msra.mxu0 %v11073_v37  ;;  %v11433_v2 = vor.u32 %v15449_v44, %v11430_v20  ;;  %v11358_v37 = vld [vmem:[%s17079_s13 + $0x848] sm:$0xf0]  ;;  %v8974_v31 = vpop.f32.mrf.mxu0  ;;  %v15477_v18 = vld [vmem:[%s17079_s13 + $0x9b4] sm:$0xf]  ;;  %v15427_v60 = vld [vmem:[%s17079_s13 + $0x824] sm:$0xf] }
 0x34e   : > { %9193 = vmatpush.bf16.msra.mxu1 %v11137_v4  ;;  %v15479_v4 = vld [vmem:[%s17079_s13 + $0x9c4] sm:$0xf]  ;;  %v11361_v45 = vor.u32 %v15431_v59, %v11358_v37  ;;  %v8987_v22 = vpop.f32.mrf.mxu1  ;;  %v11406_v44 = vld [vmem:[%s17079_s13 + $0x8a8] sm:$0xf0] }
 0x34f   : > { %9206 = vmatpush.bf16.msra.mxu2 %v11201_v1  ;;  %v11550_v1 = vld [vmem:[%s17079_s13 + $0x9c8] sm:$0xf0] }
 0x350   : > { %9219 = vmatpush.bf16.msra.mxu3 %v11265_v57  ;;  %9181 = vmatmul.bf16.vlgmr.msra.gmra.mxu0 %v17419_v24  ;;  %v11369_v24 = vor.u32 %v15433_v52, %v11366_v5  ;;  %v11553_v40 = vor.u32 %v15479_v4, %v11550_v1  ;;  %v11545_v52 = vor.u32 %v15477_v18, %v11542_v62  ;;  %v11470_v20 = vld [vmem:[%s17079_s13 + $0x928] sm:$0xf0]  ;;  %v11462_v4 = vld [vmem:[%s17079_s13 + $0x918] sm:$0xf0]  ;;  %v15471_v62 = vld [vmem:[%s17079_s13 + $0x984] sm:$0xf] }
 0x351   : > { %9225 = vmatpush.bf16.msrb.mxu0 %v11385_v19  ;;  %9194 = vmatmul.bf16.vlgmr.msra.gmra.mxu1 %v17426_v32  ;;  %v11422_v32 = vld [vmem:[%s17079_s13 + $0x8c8] sm:$0xf0] }
 0x352   : > { %9238 = vmatpush.bf16.msrb.mxu1 %v11449_v41  ;;  %9207 = vmatmul.bf16.vlgmr.msra.gmra.mxu2 %v17424_v29  ;;  %v15447_v29 = vld [vmem:[%s17079_s13 + $0x8c4] sm:$0xf]  ;;  %v15429_v41 = vld [vmem:[%s17079_s13 + $0x834] sm:$0xf]  ;;  %v18990_v1 = vld [vmem:[%s17102_s5 + $0x8] sm:$0xff] }
 0x353   : > { %9251 = vmatpush.bf16.msrb.mxu2 %v11513_v35  ;;  %9220 = vmatmul.bf16.vlgmr.msra.gmra.mxu3 %v17430_v36  ;;  %v8962_v36 = vadd.f32 %v18903_v42, %v8949_v0  ;;  %v11425_v19 = vor.u32 %v15447_v29, %v11422_v32  ;;  %v11350_v35 = vld [vmem:[%s17079_s13 + $0x838] sm:$0xf0]  ;;  %v15445_v42 = vld [vmem:[%s17079_s13 + $0x8b4] sm:$0xf]  ;;  %v15475_v0 = vld [vmem:[%s17079_s13 + $0x9a4] sm:$0xf] }
 0x354   : > { %9264 = vmatpush.bf16.msrb.mxu3 %v11577_v58  ;;  %v11478_v58 = vld [vmem:[%s17079_s13 + $0x938] sm:$0xf0]  ;;  %v11353_v8 = vor.u32 %v15429_v41, %v11350_v35  ;;  %v11417_v6 = vor.u32 %v15445_v42, %v11414_v39  ;;  %v11326_v41 = vld [vmem:[%s17079_s13 + $0x808] sm:$0xf0]  ;;  %v11401_v35 = vor.u32 %v15441_v27, %v11398_v30  ;;  %v15547_v27 = vld [vmem:[%s17079_s13 + $0xbe4] sm:$0xf] }
 0x355   : > { %9226 = vmatpush.bf16.msrb.mxu0 %v11377_v34  ;;  %v8975_v57 = vadd.f32 %v8974_v31, %v8962_v36  ;;  %v11481_v34 = vor.u32 %v15461_v54, %v11478_v58  ;;  %v9000_v5 = vpop.f32.mrf.mxu2  ;;  %v8976_v55 = vpop.f32.mrf.mxu0  ;;  %v11334_v32 = vld [vmem:[%s17079_s13 + $0x818] sm:$0xf0]  ;;  %v11537_v36 = vor.u32 %v15475_v0, %v11534_v21  ;;  %v15457_v31 = vld [vmem:[%s17079_s13 + $0x914] sm:$0xf]  ;;  %v11390_v39 = vld [vmem:[%s17079_s13 + $0x888] sm:$0xf0] }
 0x356   : > { %9239 = vmatpush.bf16.msrb.mxu1 %v11441_v63  ;;  %v11342_v63 = vld [vmem:[%s17079_s13 + $0x828] sm:$0xf0]  ;;  %v9013_v61 = vpop.f32.mrf.mxu3  ;;  %v8989_v59 = vpop.f32.mrf.mxu1  ;;  %v11465_v42 = vor.u32 %v15457_v31, %v11462_v4  ;;  %v15455_v54 = vld [vmem:[%s17079_s13 + $0x904] sm:$0xf] }
 0x357   : > { %9252 = vmatpush.bf16.msrb.mxu2 %v11505_v49  ;;  %v8988_v51 = vadd.f32 %v8987_v22, %v8975_v57  ;;  %v15443_v49 = vld [vmem:[%s17079_s13 + $0x8a4] sm:$0xf]  ;;  %v15473_v22 = vld [vmem:[%s17079_s13 + $0x994] sm:$0xf]  ;;  %v11526_v57 = vld [vmem:[%s17079_s13 + $0x998] sm:$0xf0] }
 0x358   : > { %9265 = vmatpush.bf16.msrb.mxu3 %v11569_v53  ;;  %v15459_v53 = vld [vmem:[%s17079_s13 + $0x924] sm:$0xf]  ;;  %v11409_v29 = vor.u32 %v15443_v49, %v11406_v44  ;;  %v11529_v58 = vor.u32 %v15473_v22, %v11526_v57  ;;  %v11454_v18 = vld [vmem:[%s17079_s13 + $0x908] sm:$0xf0]  ;;  %v11766_v44 = vld [vmem:[%s17079_s13 + $0xb78] sm:$0xf0] }
 0x359   : > { %9227 = vmatpush.bf16.msrb.mxu0 %v11369_v24  ;;  %v9001_v7 = vadd.f32 %v9000_v5, %v8988_v51  ;;  %v427_v24 = vld [vmem:[%s17102_s5] sm:$0xff]  ;;  %v15533_v5 = vld [vmem:[%s17079_s13 + $0xb74] sm:$0xf]  ;;  %v11822_v30 = vld [vmem:[%s17079_s13 + $0xbe8] sm:$0xf0] }
 0x35a   : > { %9240 = vmatpush.bf16.msrb.mxu1 %v11433_v2  ;;  %v11345_v2 = vor.u32 %v15427_v60, %v11342_v63  ;;  %v15517_v60 = vld [vmem:[%s17079_s13 + $0xaf4] sm:$0xf]  ;;  %v15515_v59 = vld [vmem:[%s17079_s13 + $0xae4] sm:$0xf]  ;;  %v11622_v22 = vld [vmem:[%s17079_s13 + $0xa58] sm:$0xf0] }
 0x35b   : > { %9253 = vmatpush.bf16.msrb.mxu2 %v11497_v26  ;;  %v15425_v26 = vld [vmem:[%s17079_s13 + $0x814] sm:$0xf]  ;;  %v9014_v37 = vadd.f32 %v9013_v61, %v9001_v7  ;;  %v11830_v61 = vld [vmem:[%s17079_s13 + $0xbf8] sm:$0xf0] }
 0x35c   : > { %9266 = vmatpush.bf16.msrb.mxu3 %v11561_v43  ;;  %v11473_v43 = vor.u32 %v15459_v53, %v11470_v20  ;;  %v11457_v20 = vor.u32 %v15455_v54, %v11454_v18  ;;  %v15549_v7 = vld [vmem:[%s17079_s13 + $0xbf4] sm:$0xf]  ;;  %v11614_v18 = vld [vmem:[%s17079_s13 + $0xa48] sm:$0xf0] }
 0x35d   : > { %9228 = vmatpush.bf16.msrb.mxu0 %v11361_v45  ;;  %v10005_v45 = vadd.f32 %v9014_v37, %v427_v24  ;;  %v9002_v51 = vpop.f32.mrf.mxu2  ;;  %v11769_v24 = vor.u32 %v15533_v5, %v11766_v44  ;;  %v11833_v37 = vor.u32 %v15549_v7, %v11830_v61  ;;  %v15513_v57 = vld [vmem:[%s17079_s13 + $0xad4] sm:$0xf]  ;;  %v11606_v5 = vld [vmem:[%s17079_s13 + $0xa38] sm:$0xf0] }
 0x35e   : > { %9241 = vmatpush.bf16.msrb.mxu1 %v11425_v19  ;;  %v11337_v19 = vor.u32 %v15425_v26, %v11334_v32  ;;  %v9015_v63 = vpop.f32.mrf.mxu3  ;;  %v11630_v26 = vld [vmem:[%s17079_s13 + $0xa68] sm:$0xf0]  ;;  %v15509_v44 = vld [vmem:[%s17079_s13 + $0xab4] sm:$0xf]  ;;  %v11670_v7 = vld [vmem:[%s17079_s13 + $0xab8] sm:$0xf0] }
 0x35f   : > { %9254 = vmatpush.bf16.msrb.mxu2 %v11489_v12  ;;  %v15423_v12 = vld [vmem:[%s17079_s13 + $0x804] sm:$0xf]  ;;  %10007 = vst [vmem:[%s17102_s5] sm:$0xff] %v10005_v45  ;;  %v11758_v32 = vld [vmem:[%s17079_s13 + $0xb68] sm:$0xf0]  ;;  %v15497_v45 = vld [vmem:[%s17079_s13 + $0xa54] sm:$0xf] }
 0x360   : > { %9267 = vmatpush.bf16.msrb.mxu3 %v11553_v40  ;;  %v15439_v40 = vld [vmem:[%s17079_s13 + $0x884] sm:$0xf]  ;;  %v11329_v49 = vor.u32 %v15423_v12, %v11326_v41  ;;  %v11686_v12 = vld [vmem:[%s17079_s13 + $0xad8] sm:$0xf0]  ;;  %v15529_v41 = vld [vmem:[%s17079_s13 + $0xb54] sm:$0xf] }
 0x361   : > { %9229 = vmatpush.bf16.msrb.mxu0 %v11353_v8  ;;  %v11518_v8 = vld [vmem:[%s17079_s13 + $0x988] sm:$0xf0]  ;;  %v11393_v53 = vor.u32 %v15439_v40, %v11390_v39  ;;  %v11814_v40 = vld [vmem:[%s17079_s13 + $0xbd8] sm:$0xf0]  ;;  %v11689_v39 = vor.u32 %v15513_v57, %v11686_v12  ;;  %v15525_v61 = vld [vmem:[%s17079_s13 + $0xb34] sm:$0xf] }
 0x362   : > { %9242 = vmatpush.bf16.msrb.mxu1 %v11417_v6  ;;  %v15501_v6 = vld [vmem:[%s17079_s13 + $0xa74] sm:$0xf]  ;;  %v11521_v0 = vor.u32 %v15471_v62, %v11518_v8  ;;  %v11678_v62 = vld [vmem:[%s17079_s13 + $0xac8] sm:$0xf0]  ;;  %v15527_v8 = vld [vmem:[%s17079_s13 + $0xb44] sm:$0xf] }
 0x363   : > { %9255 = vmatpush.bf16.msrb.mxu2 %v11481_v34  ;;  %v11638_v34 = vld [vmem:[%s17079_s13 + $0xa78] sm:$0xf0]  ;;  %v11742_v51 = vld [vmem:[%s17079_s13 + $0xb48] sm:$0xf0] }
 0x364   : > { %9268 = vmatpush.bf16.msrb.mxu3 %v11545_v52  ;;  %v11702_v52 = vld [vmem:[%s17079_s13 + $0xaf8] sm:$0xf0]  ;;  %v11641_v21 = vor.u32 %v15501_v6, %v11638_v34  ;;  %v11806_v6 = vld [vmem:[%s17079_s13 + $0xbc8] sm:$0xf0] }
 0x365   : > { %9230 = vmatpush.bf16.msrb.mxu0 %v11345_v2  ;;  %v11705_v55 = vor.u32 %v15517_v60, %v11702_v52  ;;  %v15499_v2 = vld [vmem:[%s17079_s13 + $0xa64] sm:$0xf]  ;;  %v15493_v52 = vld [vmem:[%s17079_s13 + $0xa34] sm:$0xf]  ;;  %v11790_v57 = vld [vmem:[%s17079_s13 + $0xba8] sm:$0xf0] }
 0x366   : > { %9243 = vmatpush.bf16.msrb.mxu1 %v11409_v29  ;;  %v11694_v29 = vld [vmem:[%s17079_s13 + $0xae8] sm:$0xf0] }
 0x367   : > { %9256 = vmatpush.bf16.msrb.mxu2 %v11473_v43  ;;  %v15531_v43 = vld [vmem:[%s17079_s13 + $0xb64] sm:$0xf]  ;;  %v11697_v31 = vor.u32 %v15515_v59, %v11694_v29  ;;  %v11598_v29 = vld [vmem:[%s17079_s13 + $0xa28] sm:$0xf0] }
 0x368   : > { %9269 = vmatpush.bf16.msrb.mxu3 %v11537_v36  ;;  %v11633_v36 = vor.u32 %v15499_v2, %v11630_v26  ;;  %v11761_v4 = vor.u32 %v15531_v43, %v11758_v32  ;;  %v11609_v2 = vor.u32 %v15493_v52, %v11606_v5  ;;  %v11673_v26 = vor.u32 %v15509_v44, %v11670_v7  ;;  %v15507_v43 = vld [vmem:[%s17079_s13 + $0xaa4] sm:$0xf]  ;;  %v11774_v7 = vld [vmem:[%s17079_s13 + $0xb88] sm:$0xf0] }
 0x369   : > { %9231 = vmatpush.bf16.msrb.mxu0 %v11337_v19  ;;  %v11825_v19 = vor.u32 %v15547_v27, %v11822_v30  ;;  %v11662_v30 = vld [vmem:[%s17079_s13 + $0xaa8] sm:$0xf0]  ;;  %v15519_v52 = vld [vmem:[%s17079_s13 + $0xb04] sm:$0xf] }
 0x36a   : > { %9244 = vmatpush.bf16.msrb.mxu1 %v11401_v35  ;;  %v11750_v35 = vld [vmem:[%s17079_s13 + $0xb58] sm:$0xf0] }
 0x36b   : > { %9257 = vmatpush.bf16.msrb.mxu2 %v11465_v42  ;;  %v15545_v42 = vld [vmem:[%s17079_s13 + $0xbd4] sm:$0xf]  ;;  %v11753_v54 = vor.u32 %v15529_v41, %v11750_v35  ;;  %v11665_v35 = vor.u32 %v15507_v43, %v11662_v30 }
 0x36c   : > { %9270 = vmatpush.bf16.msrb.mxu3 %v11529_v58  ;;  %v15495_v58 = vld [vmem:[%s17079_s13 + $0xa44] sm:$0xf]  ;;  %v15613_v43 = vld [vmem:[%s17079_s13 + $0xdf4] sm:$0xf] }
 0x36d   : > { %9232 = vmatpush.bf16.msrb.mxu0 %v11329_v49  ;;  %v11617_v34 = vor.u32 %v15495_v58, %v11614_v18  ;;  %v9026_v60 = vpop.f32.mrf.mxu0  ;;  %v11745_v49 = vor.u32 %v15527_v8, %v11742_v51  ;;  %v11654_v18 = vld [vmem:[%s17079_s13 + $0xa98] sm:$0xf0] }
 0x36e   : > { %9245 = vmatpush.bf16.msrb.mxu1 %v11393_v53  ;;  %v9039_v53 = vpop.f32.mrf.mxu1  ;;  %v11782_v8 = vld [vmem:[%s17079_s13 + $0xb98] sm:$0xf0] }
 0x36f   : > { %9258 = vmatpush.bf16.msrb.mxu2 %v11457_v20 }
 0x370   : > { %9271 = vmatpush.bf16.msrb.mxu3 %v11521_v0  ;;  %9233 = vmatmul.bf16.vlgmr.msrb.gmra.mxu0 %v17497_v38  ;;  %v11625_v38 = vor.u32 %v15497_v45, %v11622_v22  ;;  %v11734_v0 = vld [vmem:[%s17079_s13 + $0xb38] sm:$0xf0]  ;;  %v15539_v22 = vld [vmem:[%s17079_s13 + $0xba4] sm:$0xf] }
 0x371   : > { %9277 = vmatpush.bf16.msra.mxu0 %v11641_v21  ;;  %9246 = vmatmul.bf16.vlgmr.msrb.gmra.mxu1 %v17504_v47  ;;  %v11817_v47 = vor.u32 %v15545_v42, %v11814_v40  ;;  %v9040_v21 = vadd.f32 %v9039_v53, %v9026_v60  ;;  %v11737_v59 = vor.u32 %v15525_v61, %v11734_v0  ;;  %v15489_v40 = vld [vmem:[%s17079_s13 + $0xa14] sm:$0xf]  ;;  %v11710_v53 = vld [vmem:[%s17079_s13 + $0xb08] sm:$0xf0] }
 0x372   : > { %9290 = vmatpush.bf16.msra.mxu1 %v11705_v55  ;;  %9259 = vmatmul.bf16.vlgmr.msrb.gmra.mxu2 %v17502_v46  ;;  %v15511_v46 = vld [vmem:[%s17079_s13 + $0xac4] sm:$0xf]  ;;  %v15541_v55 = vld [vmem:[%s17079_s13 + $0xbb4] sm:$0xf]  ;;  %v11793_v58 = vor.u32 %v15539_v22, %v11790_v57 }
 0x373   : > { %9303 = vmatpush.bf16.msra.mxu2 %v11769_v24  ;;  %9272 = vmatmul.bf16.vlgmr.msrb.gmra.mxu3 %v17508_v50  ;;  %v15543_v50 = vld [vmem:[%s17079_s13 + $0xbc4] sm:$0xf]  ;;  %v11681_v63 = vor.u32 %v15511_v46, %v11678_v62  ;;  %v11798_v24 = vld [vmem:[%s17079_s13 + $0xbb8] sm:$0xf0]  ;;  %v15521_v46 = vld [vmem:[%s17079_s13 + $0xb14] sm:$0xf] }
 0x374   : > { %9316 = vmatpush.bf16.msra.mxu3 %v11833_v37  ;;  %v11809_v20 = vor.u32 %v15543_v50, %v11806_v6  ;;  %v15491_v37 = vld [vmem:[%s17079_s13 + $0xa24] sm:$0xf]  ;;  %v11801_v27 = vor.u32 %v15541_v55, %v11798_v24  ;;  %v15537_v62 = vld [vmem:[%s17079_s13 + $0xb94] sm:$0xf]  ;;  %v11582_v6 = vld [vmem:[%s17079_s13 + $0xa08] sm:$0xf0] }
 0x375   : > { %9278 = vmatpush.bf16.msra.mxu0 %v11633_v36  ;;  %v9052_v32 = vpop.f32.mrf.mxu2  ;;  %v15523_v36 = vld [vmem:[%s17079_s13 + $0xb24] sm:$0xf]  ;;  %v9028_v41 = vpop.f32.mrf.mxu0  ;;  %v11785_v44 = vor.u32 %v15537_v62, %v11782_v8  ;;  %v15565_v0 = vld [vmem:[%s17079_s13 + $0xc74] sm:$0xf]  ;;  %v11942_v62 = vld [vmem:[%s17079_s13 + $0xcd8] sm:$0xf0] }
 0x376   : > { %9291 = vmatpush.bf16.msra.mxu1 %v11697_v31  ;;  %v11726_v31 = vld [vmem:[%s17079_s13 + $0xb28] sm:$0xf0]  ;;  %v9065_v45 = vpop.f32.mrf.mxu3  ;;  %v15487_v50 = vld [vmem:[%s17079_s13 + $0xa04] sm:$0xf]  ;;  %v15581_v55 = vld [vmem:[%s17079_s13 + $0xcf4] sm:$0xf] }
 0x377   : > { %9304 = vmatpush.bf16.msra.mxu2 %v11761_v4  ;;  %v9053_v4 = vadd.f32 %v9052_v32, %v9040_v21  ;;  %v11729_v42 = vor.u32 %v15523_v36, %v11726_v31  ;;  %v11894_v21 = vld [vmem:[%s17079_s13 + $0xc78] sm:$0xf0]  ;;  %v11585_v24 = vor.u32 %v15487_v50, %v11582_v6  ;;  %v15579_v22 = vld [vmem:[%s17079_s13 + $0xce4] sm:$0xf]  ;;  %v15593_v8 = vld [vmem:[%s17079_s13 + $0xd54] sm:$0xf] }
 0x378   : > { %9317 = vmatpush.bf16.msra.mxu3 %v11825_v19  ;;  %v11601_v19 = vor.u32 %v15491_v37, %v11598_v29  ;;  %v11713_v29 = vor.u32 %v15519_v52, %v11710_v53  ;;  %v12086_v32 = vld [vmem:[%s17079_s13 + $0xdf8] sm:$0xf0]  ;;  %v11897_v30 = vor.u32 %v15565_v0, %v11894_v21  ;;  %v15595_v41 = vld [vmem:[%s17079_s13 + $0xd64] sm:$0xf]  ;;  %v15609_v50 = vld [vmem:[%s17079_s13 + $0xdd4] sm:$0xf] }
 0x379   : > { %9279 = vmatpush.bf16.msra.mxu0 %v11625_v38  ;;  %v19055_v12 = vadd.f32 %v9065_v45, %v9053_v4  ;;  %v11590_v38 = vld [vmem:[%s17079_s13 + $0xa18] sm:$0xf0]  ;;  %v15563_v4 = vld [vmem:[%s17079_s13 + $0xc64] sm:$0xf]  ;;  %v11886_v45 = vld [vmem:[%s17079_s13 + $0xc68] sm:$0xf0]  ;;  %v12089_v57 = vor.u32 %v15613_v43, %v12086_v32 }
 0x37a   : > { %9292 = vmatpush.bf16.msra.mxu1 %v11689_v39  ;;  %v15505_v39 = vld [vmem:[%s17079_s13 + $0xa94] sm:$0xf]  ;;  %v11593_v51 = vor.u32 %v15489_v40, %v11590_v38  ;;  %v12078_v40 = vld [vmem:[%s17079_s13 + $0xde8] sm:$0xf0]  ;;  %v11889_v38 = vor.u32 %v15563_v4, %v11886_v45  ;;  %v12070_v6 = vld [vmem:[%s17079_s13 + $0xdd8] sm:$0xf0] }
 0x37b   : > { %9305 = vmatpush.bf16.msra.mxu2 %v11753_v54  ;;  %v9041_v54 = vpop.f32.mrf.mxu1  ;;  %v11934_v52 = vld [vmem:[%s17079_s13 + $0xcc8] sm:$0xf0]  ;;  %v15607_v53 = vld [vmem:[%s17079_s13 + $0xdc4] sm:$0xf]  ;;  %v15557_v21 = vld [vmem:[%s17079_s13 + $0xc34] sm:$0xf] }
 0x37c   : > { %9318 = vmatpush.bf16.msra.mxu3 %v11817_v47  ;;  %v11718_v47 = vld [vmem:[%s17079_s13 + $0xb18] sm:$0xf0]  ;;  %v15605_v32 = vld [vmem:[%s17079_s13 + $0xdb4] sm:$0xf]  ;;  %v15555_v4 = vld [vmem:[%s17079_s13 + $0xc24] sm:$0xf] }
 0x37d   : > { %9280 = vmatpush.bf16.msra.mxu0 %v11617_v34  ;;  %v11657_v34 = vor.u32 %v15505_v39, %v11654_v18  ;;  %v11721_v60 = vor.u32 %v15521_v46, %v11718_v47  ;;  %v9054_v5 = vpop.f32.mrf.mxu2  ;;  %v11878_v18 = vld [vmem:[%s17079_s13 + $0xc58] sm:$0xf0]  ;;  %v15577_v46 = vld [vmem:[%s17079_s13 + $0xcd4] sm:$0xf]  ;;  %v11854_v45 = vld [vmem:[%s17079_s13 + $0xc28] sm:$0xf0] }
 0x37e   : > { %9293 = vmatpush.bf16.msra.mxu1 %v11681_v63  ;;  %v15503_v63 = vld [vmem:[%s17079_s13 + $0xa84] sm:$0xf]  ;;  %v9067_v61 = vpop.f32.mrf.mxu3  ;;  %v11990_v43 = vld [vmem:[%s17079_s13 + $0xd38] sm:$0xf0] }
 0x37f   : > { %9306 = vmatpush.bf16.msra.mxu2 %v11745_v49  ;;  %v11646_v49 = vld [vmem:[%s17079_s13 + $0xa88] sm:$0xf0]  ;;  %v15591_v5 = vld [vmem:[%s17079_s13 + $0xd44] sm:$0xf] }
 0x380   : > { %9319 = vmatpush.bf16.msra.mxu3 %v11809_v20  ;;  %v15535_v20 = vld [vmem:[%s17079_s13 + $0xb84] sm:$0xf]  ;;  %v11649_v37 = vor.u32 %v15503_v63, %v11646_v49  ;;  %v11870_v49 = vld [vmem:[%s17079_s13 + $0xc48] sm:$0xf0] }
 0x381   : > { %9281 = vmatpush.bf16.msra.mxu0 %v11609_v2  ;;  %v11958_v2 = vld [vmem:[%s17079_s13 + $0xcf8] sm:$0xf0]  ;;  %v15559_v63 = vld [vmem:[%s17079_s13 + $0xc44] sm:$0xf] }
 0x382   : > { %9294 = vmatpush.bf16.msra.mxu1 %v11673_v26  ;;  %v15597_v26 = vld [vmem:[%s17079_s13 + $0xd74] sm:$0xf]  ;;  %v11961_v36 = vor.u32 %v15581_v55, %v11958_v2  ;;  %v11862_v55 = vld [vmem:[%s17079_s13 + $0xc38] sm:$0xf0] }
 0x383   : > { %9307 = vmatpush.bf16.msra.mxu2 %v11737_v59  ;;  %v12022_v59 = vld [vmem:[%s17079_s13 + $0xd78] sm:$0xf0] }
 0x384   : > { %9320 = vmatpush.bf16.msra.mxu3 %v11801_v27  ;;  %v11777_v27 = vor.u32 %v15535_v20, %v11774_v7  ;;  %v12025_v31 = vor.u32 %v15597_v26, %v12022_v59  ;;  %v11873_v20 = vor.u32 %v15559_v63, %v11870_v49  ;;  %v11974_v63 = vld [vmem:[%s17079_s13 + $0xd18] sm:$0xf0]  ;;  %v15601_v49 = vld [vmem:[%s17079_s13 + $0xd94] sm:$0xf] }
 0x385   : > { %9282 = vmatpush.bf16.msra.mxu0 %v11601_v19  ;;  %v11950_v19 = vld [vmem:[%s17079_s13 + $0xce8] sm:$0xf0] }
 0x386   : > { %9295 = vmatpush.bf16.msra.mxu1 %v11665_v35  ;;  %v12014_v35 = vld [vmem:[%s17079_s13 + $0xd68] sm:$0xf0]  ;;  %v11953_v39 = vor.u32 %v15579_v22, %v11950_v19  ;;  %v15571_v22 = vld [vmem:[%s17079_s13 + $0xca4] sm:$0xf] }
 0x387   : > { %9308 = vmatpush.bf16.msra.mxu2 %v11729_v42  ;;  %v15611_v42 = vld [vmem:[%s17079_s13 + $0xde4] sm:$0xf]  ;;  %v12017_v54 = vor.u32 %v15595_v41, %v12014_v35  ;;  %v11918_v41 = vld [vmem:[%s17079_s13 + $0xca8] sm:$0xf0] }
 0x388   : > { %9321 = vmatpush.bf16.msra.mxu3 %v11793_v58  ;;  %v15561_v58 = vld [vmem:[%s17079_s13 + $0xc54] sm:$0xf]  ;;  %v12081_v47 = vor.u32 %v15611_v42, %v12078_v40  ;;  %v15587_v35 = vld [vmem:[%s17079_s13 + $0xd24] sm:$0xf]  ;;  %v11982_v42 = vld [vmem:[%s17079_s13 + $0xd28] sm:$0xf0] }
 0x389   : > { %9283 = vmatpush.bf16.msra.mxu0 %v11593_v51  ;;  %v12006_v51 = vld [vmem:[%s17079_s13 + $0xd58] sm:$0xf0] }
 0x38a   : > { %9296 = vmatpush.bf16.msra.mxu1 %v11657_v34  ;;  %v11945_v34 = vor.u32 %v15577_v46, %v11942_v62  ;;  %v11985_v62 = vor.u32 %v15587_v35, %v11982_v42  ;;  %v15643_v35 = vld [vmem:[%s17079_s13 + $0xee4] sm:$0xf] }
 0x38b   : > { %9309 = vmatpush.bf16.msra.mxu2 %v11721_v60  ;;  %v12009_v60 = vor.u32 %v15593_v8, %v12006_v51  ;;  %v15553_v8 = vld [vmem:[%s17079_s13 + $0xc14] sm:$0xf]  ;;  %v11846_v51 = vld [vmem:[%s17079_s13 + $0xc18] sm:$0xf0] }
 0x38c   : > { %9322 = vmatpush.bf16.msra.mxu3 %v11785_v44  ;;  %v11998_v44 = vld [vmem:[%s17079_s13 + $0xd48] sm:$0xf0] }
 0x38d   : > { %9284 = vmatpush.bf16.msra.mxu0 %v11585_v24  ;;  %v9078_v7 = vpop.f32.mrf.mxu0  ;;  %v12001_v0 = vor.u32 %v15591_v5, %v11998_v44  ;;  %v15573_v24 = vld [vmem:[%s17079_s13 + $0xcb4] sm:$0xf]  ;;  %v11838_v5 = vld [vmem:[%s17079_s13 + $0xc08] sm:$0xf0] }
 0x38e   : > { %9297 = vmatpush.bf16.msra.mxu1 %v11649_v37  ;;  %v9079_v2 = vadd.f32 %v9078_v7, %v19055_v12  ;;  %v9091_v26 = vpop.f32.mrf.mxu1  ;;  %v11926_v37 = vld [vmem:[%s17079_s13 + $0xcb8] sm:$0xf0]  ;;  %v15583_v7 = vld [vmem:[%s17079_s13 + $0xd04] sm:$0xf] }
 0x38f   : > { %9310 = vmatpush.bf16.msra.mxu2 %v11713_v29  ;;  %v15589_v29 = vld [vmem:[%s17079_s13 + $0xd34] sm:$0xf]  ;;  %v11929_v12 = vor.u32 %v15573_v24, %v11926_v37  ;;  %v12030_v24 = vld [vmem:[%s17079_s13 + $0xd88] sm:$0xf0] }
 0x390   : > { %9323 = vmatpush.bf16.msra.mxu3 %v11777_v27  ;;  %9285 = vmatmul.bf16.vlgmr.msra.gmra.mxu0 %v17577_v9  ;;  %v11881_v9 = vor.u32 %v15561_v58, %v11878_v18  ;;  %v12054_v27 = vld [vmem:[%s17079_s13 + $0xdb8] sm:$0xf0]  ;;  %v11857_v58 = vor.u32 %v15555_v4, %v11854_v45  ;;  %v15645_v37 = vld [vmem:[%s17079_s13 + $0xef4] sm:$0xf] }
 0x391   : > { %9329 = vmatpush.bf16.msrb.mxu0 %v11897_v30  ;;  %9298 = vmatmul.bf16.vlgmr.msra.gmra.mxu1 %v17584_v14  ;;  %v12073_v14 = vor.u32 %v15609_v50, %v12070_v6  ;;  %v9092_v30 = vadd.f32 %v9091_v26, %v9079_v2  ;;  %v12057_v19 = vor.u32 %v15605_v32, %v12054_v27  ;;  %v15569_v50 = vld [vmem:[%s17079_s13 + $0xc94] sm:$0xf]  ;;  %v12278_v27 = vld [vmem:[%s17079_s13 + $0xf78] sm:$0xf0] }
 0x392   : > { %9342 = vmatpush.bf16.msrb.mxu1 %v11961_v36  ;;  %9311 = vmatmul.bf16.vlgmr.msra.gmra.mxu2 %v17582_v13  ;;  %v15575_v13 = vld [vmem:[%s17079_s13 + $0xcc4] sm:$0xf]  ;;  %v11865_v36 = vor.u32 %v15557_v21, %v11862_v55  ;;  %v11966_v21 = vld [vmem:[%s17079_s13 + $0xd08] sm:$0xf0]  ;;  %v15629_v26 = vld [vmem:[%s17079_s13 + $0xe74] sm:$0xf] }
 0x393   : > { %9355 = vmatpush.bf16.msrb.mxu2 %v12025_v31  ;;  %9324 = vmatmul.bf16.vlgmr.msra.gmra.mxu3 %v17588_v17  ;;  %v12062_v17 = vld [vmem:[%s17079_s13 + $0xdc8] sm:$0xf0]  ;;  %v11937_v61 = vor.u32 %v15575_v13, %v11934_v52  ;;  %v11993_v31 = vor.u32 %v15589_v29, %v11990_v43  ;;  %v12038_v13 = vld [vmem:[%s17079_s13 + $0xd98] sm:$0xf0]  ;;  %v15551_v52 = vld [vmem:[%s17079_s13 + $0xc04] sm:$0xf] }
 0x394   : > { %9368 = vmatpush.bf16.msrb.mxu3 %v12089_v57  ;;  %v12065_v59 = vor.u32 %v15607_v53, %v12062_v17  ;;  %v15567_v17 = vld [vmem:[%s17079_s13 + $0xc84] sm:$0xf]  ;;  %v11841_v29 = vor.u32 %v15551_v52, %v11838_v5  ;;  %v12214_v43 = vld [vmem:[%s17079_s13 + $0xef8] sm:$0xf0]  ;;  %v15661_v32 = vld [vmem:[%s17079_s13 + $0xf74] sm:$0xf] }
 0x395   : > { %9330 = vmatpush.bf16.msrb.mxu0 %v11889_v38  ;;  %v9104_v57 = vpop.f32.mrf.mxu2  ;;  %v9080_v46 = vpop.f32.mrf.mxu0  ;;  %v15599_v55 = vld [vmem:[%s17079_s13 + $0xd84] sm:$0xf]  ;;  %v12126_v5 = vld [vmem:[%s17079_s13 + $0xe48] sm:$0xf0] }
 0x396   : > { %9343 = vmatpush.bf16.msrb.mxu1 %v11953_v39  ;;  %v9105_v40 = vadd.f32 %v9104_v57, %v9092_v30  ;;  %v9117_v38 = vpop.f32.mrf.mxu3  ;;  %v15603_v39 = vld [vmem:[%s17079_s13 + $0xda4] sm:$0xf]  ;;  %v9093_v6 = vpop.f32.mrf.mxu1  ;;  %v12033_v4 = vor.u32 %v15599_v55, %v12030_v24  ;;  %v12281_v57 = vor.u32 %v15661_v32, %v12278_v27  ;;  %v15653_v32 = vld [vmem:[%s17079_s13 + $0xf34] sm:$0xf] }
 0x397   : > { %9356 = vmatpush.bf16.msrb.mxu2 %v12017_v54  ;;  %v12046_v54 = vld [vmem:[%s17079_s13 + $0xda8] sm:$0xf0]  ;;  %v15623_v52 = vld [vmem:[%s17079_s13 + $0xe44] sm:$0xf]  ;;  %v15669_v27 = vld [vmem:[%s17079_s13 + $0xfb4] sm:$0xf] }
 0x398   : > { %9369 = vmatpush.bf16.msrb.mxu3 %v12081_v47  ;;  %v19126_v18 = vadd.f32 %v9117_v38, %v9105_v40  ;;  %v11921_v47 = vor.u32 %v15571_v22, %v11918_v41  ;;  %v12217_v22 = vor.u32 %v15645_v37, %v12214_v43  ;;  %v12142_v41 = vld [vmem:[%s17079_s13 + $0xe68] sm:$0xf0]  ;;  %v15659_v38 = vld [vmem:[%s17079_s13 + $0xf64] sm:$0xf]  ;;  %v12182_v43 = vld [vmem:[%s17079_s13 + $0xeb8] sm:$0xf0] }
 0x399   : > { %9331 = vmatpush.bf16.msrb.mxu0 %v11881_v9  ;;  %v12049_v9 = vor.u32 %v15603_v39, %v12046_v54  ;;  %v12206_v40 = vld [vmem:[%s17079_s13 + $0xee8] sm:$0xf0]  ;;  %v15675_v54 = vld [vmem:[%s17079_s13 + $0xfe4] sm:$0xf] }
 0x39a   : > { %9344 = vmatpush.bf16.msrb.mxu1 %v11945_v34  ;;  %v11910_v34 = vld [vmem:[%s17079_s13 + $0xc98] sm:$0xf0]  ;;  %v12270_v39 = vld [vmem:[%s17079_s13 + $0xf68] sm:$0xf0] }
 0x39b   : > { %9357 = vmatpush.bf16.msrb.mxu2 %v12009_v60  ;;  %v15585_v60 = vld [vmem:[%s17079_s13 + $0xd14] sm:$0xf]  ;;  %v11913_v44 = vor.u32 %v15569_v50, %v11910_v34 }
 0x39c   : > { %9370 = vmatpush.bf16.msrb.mxu3 %v12073_v14  ;;  %v11849_v14 = vor.u32 %v15553_v8, %v11846_v51  ;;  %v11977_v53 = vor.u32 %v15585_v60, %v11974_v63  ;;  %v15625_v8 = vld [vmem:[%s17079_s13 + $0xe54] sm:$0xf]  ;;  %v12134_v51 = vld [vmem:[%s17079_s13 + $0xe58] sm:$0xf0] }
 0x39d   : > { %9332 = vmatpush.bf16.msrb.mxu0 %v11873_v20  ;;  %v11902_v20 = vld [vmem:[%s17079_s13 + $0xc88] sm:$0xf0]  ;;  %v15641_v50 = vld [vmem:[%s17079_s13 + $0xed4] sm:$0xf]  ;;  %v12262_v60 = vld [vmem:[%s17079_s13 + $0xf58] sm:$0xf0] }
 0x39e   : > { %9345 = vmatpush.bf16.msrb.mxu1 %v11937_v61  ;;  %v9106_v61 = vpop.f32.mrf.mxu2  ;;  %v9119_v2 = vpop.f32.mrf.mxu3  ;;  %v11905_v30 = vor.u32 %v15567_v17, %v11902_v20  ;;  %v15657_v34 = vld [vmem:[%s17079_s13 + $0xf54] sm:$0xf]  ;;  %v12254_v17 = vld [vmem:[%s17079_s13 + $0xf48] sm:$0xf0]  ;;  %v15671_v20 = vld [vmem:[%s17079_s13 + $0xfc4] sm:$0xf] }
 0x39f   : > { %9358 = vmatpush.bf16.msrb.mxu2 %v12001_v0  ;;  %v12041_v0 = vor.u32 %v15601_v49, %v12038_v13  ;;  %v15673_v63 = vld [vmem:[%s17079_s13 + $0xfd4] sm:$0xf]  ;;  %v12326_v49 = vld [vmem:[%s17079_s13 + $0xfd8] sm:$0xf0] }
 0x3a0   : > { %9371 = vmatpush.bf16.msrb.mxu3 %v12065_v59  ;;  %v12150_v59 = vld [vmem:[%s17079_s13 + $0xe78] sm:$0xf0]  ;;  %v15621_v2 = vld [vmem:[%s17079_s13 + $0xe34] sm:$0xf] }
 0x3a1   : > { %9333 = vmatpush.bf16.msrb.mxu0 %v11865_v36  ;;  %v11969_v36 = vor.u32 %v15583_v7, %v11966_v21  ;;  %v12153_v45 = vor.u32 %v15629_v26, %v12150_v59  ;;  %v12318_v7 = vld [vmem:[%s17079_s13 + $0xfc8] sm:$0xf0]  ;;  %v12118_v26 = vld [vmem:[%s17079_s13 + $0xe38] sm:$0xf0]  ;;  %v15637_v59 = vld [vmem:[%s17079_s13 + $0xeb4] sm:$0xf] }
 0x3a2   : > { %9346 = vmatpush.bf16.msrb.mxu1 %v11929_v12  ;;  %v15677_v12 = vld [vmem:[%s17079_s13 + $0xff4] sm:$0xf]  ;;  %v12321_v37 = vor.u32 %v15671_v20, %v12318_v7  ;;  %v12222_v20 = vld [vmem:[%s17079_s13 + $0xf08] sm:$0xf0]  ;;  %v15663_v7 = vld [vmem:[%s17079_s13 + $0xf84] sm:$0xf] }
 0x3a3   : > { %9359 = vmatpush.bf16.msrb.mxu2 %v11993_v31  ;;  %v12342_v31 = vld [vmem:[%s17079_s13 + $0xff8] sm:$0xf0] }
 0x3a4   : > { %9372 = vmatpush.bf16.msrb.mxu3 %v12057_v19  ;;  %v15627_v19 = vld [vmem:[%s17079_s13 + $0xe64] sm:$0xf]  ;;  %v12345_v42 = vor.u32 %v15677_v12, %v12342_v31  ;;  %v12185_v12 = vor.u32 %v15637_v59, %v12182_v43  ;;  %v12470_v59 = vld [vmem:[%s17079_s13 + $0x10f8] sm:$0xf0] }
 0x3a5   : > { %9334 = vmatpush.bf16.msrb.mxu0 %v11857_v58  ;;  %v12334_v58 = vld [vmem:[%s17079_s13 + $0xfe8] sm:$0xf0]  ;;  %v12145_v46 = vor.u32 %v15627_v19, %v12142_v41 }
 0x3a6   : > { %9347 = vmatpush.bf16.msrb.mxu1 %v11921_v47  ;;  %v12209_v47 = vor.u32 %v15643_v35, %v12206_v40  ;;  %v12337_v6 = vor.u32 %v15675_v54, %v12334_v58  ;;  %v12174_v41 = vld [vmem:[%s17079_s13 + $0xea8] sm:$0xf0]  ;;  %v15651_v35 = vld [vmem:[%s17079_s13 + $0xf24] sm:$0xf] }
 0x3a7   : > { %9360 = vmatpush.bf16.msrb.mxu2 %v11985_v62  ;;  %v12273_v62 = vor.u32 %v15659_v38, %v12270_v39  ;;  %v15667_v39 = vld [vmem:[%s17079_s13 + $0xfa4] sm:$0xf]  ;;  %v12302_v54 = vld [vmem:[%s17079_s13 + $0xfa8] sm:$0xf0] }
 0x3a8   : > { %9373 = vmatpush.bf16.msrb.mxu3 %v12049_v9  ;;  %v12198_v9 = vld [vmem:[%s17079_s13 + $0xed8] sm:$0xf0] }
 0x3a9   : > { %9335 = vmatpush.bf16.msrb.mxu0 %v11849_v14  ;;  %v12201_v13 = vor.u32 %v15641_v50, %v12198_v9  ;;  %v12265_v14 = vor.u32 %v15657_v34, %v12262_v60  ;;  %v15617_v50 = vld [vmem:[%s17079_s13 + $0xe14] sm:$0xf]  ;;  %v12305_v34 = vor.u32 %v15667_v39, %v12302_v54  ;;  %v12166_v60 = vld [vmem:[%s17079_s13 + $0xe98] sm:$0xf0] }
 0x3aa   : > { %9348 = vmatpush.bf16.msrb.mxu1 %v11913_v44  ;;  %v12190_v44 = vld [vmem:[%s17079_s13 + $0xec8] sm:$0xf0]  ;;  %v15633_v9 = vld [vmem:[%s17079_s13 + $0xe94] sm:$0xf] }
 0x3ab   : > { %9361 = vmatpush.bf16.msrb.mxu2 %v11977_v53  ;;  %v15655_v53 = vld [vmem:[%s17079_s13 + $0xf44] sm:$0xf] }
 0x3ac   : > { %9374 = vmatpush.bf16.msrb.mxu3 %v12041_v0  ;;  %v12129_v0 = vor.u32 %v15623_v52, %v12126_v5  ;;  %v12257_v24 = vor.u32 %v15655_v53, %v12254_v17  ;;  %v15615_v52 = vld [vmem:[%s17079_s13 + $0xe04] sm:$0xf]  ;;  %v12094_v5 = vld [vmem:[%s17079_s13 + $0xe08] sm:$0xf0] }
 0x3ad   : > { %9336 = vmatpush.bf16.msrb.mxu0 %v11841_v29  ;;  %v12158_v53 = vld [vmem:[%s17079_s13 + $0xe88] sm:$0xf0]  ;;  %v15647_v17 = vld [vmem:[%s17079_s13 + $0xf04] sm:$0xf] }
 0x3ae   : > { %9349 = vmatpush.bf16.msrb.mxu1 %v11905_v30  ;;  %v9143_v21 = vpop.f32.mrf.mxu1  ;;  %v12310_v30 = vld [vmem:[%s17079_s13 + $0xfb8] sm:$0xf0] }
 0x3af   : > { %9362 = vmatpush.bf16.msrb.mxu2 %v11969_v36  ;;  %v12121_v36 = vor.u32 %v15621_v2, %v12118_v26  ;;  %v12097_v26 = vor.u32 %v15615_v52, %v12094_v5  ;;  %v15719_v52 = vld [vmem:[%s17079_s13 + $0x1144] sm:$0xf]  ;;  %v12510_v5 = vld [vmem:[%s17079_s13 + $0x1148] sm:$0xf0] }
 0x3b0   : > { %9375 = vmatpush.bf16.msrb.mxu3 %v12033_v4  ;;  %9337 = vmatmul.bf16.vlgmr.msrb.gmra.mxu0 %v17658_v3  ;;  %v12137_v3 = vor.u32 %v15625_v8, %v12134_v51  ;;  %v15619_v4 = vld [vmem:[%s17079_s13 + $0xe24] sm:$0xf] }
 0x3b1   : > { %9381 = vmatpush.bf16.msra.mxu0 %v12153_v45  ;;  %9350 = vmatmul.bf16.vlgmr.msrb.gmra.mxu1 %v17665_v11  ;;  %v12329_v11 = vor.u32 %v15673_v63, %v12326_v49  ;;  %v12110_v45 = vld [vmem:[%s17079_s13 + $0xe28] sm:$0xf0]  ;;  %v15649_v63 = vld [vmem:[%s17079_s13 + $0xf14] sm:$0xf]  ;;  %v12230_v49 = vld [vmem:[%s17079_s13 + $0xf18] sm:$0xf0] }
 0x3b2   : > { %9394 = vmatpush.bf16.msra.mxu1 %v12217_v22  ;;  %9363 = vmatmul.bf16.vlgmr.msrb.gmra.mxu2 %v17663_v10  ;;  %v15639_v10 = vld [vmem:[%s17079_s13 + $0xec4] sm:$0xf] }
 0x3b3   : > { %9407 = vmatpush.bf16.msra.mxu2 %v12281_v57  ;;  %9376 = vmatmul.bf16.vlgmr.msrb.gmra.mxu3 %v17669_v16  ;;  %v9130_v16 = vpop.f32.mrf.mxu0  ;;  %v12193_v55 = vor.u32 %v15639_v10, %v12190_v44  ;;  %v15635_v22 = vld [vmem:[%s17079_s13 + $0xea4] sm:$0xf]  ;;  %v12313_v57 = vor.u32 %v15669_v27, %v12310_v30  ;;  %v12169_v10 = vor.u32 %v15633_v9, %v12166_v60  ;;  %v12598_v27 = vld [vmem:[%s17079_s13 + $0x11f8] sm:$0xf0]  ;;  %v15737_v9 = vld [vmem:[%s17079_s13 + $0x11d4] sm:$0xf] }
 0x3b4   : > { %9420 = vmatpush.bf16.msra.mxu3 %v12345_v42  ;;  %v9131_v61 = vadd.f32 %v9130_v16, %v19126_v18  ;;  %v12246_v18 = vld [vmem:[%s17079_s13 + $0xf38] sm:$0xf0]  ;;  %v12238_v42 = vld [vmem:[%s17079_s13 + $0xf28] sm:$0xf0]  ;;  %v12177_v8 = vor.u32 %v15635_v22, %v12174_v41  ;;  %v15631_v44 = vld [vmem:[%s17079_s13 + $0xe84] sm:$0xf] }
 0x3b5   : > { %9382 = vmatpush.bf16.msra.mxu0 %v12145_v46  ;;  %v12249_v31 = vor.u32 %v15653_v32, %v12246_v18  ;;  %v9156_v19 = vpop.f32.mrf.mxu2  ;;  %v12113_v46 = vor.u32 %v15619_v4, %v12110_v45  ;;  %v12241_v51 = vor.u32 %v15651_v35, %v12238_v42  ;;  %v12161_v43 = vor.u32 %v15631_v44, %v12158_v53  ;;  %v15741_v18 = vld [vmem:[%s17079_s13 + $0x11f4] sm:$0xf]  ;;  %v15691_v4 = vld [vmem:[%s17079_s13 + $0x1064] sm:$0xf]  ;;  %v12398_v45 = vld [vmem:[%s17079_s13 + $0x1068] sm:$0xf0] }
 0x3b6   : > { %9395 = vmatpush.bf16.msra.mxu1 %v12209_v47  ;;  %v9144_v29 = vadd.f32 %v9143_v21, %v9131_v61  ;;  %v9169_v38 = vpop.f32.mrf.mxu3  ;;  %v9145_v47 = vpop.f32.mrf.mxu1  ;;  %v12286_v61 = vld [vmem:[%s17079_s13 + $0xf88] sm:$0xf0]  ;;  %v15693_v21 = vld [vmem:[%s17079_s13 + $0x1074] sm:$0xf]  ;;  %v12225_v32 = vor.u32 %v15647_v17, %v12222_v20  ;;  %v15707_v22 = vld [vmem:[%s17079_s13 + $0x10e4] sm:$0xf] }
 0x3b7   : > { %9408 = vmatpush.bf16.msra.mxu2 %v12273_v62  ;;  %v12289_v30 = vor.u32 %v15663_v7, %v12286_v61  ;;  %v15723_v41 = vld [vmem:[%s17079_s13 + $0x1164] sm:$0xf]  ;;  %v12526_v35 = vld [vmem:[%s17079_s13 + $0x1168] sm:$0xf0]  ;;  %v15705_v47 = vld [vmem:[%s17079_s13 + $0x10d4] sm:$0xf]  ;;  %v12513_v7 = vor.u32 %v15719_v52, %v12510_v5 }
 0x3b8   : > { %9421 = vmatpush.bf16.msra.mxu3 %v12337_v6  ;;  %v9157_v40 = vadd.f32 %v9156_v19, %v9144_v29  ;;  %v12102_v6 = vld [vmem:[%s17079_s13 + $0xe18] sm:$0xf0]  ;;  %v12462_v19 = vld [vmem:[%s17079_s13 + $0x10e8] sm:$0xf0]  ;;  %v15739_v42 = vld [vmem:[%s17079_s13 + $0x11e4] sm:$0xf]  ;;  %v12529_v54 = vor.u32 %v15723_v41, %v12526_v35 }
 0x3b9   : > { %9383 = vmatpush.bf16.msra.mxu0 %v12137_v3  ;;  %v15665_v3 = vld [vmem:[%s17079_s13 + $0xf94] sm:$0xf]  ;;  %v12534_v29 = vld [vmem:[%s17079_s13 + $0x1178] sm:$0xf0]  ;;  %v12465_v39 = vor.u32 %v15707_v22, %v12462_v19  ;;  %v20191_v60 = vld [vmem:[#allocation26_spill] sm:$0xff] }
 0x3ba   : > { %9396 = vmatpush.bf16.msra.mxu1 %v12201_v13  ;;  %v19197_v62 = vadd.f32 %v9169_v38, %v9157_v40  ;;  %v12294_v13 = vld [vmem:[%s17079_s13 + $0xf98] sm:$0xf0]  ;;  %v12590_v40 = vld [vmem:[%s17079_s13 + $0x11e8] sm:$0xf0]  ;;  %v12401_v38 = vor.u32 %v15691_v4, %v12398_v45  ;;  %v15685_v61 = vld [vmem:[%s17079_s13 + $0x1034] sm:$0xf] }
 0x3bb   : > { %9409 = vmatpush.bf16.msra.mxu2 %v12265_v14  ;;  %v9132_v58 = vpop.f32.mrf.mxu0  ;;  %v12105_v14 = vor.u32 %v15617_v50, %v12102_v6  ;;  %v12297_v16 = vor.u32 %v15665_v3, %v12294_v13  ;;  %v15721_v50 = vld [vmem:[%s17079_s13 + $0x1154] sm:$0xf]  ;;  %v12518_v6 = vld [vmem:[%s17079_s13 + $0x1158] sm:$0xf0]  ;;  %v15687_v3 = vld [vmem:[%s17079_s13 + $0x1044] sm:$0xf] }
 0x3bc   : > { %9422 = vmatpush.bf16.msra.mxu3 %v12329_v11  ;;  %v12233_v11 = vor.u32 %v15649_v63, %v12230_v49  ;;  %v15689_v58 = vld [vmem:[%s17079_s13 + $0x1054] sm:$0xf]  ;;  %v12521_v49 = vor.u32 %v15721_v50, %v12518_v6  ;;  %v12382_v13 = vld [vmem:[%s17079_s13 + $0x1048] sm:$0xf0]  ;;  %v15715_v4 = vld [vmem:[%s17079_s13 + $0x1124] sm:$0xf] }
 0x3bd   : > { %9384 = vmatpush.bf16.msra.mxu0 %v12129_v0  ;;  %v9158_v0 = vpop.f32.mrf.mxu2  ;;  %v12574_v44 = vld [vmem:[%s17079_s13 + $0x11c8] sm:$0xf0]  ;;  %v12385_v17 = vor.u32 %v15687_v3, %v12382_v13  ;;  %v15731_v19 = vld [vmem:[%s17079_s13 + $0x11a4] sm:$0xf]  ;;  %v15713_v50 = vld [vmem:[%s17079_s13 + $0x1114] sm:$0xf] }
 0x3be   : > { %9397 = vmatpush.bf16.msra.mxu1 %v12193_v55  ;;  %v12406_v55 = vld [vmem:[%s17079_s13 + $0x1078] sm:$0xf0]  ;;  %v9171_v2 = vpop.f32.mrf.mxu3  ;;  %v12494_v45 = vld [vmem:[%s17079_s13 + $0x1128] sm:$0xf0]  ;;  %v15695_v13 = vld [vmem:[%s17079_s13 + $0x1084] sm:$0xf] }
 0x3bf   : > { %9410 = vmatpush.bf16.msra.mxu2 %v12257_v24  ;;  %v15709_v24 = vld [vmem:[%s17079_s13 + $0x10f4] sm:$0xf]  ;;  %v12374_v0 = vld [vmem:[%s17079_s13 + $0x1038] sm:$0xf0]  ;;  %v12558_v41 = vld [vmem:[%s17079_s13 + $0x11a8] sm:$0xf0] }
 0x3c0   : > { %9423 = vmatpush.bf16.msra.mxu3 %v12321_v37  ;;  %v15725_v37 = vld [vmem:[%s17079_s13 + $0x1174] sm:$0xf]  ;;  %v12438_v2 = vld [vmem:[%s17079_s13 + $0x10b8] sm:$0xf0]  ;;  %v12478_v52 = vld [vmem:[%s17079_s13 + $0x1108] sm:$0xf0] }
 0x3c1   : > { %9385 = vmatpush.bf16.msra.mxu0 %v12121_v36  ;;  %v12409_v36 = vor.u32 %v15693_v21, %v12406_v55  ;;  %v15701_v21 = vld [vmem:[%s17079_s13 + $0x10b4] sm:$0xf]  ;;  %v12486_v6 = vld [vmem:[%s17079_s13 + $0x1118] sm:$0xf0]  ;;  %v15727_v5 = vld [vmem:[%s17079_s13 + $0x1184] sm:$0xf] }
 0x3c2   : > { %9398 = vmatpush.bf16.msra.mxu1 %v12185_v12  ;;  %v12473_v12 = vor.u32 %v15709_v24, %v12470_v59  ;;  %v15733_v59 = vld [vmem:[%s17079_s13 + $0x11b4] sm:$0xf]  ;;  %v12489_v3 = vor.u32 %v15713_v50, %v12486_v6 }
 0x3c3   : > { %9411 = vmatpush.bf16.msra.mxu2 %v12249_v31  ;;  %v12537_v31 = vor.u32 %v15725_v37, %v12534_v29  ;;  %v12566_v37 = vld [vmem:[%s17079_s13 + $0x11b8] sm:$0xf0]  ;;  %v12377_v29 = vor.u32 %v15685_v61, %v12374_v0  ;;  %v15789_v61 = vld [vmem:[%s17079_s13 + $0x1374] sm:$0xf] }
 0x3c4   : > { %9424 = vmatpush.bf16.msra.mxu3 %v12313_v57  ;;  %v12601_v57 = vor.u32 %v15741_v18, %v12598_v27  ;;  %v15683_v18 = vld [vmem:[%s17079_s13 + $0x1024] sm:$0xf]  ;;  %v12366_v27 = vld [vmem:[%s17079_s13 + $0x1028] sm:$0xf0]  ;;  %v12790_v0 = vld [vmem:[%s17079_s13 + $0x1378] sm:$0xf0] }
 0x3c5   : > { %9386 = vmatpush.bf16.msra.mxu0 %v12113_v46  ;;  %v12390_v46 = vld [vmem:[%s17079_s13 + $0x1058] sm:$0xf0] }
 0x3c6   : > { %9399 = vmatpush.bf16.msra.mxu1 %v12177_v8  ;;  %v12593_v8 = vor.u32 %v15739_v42, %v12590_v40  ;;  %v12369_v42 = vor.u32 %v15683_v18, %v12366_v27  ;;  %v12718_v27 = vld [vmem:[%s17079_s13 + $0x12e8] sm:$0xf0] }
 0x3c7   : > { %9412 = vmatpush.bf16.msra.mxu2 %v12241_v51  ;;  %v12454_v51 = vld [vmem:[%s17079_s13 + $0x10d8] sm:$0xf0] }
 0x3c8   : > { %9425 = vmatpush.bf16.msra.mxu3 %v12305_v34  ;;  %v12582_v34 = vld [vmem:[%s17079_s13 + $0x11d8] sm:$0xf0]  ;;  %v12457_v63 = vor.u32 %v15705_v47, %v12454_v51  ;;  %v15697_v47 = vld [vmem:[%s17079_s13 + $0x1094] sm:$0xf] }
 0x3c9   : > { %9387 = vmatpush.bf16.msra.mxu0 %v12105_v14  ;;  %v12446_v14 = vld [vmem:[%s17079_s13 + $0x10c8] sm:$0xf0]  ;;  %v12422_v51 = vld [vmem:[%s17079_s13 + $0x1098] sm:$0xf0] }
 0x3ca   : > { %9400 = vmatpush.bf16.msra.mxu1 %v12169_v10 }
 0x3cb   : > { %9413 = vmatpush.bf16.msra.mxu2 %v12233_v11  ;;  %v15735_v11 = vld [vmem:[%s17079_s13 + $0x11c4] sm:$0xf] }
 0x3cc   : > { %9426 = vmatpush.bf16.msra.mxu3 %v12297_v16  ;;  %v12577_v55 = vor.u32 %v15735_v11, %v12574_v44  ;;  %v15757_v44 = vld [vmem:[%s17079_s13 + $0x1274] sm:$0xf] }
 0x3cd   : > { %9388 = vmatpush.bf16.msra.mxu0 %v12097_v26  ;;  %v9182_v10 = vpop.f32.mrf.mxu0  ;;  %v15717_v26 = vld [vmem:[%s17079_s13 + $0x1134] sm:$0xf] }
 0x3ce   : > { %9401 = vmatpush.bf16.msra.mxu1 %v12161_v43  ;;  %v9183_v53 = vadd.f32 %v9182_v10, %v19197_v62  ;;  %v9195_v16 = vpop.f32.mrf.mxu1  ;;  %v12502_v62 = vld [vmem:[%s17079_s13 + $0x1138] sm:$0xf0]  ;;  %v12441_v43 = vor.u32 %v15701_v21, %v12438_v2  ;;  %v12542_v10 = vld [vmem:[%s17079_s13 + $0x1188] sm:$0xf0] }
 0x3cf   : > { %9414 = vmatpush.bf16.msra.mxu2 %v12225_v32  ;;  %v12505_v32 = vor.u32 %v15717_v26, %v12502_v62  ;;  %v12854_v2 = vld [vmem:[%s17079_s13 + $0x13f8] sm:$0xf0]  ;;  %v12545_v26 = vor.u32 %v15727_v5, %v12542_v10 }
 0x3d0   : > { %9427 = vmatpush.bf16.msra.mxu3 %v12289_v30  ;;  %9389 = vmatmul.bf16.vlgmr.msra.gmra.mxu0 %v17739_v23  ;;  %v12393_v23 = vor.u32 %v15689_v58, %v12390_v46  ;;  %v9196_v24 = vadd.f32 %v9195_v16, %v9183_v53  ;;  %v15699_v30 = vld [vmem:[%s17079_s13 + $0x10a4] sm:$0xf]  ;;  %v15681_v58 = vld [vmem:[%s17079_s13 + $0x1014] sm:$0xf]  ;;  %v12358_v46 = vld [vmem:[%s17079_s13 + $0x1018] sm:$0xf0] }
 0x3d1   : > { %9433 = vmatpush.bf16.msrb.mxu0 %v12409_v36  ;;  %9402 = vmatmul.bf16.vlgmr.msra.gmra.mxu1 %v17746_v33  ;;  %v12585_v33 = vor.u32 %v15737_v9, %v12582_v34  ;;  %v12569_v36 = vor.u32 %v15733_v59, %v12566_v37  ;;  %v15729_v9 = vld [vmem:[%s17079_s13 + $0x1194] sm:$0xf]  ;;  %v12550_v34 = vld [vmem:[%s17079_s13 + $0x1198] sm:$0xf0]  ;;  %v12793_v37 = vor.u32 %v15789_v61, %v12790_v0 }
 0x3d2   : > { %9446 = vmatpush.bf16.msrb.mxu1 %v12473_v12  ;;  %9415 = vmatmul.bf16.vlgmr.msra.gmra.mxu2 %v17744_v28  ;;  %v15703_v28 = vld [vmem:[%s17079_s13 + $0x10c4] sm:$0xf]  ;;  %v12662_v53 = vld [vmem:[%s17079_s13 + $0x1278] sm:$0xf0]  ;;  %v15781_v0 = vld [vmem:[%s17079_s13 + $0x1334] sm:$0xf] }
 0x3d3   : > { %9459 = vmatpush.bf16.msrb.mxu2 %v12537_v31  ;;  %9428 = vmatmul.bf16.vlgmr.msra.gmra.mxu3 %v20191_v60  ;;  %v12449_v20 = vor.u32 %v15703_v28, %v12446_v14  ;;  %v12430_v31 = vld [vmem:[%s17079_s13 + $0x10a8] sm:$0xf0]  ;;  %v12361_v60 = vor.u32 %v15681_v58, %v12358_v46  ;;  %v12553_v14 = vor.u32 %v15729_v9, %v12550_v34  ;;  %v20193_v58 = vld [vmem:[#allocation28_spill] sm:$0xff]  ;;  %v20194_v46 = vld [vmem:[#allocation29_spill] sm:$0xff] }
 0x3d4   : > { %9472 = vmatpush.bf16.msrb.mxu3 %v12601_v57  ;;  %v12414_v28 = vld [vmem:[%s17079_s13 + $0x1088] sm:$0xf0]  ;;  %v12665_v62 = vor.u32 %v15757_v44, %v12662_v53  ;;  %v15751_v34 = vld [vmem:[%s17079_s13 + $0x1244] sm:$0xf]  ;;  %v15749_v53 = vld [vmem:[%s17079_s13 + $0x1234] sm:$0xf] }
 0x3d5   : > { %9434 = vmatpush.bf16.msrb.mxu0 %v12401_v38  ;;  %v9208_v12 = vpop.f32.mrf.mxu2  ;;  %v9184_v35 = vpop.f32.mrf.mxu0  ;;  %v12417_v21 = vor.u32 %v15695_v13, %v12414_v28  ;;  %v12766_v13 = vld [vmem:[%s17079_s13 + $0x1348] sm:$0xf0]  ;;  %v12694_v61 = vld [vmem:[%s17079_s13 + $0x12b8] sm:$0xf0] }
 0x3d6   : > { %9447 = vmatpush.bf16.msrb.mxu1 %v12465_v39  ;;  %v9209_v22 = vadd.f32 %v9208_v12, %v9196_v24  ;;  %v9221_v57 = vpop.f32.mrf.mxu3  ;;  %v9197_v40 = vpop.f32.mrf.mxu1  ;;  %v12433_v39 = vor.u32 %v15699_v30, %v12430_v31  ;;  %v15805_v24 = vld [vmem:[%s17079_s13 + $0x13f4] sm:$0xf]  ;;  %v15787_v30 = vld [vmem:[%s17079_s13 + $0x1364] sm:$0xf]  ;;  %v12846_v31 = vld [vmem:[%s17079_s13 + $0x13e8] sm:$0xf0] }
 0x3d7   : > { %9460 = vmatpush.bf16.msrb.mxu2 %v12529_v54  ;;  %v12497_v54 = vor.u32 %v15715_v4, %v12494_v45  ;;  %v12857_v18 = vor.u32 %v15805_v24, %v12854_v2  ;;  %v15803_v12 = vld [vmem:[%s17079_s13 + $0x13e4] sm:$0xf]  ;;  %v20192_v35 = vld [vmem:[#allocation27_spill] sm:$0xff]  ;;  %v12710_v40 = vld [vmem:[%s17079_s13 + $0x12d8] sm:$0xf0] }
 0x3d8   : > { %9473 = vmatpush.bf16.msrb.mxu3 %v12593_v8  ;;  %v19268_v38 = vadd.f32 %v9221_v57, %v9209_v22  ;;  %v12561_v8 = vor.u32 %v15731_v19, %v12558_v41  ;;  %v15753_v57 = vld [vmem:[%s17079_s13 + $0x1254] sm:$0xf]  ;;  %v12646_v19 = vld [vmem:[%s17079_s13 + $0x1258] sm:$0xf0] }
 0x3d9   : > { %9435 = vmatpush.bf16.msrb.mxu0 %v12393_v23  ;;  %v15679_v23 = vld [vmem:[%s17079_s13 + $0x1004] sm:$0xf]  ;;  %v15769_v41 = vld [vmem:[%s17079_s13 + $0x12d4] sm:$0xf]  ;;  %v12649_v50 = vor.u32 %v15753_v57, %v12646_v19 }
 0x3da   : > { %9448 = vmatpush.bf16.msrb.mxu1 %v12457_v63  ;;  %v12350_v63 = vld [vmem:[%s17079_s13 + $0x1008] sm:$0xf0]  ;;  %v12713_v6 = vor.u32 %v15769_v41, %v12710_v40  ;;  %v15761_v40 = vld [vmem:[%s17079_s13 + $0x1294] sm:$0xf] }
 0x3db   : > { %9461 = vmatpush.bf16.msrb.mxu2 %v12521_v49  ;;  %v12425_v49 = vor.u32 %v15697_v47, %v12422_v51  ;;  %v15801_v47 = vld [vmem:[%s17079_s13 + $0x13d4] sm:$0xf]  ;;  %v20195_v51 = vld [vmem:[#allocation30_spill] sm:$0xff] }
 0x3dc   : > { %9474 = vmatpush.bf16.msrb.mxu3 %v12585_v33  ;;  %v15711_v33 = vld [vmem:[%s17079_s13 + $0x1104] sm:$0xf] }
 0x3dd   : > { %9436 = vmatpush.bf16.msrb.mxu0 %v12385_v17  ;;  %v9210_v11 = vpop.f32.mrf.mxu2  ;;  %v15773_v17 = vld [vmem:[%s17079_s13 + $0x12f4] sm:$0xf] }
 0x3de   : > { %9449 = vmatpush.bf16.msrb.mxu1 %v12449_v20  ;;  %v9223_v16 = vpop.f32.mrf.mxu3  ;;  %v12353_v20 = vor.u32 %v15679_v23, %v12350_v63  ;;  %v15767_v23 = vld [vmem:[%s17079_s13 + $0x12c4] sm:$0xf] }
 0x3df   : > { %9462 = vmatpush.bf16.msrb.mxu2 %v12513_v7  ;;  %v12726_v7 = vld [vmem:[%s17079_s13 + $0x12f8] sm:$0xf0]  ;;  %v15765_v16 = vld [vmem:[%s17079_s13 + $0x12b4] sm:$0xf] }
 0x3e0   : > { %9475 = vmatpush.bf16.msrb.mxu3 %v12577_v55  ;;  %v12481_v55 = vor.u32 %v15711_v33, %v12478_v52  ;;  %v12729_v59 = vor.u32 %v15773_v17, %v12726_v7  ;;  %v15799_v33 = vld [vmem:[%s17079_s13 + $0x13c4] sm:$0xf]  ;;  %v12630_v17 = vld [vmem:[%s17079_s13 + $0x1238] sm:$0xf0]  ;;  %v12697_v2 = vor.u32 %v15765_v16, %v12694_v61 }
 0x3e1   : > { %9437 = vmatpush.bf16.msrb.mxu0 %v12377_v29  ;;  %v15755_v29 = vld [vmem:[%s17079_s13 + $0x1264] sm:$0xf]  ;;  %v12633_v24 = vor.u32 %v15749_v53, %v12630_v17  ;;  %v15853_v53 = vld [vmem:[%s17079_s13 + $0x1574] sm:$0xf]  ;;  %v13046_v17 = vld [vmem:[%s17079_s13 + $0x1578] sm:$0xf0] }
 0x3e2   : > { %9450 = vmatpush.bf16.msrb.mxu1 %v12441_v43  ;;  %v12654_v43 = vld [vmem:[%s17079_s13 + $0x1268] sm:$0xf0]  ;;  %v13110_v61 = vld [vmem:[%s17079_s13 + $0x15f8] sm:$0xf0] }
 0x3e3   : > { %9463 = vmatpush.bf16.msrb.mxu2 %v12505_v32  ;;  %v15771_v32 = vld [vmem:[%s17079_s13 + $0x12e4] sm:$0xf]  ;;  %v12657_v4 = vor.u32 %v15755_v29, %v12654_v43 }
 0x3e4   : > { %9476 = vmatpush.bf16.msrb.mxu3 %v12569_v36  ;;  %v12782_v36 = vld [vmem:[%s17079_s13 + $0x1368] sm:$0xf0]  ;;  %v12721_v45 = vor.u32 %v15771_v32, %v12718_v27 }
 0x3e5   : > { %9438 = vmatpush.bf16.msrb.mxu0 %v12369_v42  ;;  %v12785_v22 = vor.u32 %v15787_v30, %v12782_v36  ;;  %v12849_v42 = vor.u32 %v15803_v12, %v12846_v31  ;;  %v12686_v32 = vld [vmem:[%s17079_s13 + $0x12a8] sm:$0xf0]  ;;  %v15795_v12 = vld [vmem:[%s17079_s13 + $0x13a4] sm:$0xf] }
 0x3e6   : > { %9451 = vmatpush.bf16.msrb.mxu1 %v12433_v39  ;;  %v15785_v39 = vld [vmem:[%s17079_s13 + $0x1354] sm:$0xf]  ;;  %v12750_v27 = vld [vmem:[%s17079_s13 + $0x1328] sm:$0xf0] }
 0x3e7   : > { %9464 = vmatpush.bf16.msrb.mxu2 %v12497_v54  ;;  %v12774_v54 = vld [vmem:[%s17079_s13 + $0x1358] sm:$0xf0]  ;;  %v12814_v31 = vld [vmem:[%s17079_s13 + $0x13a8] sm:$0xf0] }
 0x3e8   : > { %9477 = vmatpush.bf16.msrb.mxu3 %v12561_v8  ;;  %v12838_v8 = vld [vmem:[%s17079_s13 + $0x13d8] sm:$0xf0]  ;;  %v12777_v9 = vor.u32 %v15785_v39, %v12774_v54  ;;  %v12817_v39 = vor.u32 %v15795_v12, %v12814_v31  ;;  %v15833_v31 = vld [vmem:[%s17079_s13 + $0x14d4] sm:$0xf] }
 0x3e9   : > { %9439 = vmatpush.bf16.msrb.mxu0 %v12361_v60  ;;  %v12638_v60 = vld [vmem:[%s17079_s13 + $0x1248] sm:$0xf0]  ;;  %v12841_v63 = vor.u32 %v15801_v47, %v12838_v8  ;;  %v12678_v54 = vld [vmem:[%s17079_s13 + $0x1298] sm:$0xf0]  ;;  %v15793_v47 = vld [vmem:[%s17079_s13 + $0x1394] sm:$0xf] }
 0x3ea   : > { %9452 = vmatpush.bf16.msrb.mxu1 %v12425_v49  ;;  %v12702_v49 = vld [vmem:[%s17079_s13 + $0x12c8] sm:$0xf0]  ;;  %v12641_v5 = vor.u32 %v15751_v34, %v12638_v60  ;;  %v12806_v8 = vld [vmem:[%s17079_s13 + $0x1398] sm:$0xf0]  ;;  %v15759_v60 = vld [vmem:[%s17079_s13 + $0x1284] sm:$0xf] }
 0x3eb   : > { %9465 = vmatpush.bf16.msrb.mxu2 %v12489_v3  ;;  %v15783_v3 = vld [vmem:[%s17079_s13 + $0x1344] sm:$0xf]  ;;  %v12705_v11 = vor.u32 %v15767_v23, %v12702_v49  ;;  %v12670_v23 = vld [vmem:[%s17079_s13 + $0x1288] sm:$0xf0]  ;;  %v12809_v49 = vor.u32 %v15793_v47, %v12806_v8  ;;  %v12902_v12 = vld [vmem:[%s17079_s13 + $0x1458] sm:$0xf0] }
 0x3ec   : > { %9478 = vmatpush.bf16.msrb.mxu3 %v12553_v14  ;;  %v12830_v14 = vld [vmem:[%s17079_s13 + $0x13c8] sm:$0xf0]  ;;  %v12769_v44 = vor.u32 %v15783_v3, %v12766_v13  ;;  %v15791_v13 = vld [vmem:[%s17079_s13 + $0x1384] sm:$0xf]  ;;  %v12673_v16 = vor.u32 %v15759_v60, %v12670_v23 }
 0x3ed   : > { %9440 = vmatpush.bf16.msrb.mxu0 %v12353_v20  ;;  %v9234_v28 = vpop.f32.mrf.mxu0  ;;  %v12833_v20 = vor.u32 %v15799_v33, %v12830_v14  ;;  %v12734_v3 = vld [vmem:[%s17079_s13 + $0x1308] sm:$0xf0]  ;;  %v15821_v14 = vld [vmem:[%s17079_s13 + $0x1474] sm:$0xf]  ;;  %v15815_v8 = vld [vmem:[%s17079_s13 + $0x1444] sm:$0xf] }
 0x3ee   : > { %9453 = vmatpush.bf16.msrb.mxu1 %v12417_v21  ;;  %v9235_v52 = vadd.f32 %v9234_v28, %v19268_v38  ;;  %v9247_v10 = vpop.f32.mrf.mxu1  ;;  %v12758_v38 = vld [vmem:[%s17079_s13 + $0x1338] sm:$0xf0]  ;;  %v15797_v21 = vld [vmem:[%s17079_s13 + $0x13b4] sm:$0xf]  ;;  %v12798_v28 = vld [vmem:[%s17079_s13 + $0x1388] sm:$0xf0] }
 0x3ef   : > { %9466 = vmatpush.bf16.msrb.mxu2 %v12481_v55  ;;  %v12822_v55 = vld [vmem:[%s17079_s13 + $0x13b8] sm:$0xf0]  ;;  %v13022_v60 = vld [vmem:[%s17079_s13 + $0x1548] sm:$0xf0] }
 0x3f0   : > { %9479 = vmatpush.bf16.msrb.mxu3 %v12545_v26  ;;  %9441 = vmatmul.bf16.vlgmr.msrb.gmra.mxu0 %v20192_v35  ;;  %v9248_v7 = vadd.f32 %v9247_v10, %v9235_v52  ;;  %v12761_v26 = vor.u32 %v15781_v0, %v12758_v38  ;;  %v12825_v29 = vor.u32 %v15797_v21, %v12822_v55  ;;  %v15745_v35 = vld [vmem:[%s17079_s13 + $0x1214] sm:$0xf]  ;;  %v12918_v52 = vld [vmem:[%s17079_s13 + $0x1478] sm:$0xf0] }
 0x3f1   : > { %9485 = vmatpush.bf16.msra.mxu0 %v12665_v62  ;;  %9454 = vmatmul.bf16.vlgmr.msrb.gmra.mxu1 %v20194_v46  ;;  %v15747_v62 = vld [vmem:[%s17079_s13 + $0x1224] sm:$0xf]  ;;  %v12742_v46 = vld [vmem:[%s17079_s13 + $0x1318] sm:$0xf0]  ;;  %v12801_v0 = vor.u32 %v15791_v13, %v12798_v28  ;;  %v12921_v38 = vor.u32 %v15821_v14, %v12918_v52  ;;  %v13049_v55 = vor.u32 %v15853_v53, %v13046_v17  ;;  %v15813_v52 = vld [vmem:[%s17079_s13 + $0x1434] sm:$0xf] }
 0x3f2   : > { %9498 = vmatpush.bf16.msra.mxu1 %v12729_v59  ;;  %9467 = vmatmul.bf16.vlgmr.msrb.gmra.mxu2 %v20193_v58  ;;  %v12622_v59 = vld [vmem:[%s17079_s13 + $0x1228] sm:$0xf0]  ;;  %v15777_v58 = vld [vmem:[%s17079_s13 + $0x1314] sm:$0xf]  ;;  %v12950_v53 = vld [vmem:[%s17079_s13 + $0x14b8] sm:$0xf0] }
 0x3f3   : > { %9511 = vmatpush.bf16.msra.mxu2 %v12793_v37  ;;  %9480 = vmatmul.bf16.vlgmr.msrb.gmra.mxu3 %v20195_v51  ;;  %v15763_v37 = vld [vmem:[%s17079_s13 + $0x12a4] sm:$0xf]  ;;  %v12745_v34 = vor.u32 %v15777_v58, %v12742_v46  ;;  %v15845_v17 = vld [vmem:[%s17079_s13 + $0x1534] sm:$0xf] }
 0x3f4   : > { %9524 = vmatpush.bf16.msra.mxu3 %v12857_v18  ;;  %v15779_v18 = vld [vmem:[%s17079_s13 + $0x1324] sm:$0xf]  ;;  %v12689_v19 = vor.u32 %v15763_v37, %v12686_v32  ;;  %v13102_v32 = vld [vmem:[%s17079_s13 + $0x15e8] sm:$0xf0] }
 0x3f5   : > { %9486 = vmatpush.bf16.msra.mxu0 %v12657_v4  ;;  %v9260_v43 = vpop.f32.mrf.mxu2  ;;  %v9236_v4 = vpop.f32.mrf.mxu0  ;;  %v12753_v41 = vor.u32 %v15779_v18, %v12750_v27  ;;  %v15851_v37 = vld [vmem:[%s17079_s13 + $0x1564] sm:$0xf] }
 0x3f6   : > { %9499 = vmatpush.bf16.msra.mxu1 %v12721_v45  ;;  %v9261_v30 = vadd.f32 %v9260_v43, %v9248_v7  ;;  %v9273_v36 = vpop.f32.mrf.mxu3  ;;  %v12625_v45 = vor.u32 %v15747_v62, %v12622_v59  ;;  %v15869_v7 = vld [vmem:[%s17079_s13 + $0x15f4] sm:$0xf]  ;;  %v12974_v59 = vld [vmem:[%s17079_s13 + $0x14e8] sm:$0xf0]  ;;  %v15867_v43 = vld [vmem:[%s17079_s13 + $0x15e4] sm:$0xf] }
 0x3f7   : > { %9512 = vmatpush.bf16.msra.mxu2 %v12785_v22  ;;  %v9249_v22 = vpop.f32.mrf.mxu1  ;;  %v13113_v62 = vor.u32 %v15869_v7, %v13110_v61  ;;  %v20196_v4 = vld [vmem:[#allocation31_spill] sm:$0xff] }
 0x3f8   : > { %9525 = vmatpush.bf16.msra.mxu3 %v12849_v42  ;;  %v19339_v57 = vadd.f32 %v9273_v36, %v9261_v30  ;;  %v12614_v42 = vld [vmem:[%s17079_s13 + $0x1218] sm:$0xf0]  ;;  %v15817_v36 = vld [vmem:[%s17079_s13 + $0x1454] sm:$0xf] }
 0x3f9   : > { %9487 = vmatpush.bf16.msra.mxu0 %v12649_v50  ;;  %v12617_v51 = vor.u32 %v15745_v35, %v12614_v42  ;;  %v15743_v50 = vld [vmem:[%s17079_s13 + $0x1204] sm:$0xf]  ;;  %v12966_v22 = vld [vmem:[%s17079_s13 + $0x14d8] sm:$0xf0]  ;;  %v12905_v58 = vor.u32 %v15817_v36, %v12902_v12 }
 0x3fa   : > { %9500 = vmatpush.bf16.msra.mxu1 %v12713_v6  ;;  %v12606_v6 = vld [vmem:[%s17079_s13 + $0x1208] sm:$0xf0]  ;;  %v20197_v35 = vld [vmem:[#allocation32_spill] sm:$0xff]  ;;  %v20198_v42 = vld [vmem:[#allocation33_spill] sm:$0xff]  ;;  %v12969_v46 = vor.u32 %v15833_v31, %v12966_v22 }
 0x3fb   : > { %9513 = vmatpush.bf16.msra.mxu2 %v12777_v9  ;;  %v12681_v9 = vor.u32 %v15761_v40, %v12678_v54  ;;  %v15865_v40 = vld [vmem:[%s17079_s13 + $0x15d4] sm:$0xf]  ;;  %v20199_v54 = vld [vmem:[#allocation34_spill] sm:$0xff] }
 0x3fc   : > { %9526 = vmatpush.bf16.msra.mxu3 %v12841_v63  ;;  %v15775_v63 = vld [vmem:[%s17079_s13 + $0x1304] sm:$0xf]  ;;  %v15825_v22 = vld [vmem:[%s17079_s13 + $0x1494] sm:$0xf] }
 0x3fd   : > { %9488 = vmatpush.bf16.msra.mxu0 %v12641_v5  ;;  %v9262_v33 = vpop.f32.mrf.mxu2  ;;  %v15837_v5 = vld [vmem:[%s17079_s13 + $0x14f4] sm:$0xf] }
 0x3fe   : > { %9501 = vmatpush.bf16.msra.mxu1 %v12705_v11  ;;  %v9275_v10 = vpop.f32.mrf.mxu3  ;;  %v12609_v11 = vor.u32 %v15743_v50, %v12606_v6  ;;  %v15831_v50 = vld [vmem:[%s17079_s13 + $0x14c4] sm:$0xf] }
 0x3ff   : > { %9514 = vmatpush.bf16.msra.mxu2 %v12769_v44  ;;  %v12982_v44 = vld [vmem:[%s17079_s13 + $0x14f8] sm:$0xf0]  ;;  %v15829_v10 = vld [vmem:[%s17079_s13 + $0x14b4] sm:$0xf] }
 0x400   : > { %9527 = vmatpush.bf16.msra.mxu3 %v12833_v20  ;;  %v12737_v20 = vor.u32 %v15775_v63, %v12734_v3  ;;  %v12985_v21 = vor.u32 %v15837_v5, %v12982_v44  ;;  %v15863_v63 = vld [vmem:[%s17079_s13 + $0x15c4] sm:$0xf]  ;;  %v12886_v5 = vld [vmem:[%s17079_s13 + $0x1438] sm:$0xf0]  ;;  %v12953_v61 = vor.u32 %v15829_v10, %v12950_v53 }
 0x401   : > { %9489 = vmatpush.bf16.msra.mxu0 %v12633_v24  ;;  %v15819_v24 = vld [vmem:[%s17079_s13 + $0x1464] sm:$0xf]  ;;  %v12889_v7 = vor.u32 %v15813_v52, %v12886_v5  ;;  %v15917_v52 = vld [vmem:[%s17079_s13 + $0x1774] sm:$0xf]  ;;  %v13302_v5 = vld [vmem:[%s17079_s13 + $0x1778] sm:$0xf0] }
 0x402   : > { %9502 = vmatpush.bf16.msra.mxu1 %v12697_v2  ;;  %v12910_v2 = vld [vmem:[%s17079_s13 + $0x1468] sm:$0xf0]  ;;  %v13366_v53 = vld [vmem:[%s17079_s13 + $0x17f8] sm:$0xf0] }
 0x403   : > { %9515 = vmatpush.bf16.msra.mxu2 %v12761_v26  ;;  %v15835_v26 = vld [vmem:[%s17079_s13 + $0x14e4] sm:$0xf]  ;;  %v12913_v18 = vor.u32 %v15819_v24, %v12910_v2 }
 0x404   : > { %9528 = vmatpush.bf16.msra.mxu3 %v12825_v29  ;;  %v13038_v29 = vld [vmem:[%s17079_s13 + $0x1568] sm:$0xf0]  ;;  %v12977_v27 = vor.u32 %v15835_v26, %v12974_v59 }
 0x405   : > { %9490 = vmatpush.bf16.msra.mxu0 %v12625_v45  ;;  %v13041_v30 = vor.u32 %v15851_v37, %v13038_v29  ;;  %v13105_v45 = vor.u32 %v15867_v43, %v13102_v32  ;;  %v12942_v26 = vld [vmem:[%s17079_s13 + $0x14a8] sm:$0xf0]  ;;  %v15859_v43 = vld [vmem:[%s17079_s13 + $0x15a4] sm:$0xf] }
 0x406   : > { %9503 = vmatpush.bf16.msra.mxu1 %v12689_v19  ;;  %v15849_v19 = vld [vmem:[%s17079_s13 + $0x1554] sm:$0xf]  ;;  %v13006_v59 = vld [vmem:[%s17079_s13 + $0x1528] sm:$0xf0] }
 0x407   : > { %9516 = vmatpush.bf16.msra.mxu2 %v12753_v41  ;;  %v13030_v41 = vld [vmem:[%s17079_s13 + $0x1558] sm:$0xf0]  ;;  %v13070_v32 = vld [vmem:[%s17079_s13 + $0x15a8] sm:$0xf0] }
 0x408   : > { %9529 = vmatpush.bf16.msra.mxu3 %v12817_v39  ;;  %v13094_v39 = vld [vmem:[%s17079_s13 + $0x15d8] sm:$0xf0]  ;;  %v13033_v47 = vor.u32 %v15849_v19, %v13030_v41  ;;  %v13073_v19 = vor.u32 %v15859_v43, %v13070_v32  ;;  %v15897_v32 = vld [vmem:[%s17079_s13 + $0x16d4] sm:$0xf] }
 0x409   : > { %9491 = vmatpush.bf16.msra.mxu0 %v12617_v51  ;;  %v12894_v51 = vld [vmem:[%s17079_s13 + $0x1448] sm:$0xf0]  ;;  %v13097_v6 = vor.u32 %v15865_v40, %v13094_v39  ;;  %v12934_v41 = vld [vmem:[%s17079_s13 + $0x1498] sm:$0xf0]  ;;  %v15857_v40 = vld [vmem:[%s17079_s13 + $0x1594] sm:$0xf] }
 0x40a   : > { %9504 = vmatpush.bf16.msra.mxu1 %v12681_v9  ;;  %v12958_v9 = vld [vmem:[%s17079_s13 + $0x14c8] sm:$0xf0]  ;;  %v12897_v13 = vor.u32 %v15815_v8, %v12894_v51  ;;  %v13062_v39 = vld [vmem:[%s17079_s13 + $0x1598] sm:$0xf0]  ;;  %v15823_v51 = vld [vmem:[%s17079_s13 + $0x1484] sm:$0xf] }
 0x40b   : > { %9517 = vmatpush.bf16.msra.mxu2 %v12745_v34  ;;  %v15847_v34 = vld [vmem:[%s17079_s13 + $0x1544] sm:$0xf]  ;;  %v12961_v33 = vor.u32 %v15831_v50, %v12958_v9  ;;  %v12926_v50 = vld [vmem:[%s17079_s13 + $0x1488] sm:$0xf0]  ;;  %v13065_v9 = vor.u32 %v15857_v40, %v13062_v39  ;;  %v13158_v43 = vld [vmem:[%s17079_s13 + $0x1658] sm:$0xf0] }
 0x40c   : > { %9530 = vmatpush.bf16.msra.mxu3 %v12809_v49  ;;  %v13086_v49 = vld [vmem:[%s17079_s13 + $0x15c8] sm:$0xf0]  ;;  %v13025_v14 = vor.u32 %v15847_v34, %v13022_v60  ;;  %v15855_v60 = vld [vmem:[%s17079_s13 + $0x1584] sm:$0xf]  ;;  %v12929_v10 = vor.u32 %v15823_v51, %v12926_v50 }
 0x40d   : > { %9492 = vmatpush.bf16.msra.mxu0 %v12609_v11  ;;  %v9286_v23 = vpop.f32.mrf.mxu0  ;;  %v13089_v11 = vor.u32 %v15863_v63, %v13086_v49  ;;  %v12990_v34 = vld [vmem:[%s17079_s13 + $0x1508] sm:$0xf0]  ;;  %v15885_v49 = vld [vmem:[%s17079_s13 + $0x1674] sm:$0xf]  ;;  %v15879_v39 = vld [vmem:[%s17079_s13 + $0x1644] sm:$0xf] }
 0x40e   : > { %9505 = vmatpush.bf16.msra.mxu1 %v12673_v16  ;;  %v9287_v3 = vadd.f32 %v9286_v23, %v19339_v57  ;;  %v9299_v28 = vpop.f32.mrf.mxu1  ;;  %v13014_v57 = vld [vmem:[%s17079_s13 + $0x1538] sm:$0xf0]  ;;  %v15861_v16 = vld [vmem:[%s17079_s13 + $0x15b4] sm:$0xf]  ;;  %v13054_v23 = vld [vmem:[%s17079_s13 + $0x1588] sm:$0xf0] }
 0x40f   : > { %9518 = vmatpush.bf16.msra.mxu2 %v12737_v20  ;;  %v13078_v20 = vld [vmem:[%s17079_s13 + $0x15b8] sm:$0xf0]  ;;  %v13278_v51 = vld [vmem:[%s17079_s13 + $0x1748] sm:$0xf0] }
 0x410   : > { %9531 = vmatpush.bf16.msra.mxu3 %v12801_v0  ;;  %9493 = vmatmul.bf16.vlgmr.msra.gmra.mxu0 %v20196_v4  ;;  %v9300_v44 = vadd.f32 %v9299_v28, %v9287_v3  ;;  %v13017_v0 = vor.u32 %v15845_v17, %v13014_v57  ;;  %v13081_v24 = vor.u32 %v15861_v16, %v13078_v20  ;;  %v15809_v4 = vld [vmem:[%s17079_s13 + $0x1414] sm:$0xf]  ;;  %v13174_v3 = vld [vmem:[%s17079_s13 + $0x1678] sm:$0xf0] }
 0x411   : > { %9537 = vmatpush.bf16.msrb.mxu0 %v12921_v38  ;;  %9506 = vmatmul.bf16.vlgmr.msra.gmra.mxu1 %v20198_v42  ;;  %v15811_v38 = vld [vmem:[%s17079_s13 + $0x1424] sm:$0xf]  ;;  %v12998_v42 = vld [vmem:[%s17079_s13 + $0x1518] sm:$0xf0]  ;;  %v13057_v17 = vor.u32 %v15855_v60, %v13054_v23  ;;  %v13177_v57 = vor.u32 %v15885_v49, %v13174_v3  ;;  %v13305_v20 = vor.u32 %v15917_v52, %v13302_v5  ;;  %v15877_v3 = vld [vmem:[%s17079_s13 + $0x1634] sm:$0xf] }
 0x412   : > { %9550 = vmatpush.bf16.msrb.mxu1 %v12985_v21  ;;  %9519 = vmatmul.bf16.vlgmr.msra.gmra.mxu2 %v20197_v35  ;;  %v12878_v21 = vld [vmem:[%s17079_s13 + $0x1428] sm:$0xf0]  ;;  %v15841_v35 = vld [vmem:[%s17079_s13 + $0x1514] sm:$0xf]  ;;  %v13206_v52 = vld [vmem:[%s17079_s13 + $0x16b8] sm:$0xf0] }
 0x413   : > { %9563 = vmatpush.bf16.msrb.mxu2 %v13049_v55  ;;  %9532 = vmatmul.bf16.vlgmr.msra.gmra.mxu3 %v20199_v54  ;;  %v15827_v55 = vld [vmem:[%s17079_s13 + $0x14a4] sm:$0xf]  ;;  %v13001_v8 = vor.u32 %v15841_v35, %v12998_v42  ;;  %v15909_v5 = vld [vmem:[%s17079_s13 + $0x1734] sm:$0xf] }
 0x414   : > { %9576 = vmatpush.bf16.msrb.mxu3 %v13113_v62  ;;  %v15843_v62 = vld [vmem:[%s17079_s13 + $0x1524] sm:$0xf]  ;;  %v12945_v12 = vor.u32 %v15827_v55, %v12942_v26  ;;  %v13358_v26 = vld [vmem:[%s17079_s13 + $0x17e8] sm:$0xf0] }
 0x415   : > { %9538 = vmatpush.bf16.msrb.mxu0 %v12913_v18  ;;  %v9312_v2 = vpop.f32.mrf.mxu2  ;;  %v9288_v18 = vpop.f32.mrf.mxu0  ;;  %v13009_v31 = vor.u32 %v15843_v62, %v13006_v59  ;;  %v15915_v55 = vld [vmem:[%s17079_s13 + $0x1764] sm:$0xf] }
 0x416   : > { %9551 = vmatpush.bf16.msrb.mxu1 %v12977_v27  ;;  %v9313_v37 = vadd.f32 %v9312_v2, %v9300_v44  ;;  %v9325_v29 = vpop.f32.mrf.mxu3  ;;  %v12881_v27 = vor.u32 %v15811_v38, %v12878_v21  ;;  %v15933_v44 = vld [vmem:[%s17079_s13 + $0x17f4] sm:$0xf]  ;;  %v13230_v21 = vld [vmem:[%s17079_s13 + $0x16e8] sm:$0xf0]  ;;  %v15931_v2 = vld [vmem:[%s17079_s13 + $0x17e4] sm:$0xf] }
 0x417   : > { %9564 = vmatpush.bf16.msrb.mxu2 %v13041_v30  ;;  %v9301_v30 = vpop.f32.mrf.mxu1  ;;  %v13369_v38 = vor.u32 %v15933_v44, %v13366_v53  ;;  %v20200_v18 = vld [vmem:[#allocation35_spill] sm:$0xff] }
 0x418   : > { %9577 = vmatpush.bf16.msrb.mxu3 %v13105_v45  ;;  %v19410_v36 = vadd.f32 %v9325_v29, %v9313_v37  ;;  %v12870_v45 = vld [vmem:[%s17079_s13 + $0x1418] sm:$0xf0]  ;;  %v15881_v29 = vld [vmem:[%s17079_s13 + $0x1654] sm:$0xf] }
 0x419   : > { %9539 = vmatpush.bf16.msrb.mxu0 %v12905_v58  ;;  %v12873_v54 = vor.u32 %v15809_v4, %v12870_v45  ;;  %v15807_v58 = vld [vmem:[%s17079_s13 + $0x1404] sm:$0xf]  ;;  %v13222_v30 = vld [vmem:[%s17079_s13 + $0x16d8] sm:$0xf0]  ;;  %v13161_v35 = vor.u32 %v15881_v29, %v13158_v43 }
 0x41a   : > { %9552 = vmatpush.bf16.msrb.mxu1 %v12969_v46  ;;  %v12862_v46 = vld [vmem:[%s17079_s13 + $0x1408] sm:$0xf0]  ;;  %v20201_v4 = vld [vmem:[#allocation36_spill] sm:$0xff]  ;;  %v20202_v45 = vld [vmem:[#allocation37_spill] sm:$0xff]  ;;  %v13225_v42 = vor.u32 %v15897_v32, %v13222_v30 }
 0x41b   : > { %9565 = vmatpush.bf16.msrb.mxu2 %v13033_v47  ;;  %v12937_v47 = vor.u32 %v15825_v22, %v12934_v41  ;;  %v15929_v22 = vld [vmem:[%s17079_s13 + $0x17d4] sm:$0xf]  ;;  %v20203_v41 = vld [vmem:[#allocation38_spill] sm:$0xff] }
 0x41c   : > { %9578 = vmatpush.bf16.msrb.mxu3 %v13097_v6  ;;  %v15839_v6 = vld [vmem:[%s17079_s13 + $0x1504] sm:$0xf]  ;;  %v15889_v30 = vld [vmem:[%s17079_s13 + $0x1694] sm:$0xf] }
 0x41d   : > { %9540 = vmatpush.bf16.msrb.mxu0 %v12897_v13  ;;  %v9314_v63 = vpop.f32.mrf.mxu2  ;;  %v15901_v13 = vld [vmem:[%s17079_s13 + $0x16f4] sm:$0xf] }
 0x41e   : > { %9553 = vmatpush.bf16.msrb.mxu1 %v12961_v33  ;;  %v9327_v28 = vpop.f32.mrf.mxu3  ;;  %v12865_v33 = vor.u32 %v15807_v58, %v12862_v46  ;;  %v15895_v58 = vld [vmem:[%s17079_s13 + $0x16c4] sm:$0xf] }
 0x41f   : > { %9566 = vmatpush.bf16.msrb.mxu2 %v13025_v14  ;;  %v13238_v14 = vld [vmem:[%s17079_s13 + $0x16f8] sm:$0xf0]  ;;  %v15893_v28 = vld [vmem:[%s17079_s13 + $0x16b4] sm:$0xf] }
 0x420   : > { %9579 = vmatpush.bf16.msrb.mxu3 %v13089_v11  ;;  %v12993_v11 = vor.u32 %v15839_v6, %v12990_v34  ;;  %v13241_v16 = vor.u32 %v15901_v13, %v13238_v14  ;;  %v15927_v6 = vld [vmem:[%s17079_s13 + $0x17c4] sm:$0xf]  ;;  %v13142_v13 = vld [vmem:[%s17079_s13 + $0x1638] sm:$0xf0]  ;;  %v13209_v53 = vor.u32 %v15893_v28, %v13206_v52 }
 0x421   : > { %9541 = vmatpush.bf16.msrb.mxu0 %v12889_v7  ;;  %v15883_v7 = vld [vmem:[%s17079_s13 + $0x1664] sm:$0xf]  ;;  %v13145_v44 = vor.u32 %v15877_v3, %v13142_v13  ;;  %v15981_v3 = vld [vmem:[%s17079_s13 + $0x1974] sm:$0xf]  ;;  %v13558_v13 = vld [vmem:[%s17079_s13 + $0x1978] sm:$0xf0] }
 0x422   : > { %9554 = vmatpush.bf16.msrb.mxu1 %v12953_v61  ;;  %v13166_v61 = vld [vmem:[%s17079_s13 + $0x1668] sm:$0xf0]  ;;  %v13622_v52 = vld [vmem:[%s17079_s13 + $0x19f8] sm:$0xf0] }
 0x423   : > { %9567 = vmatpush.bf16.msrb.mxu2 %v13017_v0  ;;  %v15899_v0 = vld [vmem:[%s17079_s13 + $0x16e4] sm:$0xf]  ;;  %v13169_v62 = vor.u32 %v15883_v7, %v13166_v61 }
 0x424   : > { %9580 = vmatpush.bf16.msrb.mxu3 %v13081_v24  ;;  %v13294_v24 = vld [vmem:[%s17079_s13 + $0x1768] sm:$0xf0]  ;;  %v13233_v59 = vor.u32 %v15899_v0, %v13230_v21 }
 0x425   : > { %9542 = vmatpush.bf16.msrb.mxu0 %v12881_v27  ;;  %v13297_v37 = vor.u32 %v15915_v55, %v13294_v24  ;;  %v13361_v27 = vor.u32 %v15931_v2, %v13358_v26  ;;  %v13198_v0 = vld [vmem:[%s17079_s13 + $0x16a8] sm:$0xf0]  ;;  %v15923_v2 = vld [vmem:[%s17079_s13 + $0x17a4] sm:$0xf] }
 0x426   : > { %9555 = vmatpush.bf16.msrb.mxu1 %v12945_v12  ;;  %v15913_v12 = vld [vmem:[%s17079_s13 + $0x1754] sm:$0xf]  ;;  %v13262_v21 = vld [vmem:[%s17079_s13 + $0x1728] sm:$0xf0] }
 0x427   : > { %9568 = vmatpush.bf16.msrb.mxu2 %v13009_v31  ;;  %v13286_v31 = vld [vmem:[%s17079_s13 + $0x1758] sm:$0xf0]  ;;  %v13326_v26 = vld [vmem:[%s17079_s13 + $0x17a8] sm:$0xf0] }
 0x428   : > { %9581 = vmatpush.bf16.msrb.mxu3 %v13073_v19  ;;  %v13350_v19 = vld [vmem:[%s17079_s13 + $0x17d8] sm:$0xf0]  ;;  %v13289_v40 = vor.u32 %v15913_v12, %v13286_v31  ;;  %v13329_v12 = vor.u32 %v15923_v2, %v13326_v26  ;;  %v15961_v26 = vld [vmem:[%s17079_s13 + $0x18d4] sm:$0xf] }
 0x429   : > { %9543 = vmatpush.bf16.msrb.mxu0 %v12873_v54  ;;  %v13150_v54 = vld [vmem:[%s17079_s13 + $0x1648] sm:$0xf0]  ;;  %v13353_v46 = vor.u32 %v15929_v22, %v13350_v19  ;;  %v13190_v31 = vld [vmem:[%s17079_s13 + $0x1698] sm:$0xf0]  ;;  %v15921_v22 = vld [vmem:[%s17079_s13 + $0x1794] sm:$0xf] }
 0x42a   : > { %9556 = vmatpush.bf16.msrb.mxu1 %v12937_v47  ;;  %v13214_v47 = vld [vmem:[%s17079_s13 + $0x16c8] sm:$0xf0]  ;;  %v13153_v60 = vor.u32 %v15879_v39, %v13150_v54  ;;  %v13318_v19 = vld [vmem:[%s17079_s13 + $0x1798] sm:$0xf0]  ;;  %v15887_v54 = vld [vmem:[%s17079_s13 + $0x1684] sm:$0xf] }
 0x42b   : > { %9569 = vmatpush.bf16.msrb.mxu2 %v13001_v8  ;;  %v15911_v8 = vld [vmem:[%s17079_s13 + $0x1744] sm:$0xf]  ;;  %v13217_v63 = vor.u32 %v15895_v58, %v13214_v47  ;;  %v13182_v58 = vld [vmem:[%s17079_s13 + $0x1688] sm:$0xf0]  ;;  %v13321_v47 = vor.u32 %v15921_v22, %v13318_v19  ;;  %v13414_v2 = vld [vmem:[%s17079_s13 + $0x1858] sm:$0xf0] }
 0x42c   : > { %9582 = vmatpush.bf16.msrb.mxu3 %v13065_v9  ;;  %v13342_v9 = vld [vmem:[%s17079_s13 + $0x17c8] sm:$0xf0]  ;;  %v13281_v49 = vor.u32 %v15911_v8, %v13278_v51  ;;  %v15919_v51 = vld [vmem:[%s17079_s13 + $0x1784] sm:$0xf]  ;;  %v13185_v28 = vor.u32 %v15887_v54, %v13182_v58 }
 0x42d   : > { %9544 = vmatpush.bf16.msrb.mxu0 %v12865_v33  ;;  %v9338_v50 = vpop.f32.mrf.mxu0  ;;  %v13345_v33 = vor.u32 %v15927_v6, %v13342_v9  ;;  %v13246_v8 = vld [vmem:[%s17079_s13 + $0x1708] sm:$0xf0]  ;;  %v15949_v9 = vld [vmem:[%s17079_s13 + $0x1874] sm:$0xf]  ;;  %v15943_v19 = vld [vmem:[%s17079_s13 + $0x1844] sm:$0xf] }
 0x42e   : > { %9557 = vmatpush.bf16.msrb.mxu1 %v12929_v10  ;;  %v9339_v34 = vadd.f32 %v9338_v50, %v19410_v36  ;;  %v9351_v23 = vpop.f32.mrf.mxu1  ;;  %v13270_v36 = vld [vmem:[%s17079_s13 + $0x1738] sm:$0xf0]  ;;  %v15925_v10 = vld [vmem:[%s17079_s13 + $0x17b4] sm:$0xf]  ;;  %v13310_v50 = vld [vmem:[%s17079_s13 + $0x1788] sm:$0xf0] }
 0x42f   : > { %9570 = vmatpush.bf16.msrb.mxu2 %v12993_v11  ;;  %v13334_v11 = vld [vmem:[%s17079_s13 + $0x17b8] sm:$0xf0]  ;;  %v13534_v54 = vld [vmem:[%s17079_s13 + $0x1948] sm:$0xf0] }
 0x430   : > { %9583 = vmatpush.bf16.msrb.mxu3 %v13057_v17  ;;  %9545 = vmatmul.bf16.vlgmr.msrb.gmra.mxu0 %v20200_v18  ;;  %v9352_v14 = vadd.f32 %v9351_v23, %v9339_v34  ;;  %v13273_v17 = vor.u32 %v15909_v5, %v13270_v36  ;;  %v13337_v7 = vor.u32 %v15925_v10, %v13334_v11  ;;  %v15873_v18 = vld [vmem:[%s17079_s13 + $0x1614] sm:$0xf]  ;;  %v13430_v34 = vld [vmem:[%s17079_s13 + $0x1878] sm:$0xf0] }
 0x431   : > { %9589 = vmatpush.bf16.msra.mxu0 %v13177_v57  ;;  %9558 = vmatmul.bf16.vlgmr.msrb.gmra.mxu1 %v20202_v45  ;;  %v15875_v57 = vld [vmem:[%s17079_s13 + $0x1624] sm:$0xf]  ;;  %v13254_v45 = vld [vmem:[%s17079_s13 + $0x1718] sm:$0xf0]  ;;  %v13313_v5 = vor.u32 %v15919_v51, %v13310_v50  ;;  %v13433_v36 = vor.u32 %v15949_v9, %v13430_v34  ;;  %v13561_v11 = vor.u32 %v15981_v3, %v13558_v13  ;;  %v15941_v34 = vld [vmem:[%s17079_s13 + $0x1834] sm:$0xf] }
 0x432   : > { %9602 = vmatpush.bf16.msra.mxu1 %v13241_v16  ;;  %9571 = vmatmul.bf16.vlgmr.msrb.gmra.mxu2 %v20201_v4  ;;  %v13134_v16 = vld [vmem:[%s17079_s13 + $0x1628] sm:$0xf0]  ;;  %v15905_v4 = vld [vmem:[%s17079_s13 + $0x1714] sm:$0xf]  ;;  %v13462_v3 = vld [vmem:[%s17079_s13 + $0x18b8] sm:$0xf0] }
 0x433   : > { %9615 = vmatpush.bf16.msra.mxu2 %v13305_v20  ;;  %9584 = vmatmul.bf16.vlgmr.msrb.gmra.mxu3 %v20203_v41  ;;  %v15891_v20 = vld [vmem:[%s17079_s13 + $0x16a4] sm:$0xf]  ;;  %v13257_v39 = vor.u32 %v15905_v4, %v13254_v45  ;;  %v15973_v13 = vld [vmem:[%s17079_s13 + $0x1934] sm:$0xf] }
 0x434   : > { %9628 = vmatpush.bf16.msra.mxu3 %v13369_v38  ;;  %v15907_v38 = vld [vmem:[%s17079_s13 + $0x1724] sm:$0xf]  ;;  %v13201_v43 = vor.u32 %v15891_v20, %v13198_v0  ;;  %v13614_v0 = vld [vmem:[%s17079_s13 + $0x19e8] sm:$0xf0] }
 0x435   : > { %9590 = vmatpush.bf16.msra.mxu0 %v13169_v62  ;;  %v9364_v61 = vpop.f32.mrf.mxu2  ;;  %v9340_v62 = vpop.f32.mrf.mxu0  ;;  %v13265_v32 = vor.u32 %v15907_v38, %v13262_v21  ;;  %v15979_v20 = vld [vmem:[%s17079_s13 + $0x1964] sm:$0xf] }
 0x436   : > { %9603 = vmatpush.bf16.msra.mxu1 %v13233_v59  ;;  %v9365_v55 = vadd.f32 %v9364_v61, %v9352_v14  ;;  %v9377_v24 = vpop.f32.mrf.mxu3  ;;  %v13137_v59 = vor.u32 %v15875_v57, %v13134_v16  ;;  %v15997_v14 = vld [vmem:[%s17079_s13 + $0x19f4] sm:$0xf]  ;;  %v13486_v16 = vld [vmem:[%s17079_s13 + $0x18e8] sm:$0xf0]  ;;  %v15995_v61 = vld [vmem:[%s17079_s13 + $0x19e4] sm:$0xf] }
 0x437   : > { %9616 = vmatpush.bf16.msra.mxu2 %v13297_v37  ;;  %v9353_v37 = vpop.f32.mrf.mxu1  ;;  %v13625_v57 = vor.u32 %v15997_v14, %v13622_v52  ;;  %v20204_v62 = vld [vmem:[#allocation39_spill] sm:$0xff] }
 0x438   : > { %9629 = vmatpush.bf16.msra.mxu3 %v13361_v27  ;;  %v19481_v29 = vadd.f32 %v9377_v24, %v9365_v55  ;;  %v13126_v27 = vld [vmem:[%s17079_s13 + $0x1618] sm:$0xf0]  ;;  %v15945_v24 = vld [vmem:[%s17079_s13 + $0x1854] sm:$0xf] }
 0x439   : > { %9591 = vmatpush.bf16.msra.mxu0 %v13161_v35  ;;  %v13129_v41 = vor.u32 %v15873_v18, %v13126_v27  ;;  %v15871_v35 = vld [vmem:[%s17079_s13 + $0x1604] sm:$0xf]  ;;  %v13478_v37 = vld [vmem:[%s17079_s13 + $0x18d8] sm:$0xf0]  ;;  %v13417_v4 = vor.u32 %v15945_v24, %v13414_v2 }
 0x43a   : > { %9604 = vmatpush.bf16.msra.mxu1 %v13225_v42  ;;  %v13118_v42 = vld [vmem:[%s17079_s13 + $0x1608] sm:$0xf0]  ;;  %v20205_v18 = vld [vmem:[#allocation40_spill] sm:$0xff]  ;;  %v20206_v27 = vld [vmem:[#allocation41_spill] sm:$0xff]  ;;  %v13481_v45 = vor.u32 %v15961_v26, %v13478_v37 }
 0x43b   : > { %9617 = vmatpush.bf16.msra.mxu2 %v13289_v40  ;;  %v13193_v40 = vor.u32 %v15889_v30, %v13190_v31  ;;  %v15993_v30 = vld [vmem:[%s17079_s13 + $0x19d4] sm:$0xf]  ;;  %v20207_v31 = vld [vmem:[#allocation42_spill] sm:$0xff] }
 0x43c   : > { %9630 = vmatpush.bf16.msra.mxu3 %v13353_v46  ;;  %v15903_v46 = vld [vmem:[%s17079_s13 + $0x1704] sm:$0xf]  ;;  %v15953_v37 = vld [vmem:[%s17079_s13 + $0x1894] sm:$0xf] }
 0x43d   : > { %9592 = vmatpush.bf16.msra.mxu0 %v13153_v60  ;;  %v9366_v6 = vpop.f32.mrf.mxu2  ;;  %v15965_v60 = vld [vmem:[%s17079_s13 + $0x18f4] sm:$0xf] }
 0x43e   : > { %9605 = vmatpush.bf16.msra.mxu1 %v13217_v63  ;;  %v9379_v23 = vpop.f32.mrf.mxu3  ;;  %v13121_v63 = vor.u32 %v15871_v35, %v13118_v42  ;;  %v15959_v35 = vld [vmem:[%s17079_s13 + $0x18c4] sm:$0xf] }
 0x43f   : > { %9618 = vmatpush.bf16.msra.mxu2 %v13281_v49  ;;  %v13494_v49 = vld [vmem:[%s17079_s13 + $0x18f8] sm:$0xf0]  ;;  %v15957_v23 = vld [vmem:[%s17079_s13 + $0x18b4] sm:$0xf] }
 0x440   : > { %9631 = vmatpush.bf16.msra.mxu3 %v13345_v33  ;;  %v13249_v33 = vor.u32 %v15903_v46, %v13246_v8  ;;  %v13497_v10 = vor.u32 %v15965_v60, %v13494_v49  ;;  %v15991_v46 = vld [vmem:[%s17079_s13 + $0x19c4] sm:$0xf]  ;;  %v13398_v60 = vld [vmem:[%s17079_s13 + $0x1838] sm:$0xf0]  ;;  %v13465_v52 = vor.u32 %v15957_v23, %v13462_v3 }
 0x441   : > { %9593 = vmatpush.bf16.msra.mxu0 %v13145_v44  ;;  %v15947_v44 = vld [vmem:[%s17079_s13 + $0x1864] sm:$0xf]  ;;  %v13401_v14 = vor.u32 %v15941_v34, %v13398_v60  ;;  %v16045_v34 = vld [vmem:[%s17079_s13 + $0x1b74] sm:$0xf]  ;;  %v13814_v60 = vld [vmem:[%s17079_s13 + $0x1b78] sm:$0xf0] }
 0x442   : > { %9606 = vmatpush.bf16.msra.mxu1 %v13209_v53  ;;  %v13422_v53 = vld [vmem:[%s17079_s13 + $0x1868] sm:$0xf0]  ;;  %v13878_v3 = vld [vmem:[%s17079_s13 + $0x1bf8] sm:$0xf0] }
 0x443   : > { %9619 = vmatpush.bf16.msra.mxu2 %v13273_v17  ;;  %v15963_v17 = vld [vmem:[%s17079_s13 + $0x18e4] sm:$0xf]  ;;  %v13425_v38 = vor.u32 %v15947_v44, %v13422_v53 }
 0x444   : > { %9632 = vmatpush.bf16.msra.mxu3 %v13337_v7  ;;  %v13550_v7 = vld [vmem:[%s17079_s13 + $0x1968] sm:$0xf0]  ;;  %v13489_v21 = vor.u32 %v15963_v17, %v13486_v16 }
 0x445   : > { %9594 = vmatpush.bf16.msra.mxu0 %v13137_v59  ;;  %v13553_v55 = vor.u32 %v15979_v20, %v13550_v7  ;;  %v13617_v59 = vor.u32 %v15995_v61, %v13614_v0  ;;  %v13454_v17 = vld [vmem:[%s17079_s13 + $0x18a8] sm:$0xf0]  ;;  %v15987_v61 = vld [vmem:[%s17079_s13 + $0x19a4] sm:$0xf] }
 0x446   : > { %9607 = vmatpush.bf16.msra.mxu1 %v13201_v43  ;;  %v15977_v43 = vld [vmem:[%s17079_s13 + $0x1954] sm:$0xf]  ;;  %v13518_v16 = vld [vmem:[%s17079_s13 + $0x1928] sm:$0xf0] }
 0x447   : > { %9620 = vmatpush.bf16.msra.mxu2 %v13265_v32  ;;  %v13542_v32 = vld [vmem:[%s17079_s13 + $0x1958] sm:$0xf0]  ;;  %v13582_v0 = vld [vmem:[%s17079_s13 + $0x19a8] sm:$0xf0] }
 0x448   : > { %9633 = vmatpush.bf16.msra.mxu3 %v13329_v12  ;;  %v13606_v12 = vld [vmem:[%s17079_s13 + $0x19d8] sm:$0xf0]  ;;  %v13545_v22 = vor.u32 %v15977_v43, %v13542_v32  ;;  %v13585_v43 = vor.u32 %v15987_v61, %v13582_v0  ;;  %v16025_v0 = vld [vmem:[%s17079_s13 + $0x1ad4] sm:$0xf] }
 0x449   : > { %9595 = vmatpush.bf16.msra.mxu0 %v13129_v41  ;;  %v13406_v41 = vld [vmem:[%s17079_s13 + $0x1848] sm:$0xf0]  ;;  %v13609_v42 = vor.u32 %v15993_v30, %v13606_v12  ;;  %v13446_v32 = vld [vmem:[%s17079_s13 + $0x1898] sm:$0xf0]  ;;  %v15985_v30 = vld [vmem:[%s17079_s13 + $0x1994] sm:$0xf] }
 0x44a   : > { %9608 = vmatpush.bf16.msra.mxu1 %v13193_v40  ;;  %v13470_v40 = vld [vmem:[%s17079_s13 + $0x18c8] sm:$0xf0]  ;;  %v13409_v51 = vor.u32 %v15943_v19, %v13406_v41  ;;  %v13574_v12 = vld [vmem:[%s17079_s13 + $0x1998] sm:$0xf0]  ;;  %v15951_v41 = vld [vmem:[%s17079_s13 + $0x1884] sm:$0xf] }
 0x44b   : > { %9621 = vmatpush.bf16.msra.mxu2 %v13257_v39  ;;  %v15975_v39 = vld [vmem:[%s17079_s13 + $0x1944] sm:$0xf]  ;;  %v13473_v6 = vor.u32 %v15959_v35, %v13470_v40  ;;  %v13438_v35 = vld [vmem:[%s17079_s13 + $0x1888] sm:$0xf0]  ;;  %v13577_v40 = vor.u32 %v15985_v30, %v13574_v12  ;;  %v13670_v61 = vld [vmem:[%s17079_s13 + $0x1a58] sm:$0xf0] }
 0x44c   : > { %9634 = vmatpush.bf16.msra.mxu3 %v13321_v47  ;;  %v13598_v47 = vld [vmem:[%s17079_s13 + $0x19c8] sm:$0xf0]  ;;  %v13537_v9 = vor.u32 %v15975_v39, %v13534_v54  ;;  %v15983_v54 = vld [vmem:[%s17079_s13 + $0x1984] sm:$0xf]  ;;  %v13441_v23 = vor.u32 %v15951_v41, %v13438_v35 }
 0x44d   : > { %9596 = vmatpush.bf16.msra.mxu0 %v13121_v63  ;;  %v9390_v58 = vpop.f32.mrf.mxu0  ;;  %v13601_v63 = vor.u32 %v15991_v46, %v13598_v47  ;;  %v13502_v39 = vld [vmem:[%s17079_s13 + $0x1908] sm:$0xf0]  ;;  %v16013_v47 = vld [vmem:[%s17079_s13 + $0x1a74] sm:$0xf]  ;;  %v16007_v12 = vld [vmem:[%s17079_s13 + $0x1a44] sm:$0xf] }
 0x44e   : > { %9609 = vmatpush.bf16.msra.mxu1 %v13185_v28  ;;  %v9391_v8 = vadd.f32 %v9390_v58, %v19481_v29  ;;  %v9403_v50 = vpop.f32.mrf.mxu1  ;;  %v13526_v29 = vld [vmem:[%s17079_s13 + $0x1938] sm:$0xf0]  ;;  %v15989_v28 = vld [vmem:[%s17079_s13 + $0x19b4] sm:$0xf]  ;;  %v13566_v58 = vld [vmem:[%s17079_s13 + $0x1988] sm:$0xf0] }
 0x44f   : > { %9622 = vmatpush.bf16.msra.mxu2 %v13249_v33  ;;  %v13590_v33 = vld [vmem:[%s17079_s13 + $0x19b8] sm:$0xf0]  ;;  %v13790_v41 = vld [vmem:[%s17079_s13 + $0x1b48] sm:$0xf0] }
 0x450   : > { %9635 = vmatpush.bf16.msra.mxu3 %v13313_v5  ;;  %9597 = vmatmul.bf16.vlgmr.msra.gmra.mxu0 %v20204_v62  ;;  %v9404_v49 = vadd.f32 %v9403_v50, %v9391_v8  ;;  %v13529_v5 = vor.u32 %v15973_v13, %v13526_v29  ;;  %v13593_v44 = vor.u32 %v15989_v28, %v13590_v33  ;;  %v15937_v62 = vld [vmem:[%s17079_s13 + $0x1814] sm:$0xf]  ;;  %v13686_v8 = vld [vmem:[%s17079_s13 + $0x1a78] sm:$0xf0] }
 0x451   : > { %9641 = vmatpush.bf16.msrb.mxu0 %v13433_v36  ;;  %9610 = vmatmul.bf16.vlgmr.msra.gmra.mxu1 %v20206_v27  ;;  %v15939_v36 = vld [vmem:[%s17079_s13 + $0x1824] sm:$0xf]  ;;  %v13510_v27 = vld [vmem:[%s17079_s13 + $0x1918] sm:$0xf0]  ;;  %v13569_v13 = vor.u32 %v15983_v54, %v13566_v58  ;;  %v13689_v29 = vor.u32 %v16013_v47, %v13686_v8  ;;  %v13817_v33 = vor.u32 %v16045_v34, %v13814_v60  ;;  %v16005_v8 = vld [vmem:[%s17079_s13 + $0x1a34] sm:$0xf] }
 0x452   : > { %9654 = vmatpush.bf16.msrb.mxu1 %v13497_v10  ;;  %9623 = vmatmul.bf16.vlgmr.msra.gmra.mxu2 %v20205_v18  ;;  %v13390_v10 = vld [vmem:[%s17079_s13 + $0x1828] sm:$0xf0]  ;;  %v15969_v18 = vld [vmem:[%s17079_s13 + $0x1914] sm:$0xf]  ;;  %v13718_v34 = vld [vmem:[%s17079_s13 + $0x1ab8] sm:$0xf0] }
 0x453   : > { %9667 = vmatpush.bf16.msrb.mxu2 %v13561_v11  ;;  %9636 = vmatmul.bf16.vlgmr.msra.gmra.mxu3 %v20207_v31  ;;  %v15955_v11 = vld [vmem:[%s17079_s13 + $0x18a4] sm:$0xf]  ;;  %v13513_v19 = vor.u32 %v15969_v18, %v13510_v27  ;;  %v16037_v60 = vld [vmem:[%s17079_s13 + $0x1b34] sm:$0xf] }
 0x454   : > { %9680 = vmatpush.bf16.msrb.mxu3 %v13625_v57  ;;  %v15971_v57 = vld [vmem:[%s17079_s13 + $0x1924] sm:$0xf]  ;;  %v13457_v2 = vor.u32 %v15955_v11, %v13454_v17  ;;  %v13870_v17 = vld [vmem:[%s17079_s13 + $0x1be8] sm:$0xf0] }
 0x455   : > { %9642 = vmatpush.bf16.msrb.mxu0 %v13425_v38  ;;  %v9416_v53 = vpop.f32.mrf.mxu2  ;;  %v9392_v38 = vpop.f32.mrf.mxu0  ;;  %v13521_v26 = vor.u32 %v15971_v57, %v13518_v16  ;;  %v16043_v11 = vld [vmem:[%s17079_s13 + $0x1b64] sm:$0xf] }
 0x456   : > { %9655 = vmatpush.bf16.msrb.mxu1 %v13489_v21  ;;  %v9417_v20 = vadd.f32 %v9416_v53, %v9404_v49  ;;  %v9429_v7 = vpop.f32.mrf.mxu3  ;;  %v13393_v21 = vor.u32 %v15939_v36, %v13390_v10  ;;  %v16061_v49 = vld [vmem:[%s17079_s13 + $0x1bf4] sm:$0xf]  ;;  %v13742_v10 = vld [vmem:[%s17079_s13 + $0x1ae8] sm:$0xf0]  ;;  %v16059_v53 = vld [vmem:[%s17079_s13 + $0x1be4] sm:$0xf] }
 0x457   : > { %9668 = vmatpush.bf16.msrb.mxu2 %v13553_v55  ;;  %v9405_v55 = vpop.f32.mrf.mxu1  ;;  %v13881_v36 = vor.u32 %v16061_v49, %v13878_v3  ;;  %v20208_v38 = vld [vmem:[#allocation43_spill] sm:$0xff] }
 0x458   : > { %9681 = vmatpush.bf16.msrb.mxu3 %v13617_v59  ;;  %v19552_v24 = vadd.f32 %v9429_v7, %v9417_v20  ;;  %v13382_v59 = vld [vmem:[%s17079_s13 + $0x1818] sm:$0xf0]  ;;  %v16009_v7 = vld [vmem:[%s17079_s13 + $0x1a54] sm:$0xf] }
 0x459   : > { %9643 = vmatpush.bf16.msrb.mxu0 %v13417_v4  ;;  %v13385_v31 = vor.u32 %v15937_v62, %v13382_v59  ;;  %v15935_v4 = vld [vmem:[%s17079_s13 + $0x1804] sm:$0xf]  ;;  %v13734_v55 = vld [vmem:[%s17079_s13 + $0x1ad8] sm:$0xf0]  ;;  %v13673_v18 = vor.u32 %v16009_v7, %v13670_v61 }
 0x45a   : > { %9656 = vmatpush.bf16.msrb.mxu1 %v13481_v45  ;;  %v13374_v45 = vld [vmem:[%s17079_s13 + $0x1808] sm:$0xf0]  ;;  %v20209_v62 = vld [vmem:[#allocation44_spill] sm:$0xff]  ;;  %v20210_v59 = vld [vmem:[#allocation45_spill] sm:$0xff]  ;;  %v13737_v27 = vor.u32 %v16025_v0, %v13734_v55 }
 0x45b   : > { %9669 = vmatpush.bf16.msrb.mxu2 %v13545_v22  ;;  %v13449_v22 = vor.u32 %v15953_v37, %v13446_v32  ;;  %v16057_v37 = vld [vmem:[%s17079_s13 + $0x1bd4] sm:$0xf]  ;;  %v20211_v32 = vld [vmem:[#allocation46_spill] sm:$0xff] }
 0x45c   : > { %9682 = vmatpush.bf16.msrb.mxu3 %v13609_v42  ;;  %v15967_v42 = vld [vmem:[%s17079_s13 + $0x1904] sm:$0xf]  ;;  %v16017_v55 = vld [vmem:[%s17079_s13 + $0x1a94] sm:$0xf] }
 0x45d   : > { %9644 = vmatpush.bf16.msrb.mxu0 %v13409_v51  ;;  %v9418_v46 = vpop.f32.mrf.mxu2  ;;  %v16029_v51 = vld [vmem:[%s17079_s13 + $0x1af4] sm:$0xf] }
 0x45e   : > { %9657 = vmatpush.bf16.msrb.mxu1 %v13473_v6  ;;  %v9431_v50 = vpop.f32.mrf.mxu3  ;;  %v13377_v6 = vor.u32 %v15935_v4, %v13374_v45  ;;  %v16023_v4 = vld [vmem:[%s17079_s13 + $0x1ac4] sm:$0xf] }
 0x45f   : > { %9670 = vmatpush.bf16.msrb.mxu2 %v13537_v9  ;;  %v13750_v9 = vld [vmem:[%s17079_s13 + $0x1af8] sm:$0xf0]  ;;  %v16021_v50 = vld [vmem:[%s17079_s13 + $0x1ab4] sm:$0xf] }
 0x460   : > { %9683 = vmatpush.bf16.msrb.mxu3 %v13601_v63  ;;  %v13505_v63 = vor.u32 %v15967_v42, %v13502_v39  ;;  %v13753_v28 = vor.u32 %v16029_v51, %v13750_v9  ;;  %v16055_v42 = vld [vmem:[%s17079_s13 + $0x1bc4] sm:$0xf]  ;;  %v13654_v51 = vld [vmem:[%s17079_s13 + $0x1a38] sm:$0xf0]  ;;  %v13721_v3 = vor.u32 %v16021_v50, %v13718_v34 }
 0x461   : > { %9645 = vmatpush.bf16.msrb.mxu0 %v13401_v14  ;;  %v16011_v14 = vld [vmem:[%s17079_s13 + $0x1a64] sm:$0xf]  ;;  %v13657_v49 = vor.u32 %v16005_v8, %v13654_v51  ;;  %v16109_v8 = vld [vmem:[%s17079_s13 + $0x1d74] sm:$0xf]  ;;  %v14070_v51 = vld [vmem:[%s17079_s13 + $0x1d78] sm:$0xf0] }
 0x462   : > { %9658 = vmatpush.bf16.msrb.mxu1 %v13465_v52  ;;  %v13678_v52 = vld [vmem:[%s17079_s13 + $0x1a68] sm:$0xf0]  ;;  %v14134_v34 = vld [vmem:[%s17079_s13 + $0x1df8] sm:$0xf0] }
 0x463   : > { %9671 = vmatpush.bf16.msrb.mxu2 %v13529_v5  ;;  %v16027_v5 = vld [vmem:[%s17079_s13 + $0x1ae4] sm:$0xf]  ;;  %v13681_v57 = vor.u32 %v16011_v14, %v13678_v52 }
 0x464   : > { %9684 = vmatpush.bf16.msrb.mxu3 %v13593_v44  ;;  %v13806_v44 = vld [vmem:[%s17079_s13 + $0x1b68] sm:$0xf0]  ;;  %v13745_v16 = vor.u32 %v16027_v5, %v13742_v10 }
 0x465   : > { %9646 = vmatpush.bf16.msrb.mxu0 %v13393_v21  ;;  %v13809_v20 = vor.u32 %v16043_v11, %v13806_v44  ;;  %v13873_v21 = vor.u32 %v16059_v53, %v13870_v17  ;;  %v13710_v5 = vld [vmem:[%s17079_s13 + $0x1aa8] sm:$0xf0]  ;;  %v16051_v53 = vld [vmem:[%s17079_s13 + $0x1ba4] sm:$0xf] }
 0x466   : > { %9659 = vmatpush.bf16.msrb.mxu1 %v13457_v2  ;;  %v16041_v2 = vld [vmem:[%s17079_s13 + $0x1b54] sm:$0xf]  ;;  %v13774_v10 = vld [vmem:[%s17079_s13 + $0x1b28] sm:$0xf0] }
 0x467   : > { %9672 = vmatpush.bf16.msrb.mxu2 %v13521_v26  ;;  %v13798_v26 = vld [vmem:[%s17079_s13 + $0x1b58] sm:$0xf0]  ;;  %v13838_v17 = vld [vmem:[%s17079_s13 + $0x1ba8] sm:$0xf0] }
 0x468   : > { %9685 = vmatpush.bf16.msrb.mxu3 %v13585_v43  ;;  %v13862_v43 = vld [vmem:[%s17079_s13 + $0x1bd8] sm:$0xf0]  ;;  %v13801_v30 = vor.u32 %v16041_v2, %v13798_v26  ;;  %v13841_v2 = vor.u32 %v16051_v53, %v13838_v17  ;;  %v16089_v17 = vld [vmem:[%s17079_s13 + $0x1cd4] sm:$0xf] }
 0x469   : > { %9647 = vmatpush.bf16.msrb.mxu0 %v13385_v31  ;;  %v13662_v31 = vld [vmem:[%s17079_s13 + $0x1a48] sm:$0xf0]  ;;  %v13865_v45 = vor.u32 %v16057_v37, %v13862_v43  ;;  %v13702_v26 = vld [vmem:[%s17079_s13 + $0x1a98] sm:$0xf0]  ;;  %v16049_v37 = vld [vmem:[%s17079_s13 + $0x1b94] sm:$0xf] }
 0x46a   : > { %9660 = vmatpush.bf16.msrb.mxu1 %v13449_v22  ;;  %v13726_v22 = vld [vmem:[%s17079_s13 + $0x1ac8] sm:$0xf0]  ;;  %v13665_v54 = vor.u32 %v16007_v12, %v13662_v31  ;;  %v13830_v43 = vld [vmem:[%s17079_s13 + $0x1b98] sm:$0xf0]  ;;  %v16015_v31 = vld [vmem:[%s17079_s13 + $0x1a84] sm:$0xf] }
 0x46b   : > { %9673 = vmatpush.bf16.msrb.mxu2 %v13513_v19  ;;  %v16039_v19 = vld [vmem:[%s17079_s13 + $0x1b44] sm:$0xf]  ;;  %v13729_v46 = vor.u32 %v16023_v4, %v13726_v22  ;;  %v13694_v4 = vld [vmem:[%s17079_s13 + $0x1a88] sm:$0xf0]  ;;  %v13833_v22 = vor.u32 %v16049_v37, %v13830_v43  ;;  %v13926_v53 = vld [vmem:[%s17079_s13 + $0x1c58] sm:$0xf0] }
 0x46c   : > { %9686 = vmatpush.bf16.msrb.mxu3 %v13577_v40  ;;  %v13854_v40 = vld [vmem:[%s17079_s13 + $0x1bc8] sm:$0xf0]  ;;  %v13793_v47 = vor.u32 %v16039_v19, %v13790_v41  ;;  %v16047_v41 = vld [vmem:[%s17079_s13 + $0x1b84] sm:$0xf]  ;;  %v13697_v50 = vor.u32 %v16015_v31, %v13694_v4 }
 0x46d   : > { %9648 = vmatpush.bf16.msrb.mxu0 %v13377_v6  ;;  %v9442_v35 = vpop.f32.mrf.mxu0  ;;  %v13857_v6 = vor.u32 %v16055_v42, %v13854_v40  ;;  %v13758_v19 = vld [vmem:[%s17079_s13 + $0x1b08] sm:$0xf0]  ;;  %v16077_v40 = vld [vmem:[%s17079_s13 + $0x1c74] sm:$0xf]  ;;  %v16071_v43 = vld [vmem:[%s17079_s13 + $0x1c44] sm:$0xf] }
 0x46e   : > { %9661 = vmatpush.bf16.msrb.mxu1 %v13441_v23  ;;  %v9443_v39 = vadd.f32 %v9442_v35, %v19552_v24  ;;  %v9455_v58 = vpop.f32.mrf.mxu1  ;;  %v13782_v24 = vld [vmem:[%s17079_s13 + $0x1b38] sm:$0xf0]  ;;  %v16053_v23 = vld [vmem:[%s17079_s13 + $0x1bb4] sm:$0xf]  ;;  %v13822_v35 = vld [vmem:[%s17079_s13 + $0x1b88] sm:$0xf0] }
 0x46f   : > { %9674 = vmatpush.bf16.msrb.mxu2 %v13505_v63  ;;  %v13846_v63 = vld [vmem:[%s17079_s13 + $0x1bb8] sm:$0xf0]  ;;  %v14046_v31 = vld [vmem:[%s17079_s13 + $0x1d48] sm:$0xf0] }
 0x470   : > { %9687 = vmatpush.bf16.msrb.mxu3 %v13569_v13  ;;  %9649 = vmatmul.bf16.vlgmr.msrb.gmra.mxu0 %v20208_v38  ;;  %v9456_v9 = vadd.f32 %v9455_v58, %v9443_v39  ;;  %v13785_v13 = vor.u32 %v16037_v60, %v13782_v24  ;;  %v13849_v14 = vor.u32 %v16053_v23, %v13846_v63  ;;  %v16001_v38 = vld [vmem:[%s17079_s13 + $0x1a14] sm:$0xf]  ;;  %v13942_v39 = vld [vmem:[%s17079_s13 + $0x1c78] sm:$0xf0] }
 0x471   : > { %9693 = vmatpush.bf16.msra.mxu0 %v13689_v29  ;;  %9662 = vmatmul.bf16.vlgmr.msrb.gmra.mxu1 %v20210_v59  ;;  %v16003_v29 = vld [vmem:[%s17079_s13 + $0x1a24] sm:$0xf]  ;;  %v13766_v59 = vld [vmem:[%s17079_s13 + $0x1b18] sm:$0xf0]  ;;  %v13825_v60 = vor.u32 %v16047_v41, %v13822_v35  ;;  %v13945_v24 = vor.u32 %v16077_v40, %v13942_v39  ;;  %v14073_v63 = vor.u32 %v16109_v8, %v14070_v51  ;;  %v16069_v39 = vld [vmem:[%s17079_s13 + $0x1c34] sm:$0xf] }
 0x472   : > { %9706 = vmatpush.bf16.msra.mxu1 %v13753_v28  ;;  %9675 = vmatmul.bf16.vlgmr.msrb.gmra.mxu2 %v20209_v62  ;;  %v13646_v28 = vld [vmem:[%s17079_s13 + $0x1a28] sm:$0xf0]  ;;  %v16033_v62 = vld [vmem:[%s17079_s13 + $0x1b14] sm:$0xf]  ;;  %v13974_v8 = vld [vmem:[%s17079_s13 + $0x1cb8] sm:$0xf0] }
 0x473   : > { %9719 = vmatpush.bf16.msra.mxu2 %v13817_v33  ;;  %9688 = vmatmul.bf16.vlgmr.msrb.gmra.mxu3 %v20211_v32  ;;  %v16019_v33 = vld [vmem:[%s17079_s13 + $0x1aa4] sm:$0xf]  ;;  %v13769_v12 = vor.u32 %v16033_v62, %v13766_v59  ;;  %v16101_v51 = vld [vmem:[%s17079_s13 + $0x1d34] sm:$0xf] }
 0x474   : > { %9732 = vmatpush.bf16.msra.mxu3 %v13881_v36  ;;  %v16035_v36 = vld [vmem:[%s17079_s13 + $0x1b24] sm:$0xf]  ;;  %v13713_v61 = vor.u32 %v16019_v33, %v13710_v5  ;;  %v14126_v5 = vld [vmem:[%s17079_s13 + $0x1de8] sm:$0xf0] }
 0x475   : > { %9694 = vmatpush.bf16.msra.mxu0 %v13681_v57  ;;  %v9468_v52 = vpop.f32.mrf.mxu2  ;;  %v9444_v57 = vpop.f32.mrf.mxu0  ;;  %v13777_v0 = vor.u32 %v16035_v36, %v13774_v10  ;;  %v16107_v33 = vld [vmem:[%s17079_s13 + $0x1d64] sm:$0xf] }
 0x476   : > { %9707 = vmatpush.bf16.msra.mxu1 %v13745_v16  ;;  %v9469_v11 = vadd.f32 %v9468_v52, %v9456_v9  ;;  %v9481_v44 = vpop.f32.mrf.mxu3  ;;  %v13649_v16 = vor.u32 %v16003_v29, %v13646_v28  ;;  %v16125_v9 = vld [vmem:[%s17079_s13 + $0x1df4] sm:$0xf]  ;;  %v13998_v28 = vld [vmem:[%s17079_s13 + $0x1ce8] sm:$0xf0]  ;;  %v16123_v52 = vld [vmem:[%s17079_s13 + $0x1de4] sm:$0xf] }
 0x477   : > { %9720 = vmatpush.bf16.msra.mxu2 %v13809_v20  ;;  %v9457_v20 = vpop.f32.mrf.mxu1  ;;  %v14137_v29 = vor.u32 %v16125_v9, %v14134_v34  ;;  %v20212_v57 = vld [vmem:[#allocation47_spill] sm:$0xff] }
 0x478   : > { %9733 = vmatpush.bf16.msra.mxu3 %v13873_v21  ;;  %v19623_v7 = vadd.f32 %v9481_v44, %v9469_v11  ;;  %v13638_v21 = vld [vmem:[%s17079_s13 + $0x1a18] sm:$0xf0]  ;;  %v16073_v44 = vld [vmem:[%s17079_s13 + $0x1c54] sm:$0xf] }
 0x479   : > { %9695 = vmatpush.bf16.msra.mxu0 %v13673_v18  ;;  %v13641_v32 = vor.u32 %v16001_v38, %v13638_v21  ;;  %v15999_v18 = vld [vmem:[%s17079_s13 + $0x1a04] sm:$0xf]  ;;  %v13990_v20 = vld [vmem:[%s17079_s13 + $0x1cd8] sm:$0xf0]  ;;  %v13929_v62 = vor.u32 %v16073_v44, %v13926_v53 }
 0x47a   : > { %9708 = vmatpush.bf16.msra.mxu1 %v13737_v27  ;;  %v13630_v27 = vld [vmem:[%s17079_s13 + $0x1a08] sm:$0xf0]  ;;  %v20213_v38 = vld [vmem:[#allocation48_spill] sm:$0xff]  ;;  %v20214_v21 = vld [vmem:[#allocation49_spill] sm:$0xff]  ;;  %v13993_v59 = vor.u32 %v16089_v17, %v13990_v20 }
 0x47b   : > { %9721 = vmatpush.bf16.msra.mxu2 %v13801_v30  ;;  %v13705_v30 = vor.u32 %v16017_v55, %v13702_v26  ;;  %v16121_v55 = vld [vmem:[%s17079_s13 + $0x1dd4] sm:$0xf]  ;;  %v20215_v26 = vld [vmem:[#allocation50_spill] sm:$0xff] }
 0x47c   : > { %9734 = vmatpush.bf16.msra.mxu3 %v13865_v45  ;;  %v16031_v45 = vld [vmem:[%s17079_s13 + $0x1b04] sm:$0xf]  ;;  %v16081_v20 = vld [vmem:[%s17079_s13 + $0x1c94] sm:$0xf] }
 0x47d   : > { %9696 = vmatpush.bf16.msra.mxu0 %v13665_v54  ;;  %v9470_v42 = vpop.f32.mrf.mxu2  ;;  %v16093_v54 = vld [vmem:[%s17079_s13 + $0x1cf4] sm:$0xf] }
 0x47e   : > { %9709 = vmatpush.bf16.msra.mxu1 %v13729_v46  ;;  %v9483_v58 = vpop.f32.mrf.mxu3  ;;  %v13633_v46 = vor.u32 %v15999_v18, %v13630_v27  ;;  %v16087_v18 = vld [vmem:[%s17079_s13 + $0x1cc4] sm:$0xf] }
 0x47f   : > { %9722 = vmatpush.bf16.msra.mxu2 %v13793_v47  ;;  %v14006_v47 = vld [vmem:[%s17079_s13 + $0x1cf8] sm:$0xf0]  ;;  %v16085_v58 = vld [vmem:[%s17079_s13 + $0x1cb4] sm:$0xf] }
 0x480   : > { %9735 = vmatpush.bf16.msra.mxu3 %v13857_v6  ;;  %v13761_v6 = vor.u32 %v16031_v45, %v13758_v19  ;;  %v14009_v23 = vor.u32 %v16093_v54, %v14006_v47  ;;  %v16119_v45 = vld [vmem:[%s17079_s13 + $0x1dc4] sm:$0xf]  ;;  %v13910_v54 = vld [vmem:[%s17079_s13 + $0x1c38] sm:$0xf0]  ;;  %v13977_v34 = vor.u32 %v16085_v58, %v13974_v8 }
 0x481   : > { %9697 = vmatpush.bf16.msra.mxu0 %v13657_v49  ;;  %v16075_v49 = vld [vmem:[%s17079_s13 + $0x1c64] sm:$0xf]  ;;  %v13913_v9 = vor.u32 %v16069_v39, %v13910_v54  ;;  %v16173_v39 = vld [vmem:[%s17079_s13 + $0x1f74] sm:$0xf]  ;;  %v14326_v54 = vld [vmem:[%s17079_s13 + $0x1f78] sm:$0xf0] }
 0x482   : > { %9710 = vmatpush.bf16.msra.mxu1 %v13721_v3  ;;  %v13934_v3 = vld [vmem:[%s17079_s13 + $0x1c68] sm:$0xf0]  ;;  %v14390_v8 = vld [vmem:[%s17079_s13 + $0x1ff8] sm:$0xf0] }
 0x483   : > { %9723 = vmatpush.bf16.msra.mxu2 %v13785_v13  ;;  %v16091_v13 = vld [vmem:[%s17079_s13 + $0x1ce4] sm:$0xf]  ;;  %v13937_v36 = vor.u32 %v16075_v49, %v13934_v3 }
 0x484   : > { %9736 = vmatpush.bf16.msra.mxu3 %v13849_v14  ;;  %v14062_v14 = vld [vmem:[%s17079_s13 + $0x1d68] sm:$0xf0]  ;;  %v14001_v10 = vor.u32 %v16091_v13, %v13998_v28 }
 0x485   : > { %9698 = vmatpush.bf16.msra.mxu0 %v13649_v16  ;;  %v14065_v11 = vor.u32 %v16107_v33, %v14062_v14  ;;  %v14129_v16 = vor.u32 %v16123_v52, %v14126_v5  ;;  %v13966_v13 = vld [vmem:[%s17079_s13 + $0x1ca8] sm:$0xf0]  ;;  %v16115_v52 = vld [vmem:[%s17079_s13 + $0x1da4] sm:$0xf] }
 0x486   : > { %9711 = vmatpush.bf16.msra.mxu1 %v13713_v61  ;;  %v16105_v61 = vld [vmem:[%s17079_s13 + $0x1d54] sm:$0xf]  ;;  %v14030_v28 = vld [vmem:[%s17079_s13 + $0x1d28] sm:$0xf0] }
 0x487   : > { %9724 = vmatpush.bf16.msra.mxu2 %v13777_v0  ;;  %v14054_v0 = vld [vmem:[%s17079_s13 + $0x1d58] sm:$0xf0]  ;;  %v14094_v5 = vld [vmem:[%s17079_s13 + $0x1da8] sm:$0xf0] }
 0x488   : > { %9737 = vmatpush.bf16.msra.mxu3 %v13841_v2  ;;  %v14118_v2 = vld [vmem:[%s17079_s13 + $0x1dd8] sm:$0xf0]  ;;  %v14057_v37 = vor.u32 %v16105_v61, %v14054_v0  ;;  %v14097_v61 = vor.u32 %v16115_v52, %v14094_v5  ;;  %v16153_v5 = vld [vmem:[%s17079_s13 + $0x1ed4] sm:$0xf] }
 0x489   : > { %9699 = vmatpush.bf16.msra.mxu0 %v13641_v32  ;;  %v13918_v32 = vld [vmem:[%s17079_s13 + $0x1c48] sm:$0xf0]  ;;  %v14121_v27 = vor.u32 %v16121_v55, %v14118_v2  ;;  %v13958_v0 = vld [vmem:[%s17079_s13 + $0x1c98] sm:$0xf0]  ;;  %v16113_v55 = vld [vmem:[%s17079_s13 + $0x1d94] sm:$0xf] }
 0x48a   : > { %9712 = vmatpush.bf16.msra.mxu1 %v13705_v30  ;;  %v13982_v30 = vld [vmem:[%s17079_s13 + $0x1cc8] sm:$0xf0]  ;;  %v13921_v41 = vor.u32 %v16071_v43, %v13918_v32  ;;  %v14086_v2 = vld [vmem:[%s17079_s13 + $0x1d98] sm:$0xf0]  ;;  %v16079_v32 = vld [vmem:[%s17079_s13 + $0x1c84] sm:$0xf] }
 0x48b   : > { %9725 = vmatpush.bf16.msra.mxu2 %v13769_v12  ;;  %v16103_v12 = vld [vmem:[%s17079_s13 + $0x1d44] sm:$0xf]  ;;  %v13985_v42 = vor.u32 %v16087_v18, %v13982_v30  ;;  %v13950_v18 = vld [vmem:[%s17079_s13 + $0x1c88] sm:$0xf0]  ;;  %v14089_v30 = vor.u32 %v16113_v55, %v14086_v2  ;;  %v14182_v52 = vld [vmem:[%s17079_s13 + $0x1e58] sm:$0xf0] }
 0x48c   : > { %9738 = vmatpush.bf16.msra.mxu3 %v13833_v22  ;;  %v14110_v22 = vld [vmem:[%s17079_s13 + $0x1dc8] sm:$0xf0]  ;;  %v14049_v40 = vor.u32 %v16103_v12, %v14046_v31  ;;  %v16111_v31 = vld [vmem:[%s17079_s13 + $0x1d84] sm:$0xf]  ;;  %v13953_v58 = vor.u32 %v16079_v32, %v13950_v18 }
 0x48d   : > { %9700 = vmatpush.bf16.msra.mxu0 %v13633_v46  ;;  %v9494_v4 = vpop.f32.mrf.mxu0  ;;  %v14113_v46 = vor.u32 %v16119_v45, %v14110_v22  ;;  %v14014_v12 = vld [vmem:[%s17079_s13 + $0x1d08] sm:$0xf0]  ;;  %v16141_v22 = vld [vmem:[%s17079_s13 + $0x1e74] sm:$0xf]  ;;  %v16135_v2 = vld [vmem:[%s17079_s13 + $0x1e44] sm:$0xf] }
 0x48e   : > { %9713 = vmatpush.bf16.msra.mxu1 %v13697_v50  ;;  %v9495_v19 = vadd.f32 %v9494_v4, %v19623_v7  ;;  %v9507_v35 = vpop.f32.mrf.mxu1  ;;  %v14038_v7 = vld [vmem:[%s17079_s13 + $0x1d38] sm:$0xf0]  ;;  %v16117_v50 = vld [vmem:[%s17079_s13 + $0x1db4] sm:$0xf]  ;;  %v14078_v4 = vld [vmem:[%s17079_s13 + $0x1d88] sm:$0xf0] }
 0x48f   : > { %9726 = vmatpush.bf16.msra.mxu2 %v13761_v6  ;;  %v14102_v6 = vld [vmem:[%s17079_s13 + $0x1db8] sm:$0xf0]  ;;  %v14302_v32 = vld [vmem:[%s17079_s13 + $0x1f48] sm:$0xf0] }
 0x490   : > { %9739 = vmatpush.bf16.msra.mxu3 %v13825_v60  ;;  %9701 = vmatmul.bf16.vlgmr.msra.gmra.mxu0 %v20212_v57  ;;  %v9508_v47 = vadd.f32 %v9507_v35, %v9495_v19  ;;  %v14041_v60 = vor.u32 %v16101_v51, %v14038_v7  ;;  %v14105_v49 = vor.u32 %v16117_v50, %v14102_v6  ;;  %v16065_v57 = vld [vmem:[%s17079_s13 + $0x1c14] sm:$0xf]  ;;  %v14198_v19 = vld [vmem:[%s17079_s13 + $0x1e78] sm:$0xf0] }
 0x491   : > { %9745 = vmatpush.bf16.msrb.mxu0 %v13945_v24  ;;  %9714 = vmatmul.bf16.vlgmr.msra.gmra.mxu1 %v20214_v21  ;;  %v16067_v24 = vld [vmem:[%s17079_s13 + $0x1c24] sm:$0xf]  ;;  %v14022_v21 = vld [vmem:[%s17079_s13 + $0x1d18] sm:$0xf0]  ;;  %v14081_v51 = vor.u32 %v16111_v31, %v14078_v4  ;;  %v14201_v7 = vor.u32 %v16141_v22, %v14198_v19  ;;  %v14329_v6 = vor.u32 %v16173_v39, %v14326_v54  ;;  %v16133_v19 = vld [vmem:[%s17079_s13 + $0x1e34] sm:$0xf] }
 0x492   : > { %9758 = vmatpush.bf16.msrb.mxu1 %v14009_v23  ;;  %9727 = vmatmul.bf16.vlgmr.msra.gmra.mxu2 %v20213_v38  ;;  %v13902_v23 = vld [vmem:[%s17079_s13 + $0x1c28] sm:$0xf0]  ;;  %v16097_v38 = vld [vmem:[%s17079_s13 + $0x1d14] sm:$0xf]  ;;  %v14230_v39 = vld [vmem:[%s17079_s13 + $0x1eb8] sm:$0xf0] }
 0x493   : > { %9771 = vmatpush.bf16.msrb.mxu2 %v14073_v63  ;;  %9740 = vmatmul.bf16.vlgmr.msra.gmra.mxu3 %v20215_v26  ;;  %v16083_v63 = vld [vmem:[%s17079_s13 + $0x1ca4] sm:$0xf]  ;;  %v14025_v43 = vor.u32 %v16097_v38, %v14022_v21  ;;  %v16165_v54 = vld [vmem:[%s17079_s13 + $0x1f34] sm:$0xf] }
 0x494   : > { %9784 = vmatpush.bf16.msrb.mxu3 %v14137_v29  ;;  %v16099_v29 = vld [vmem:[%s17079_s13 + $0x1d24] sm:$0xf]  ;;  %v13969_v53 = vor.u32 %v16083_v63, %v13966_v13  ;;  %v14382_v13 = vld [vmem:[%s17079_s13 + $0x1fe8] sm:$0xf0] }
 0x495   : > { %9746 = vmatpush.bf16.msrb.mxu0 %v13937_v36  ;;  %v9520_v3 = vpop.f32.mrf.mxu2  ;;  %v9496_v36 = vpop.f32.mrf.mxu0  ;;  %v14033_v17 = vor.u32 %v16099_v29, %v14030_v28  ;;  %v16171_v63 = vld [vmem:[%s17079_s13 + $0x1f64] sm:$0xf] }
 0x496   : > { %9759 = vmatpush.bf16.msrb.mxu1 %v14001_v10  ;;  %v9521_v33 = vadd.f32 %v9520_v3, %v9508_v47  ;;  %v9533_v14 = vpop.f32.mrf.mxu3  ;;  %v13905_v10 = vor.u32 %v16067_v24, %v13902_v23  ;;  %v16189_v47 = vld [vmem:[%s17079_s13 + $0x1ff4] sm:$0xf]  ;;  %v14254_v23 = vld [vmem:[%s17079_s13 + $0x1ee8] sm:$0xf0]  ;;  %v16187_v3 = vld [vmem:[%s17079_s13 + $0x1fe4] sm:$0xf] }
 0x497   : > { %9772 = vmatpush.bf16.msrb.mxu2 %v14065_v11  ;;  %v9509_v11 = vpop.f32.mrf.mxu1  ;;  %v14393_v24 = vor.u32 %v16189_v47, %v14390_v8  ;;  %v20216_v36 = vld [vmem:[#allocation51_spill] sm:$0xff] }
 0x498   : > { %9785 = vmatpush.bf16.msrb.mxu3 %v14129_v16  ;;  %v19694_v44 = vadd.f32 %v9533_v14, %v9521_v33  ;;  %v13894_v16 = vld [vmem:[%s17079_s13 + $0x1c18] sm:$0xf0]  ;;  %v16137_v14 = vld [vmem:[%s17079_s13 + $0x1e54] sm:$0xf] }
 0x499   : > { %9747 = vmatpush.bf16.msrb.mxu0 %v13929_v62  ;;  %v13897_v26 = vor.u32 %v16065_v57, %v13894_v16  ;;  %v16063_v62 = vld [vmem:[%s17079_s13 + $0x1c04] sm:$0xf]  ;;  %v14246_v11 = vld [vmem:[%s17079_s13 + $0x1ed8] sm:$0xf0]  ;;  %v14185_v38 = vor.u32 %v16137_v14, %v14182_v52 }
 0x49a   : > { %9760 = vmatpush.bf16.msrb.mxu1 %v13993_v59  ;;  %v13886_v59 = vld [vmem:[%s17079_s13 + $0x1c08] sm:$0xf0]  ;;  %v20217_v57 = vld [vmem:[#allocation52_spill] sm:$0xff]  ;;  %v20218_v16 = vld [vmem:[#allocation53_spill] sm:$0xff]  ;;  %v14249_v21 = vor.u32 %v16153_v5, %v14246_v11 }
 0x49b   : > { %9773 = vmatpush.bf16.msrb.mxu2 %v14057_v37  ;;  %v13961_v37 = vor.u32 %v16081_v20, %v13958_v0  ;;  %v16185_v20 = vld [vmem:[%s17079_s13 + $0x1fd4] sm:$0xf]  ;;  %v20219_v0 = vld [vmem:[#allocation54_spill] sm:$0xff] }
 0x49c   : > { %9786 = vmatpush.bf16.msrb.mxu3 %v14121_v27  ;;  %v16095_v27 = vld [vmem:[%s17079_s13 + $0x1d04] sm:$0xf]  ;;  %v16145_v11 = vld [vmem:[%s17079_s13 + $0x1e94] sm:$0xf] }
 0x49d   : > { %9748 = vmatpush.bf16.msrb.mxu0 %v13921_v41  ;;  %v9522_v45 = vpop.f32.mrf.mxu2  ;;  %v16157_v41 = vld [vmem:[%s17079_s13 + $0x1ef4] sm:$0xf] }
 0x49e   : > { %9761 = vmatpush.bf16.msrb.mxu1 %v13985_v42  ;;  %v9535_v35 = vpop.f32.mrf.mxu3  ;;  %v13889_v42 = vor.u32 %v16063_v62, %v13886_v59  ;;  %v16151_v62 = vld [vmem:[%s17079_s13 + $0x1ec4] sm:$0xf] }
 0x49f   : > { %9774 = vmatpush.bf16.msrb.mxu2 %v14049_v40  ;;  %v14262_v40 = vld [vmem:[%s17079_s13 + $0x1ef8] sm:$0xf0]  ;;  %v16149_v35 = vld [vmem:[%s17079_s13 + $0x1eb4] sm:$0xf] }
 0x4a0   : > { %9787 = vmatpush.bf16.msrb.mxu3 %v14113_v46  ;;  %v14017_v46 = vor.u32 %v16095_v27, %v14014_v12  ;;  %v14265_v50 = vor.u32 %v16157_v41, %v14262_v40  ;;  %v16183_v27 = vld [vmem:[%s17079_s13 + $0x1fc4] sm:$0xf]  ;;  %v14166_v41 = vld [vmem:[%s17079_s13 + $0x1e38] sm:$0xf0]  ;;  %v14233_v8 = vor.u32 %v16149_v35, %v14230_v39 }
 0x4a1   : > { %9749 = vmatpush.bf16.msrb.mxu0 %v13913_v9  ;;  %v16139_v9 = vld [vmem:[%s17079_s13 + $0x1e64] sm:$0xf]  ;;  %v14169_v47 = vor.u32 %v16133_v19, %v14166_v41  ;;  %v16237_v19 = vld [vmem:[%s17079_s13 + $0x2174] sm:$0xf]  ;;  %v14582_v41 = vld [vmem:[%s17079_s13 + $0x2178] sm:$0xf0] }
 0x4a2   : > { %9762 = vmatpush.bf16.msrb.mxu1 %v13977_v34  ;;  %v14190_v34 = vld [vmem:[%s17079_s13 + $0x1e68] sm:$0xf0]  ;;  %v14646_v39 = vld [vmem:[%s17079_s13 + $0x21f8] sm:$0xf0] }
 0x4a3   : > { %9775 = vmatpush.bf16.msrb.mxu2 %v14041_v60  ;;  %v16155_v60 = vld [vmem:[%s17079_s13 + $0x1ee4] sm:$0xf]  ;;  %v14193_v29 = vor.u32 %v16139_v9, %v14190_v34 }
 0x4a4   : > { %9788 = vmatpush.bf16.msrb.mxu3 %v14105_v49  ;;  %v14318_v49 = vld [vmem:[%s17079_s13 + $0x1f68] sm:$0xf0]  ;;  %v14257_v28 = vor.u32 %v16155_v60, %v14254_v23 }
 0x4a5   : > { %9750 = vmatpush.bf16.msrb.mxu0 %v13905_v10  ;;  %v14321_v33 = vor.u32 %v16171_v63, %v14318_v49  ;;  %v14385_v10 = vor.u32 %v16187_v3, %v14382_v13  ;;  %v14222_v60 = vld [vmem:[%s17079_s13 + $0x1ea8] sm:$0xf0]  ;;  %v16179_v3 = vld [vmem:[%s17079_s13 + $0x1fa4] sm:$0xf] }
 0x4a6   : > { %9763 = vmatpush.bf16.msrb.mxu1 %v13969_v53  ;;  %v16169_v53 = vld [vmem:[%s17079_s13 + $0x1f54] sm:$0xf]  ;;  %v14286_v23 = vld [vmem:[%s17079_s13 + $0x1f28] sm:$0xf0] }
 0x4a7   : > { %9776 = vmatpush.bf16.msrb.mxu2 %v14033_v17  ;;  %v14310_v17 = vld [vmem:[%s17079_s13 + $0x1f58] sm:$0xf0]  ;;  %v14350_v13 = vld [vmem:[%s17079_s13 + $0x1fa8] sm:$0xf0] }
 0x4a8   : > { %9789 = vmatpush.bf16.msrb.mxu3 %v14097_v61  ;;  %v14374_v61 = vld [vmem:[%s17079_s13 + $0x1fd8] sm:$0xf0]  ;;  %v14313_v55 = vor.u32 %v16169_v53, %v14310_v17  ;;  %v14353_v53 = vor.u32 %v16179_v3, %v14350_v13  ;;  %v16217_v13 = vld [vmem:[%s17079_s13 + $0x20d4] sm:$0xf] }
 0x4a9   : > { %9751 = vmatpush.bf16.msrb.mxu0 %v13897_v26  ;;  %v14174_v26 = vld [vmem:[%s17079_s13 + $0x1e48] sm:$0xf0]  ;;  %v14377_v59 = vor.u32 %v16185_v20, %v14374_v61  ;;  %v14214_v17 = vld [vmem:[%s17079_s13 + $0x1e98] sm:$0xf0]  ;;  %v16177_v20 = vld [vmem:[%s17079_s13 + $0x1f94] sm:$0xf] }
 0x4aa   : > { %9764 = vmatpush.bf16.msrb.mxu1 %v13961_v37  ;;  %v14238_v37 = vld [vmem:[%s17079_s13 + $0x1ec8] sm:$0xf0]  ;;  %v14177_v31 = vor.u32 %v16135_v2, %v14174_v26  ;;  %v14342_v61 = vld [vmem:[%s17079_s13 + $0x1f98] sm:$0xf0]  ;;  %v16143_v26 = vld [vmem:[%s17079_s13 + $0x1e84] sm:$0xf] }
 0x4ab   : > { %9777 = vmatpush.bf16.msrb.mxu2 %v14025_v43  ;;  %v16167_v43 = vld [vmem:[%s17079_s13 + $0x1f44] sm:$0xf]  ;;  %v14241_v45 = vor.u32 %v16151_v62, %v14238_v37  ;;  %v14206_v62 = vld [vmem:[%s17079_s13 + $0x1e88] sm:$0xf0]  ;;  %v14345_v37 = vor.u32 %v16177_v20, %v14342_v61  ;;  %v14438_v3 = vld [vmem:[%s17079_s13 + $0x2058] sm:$0xf0] }
 0x4ac   : > { %9790 = vmatpush.bf16.msrb.mxu3 %v14089_v30  ;;  %v14366_v30 = vld [vmem:[%s17079_s13 + $0x1fc8] sm:$0xf0]  ;;  %v14305_v22 = vor.u32 %v16167_v43, %v14302_v32  ;;  %v16175_v32 = vld [vmem:[%s17079_s13 + $0x1f84] sm:$0xf]  ;;  %v14209_v35 = vor.u32 %v16143_v26, %v14206_v62 }
 0x4ad   : > { %9752 = vmatpush.bf16.msrb.mxu0 %v13889_v42  ;;  %v9546_v18 = vpop.f32.mrf.mxu0  ;;  %v14369_v42 = vor.u32 %v16183_v27, %v14366_v30  ;;  %v14270_v43 = vld [vmem:[%s17079_s13 + $0x1f08] sm:$0xf0]  ;;  %v16205_v30 = vld [vmem:[%s17079_s13 + $0x2074] sm:$0xf]  ;;  %v16199_v61 = vld [vmem:[%s17079_s13 + $0x2044] sm:$0xf] }
 0x4ae   : > { %9765 = vmatpush.bf16.msrb.mxu1 %v13953_v58  ;;  %v9547_v12 = vadd.f32 %v9546_v18, %v19694_v44  ;;  %v9559_v4 = vpop.f32.mrf.mxu1  ;;  %v14294_v44 = vld [vmem:[%s17079_s13 + $0x1f38] sm:$0xf0]  ;;  %v16181_v58 = vld [vmem:[%s17079_s13 + $0x1fb4] sm:$0xf]  ;;  %v14334_v18 = vld [vmem:[%s17079_s13 + $0x1f88] sm:$0xf0] }
 0x4af   : > { %9778 = vmatpush.bf16.msrb.mxu2 %v14017_v46  ;;  %v14358_v46 = vld [vmem:[%s17079_s13 + $0x1fb8] sm:$0xf0]  ;;  %v14558_v26 = vld [vmem:[%s17079_s13 + $0x2148] sm:$0xf0] }
 0x4b0   : > { %9791 = vmatpush.bf16.msrb.mxu3 %v14081_v51  ;;  %9753 = vmatmul.bf16.vlgmr.msrb.gmra.mxu0 %v20216_v36  ;;  %v9560_v40 = vadd.f32 %v9559_v4, %v9547_v12  ;;  %v14297_v51 = vor.u32 %v16165_v54, %v14294_v44  ;;  %v14361_v9 = vor.u32 %v16181_v58, %v14358_v46  ;;  %v16129_v36 = vld [vmem:[%s17079_s13 + $0x1e14] sm:$0xf]  ;;  %v14454_v12 = vld [vmem:[%s17079_s13 + $0x2078] sm:$0xf0] }
 0x4b1   : > { %9797 = vmatpush.bf16.msra.mxu0 %v14201_v7  ;;  %9766 = vmatmul.bf16.vlgmr.msrb.gmra.mxu1 %v20218_v16  ;;  %v16131_v7 = vld [vmem:[%s17079_s13 + $0x1e24] sm:$0xf]  ;;  %v14278_v16 = vld [vmem:[%s17079_s13 + $0x1f18] sm:$0xf0]  ;;  %v14337_v54 = vor.u32 %v16175_v32, %v14334_v18  ;;  %v14457_v44 = vor.u32 %v16205_v30, %v14454_v12  ;;  %v14585_v46 = vor.u32 %v16237_v19, %v14582_v41  ;;  %v16197_v12 = vld [vmem:[%s17079_s13 + $0x2034] sm:$0xf] }
 0x4b2   : > { %9810 = vmatpush.bf16.msra.mxu1 %v14265_v50  ;;  %9779 = vmatmul.bf16.vlgmr.msrb.gmra.mxu2 %v20217_v57  ;;  %v14158_v50 = vld [vmem:[%s17079_s13 + $0x1e28] sm:$0xf0]  ;;  %v16161_v57 = vld [vmem:[%s17079_s13 + $0x1f14] sm:$0xf]  ;;  %v14486_v19 = vld [vmem:[%s17079_s13 + $0x20b8] sm:$0xf0] }
 0x4b3   : > { %9823 = vmatpush.bf16.msra.mxu2 %v14329_v6  ;;  %9792 = vmatmul.bf16.vlgmr.msrb.gmra.mxu3 %v20219_v0  ;;  %v16147_v6 = vld [vmem:[%s17079_s13 + $0x1ea4] sm:$0xf]  ;;  %v14281_v2 = vor.u32 %v16161_v57, %v14278_v16  ;;  %v16229_v41 = vld [vmem:[%s17079_s13 + $0x2134] sm:$0xf] }
 0x4b4   : > { %9836 = vmatpush.bf16.msra.mxu3 %v14393_v24  ;;  %v16163_v24 = vld [vmem:[%s17079_s13 + $0x1f24] sm:$0xf]  ;;  %v14225_v52 = vor.u32 %v16147_v6, %v14222_v60  ;;  %v14638_v60 = vld [vmem:[%s17079_s13 + $0x21e8] sm:$0xf0] }
 0x4b5   : > { %9798 = vmatpush.bf16.msra.mxu0 %v14193_v29  ;;  %v9572_v34 = vpop.f32.mrf.mxu2  ;;  %v9548_v29 = vpop.f32.mrf.mxu0  ;;  %v14289_v5 = vor.u32 %v16163_v24, %v14286_v23  ;;  %v16235_v6 = vld [vmem:[%s17079_s13 + $0x2164] sm:$0xf] }
 0x4b6   : > { %9811 = vmatpush.bf16.msra.mxu1 %v14257_v28  ;;  %v9573_v63 = vadd.f32 %v9572_v34, %v9560_v40  ;;  %v9585_v49 = vpop.f32.mrf.mxu3  ;;  %v14161_v28 = vor.u32 %v16131_v7, %v14158_v50  ;;  %v16253_v40 = vld [vmem:[%s17079_s13 + $0x21f4] sm:$0xf]  ;;  %v14510_v50 = vld [vmem:[%s17079_s13 + $0x20e8] sm:$0xf0]  ;;  %v16251_v34 = vld [vmem:[%s17079_s13 + $0x21e4] sm:$0xf] }
 0x4b7   : > { %9824 = vmatpush.bf16.msra.mxu2 %v14321_v33  ;;  %v9561_v33 = vpop.f32.mrf.mxu1  ;;  %v14649_v7 = vor.u32 %v16253_v40, %v14646_v39  ;;  %v20220_v29 = vld [vmem:[#allocation55_spill] sm:$0xff] }
 0x4b8   : > { %9837 = vmatpush.bf16.msra.mxu3 %v14385_v10  ;;  %v19765_v14 = vadd.f32 %v9585_v49, %v9573_v63  ;;  %v14150_v10 = vld [vmem:[%s17079_s13 + $0x1e18] sm:$0xf0]  ;;  %v16201_v49 = vld [vmem:[%s17079_s13 + $0x2054] sm:$0xf] }
 0x4b9   : > { %9799 = vmatpush.bf16.msra.mxu0 %v14185_v38  ;;  %v14153_v0 = vor.u32 %v16129_v36, %v14150_v10  ;;  %v16127_v38 = vld [vmem:[%s17079_s13 + $0x1e04] sm:$0xf]  ;;  %v14502_v33 = vld [vmem:[%s17079_s13 + $0x20d8] sm:$0xf0]  ;;  %v14441_v57 = vor.u32 %v16201_v49, %v14438_v3 }
 0x4ba   : > { %9812 = vmatpush.bf16.msra.mxu1 %v14249_v21  ;;  %v14142_v21 = vld [vmem:[%s17079_s13 + $0x1e08] sm:$0xf0]  ;;  %v20221_v36 = vld [vmem:[#allocation56_spill] sm:$0xff]  ;;  %v20222_v10 = vld [vmem:[#allocation57_spill] sm:$0xff]  ;;  %v14505_v16 = vor.u32 %v16217_v13, %v14502_v33 }
 0x4bb   : > { %9825 = vmatpush.bf16.msra.mxu2 %v14313_v55  ;;  %v14217_v55 = vor.u32 %v16145_v11, %v14214_v17  ;;  %v16249_v11 = vld [vmem:[%s17079_s13 + $0x21d4] sm:$0xf]  ;;  %v20223_v17 = vld [vmem:[#allocation58_spill] sm:$0xff] }
 0x4bc   : > { %9838 = vmatpush.bf16.msra.mxu3 %v14377_v59  ;;  %v16159_v59 = vld [vmem:[%s17079_s13 + $0x1f04] sm:$0xf]  ;;  %v16209_v33 = vld [vmem:[%s17079_s13 + $0x2094] sm:$0xf] }
 0x4bd   : > { %9800 = vmatpush.bf16.msra.mxu0 %v14177_v31  ;;  %v9574_v27 = vpop.f32.mrf.mxu2  ;;  %v16221_v31 = vld [vmem:[%s17079_s13 + $0x20f4] sm:$0xf] }
 0x4be   : > { %9813 = vmatpush.bf16.msra.mxu1 %v14241_v45  ;;  %v9587_v4 = vpop.f32.mrf.mxu3  ;;  %v14145_v45 = vor.u32 %v16127_v38, %v14142_v21  ;;  %v16215_v38 = vld [vmem:[%s17079_s13 + $0x20c4] sm:$0xf] }
 0x4bf   : > { %9826 = vmatpush.bf16.msra.mxu2 %v14305_v22  ;;  %v14518_v22 = vld [vmem:[%s17079_s13 + $0x20f8] sm:$0xf0]  ;;  %v16213_v4 = vld [vmem:[%s17079_s13 + $0x20b4] sm:$0xf] }
 0x4c0   : > { %9839 = vmatpush.bf16.msra.mxu3 %v14369_v42  ;;  %v14273_v42 = vor.u32 %v16159_v59, %v14270_v43  ;;  %v14521_v58 = vor.u32 %v16221_v31, %v14518_v22  ;;  %v16247_v59 = vld [vmem:[%s17079_s13 + $0x21c4] sm:$0xf]  ;;  %v14422_v31 = vld [vmem:[%s17079_s13 + $0x2038] sm:$0xf0]  ;;  %v14489_v39 = vor.u32 %v16213_v4, %v14486_v19 }
 0x4c1   : > { %9801 = vmatpush.bf16.msra.mxu0 %v14169_v47  ;;  %v16203_v47 = vld [vmem:[%s17079_s13 + $0x2064] sm:$0xf]  ;;  %v14425_v40 = vor.u32 %v16197_v12, %v14422_v31  ;;  %v16301_v12 = vld [vmem:[%s17079_s13 + $0x2374] sm:$0xf]  ;;  %v14838_v31 = vld [vmem:[%s17079_s13 + $0x2378] sm:$0xf0] }
 0x4c2   : > { %9814 = vmatpush.bf16.msra.mxu1 %v14233_v8  ;;  %v14446_v8 = vld [vmem:[%s17079_s13 + $0x2068] sm:$0xf0]  ;;  %v14902_v19 = vld [vmem:[%s17079_s13 + $0x23f8] sm:$0xf0] }
 0x4c3   : > { %9827 = vmatpush.bf16.msra.mxu2 %v14297_v51  ;;  %v16219_v51 = vld [vmem:[%s17079_s13 + $0x20e4] sm:$0xf]  ;;  %v14449_v24 = vor.u32 %v16203_v47, %v14446_v8 }
 0x4c4   : > { %9840 = vmatpush.bf16.msra.mxu3 %v14361_v9  ;;  %v14574_v9 = vld [vmem:[%s17079_s13 + $0x2168] sm:$0xf0]  ;;  %v14513_v23 = vor.u32 %v16219_v51, %v14510_v50 }
 0x4c5   : > { %9802 = vmatpush.bf16.msra.mxu0 %v14161_v28  ;;  %v14577_v63 = vor.u32 %v16235_v6, %v14574_v9  ;;  %v14641_v28 = vor.u32 %v16251_v34, %v14638_v60  ;;  %v14478_v51 = vld [vmem:[%s17079_s13 + $0x20a8] sm:$0xf0]  ;;  %v16243_v34 = vld [vmem:[%s17079_s13 + $0x21a4] sm:$0xf] }
 0x4c6   : > { %9815 = vmatpush.bf16.msra.mxu1 %v14225_v52  ;;  %v16233_v52 = vld [vmem:[%s17079_s13 + $0x2154] sm:$0xf]  ;;  %v14542_v50 = vld [vmem:[%s17079_s13 + $0x2128] sm:$0xf0] }
 0x4c7   : > { %9828 = vmatpush.bf16.msra.mxu2 %v14289_v5  ;;  %v14566_v5 = vld [vmem:[%s17079_s13 + $0x2158] sm:$0xf0]  ;;  %v14606_v60 = vld [vmem:[%s17079_s13 + $0x21a8] sm:$0xf0] }
 0x4c8   : > { %9841 = vmatpush.bf16.msra.mxu3 %v14353_v53  ;;  %v14630_v53 = vld [vmem:[%s17079_s13 + $0x21d8] sm:$0xf0]  ;;  %v14569_v20 = vor.u32 %v16233_v52, %v14566_v5  ;;  %v14609_v52 = vor.u32 %v16243_v34, %v14606_v60  ;;  %v16281_v60 = vld [vmem:[%s17079_s13 + $0x22d4] sm:$0xf] }
 0x4c9   : > { %9803 = vmatpush.bf16.msra.mxu0 %v14153_v0  ;;  %v14430_v0 = vld [vmem:[%s17079_s13 + $0x2048] sm:$0xf0]  ;;  %v14633_v21 = vor.u32 %v16249_v11, %v14630_v53  ;;  %v14470_v5 = vld [vmem:[%s17079_s13 + $0x2098] sm:$0xf0]  ;;  %v16241_v11 = vld [vmem:[%s17079_s13 + $0x2194] sm:$0xf] }
 0x4ca   : > { %9816 = vmatpush.bf16.msra.mxu1 %v14217_v55  ;;  %v14494_v55 = vld [vmem:[%s17079_s13 + $0x20c8] sm:$0xf0]  ;;  %v14433_v32 = vor.u32 %v16199_v61, %v14430_v0  ;;  %v14598_v53 = vld [vmem:[%s17079_s13 + $0x2198] sm:$0xf0]  ;;  %v16207_v0 = vld [vmem:[%s17079_s13 + $0x2084] sm:$0xf] }
 0x4cb   : > { %9829 = vmatpush.bf16.msra.mxu2 %v14281_v2  ;;  %v16231_v2 = vld [vmem:[%s17079_s13 + $0x2144] sm:$0xf]  ;;  %v14497_v27 = vor.u32 %v16215_v38, %v14494_v55  ;;  %v14462_v38 = vld [vmem:[%s17079_s13 + $0x2088] sm:$0xf0]  ;;  %v14601_v55 = vor.u32 %v16241_v11, %v14598_v53  ;;  %v14694_v34 = vld [vmem:[%s17079_s13 + $0x2258] sm:$0xf0] }
 0x4cc   : > { %9842 = vmatpush.bf16.msra.mxu3 %v14345_v37  ;;  %v14622_v37 = vld [vmem:[%s17079_s13 + $0x21c8] sm:$0xf0]  ;;  %v14561_v30 = vor.u32 %v16231_v2, %v14558_v26  ;;  %v16239_v26 = vld [vmem:[%s17079_s13 + $0x2184] sm:$0xf]  ;;  %v14465_v4 = vor.u32 %v16207_v0, %v14462_v38 }
 0x4cd   : > { %9804 = vmatpush.bf16.msra.mxu0 %v14145_v45  ;;  %v9598_v62 = vpop.f32.mrf.mxu0  ;;  %v14625_v45 = vor.u32 %v16247_v59, %v14622_v37  ;;  %v14526_v2 = vld [vmem:[%s17079_s13 + $0x2108] sm:$0xf0]  ;;  %v16269_v37 = vld [vmem:[%s17079_s13 + $0x2274] sm:$0xf]  ;;  %v16263_v53 = vld [vmem:[%s17079_s13 + $0x2244] sm:$0xf] }
 0x4ce   : > { %9817 = vmatpush.bf16.msra.mxu1 %v14209_v35  ;;  %v9599_v43 = vadd.f32 %v9598_v62, %v19765_v14  ;;  %v9611_v18 = vpop.f32.mrf.mxu1  ;;  %v14550_v14 = vld [vmem:[%s17079_s13 + $0x2138] sm:$0xf0]  ;;  %v16245_v35 = vld [vmem:[%s17079_s13 + $0x21b4] sm:$0xf]  ;;  %v14590_v62 = vld [vmem:[%s17079_s13 + $0x2188] sm:$0xf0] }
 0x4cf   : > { %9830 = vmatpush.bf16.msra.mxu2 %v14273_v42  ;;  %v14614_v42 = vld [vmem:[%s17079_s13 + $0x21b8] sm:$0xf0]  ;;  %v14814_v0 = vld [vmem:[%s17079_s13 + $0x2348] sm:$0xf0] }
 0x4d0   : > { %9843 = vmatpush.bf16.msra.mxu3 %v14337_v54  ;;  %9805 = vmatmul.bf16.vlgmr.msra.gmra.mxu0 %v20220_v29  ;;  %v9612_v22 = vadd.f32 %v9611_v18, %v9599_v43  ;;  %v14553_v54 = vor.u32 %v16229_v41, %v14550_v14  ;;  %v14617_v47 = vor.u32 %v16245_v35, %v14614_v42  ;;  %v16193_v29 = vld [vmem:[%s17079_s13 + $0x2014] sm:$0xf]  ;;  %v14710_v43 = vld [vmem:[%s17079_s13 + $0x2278] sm:$0xf0] }
 0x4d1   : > { %9849 = vmatpush.bf16.msrb.mxu0 %v14457_v44  ;;  %9818 = vmatmul.bf16.vlgmr.msra.gmra.mxu1 %v20222_v10  ;;  %v16195_v44 = vld [vmem:[%s17079_s13 + $0x2024] sm:$0xf]  ;;  %v14534_v10 = vld [vmem:[%s17079_s13 + $0x2118] sm:$0xf0]  ;;  %v14593_v41 = vor.u32 %v16239_v26, %v14590_v62  ;;  %v14713_v14 = vor.u32 %v16269_v37, %v14710_v43  ;;  %v14841_v42 = vor.u32 %v16301_v12, %v14838_v31  ;;  %v16261_v43 = vld [vmem:[%s17079_s13 + $0x2234] sm:$0xf] }
 0x4d2   : > { %9862 = vmatpush.bf16.msrb.mxu1 %v14521_v58  ;;  %9831 = vmatmul.bf16.vlgmr.msra.gmra.mxu2 %v20221_v36  ;;  %v14414_v58 = vld [vmem:[%s17079_s13 + $0x2028] sm:$0xf0]  ;;  %v16225_v36 = vld [vmem:[%s17079_s13 + $0x2114] sm:$0xf]  ;;  %v14742_v12 = vld [vmem:[%s17079_s13 + $0x22b8] sm:$0xf0] }
 0x4d3   : > { %9875 = vmatpush.bf16.msrb.mxu2 %v14585_v46  ;;  %9844 = vmatmul.bf16.vlgmr.msra.gmra.mxu3 %v20223_v17  ;;  %v16211_v46 = vld [vmem:[%s17079_s13 + $0x20a4] sm:$0xf]  ;;  %v14537_v61 = vor.u32 %v16225_v36, %v14534_v10  ;;  %v16293_v31 = vld [vmem:[%s17079_s13 + $0x2334] sm:$0xf] }
 0x4d4   : > { %9888 = vmatpush.bf16.msrb.mxu3 %v14649_v7  ;;  %v16227_v7 = vld [vmem:[%s17079_s13 + $0x2124] sm:$0xf]  ;;  %v14481_v3 = vor.u32 %v16211_v46, %v14478_v51  ;;  %v14894_v51 = vld [vmem:[%s17079_s13 + $0x23e8] sm:$0xf0] }
 0x4d5   : > { %9850 = vmatpush.bf16.msrb.mxu0 %v14449_v24  ;;  %v9624_v8 = vpop.f32.mrf.mxu2  ;;  %v9600_v24 = vpop.f32.mrf.mxu0  ;;  %v14545_v13 = vor.u32 %v16227_v7, %v14542_v50  ;;  %v16299_v46 = vld [vmem:[%s17079_s13 + $0x2364] sm:$0xf] }
 0x4d6   : > { %9863 = vmatpush.bf16.msrb.mxu1 %v14513_v23  ;;  %v9625_v6 = vadd.f32 %v9624_v8, %v9612_v22  ;;  %v9637_v9 = vpop.f32.mrf.mxu3  ;;  %v14417_v23 = vor.u32 %v16195_v44, %v14414_v58  ;;  %v16317_v22 = vld [vmem:[%s17079_s13 + $0x23f4] sm:$0xf]  ;;  %v14766_v58 = vld [vmem:[%s17079_s13 + $0x22e8] sm:$0xf0]  ;;  %v16315_v8 = vld [vmem:[%s17079_s13 + $0x23e4] sm:$0xf] }
 0x4d7   : > { %9876 = vmatpush.bf16.msrb.mxu2 %v14577_v63  ;;  %v9613_v63 = vpop.f32.mrf.mxu1  ;;  %v14905_v44 = vor.u32 %v16317_v22, %v14902_v19  ;;  %v20224_v24 = vld [vmem:[#allocation59_spill] sm:$0xff] }
 0x4d8   : > { %9889 = vmatpush.bf16.msrb.mxu3 %v14641_v28  ;;  %v19836_v49 = vadd.f32 %v9637_v9, %v9625_v6  ;;  %v14406_v28 = vld [vmem:[%s17079_s13 + $0x2018] sm:$0xf0]  ;;  %v16265_v9 = vld [vmem:[%s17079_s13 + $0x2254] sm:$0xf] }
 0x4d9   : > { %9851 = vmatpush.bf16.msrb.mxu0 %v14441_v57  ;;  %v14409_v17 = vor.u32 %v16193_v29, %v14406_v28  ;;  %v16191_v57 = vld [vmem:[%s17079_s13 + $0x2004] sm:$0xf]  ;;  %v14758_v63 = vld [vmem:[%s17079_s13 + $0x22d8] sm:$0xf0]  ;;  %v14697_v36 = vor.u32 %v16265_v9, %v14694_v34 }
 0x4da   : > { %9864 = vmatpush.bf16.msrb.mxu1 %v14505_v16  ;;  %v14398_v16 = vld [vmem:[%s17079_s13 + $0x2008] sm:$0xf0]  ;;  %v20225_v29 = vld [vmem:[#allocation60_spill] sm:$0xff]  ;;  %v20226_v28 = vld [vmem:[#allocation61_spill] sm:$0xff]  ;;  %v14761_v10 = vor.u32 %v16281_v60, %v14758_v63 }
 0x4db   : > { %9877 = vmatpush.bf16.msrb.mxu2 %v14569_v20  ;;  %v14473_v20 = vor.u32 %v16209_v33, %v14470_v5  ;;  %v16313_v33 = vld [vmem:[%s17079_s13 + $0x23d4] sm:$0xf]  ;;  %v20227_v5 = vld [vmem:[#allocation62_spill] sm:$0xff] }
 0x4dc   : > { %9890 = vmatpush.bf16.msrb.mxu3 %v14633_v21  ;;  %v16223_v21 = vld [vmem:[%s17079_s13 + $0x2104] sm:$0xf]  ;;  %v16273_v63 = vld [vmem:[%s17079_s13 + $0x2294] sm:$0xf] }
 0x4dd   : > { %9852 = vmatpush.bf16.msrb.mxu0 %v14433_v32  ;;  %v9626_v59 = vpop.f32.mrf.mxu2  ;;  %v16285_v32 = vld [vmem:[%s17079_s13 + $0x22f4] sm:$0xf] }
 0x4de   : > { %9865 = vmatpush.bf16.msrb.mxu1 %v14497_v27  ;;  %v9639_v18 = vpop.f32.mrf.mxu3  ;;  %v14401_v27 = vor.u32 %v16191_v57, %v14398_v16  ;;  %v16279_v57 = vld [vmem:[%s17079_s13 + $0x22c4] sm:$0xf] }
 0x4df   : > { %9878 = vmatpush.bf16.msrb.mxu2 %v14561_v30  ;;  %v14774_v30 = vld [vmem:[%s17079_s13 + $0x22f8] sm:$0xf0]  ;;  %v16277_v18 = vld [vmem:[%s17079_s13 + $0x22b4] sm:$0xf] }
 0x4e0   : > { %9891 = vmatpush.bf16.msrb.mxu3 %v14625_v45  ;;  %v14529_v45 = vor.u32 %v16223_v21, %v14526_v2  ;;  %v14777_v35 = vor.u32 %v16285_v32, %v14774_v30  ;;  %v16311_v21 = vld [vmem:[%s17079_s13 + $0x23c4] sm:$0xf]  ;;  %v14678_v32 = vld [vmem:[%s17079_s13 + $0x2238] sm:$0xf0]  ;;  %v14745_v19 = vor.u32 %v16277_v18, %v14742_v12 }
 0x4e1   : > { %9853 = vmatpush.bf16.msrb.mxu0 %v14425_v40  ;;  %v16267_v40 = vld [vmem:[%s17079_s13 + $0x2264] sm:$0xf]  ;;  %v14681_v22 = vor.u32 %v16261_v43, %v14678_v32  ;;  %v16365_v43 = vld [vmem:[%s17079_s13 + $0x2574] sm:$0xf]  ;;  %v15094_v32 = vld [vmem:[%s17079_s13 + $0x2578] sm:$0xf0] }
 0x4e2   : > { %9866 = vmatpush.bf16.msrb.mxu1 %v14489_v39  ;;  %v14702_v39 = vld [vmem:[%s17079_s13 + $0x2268] sm:$0xf0]  ;;  %v15158_v12 = vld [vmem:[%s17079_s13 + $0x25f8] sm:$0xf0] }
 0x4e3   : > { %9879 = vmatpush.bf16.msrb.mxu2 %v14553_v54  ;;  %v16283_v54 = vld [vmem:[%s17079_s13 + $0x22e4] sm:$0xf]  ;;  %v14705_v7 = vor.u32 %v16267_v40, %v14702_v39 }
 0x4e4   : > { %9892 = vmatpush.bf16.msrb.mxu3 %v14617_v47  ;;  %v14830_v47 = vld [vmem:[%s17079_s13 + $0x2368] sm:$0xf0]  ;;  %v14769_v50 = vor.u32 %v16283_v54, %v14766_v58 }
 0x4e5   : > { %9854 = vmatpush.bf16.msrb.mxu0 %v14417_v23  ;;  %v14833_v6 = vor.u32 %v16299_v46, %v14830_v47  ;;  %v14897_v23 = vor.u32 %v16315_v8, %v14894_v51  ;;  %v14734_v54 = vld [vmem:[%s17079_s13 + $0x22a8] sm:$0xf0]  ;;  %v16307_v8 = vld [vmem:[%s17079_s13 + $0x23a4] sm:$0xf] }
 0x4e6   : > { %9867 = vmatpush.bf16.msrb.mxu1 %v14481_v3  ;;  %v16297_v3 = vld [vmem:[%s17079_s13 + $0x2354] sm:$0xf]  ;;  %v14798_v58 = vld [vmem:[%s17079_s13 + $0x2328] sm:$0xf0] }
 0x4e7   : > { %9880 = vmatpush.bf16.msrb.mxu2 %v14545_v13  ;;  %v14822_v13 = vld [vmem:[%s17079_s13 + $0x2358] sm:$0xf0]  ;;  %v14862_v51 = vld [vmem:[%s17079_s13 + $0x23a8] sm:$0xf0] }
 0x4e8   : > { %9893 = vmatpush.bf16.msrb.mxu3 %v14609_v52  ;;  %v14886_v52 = vld [vmem:[%s17079_s13 + $0x23d8] sm:$0xf0]  ;;  %v14825_v11 = vor.u32 %v16297_v3, %v14822_v13  ;;  %v14865_v3 = vor.u32 %v16307_v8, %v14862_v51  ;;  %v16345_v51 = vld [vmem:[%s17079_s13 + $0x24d4] sm:$0xf] }
 0x4e9   : > { %9855 = vmatpush.bf16.msrb.mxu0 %v14409_v17  ;;  %v14686_v17 = vld [vmem:[%s17079_s13 + $0x2248] sm:$0xf0]  ;;  %v14889_v16 = vor.u32 %v16313_v33, %v14886_v52  ;;  %v14726_v13 = vld [vmem:[%s17079_s13 + $0x2298] sm:$0xf0]  ;;  %v16305_v33 = vld [vmem:[%s17079_s13 + $0x2394] sm:$0xf] }
 0x4ea   : > { %9868 = vmatpush.bf16.msrb.mxu1 %v14473_v20  ;;  %v14750_v20 = vld [vmem:[%s17079_s13 + $0x22c8] sm:$0xf0]  ;;  %v14689_v26 = vor.u32 %v16263_v53, %v14686_v17  ;;  %v14854_v52 = vld [vmem:[%s17079_s13 + $0x2398] sm:$0xf0]  ;;  %v16271_v17 = vld [vmem:[%s17079_s13 + $0x2284] sm:$0xf] }
 0x4eb   : > { %9881 = vmatpush.bf16.msrb.mxu2 %v14537_v61  ;;  %v16295_v61 = vld [vmem:[%s17079_s13 + $0x2344] sm:$0xf]  ;;  %v14753_v59 = vor.u32 %v16279_v57, %v14750_v20  ;;  %v14718_v57 = vld [vmem:[%s17079_s13 + $0x2288] sm:$0xf0]  ;;  %v14857_v20 = vor.u32 %v16305_v33, %v14854_v52  ;;  %v14950_v8 = vld [vmem:[%s17079_s13 + $0x2458] sm:$0xf0] }
 0x4ec   : > { %9894 = vmatpush.bf16.msrb.mxu3 %v14601_v55  ;;  %v14878_v55 = vld [vmem:[%s17079_s13 + $0x23c8] sm:$0xf0]  ;;  %v14817_v37 = vor.u32 %v16295_v61, %v14814_v0  ;;  %v16303_v0 = vld [vmem:[%s17079_s13 + $0x2384] sm:$0xf]  ;;  %v14721_v18 = vor.u32 %v16271_v17, %v14718_v57 }
 0x4ed   : > { %9856 = vmatpush.bf16.msrb.mxu0 %v14401_v27  ;;  %v9650_v38 = vpop.f32.mrf.mxu0  ;;  %v14881_v27 = vor.u32 %v16311_v21, %v14878_v55  ;;  %v14782_v61 = vld [vmem:[%s17079_s13 + $0x2308] sm:$0xf0]  ;;  %v16333_v55 = vld [vmem:[%s17079_s13 + $0x2474] sm:$0xf]  ;;  %v16327_v52 = vld [vmem:[%s17079_s13 + $0x2444] sm:$0xf] }
 0x4ee   : > { %9869 = vmatpush.bf16.msrb.mxu1 %v14465_v4  ;;  %v9651_v2 = vadd.f32 %v9650_v38, %v19836_v49  ;;  %v9663_v62 = vpop.f32.mrf.mxu1  ;;  %v14806_v49 = vld [vmem:[%s17079_s13 + $0x2338] sm:$0xf0]  ;;  %v16309_v4 = vld [vmem:[%s17079_s13 + $0x23b4] sm:$0xf]  ;;  %v14846_v38 = vld [vmem:[%s17079_s13 + $0x2388] sm:$0xf0] }
 0x4ef   : > { %9882 = vmatpush.bf16.msrb.mxu2 %v14529_v45  ;;  %v14870_v45 = vld [vmem:[%s17079_s13 + $0x23b8] sm:$0xf0]  ;;  %v15070_v17 = vld [vmem:[%s17079_s13 + $0x2548] sm:$0xf0] }
 0x4f0   : > { %9895 = vmatpush.bf16.msrb.mxu3 %v14593_v41  ;;  %9857 = vmatmul.bf16.vlgmr.msrb.gmra.mxu0 %v20224_v24  ;;  %v9664_v30 = vadd.f32 %v9663_v62, %v9651_v2  ;;  %v14809_v41 = vor.u32 %v16293_v31, %v14806_v49  ;;  %v14873_v40 = vor.u32 %v16309_v4, %v14870_v45  ;;  %v16257_v24 = vld [vmem:[%s17079_s13 + $0x2214] sm:$0xf]  ;;  %v14966_v2 = vld [vmem:[%s17079_s13 + $0x2478] sm:$0xf0] }
 0x4f1   : > { %9901 = vmatpush.bf16.msra.mxu0 %v14713_v14  ;;  %9870 = vmatmul.bf16.vlgmr.msrb.gmra.mxu1 %v20226_v28  ;;  %v16259_v14 = vld [vmem:[%s17079_s13 + $0x2224] sm:$0xf]  ;;  %v14790_v28 = vld [vmem:[%s17079_s13 + $0x2318] sm:$0xf0]  ;;  %v14849_v31 = vor.u32 %v16303_v0, %v14846_v38  ;;  %v14969_v49 = vor.u32 %v16333_v55, %v14966_v2  ;;  %v15097_v45 = vor.u32 %v16365_v43, %v15094_v32  ;;  %v16325_v2 = vld [vmem:[%s17079_s13 + $0x2434] sm:$0xf] }
 0x4f2   : > { %9914 = vmatpush.bf16.msra.mxu1 %v14777_v35  ;;  %9883 = vmatmul.bf16.vlgmr.msrb.gmra.mxu2 %v20225_v29  ;;  %v14670_v35 = vld [vmem:[%s17079_s13 + $0x2228] sm:$0xf0]  ;;  %v16289_v29 = vld [vmem:[%s17079_s13 + $0x2314] sm:$0xf]  ;;  %v14998_v43 = vld [vmem:[%s17079_s13 + $0x24b8] sm:$0xf0] }
 0x4f3   : > { %9927 = vmatpush.bf16.msra.mxu2 %v14841_v42  ;;  %9896 = vmatmul.bf16.vlgmr.msrb.gmra.mxu3 %v20227_v5  ;;  %v16275_v42 = vld [vmem:[%s17079_s13 + $0x22a4] sm:$0xf]  ;;  %v14793_v53 = vor.u32 %v16289_v29, %v14790_v28  ;;  %v16357_v32 = vld [vmem:[%s17079_s13 + $0x2534] sm:$0xf] }
 0x4f4   : > { %9940 = vmatpush.bf16.msra.mxu3 %v14905_v44  ;;  %v16291_v44 = vld [vmem:[%s17079_s13 + $0x2324] sm:$0xf]  ;;  %v14737_v34 = vor.u32 %v16275_v42, %v14734_v54  ;;  %v15150_v54 = vld [vmem:[%s17079_s13 + $0x25e8] sm:$0xf0] }
 0x4f5   : > { %9902 = vmatpush.bf16.msra.mxu0 %v14705_v7  ;;  %v9676_v39 = vpop.f32.mrf.mxu2  ;;  %v9652_v7 = vpop.f32.mrf.mxu0  ;;  %v14801_v60 = vor.u32 %v16291_v44, %v14798_v58  ;;  %v16363_v42 = vld [vmem:[%s17079_s13 + $0x2564] sm:$0xf] }
 0x4f6   : > { %9915 = vmatpush.bf16.msra.mxu1 %v14769_v50  ;;  %v9677_v46 = vadd.f32 %v9676_v39, %v9664_v30  ;;  %v9689_v47 = vpop.f32.mrf.mxu3  ;;  %v14673_v50 = vor.u32 %v16259_v14, %v14670_v35  ;;  %v16381_v30 = vld [vmem:[%s17079_s13 + $0x25f4] sm:$0xf]  ;;  %v15022_v35 = vld [vmem:[%s17079_s13 + $0x24e8] sm:$0xf0]  ;;  %v16379_v39 = vld [vmem:[%s17079_s13 + $0x25e4] sm:$0xf] }
 0x4f7   : > { %9928 = vmatpush.bf16.msra.mxu2 %v14833_v6  ;;  %v9665_v6 = vpop.f32.mrf.mxu1  ;;  %v15161_v14 = vor.u32 %v16381_v30, %v15158_v12  ;;  %v20228_v7 = vld [vmem:[#allocation63_spill] sm:$0xff] }
 0x4f8   : > { %9941 = vmatpush.bf16.msra.mxu3 %v14897_v23  ;;  %v19907_v9 = vadd.f32 %v9689_v47, %v9677_v46  ;;  %v14662_v23 = vld [vmem:[%s17079_s13 + $0x2218] sm:$0xf0]  ;;  %v16329_v47 = vld [vmem:[%s17079_s13 + $0x2454] sm:$0xf] }
 0x4f9   : > { %9903 = vmatpush.bf16.msra.mxu0 %v14697_v36  ;;  %v14665_v5 = vor.u32 %v16257_v24, %v14662_v23  ;;  %v16255_v36 = vld [vmem:[%s17079_s13 + $0x2204] sm:$0xf]  ;;  %v15014_v6 = vld [vmem:[%s17079_s13 + $0x24d8] sm:$0xf0]  ;;  %v14953_v29 = vor.u32 %v16329_v47, %v14950_v8 }
 0x4fa   : > { %9916 = vmatpush.bf16.msra.mxu1 %v14761_v10  ;;  %v14654_v10 = vld [vmem:[%s17079_s13 + $0x2208] sm:$0xf0]  ;;  %v20229_v24 = vld [vmem:[#allocation64_spill] sm:$0xff]  ;;  %v20230_v23 = vld [vmem:[#allocation65_spill] sm:$0xff]  ;;  %v15017_v28 = vor.u32 %v16345_v51, %v15014_v6 }
 0x4fb   : > { %9929 = vmatpush.bf16.msra.mxu2 %v14825_v11  ;;  %v14729_v11 = vor.u32 %v16273_v63, %v14726_v13  ;;  %v16377_v63 = vld [vmem:[%s17079_s13 + $0x25d4] sm:$0xf]  ;;  %v20231_v13 = vld [vmem:[#allocation66_spill] sm:$0xff] }
 0x4fc   : > { %9942 = vmatpush.bf16.msra.mxu3 %v14889_v16  ;;  %v16287_v16 = vld [vmem:[%s17079_s13 + $0x2304] sm:$0xf]  ;;  %v16337_v6 = vld [vmem:[%s17079_s13 + $0x2494] sm:$0xf] }
 0x4fd   : > { %9904 = vmatpush.bf16.msra.mxu0 %v14689_v26  ;;  %v9678_v21 = vpop.f32.mrf.mxu2  ;;  %v16349_v26 = vld [vmem:[%s17079_s13 + $0x24f4] sm:$0xf] }
 0x4fe   : > { %9917 = vmatpush.bf16.msra.mxu1 %v14753_v59  ;;  %v9691_v62 = vpop.f32.mrf.mxu3  ;;  %v14657_v59 = vor.u32 %v16255_v36, %v14654_v10  ;;  %v16343_v36 = vld [vmem:[%s17079_s13 + $0x24c4] sm:$0xf] }
 0x4ff   : > { %9930 = vmatpush.bf16.msra.mxu2 %v14817_v37  ;;  %v15030_v37 = vld [vmem:[%s17079_s13 + $0x24f8] sm:$0xf0]  ;;  %v16341_v62 = vld [vmem:[%s17079_s13 + $0x24b4] sm:$0xf] }
 0x500   : > { %9943 = vmatpush.bf16.msra.mxu3 %v14881_v27  ;;  %v14785_v27 = vor.u32 %v16287_v16, %v14782_v61  ;;  %v15033_v4 = vor.u32 %v16349_v26, %v15030_v37  ;;  %v16375_v16 = vld [vmem:[%s17079_s13 + $0x25c4] sm:$0xf]  ;;  %v14934_v26 = vld [vmem:[%s17079_s13 + $0x2438] sm:$0xf0]  ;;  %v15001_v12 = vor.u32 %v16341_v62, %v14998_v43 }
 0x501   : > { %9905 = vmatpush.bf16.msra.mxu0 %v14681_v22  ;;  %v16331_v22 = vld [vmem:[%s17079_s13 + $0x2464] sm:$0xf]  ;;  %v14937_v30 = vor.u32 %v16325_v2, %v14934_v26 }
 0x502   : > { %9918 = vmatpush.bf16.msra.mxu1 %v14745_v19  ;;  %v14958_v19 = vld [vmem:[%s17079_s13 + $0x2468] sm:$0xf0] }
 0x503   : > { %9931 = vmatpush.bf16.msra.mxu2 %v14809_v41  ;;  %v16347_v41 = vld [vmem:[%s17079_s13 + $0x24e4] sm:$0xf]  ;;  %v14961_v44 = vor.u32 %v16331_v22, %v14958_v19 }
 0x504   : > { %9944 = vmatpush.bf16.msra.mxu3 %v14873_v40  ;;  %v15086_v40 = vld [vmem:[%s17079_s13 + $0x2568] sm:$0xf0]  ;;  %v15025_v58 = vor.u32 %v16347_v41, %v15022_v35 }
 0x505   : > { %9906 = vmatpush.bf16.msra.mxu0 %v14673_v50  ;;  %v15089_v46 = vor.u32 %v16363_v42, %v15086_v40  ;;  %v15153_v50 = vor.u32 %v16379_v39, %v15150_v54  ;;  %v14990_v41 = vld [vmem:[%s17079_s13 + $0x24a8] sm:$0xf0]  ;;  %v16371_v39 = vld [vmem:[%s17079_s13 + $0x25a4] sm:$0xf] }
 0x506   : > { %9919 = vmatpush.bf16.msra.mxu1 %v14737_v34  ;;  %v16361_v34 = vld [vmem:[%s17079_s13 + $0x2554] sm:$0xf]  ;;  %v15054_v35 = vld [vmem:[%s17079_s13 + $0x2528] sm:$0xf0] }
 0x507   : > { %9932 = vmatpush.bf16.msra.mxu2 %v14801_v60  ;;  %v15078_v60 = vld [vmem:[%s17079_s13 + $0x2558] sm:$0xf0]  ;;  %v15118_v54 = vld [vmem:[%s17079_s13 + $0x25a8] sm:$0xf0] }
 0x508   : > { %9945 = vmatpush.bf16.msra.mxu3 %v14865_v3  ;;  %v15142_v3 = vld [vmem:[%s17079_s13 + $0x25d8] sm:$0xf0]  ;;  %v15081_v33 = vor.u32 %v16361_v34, %v15078_v60  ;;  %v15121_v34 = vor.u32 %v16371_v39, %v15118_v54 }
 0x509   : > { %9907 = vmatpush.bf16.msra.mxu0 %v14665_v5  ;;  %v14942_v5 = vld [vmem:[%s17079_s13 + $0x2448] sm:$0xf0]  ;;  %v15145_v10 = vor.u32 %v16377_v63, %v15142_v3  ;;  %v14982_v60 = vld [vmem:[%s17079_s13 + $0x2498] sm:$0xf0]  ;;  %v16369_v63 = vld [vmem:[%s17079_s13 + $0x2594] sm:$0xf] }
 0x50a   : > { %9920 = vmatpush.bf16.msra.mxu1 %v14729_v11  ;;  %v15006_v11 = vld [vmem:[%s17079_s13 + $0x24c8] sm:$0xf0]  ;;  %v14945_v0 = vor.u32 %v16327_v52, %v14942_v5  ;;  %v15110_v3 = vld [vmem:[%s17079_s13 + $0x2598] sm:$0xf0]  ;;  %v16335_v5 = vld [vmem:[%s17079_s13 + $0x2484] sm:$0xf] }
 0x50b   : > { %9933 = vmatpush.bf16.msra.mxu2 %v14793_v53  ;;  %v16359_v53 = vld [vmem:[%s17079_s13 + $0x2544] sm:$0xf]  ;;  %v15009_v21 = vor.u32 %v16343_v36, %v15006_v11  ;;  %v14910_v52 = vld [vmem:[%s17079_s13 + $0x2408] sm:$0xf0]  ;;  %v15113_v36 = vor.u32 %v16369_v63, %v15110_v3 }
 0x50c   : > { %9946 = vmatpush.bf16.msra.mxu3 %v14857_v20  ;;  %v15134_v20 = vld [vmem:[%s17079_s13 + $0x25c8] sm:$0xf0]  ;;  %v15073_v55 = vor.u32 %v16359_v53, %v15070_v17  ;;  %v16351_v11 = vld [vmem:[%s17079_s13 + $0x2504] sm:$0xf] }
 0x50d   : > { %9908 = vmatpush.bf16.msra.mxu0 %v14657_v59  ;;  %v9702_v57 = vpop.f32.mrf.mxu0  ;;  %v15137_v59 = vor.u32 %v16375_v16, %v15134_v20  ;;  %v15038_v53 = vld [vmem:[%s17079_s13 + $0x2508] sm:$0xf0] }
 0x50e   : > { %9921 = vmatpush.bf16.msra.mxu1 %v14721_v18  ;;  %v9703_v61 = vadd.f32 %v9702_v57, %v19907_v9  ;;  %v9715_v38 = vpop.f32.mrf.mxu1  ;;  %v15062_v9 = vld [vmem:[%s17079_s13 + $0x2538] sm:$0xf0]  ;;  %v16373_v18 = vld [vmem:[%s17079_s13 + $0x25b4] sm:$0xf]  ;;  %v16367_v57 = vld [vmem:[%s17079_s13 + $0x2584] sm:$0xf] }
 0x50f   : > { %9934 = vmatpush.bf16.msra.mxu2 %v14785_v27  ;;  %v15126_v27 = vld [vmem:[%s17079_s13 + $0x25b8] sm:$0xf0]  ;;  %v15102_v16 = vld [vmem:[%s17079_s13 + $0x2588] sm:$0xf0] }
 0x510   : > { %9947 = vmatpush.bf16.msra.mxu3 %v14849_v31  ;;  %9909 = vmatmul.bf16.vlgmr.msra.gmra.mxu0 %v20228_v7  ;;  %v9716_v37 = vadd.f32 %v9715_v38, %v9703_v61  ;;  %v15065_v31 = vor.u32 %v16357_v32, %v15062_v9  ;;  %v15129_v22 = vor.u32 %v16373_v18, %v15126_v27  ;;  %v16321_v7 = vld [vmem:[%s17079_s13 + $0x2414] sm:$0xf] }
 0x511   : > { %9953 = vmatpush.bf16.msrb.mxu0 %v14969_v49  ;;  %9922 = vmatmul.bf16.vlgmr.msra.gmra.mxu1 %v20230_v23  ;;  %v16323_v49 = vld [vmem:[%s17079_s13 + $0x2424] sm:$0xf]  ;;  %v15046_v23 = vld [vmem:[%s17079_s13 + $0x2518] sm:$0xf0]  ;;  %v15041_v38 = vor.u32 %v16351_v11, %v15038_v53 }
 0x512   : > { %9966 = vmatpush.bf16.msrb.mxu1 %v15033_v4  ;;  %9935 = vmatmul.bf16.vlgmr.msra.gmra.mxu2 %v20229_v24  ;;  %v14926_v4 = vld [vmem:[%s17079_s13 + $0x2428] sm:$0xf0]  ;;  %v16353_v24 = vld [vmem:[%s17079_s13 + $0x2514] sm:$0xf] }
 0x513   : > { %9979 = vmatpush.bf16.msrb.mxu2 %v15097_v45  ;;  %9948 = vmatmul.bf16.vlgmr.msra.gmra.mxu3 %v20231_v13  ;;  %v16339_v45 = vld [vmem:[%s17079_s13 + $0x24a4] sm:$0xf] }
 0x514   : > { %9992 = vmatpush.bf16.msrb.mxu3 %v15161_v14  ;;  %v16355_v14 = vld [vmem:[%s17079_s13 + $0x2524] sm:$0xf]  ;;  %v14993_v8 = vor.u32 %v16339_v45, %v14990_v41 }
 0x515   : > { %9954 = vmatpush.bf16.msrb.mxu0 %v14961_v44  ;;  %v9728_v19 = vpop.f32.mrf.mxu2  ;;  %v9704_v44 = vpop.f32.mrf.mxu0  ;;  %v15057_v51 = vor.u32 %v16355_v14, %v15054_v35 }
 0x516   : > { %9967 = vmatpush.bf16.msrb.mxu1 %v15025_v58  ;;  %v9729_v42 = vadd.f32 %v9728_v19, %v9716_v37  ;;  %v9741_v40 = vpop.f32.mrf.mxu3  ;;  %v14929_v58 = vor.u32 %v16323_v49, %v14926_v4 }
 0x517   : > { %9980 = vmatpush.bf16.msrb.mxu2 %v15089_v46  ;;  %v9717_v46 = vpop.f32.mrf.mxu1 }
 0x518   : > { %9993 = vmatpush.bf16.msrb.mxu3 %v15153_v50  ;;  %v9742_v47 = vadd.f32 %v9741_v40, %v9729_v42  ;;  %v14918_v50 = vld [vmem:[%s17079_s13 + $0x2418] sm:$0xf0] }
 0x519   : > { %9955 = vmatpush.bf16.msrb.mxu0 %v14953_v29  ;;  %v14921_v13 = vor.u32 %v16321_v7, %v14918_v50  ;;  %v14985_v29 = vor.u32 %v16337_v6, %v14982_v60 }
 0x51a   : > { %9968 = vmatpush.bf16.msrb.mxu1 %v15017_v28  ;;  %v15049_v28 = vor.u32 %v16353_v24, %v15046_v23 }
 0x51b   : > { %9981 = vmatpush.bf16.msrb.mxu2 %v15081_v33  ;;  %v16319_v33 = vld [vmem:[%s17079_s13 + $0x2404] sm:$0xf] }
 0x51c   : > { %9994 = vmatpush.bf16.msrb.mxu3 %v15145_v10  ;;  %v14974_v10 = vld [vmem:[%s17079_s13 + $0x2488] sm:$0xf0]  ;;  %v14913_v61 = vor.u32 %v16319_v33, %v14910_v52 }
 0x51d   : > { %9956 = vmatpush.bf16.msrb.mxu0 %v14945_v0  ;;  %v9730_v17 = vpop.f32.mrf.mxu2  ;;  %v14977_v0 = vor.u32 %v16335_v5, %v14974_v10 }
 0x51e   : > { %9969 = vmatpush.bf16.msrb.mxu1 %v15009_v21  ;;  %v9743_v20 = vpop.f32.mrf.mxu3  ;;  %v15105_v21 = vor.u32 %v16367_v57, %v15102_v16 }
 0x51f   : > { %9982 = vmatpush.bf16.msrb.mxu2 %v15073_v55 }
 0x520   : > { %9995 = vmatpush.bf16.msrb.mxu3 %v15137_v59 }
 0x521   : > { %9957 = vmatpush.bf16.msrb.mxu0 %v14937_v30 }
 0x522   : > { %9970 = vmatpush.bf16.msrb.mxu1 %v15001_v12 }
 0x523   : > { %9983 = vmatpush.bf16.msrb.mxu2 %v15065_v31 }
 0x524   : > { %9996 = vmatpush.bf16.msrb.mxu3 %v15129_v22 }
 0x525   : > { %9958 = vmatpush.bf16.msrb.mxu0 %v14929_v58 }
 0x526   : > { %9971 = vmatpush.bf16.msrb.mxu1 %v14993_v8 }
 0x527   : > { %9984 = vmatpush.bf16.msrb.mxu2 %v15057_v51 }
 0x528   : > { %9997 = vmatpush.bf16.msrb.mxu3 %v15121_v34 }
 0x529   : > { %9959 = vmatpush.bf16.msrb.mxu0 %v14921_v13 }
 0x52a   : > { %9972 = vmatpush.bf16.msrb.mxu1 %v14985_v29 }
 0x52b   : > { %9985 = vmatpush.bf16.msrb.mxu2 %v15049_v28 }
 0x52c   : > { %9998 = vmatpush.bf16.msrb.mxu3 %v15113_v36 }
 0x52d   : > { %9960 = vmatpush.bf16.msrb.mxu0 %v14913_v61  ;;  %v9754_v55 = vpop.f32.mrf.mxu0 }
 0x52e   : > { %9973 = vmatpush.bf16.msrb.mxu1 %v14977_v0  ;;  %v9755_v2 = vadd.f32 %v9754_v55, %v9742_v47  ;;  %v9767_v26 = vpop.f32.mrf.mxu1 }
 0x52f   : > { %9986 = vmatpush.bf16.msrb.mxu2 %v15041_v38 }
 0x530   : > { %9999 = vmatpush.bf16.msrb.mxu3 %v15105_v21  ;;  %9961 = vmatmul.bf16.vlgmr.msrb.gmra.mxu0 %v18630_v25  ;;  %v9768_v62 = vadd.f32 %v9767_v26, %v9755_v2 }
 0x531   : > { %9974 = vmatmul.bf16.vlgmr.msrb.gmra.mxu1 %v18637_v56 }
 0x532   : > { %9987 = vmatmul.bf16.vlgmr.msrb.gmra.mxu2 %v18635_v15 }
 0x533   : > { %10000 = vmatmul.bf16.vlgmr.msrb.gmra.mxu3 %v18641_v48 }
 0x535   : > { %v9780_v59 = vpop.f32.mrf.mxu2  ;;  %v9756_v32 = vpop.f32.mrf.mxu0 }
 0x536   : > { %v9781_v37 = vadd.f32 %v9780_v59, %v9768_v62  ;;  %v9793_v43 = vpop.f32.mrf.mxu3  ;;  %v9769_v9 = vpop.f32.mrf.mxu1 }
 0x538   : > { %v9794_v18 = vadd.f32 %v9793_v43, %v9781_v37 }
 0x53d   : > { %v9782_v27 = vpop.f32.mrf.mxu2 }
 0x53e   : > { %v9795_v30 = vpop.f32.mrf.mxu3 }
 0x54d   : > { %v9806_v12 = vpop.f32.mrf.mxu0 }
 0x54e   : > { %v9807_v25 = vadd.f32 %v9806_v12, %v9794_v18  ;;  %v9819_v31 = vpop.f32.mrf.mxu1 }
 0x550   : > { %v9820_v56 = vadd.f32 %v9819_v31, %v9807_v25 }
 0x555   : > { %v9832_v49 = vpop.f32.mrf.mxu2  ;;  %v9808_v48 = vpop.f32.mrf.mxu0 }
 0x556   : > { %v9833_v15 = vadd.f32 %v9832_v49, %v9820_v56  ;;  %v9845_v4 = vpop.f32.mrf.mxu3  ;;  %v9821_v45 = vpop.f32.mrf.mxu1 }
 0x558   : > { %v9846_v22 = vadd.f32 %v9845_v4, %v9833_v15 }
 0x55d   : > { %v9834_v19 = vpop.f32.mrf.mxu2 }
 0x55e   : > { %v9847_v41 = vpop.f32.mrf.mxu3 }
 0x56d   : > { %v9858_v14 = vpop.f32.mrf.mxu0 }
 0x56e   : > { %v9871_v35 = vpop.f32.mrf.mxu1  ;;  %v9859_v8 = vadd.f32 %v9858_v14, %v9846_v22 }
 0x570   : > { %v9872_v34 = vadd.f32 %v9871_v35, %v9859_v8 }
 0x575   : > { %v9884_v42 = vpop.f32.mrf.mxu2  ;;  %v9860_v39 = vpop.f32.mrf.mxu0 }
 0x576   : > { %v9897_v40 = vpop.f32.mrf.mxu3  ;;  %v9873_v54 = vpop.f32.mrf.mxu1  ;;  %v9885_v60 = vadd.f32 %v9884_v42, %v9872_v34 }
 0x578   : > { %v9898_v63 = vadd.f32 %v9897_v40, %v9885_v60 }
 0x57d   : > { %v9886_v44 = vpop.f32.mrf.mxu2 }
 0x57e   : > { %v9899_v58 = vpop.f32.mrf.mxu3 }
 0x58d   : > { %v9910_v46 = vpop.f32.mrf.mxu0 }
 0x58e   : > { %v9923_v47 = vpop.f32.mrf.mxu1  ;;  %v9911_v3 = vadd.f32 %v9910_v46, %v9898_v63 }
 0x590   : > { %v9924_v13 = vadd.f32 %v9923_v47, %v9911_v3 }
 0x595   : > { %v9936_v51 = vpop.f32.mrf.mxu2  ;;  %v9912_v50 = vpop.f32.mrf.mxu0 }
 0x596   : > { %v9949_v7 = vpop.f32.mrf.mxu3  ;;  %v9925_v6 = vpop.f32.mrf.mxu1  ;;  %v9937_v29 = vadd.f32 %v9936_v51, %v9924_v13 }
 0x598   : > { %v9950_v28 = vadd.f32 %v9949_v7, %v9937_v29 }
 0x59d   : > { %v9938_v24 = vpop.f32.mrf.mxu2 }
 0x59e   : > { %v9951_v23 = vpop.f32.mrf.mxu3 }
 0x5ad   : > { %v9962_v33 = vpop.f32.mrf.mxu0 }
 0x5ae   : > { %v9975_v52 = vpop.f32.mrf.mxu1  ;;  %v9963_v5 = vadd.f32 %v9962_v33, %v9950_v28 }
 0x5b0   : > { %v9976_v36 = vadd.f32 %v9975_v52, %v9963_v5 }
 0x5b5   : > { %v9988_v10 = vpop.f32.mrf.mxu2  ;;  %v9964_v17 = vpop.f32.mrf.mxu0 }
 0x5b6   : > { %v9989_v11 = vadd.f32 %v9988_v10, %v9976_v36  ;;  %v10001_v53 = vpop.f32.mrf.mxu3  ;;  %v9977_v57 = vpop.f32.mrf.mxu1 }
 0x5b8   : > { %v10002_v16 = vadd.f32 %v10001_v53, %v9989_v11 }
 0x5ba   : > { %v10006_v20 = vadd.f32 %v10002_v16, %v18990_v1  ;;  %10012 = sbr.rel (%p15162_p13) target bundleno = 1540 (0x604), region = 68 }
 0x5bc   : > { %10008 = vst [vmem:[%s17102_s5 + $0x8] sm:$0xff] %v10006_v20 }
 0x5bd   : > { %v9990_v61 = vpop.f32.mrf.mxu2 }
 0x5be   : > { %v10003_v0 = vpop.f32.mrf.mxu3 }
 0x5bf   : > { %v10013_v38 = vld [vmem:[%s17102_s5] sm:$0xff]  ;;  %v16818_v62 = vmov 8.0   ;;  %v10024_v57 = vld [vmem:[%s362_s10] sm:$0x3] }
 0x5c0   : > { %v10015_v55 = vld [vmem:[%s342_s18] sm:$0x3]  ;;  %16531 = vrcp.f32 %v16818_v62  ;;  %v10023_v11 = vld [vmem:[%s352_s7] sm:$0x3]  ;;  %v10097_v62 = vperm.slane %v10024_v57, 1 }
 0x5c1   : > { %v10017_v2 = vperm.slane %v10015_v55, 0  ;;  %v10018_v26 = vperm.slane %v10015_v55, 1  ;;  %v10089_v20 = vperm.slane %v10023_v11, 0  ;;  %v10096_v55 = vperm.slane %v10024_v57, 0 }
 0x5c3   : > { %v10014_v21 = vld [vmem:[%s17102_s5 + $0x8] sm:$0xff]  ;;  %v10021_v59 = vadd.f32 %v10017_v2, %v10013_v38  ;;  %v10090_v38 = vperm.slane %v10023_v11, 1 }
 0x5c4   : > { %v10022_v37 = vadd.f32 %v10018_v26, %v10014_v21 }
 0x5c5   : > { %v10025_v1 = vrot.slane %v10021_v59, 4 }
 0x5c6   : > { %v10031_v43 = vrot.slane %v10022_v37, 4  ;;  %v16532_v32 = vpop.eup %16531 }
 0x5c7   : > { %v10026_v9 = vadd.f32 %v10025_v1, %v10021_v59  ;;  %v10038_v27 = vmul.f32 8.0, %v16532_v32  ;;  %vm10042_vm0 = vweird.f32 %v16532_v32 }
 0x5c8   : > { %v10032_v18 = vadd.f32 %v10031_v43, %v10022_v37 }
 0x5c9   : > { %v10027_v30 = vrot.slane %v10026_v9, 2  ;;  %v10039_v25 = vsub.f32 1.0, %v10038_v27 }
 0x5ca   : > { %v10033_v12 = vrot.slane %v10032_v18, 2 }
 0x5cb   : > { %v10028_v31 = vadd.f32 %v10027_v30, %v10026_v9  ;;  %v10040_v49 = vmul.f32 %v16532_v32, %v10039_v25 }
 0x5cc   : > { %v10034_v56 = vadd.f32 %v10033_v12, %v10032_v18 }
 0x5cd   : > { %v10029_v15 = vrot.slane %v10028_v31, 1  ;;  %v10041_v48 = vadd.f32 %v16532_v32, %v10040_v49 }
 0x5ce   : > { %v10035_v4 = vrot.slane %v10034_v56, 1 }
 0x5cf   : > { %v10030_v45 = vadd.f32 %v10029_v15, %v10028_v31  ;;  %v10043_v19 = vsel %vm10042_vm0, %v16532_v32, %v10041_v48 }
 0x5d0   : > { %v10036_v22 = vadd.f32 %v10035_v4, %v10034_v56 }
 0x5d1   : > { %v10044_v41 = vmul.f32 %v10043_v19, %v10030_v45 }
 0x5d2   : > { %v10045_v14 = vmul.f32 %v10043_v19, %v10036_v22 }
 0x5d3   : > { %v10046_v35 = vsub.f32 %v10021_v59, %v10044_v41 }
 0x5d4   : > { %v10047_v42 = vsub.f32 %v10022_v37, %v10045_v14 }
 0x5d5   : > { %v10048_v40 = vmul.f32 %v10046_v35, %v10046_v35 }
 0x5d6   : > { %v10049_v39 = vmul.f32 %v10047_v42, %v10047_v42 }
 0x5d7   : > { %v10050_v54 = vrot.slane %v10048_v40, 4 }
 0x5d8   : > { %v10056_v44 = vrot.slane %v10049_v39, 4 }
 0x5d9   : > { %v10051_v58 = vadd.f32 %v10050_v54, %v10048_v40 }
 0x5da   : > { %v10057_v46 = vadd.f32 %v10056_v44, %v10049_v39 }
 0x5db   : > { %v10052_v47 = vrot.slane %v10051_v58, 2 }
 0x5dc   : > { %v10058_v8 = vrot.slane %v10057_v46, 2 }
 0x5dd   : > { %v10053_v51 = vadd.f32 %v10052_v47, %v10051_v58 }
 0x5de   : > { %v10059_v7 = vadd.f32 %v10058_v8, %v10057_v46 }
 0x5df   : > { %v10054_v50 = vrot.slane %v10053_v51, 1 }
 0x5e0   : > { %v10060_v6 = vrot.slane %v10059_v7, 1 }
 0x5e1   : > { %v10055_v34 = vadd.f32 %v10054_v50, %v10053_v51 }
 0x5e2   : > { %v10061_v60 = vadd.f32 %v10060_v6, %v10059_v7 }
 0x5e3   : > { %v10062_v24 = vmul.f32 %v10055_v34, %v10043_v19 }
 0x5e4   : > { %v10063_v23 = vmul.f32 %v10061_v60, %v10043_v19 }
 0x5e5   : > { %v10064_v63 = vadd.f32 1e-05, %v10062_v24 }
 0x5e6   : > { %v10065_v3 = vadd.f32 1e-05, %v10063_v23 }
 0x5e7   : > { %16533 = vrsqrt.f32 %v10064_v63  ;;  %vm10072_vm1 = vweird.f32 %v10064_v63 }
 0x5e8   : > { %16535 = vrsqrt.f32 %v10065_v3  ;;  %vm10082_vm3 = vweird.f32 %v10065_v3 }
 0x5ed   : > { %v16534_v13 = vpop.eup %16533 }
 0x5ee   : > { %v16536_v29 = vpop.eup %16535  ;;  %v10067_v28 = vmul.f32 %v16534_v13, %v10064_v63  ;;  %vm10073_vm2 = vweird.f32 %v16534_v13 }
 0x5ef   : > { %v10077_v33 = vmul.f32 %v16536_v29, %v10065_v3  ;;  %vm10083_vm4 = vweird.f32 %v16536_v29  ;;  %vm10074_vm5 = vmor %vm10072_vm1, %vm10073_vm2 }
 0x5f0   : > { %v10068_v52 = vmul.f32 %v16534_v13, %v10067_v28  ;;  %vm10084_vm6 = vmor %vm10082_vm3, %vm10083_vm4 }
 0x5f1   : > { %v10078_v5 = vmul.f32 %v16536_v29, %v10077_v33 }
 0x5f2   : > { %v10069_v36 = vmul.f32 0.5, %v10068_v52 }
 0x5f3   : > { %v10079_v10 = vmul.f32 0.5, %v10078_v5 }
 0x5f4   : > { %v10070_v53 = vsub.f32 1.5, %v10069_v36 }
 0x5f5   : > { %v10080_v17 = vsub.f32 1.5, %v10079_v10 }
 0x5f6   : > { %v10071_v16 = vmul.f32 %v16534_v13, %v10070_v53 }
 0x5f7   : > { %v10081_v61 = vmul.f32 %v16536_v29, %v10080_v17 }
 0x5f8   : > { %v10075_v0 = vsel %vm10074_vm5, %v16534_v13, %v10071_v16 }
 0x5f9   : > { %v10086_v21 = vmul.f32 %v10075_v0, %v10046_v35  ;;  %v10085_v2 = vsel %vm10084_vm6, %v16536_v29, %v10081_v61 }
 0x5fa   : > { %v10087_v26 = vmul.f32 %v10085_v2, %v10047_v42 }
 0x5fb   : > { %v10093_v59 = vmul.f32 %v10089_v20, %v10086_v21 }
 0x5fc   : > { %v10094_v37 = vmul.f32 %v10090_v38, %v10087_v26 }
 0x5fd   : > { %v10100_v1 = vadd.f32 %v10096_v55, %v10093_v59 }
 0x5fe   : > { %v10101_v43 = vadd.f32 %v10097_v62, %v10094_v37 }
 0x5ff   : > { %vm10102_vm7 = vcmp.ge.f32.partialorder %v10100_v1, 0.0  ;;  %v10104_v32 = vmul.f32 0.05, %v10100_v1 }
 0x600   : > { %vm10103_vm8 = vcmp.ge.f32.partialorder %v10101_v43, 0.0  ;;  %v10105_v9 = vmul.f32 0.05, %v10101_v43 }
 0x601   : > { %v10106_v18 = vsel %vm10102_vm7, %v10100_v1, %v10104_v32 }
 0x602   : > { %10108 = vst [vmem:[%s17102_s5] sm:$0xff] %v10106_v18  ;;  %v10107_v27 = vsel %vm10103_vm8, %v10101_v43, %v10105_v9 }
 0x603   : > { %10109 = vst [vmem:[%s17102_s5 + $0x8] sm:$0xff] %v10107_v27 }
 0x604 PF: > { %s24_s6 = sadd.s32 1, %s16813_s6   ;;  %s20234_s24 = sld [smem:[#allocation14_spill]] }
 0x605   : > { %p20012_p0 = scmp.ge.s32.totalorder %s24_s6, 12   ;;  %s20235_s20 = sld [smem:[#allocation24_spill]] }
 0x606   : > { %s20236_s26 = sld [smem:[#allocation15_spill]]  ;;  %s20244_s18 = smov %s16765_s19 }
 0x607   : > { %s20237_s23 = sld [smem:[#allocation23_spill]]  ;;  %s20246_s21 = smov %s16777_s22 }
 0x608   : > { %s20238_s29 = sld [smem:[#allocation16_spill]] }
 0x609   : > { %s20239_s30 = sld [smem:[#allocation25_spill]] }
 0x60a   : > { %s20240_s27 = sld [smem:[#allocation19_spill]]  ;;  %s20245_s19 = smov %s20234_s24 }
 0x60b   : > { %s20241_s28 = sld [smem:[#allocation20_spill]]  ;;  %s20248_s24 = smov %s16789_s25 }
 0x60c   : > { %s20242_s9 = sld [smem:[#allocation21_spill]]  ;;  %s20247_s22 = smov %s20236_s26 }
 0x60d   : > { %s20243_s0 = sld [smem:[#allocation22_spill]] }
 0x60e   : > { %s20249_s25 = smov %s20238_s29 }
 0x60f   : > { %s20250_s26 = smov %s20239_s30  ;;  %23 = sbr.rel (!%p20012_p0) target bundleno = 19 (0x13), region = 136 }
 0x612   : > { %s20251_s29 = smov %s20242_s9 }
 0x613   : > { %s20252_s30 = smov %s20243_s0 }
 0x614   :  { %10132 = vsyncpa [#allocation3], 1 }
 0x615   :  { %10134 = vsyncpa [#allocation3 + $0x1], 1 }
 0x616   :  { %10135 = vsyncpa [#allocation5], 1 }
 0x617   :  { %10137 = vsyncpa [#allocation5 + $0x1], 1 }
 0x618   :  { %10138 = vsyncpa [#allocation8], 1 }
 0x619   :  { %10140 = vsyncpa [#allocation8 + $0x1], 1 }

</bundles_post_ra>
